<compile_context>
chip_gen: v7x
topology: tpu7x:2x2x1
jax: 0.10.0
libtpu: 0.0.40
codegen_flags: <defaults>
</compile_context>

<pallas_src>
import functools
import math

import jax
import jax.numpy as jnp
from jax.experimental import pallas as pl
from jax.experimental.pallas import tpu as pltpu  # noqa: F401  (CompilerParams if batch grows)

# (name, kernel_size, stride) for the four Conv1d layers (all stride 2).
CONV_SPECS = (("conv1", 5, 2), ("conv2", 5, 2), ("conv3", 3, 2), ("conv4", 2, 2))
CONV_CHANNELS = {"conv1": (2, 128), "conv2": (128, 128),
                 "conv3": (128, 64), "conv4": (64, 32)}
FC_SPECS = (("fc1", 32, 128), ("fc2", 128, 64), ("fc3", 64, 7))
NUM_CLASSES = 7
FC3_PAD = 128          # lane-dense final store, sliced back to NUM_CLASSES outside
BN_EPS = 1e-5


def _conv_out_len(l_in, k, stride=2):
    return (l_in - k) // stride + 1


# ---------------------------------------------------------------------------
# Single fused Pallas kernel: 4x (conv+BN+ReLU+maxpool) -> global avg -> 3x FC
# ---------------------------------------------------------------------------
def fused_forward_kernel(
    xcol_ref,
    w1_ref, b1_ref, w2_ref, b2_ref, w3_ref, b3_ref, w4_ref, b4_ref,
    wf1_ref, bf1_ref, wf2_ref, bf2_ref, wf3_ref, bf3_ref,
    out_ref,
    *, batch, l_out1,
):
    B = batch

    def conv_matmul(x2d, w_ref, b_ref):
        # One MXU matmul per stage: M = B*l_out, K = k*cin (taps folded into K).
        h = jnp.dot(x2d, w_ref[...], preferred_element_type=jnp.float32)
        return jnp.maximum(h + b_ref[...], 0.0)           # folded-BN bias + ReLU

    def maxpool2(h2d, l_out, cout, out_dtype):
        # MaxPool1d(2) straight from the in-register matmul result
        # (no pre-pool scratch store/reload).  Pool pairs never cross batch
        # boundaries because rows are (b, t) row-major and pairs are (2p, 2p+1).
        l_pool = l_out // 2
        h4 = h2d.reshape(B, l_out, cout)[:, :2 * l_pool, :].reshape(B, l_pool, 2, cout)
        return jnp.maximum(h4[:, :, 0, :], h4[:, :, 1, :]).astype(out_dtype)

    def im2col_stride2(a, k, l_out):
        # a: (B, l_in, C) bf16.  Split even/odd rows once; every stride-2 tap is
        # then a contiguous static slice; concatenate taps along K so the whole
        # stage is a single (B*l_out, k*C) x (k*C, Cout) matmul.
        _, l_in, c = a.shape
        if l_in % 2:
            a = jnp.concatenate([a, jnp.zeros((B, 1, c), a.dtype)], axis=1)
        a4 = a.reshape(B, a.shape[1] // 2, 2, c)
        a_even, a_odd = a4[:, :, 0, :], a4[:, :, 1, :]
        taps = []
        for j in range(k):
            src = a_even if j % 2 == 0 else a_odd
            m = j // 2
            taps.append(src[:, m:m + l_out, :])           # pad row is never read
        return jnp.concatenate(taps, axis=-1).reshape(B * l_out, k * c)

    # --- stage 1: wrapper-side im2col input (B*l_out1, 10) bf16, K = 10 -----
    h1 = conv_matmul(xcol_ref[...], w1_ref, b1_ref)                   # (B*254, 128)
    a1 = maxpool2(h1, l_out1, 128, jnp.bfloat16)                      # (B, 127, 128)

    # --- stage 2: K = 5*128 = 640 -------------------------------------------
    l2 = _conv_out_len(a1.shape[1], 5)
    h2 = conv_matmul(im2col_stride2(a1, 5, l2), w2_ref, b2_ref)
    a2 = maxpool2(h2, l2, 128, jnp.bfloat16)                          # (B, 31, 128)

    # --- stage 3: K = 3*128 = 384 -------------------------------------------
    l3 = _conv_out_len(a2.shape[1], 3)
    h3 = conv_matmul(im2col_stride2(a2, 3, l3), w3_ref, b3_ref)
    a3 = maxpool2(h3, l3, 64, jnp.bfloat16)                           # (B, 7, 64)

    # --- stage 4: K = 2*64 = 128 --------------------------------------------
    l4 = _conv_out_len(a3.shape[1], 2)
    h4 = conv_matmul(im2col_stride2(a3, 2, l4), w4_ref, b4_ref)
    a4 = maxpool2(h4, l4, 32, jnp.float32)                            # (B, 1, 32)

    # dropout1: identity at inference.
    # AdaptiveAvgPool1d(1) + flatten == mean over the remaining length.
    feat = jnp.mean(a4, axis=1)                                       # (B, 32) f32

    # FC head (dropout2: identity).  M = B is tiny; these dots are latency tail.
    h = jnp.dot(feat.astype(jnp.bfloat16), wf1_ref[...],
                preferred_element_type=jnp.float32)
    h = jnp.maximum(h + bf1_ref[...], 0.0)                            # (B, 128)
    h = jnp.dot(h.astype(jnp.bfloat16), wf2_ref[...],
                preferred_element_type=jnp.float32)
    h = jnp.maximum(h + bf2_ref[...], 0.0)                            # (B, 64)
    h = jnp.dot(h.astype(jnp.bfloat16), wf3_ref[...],
                preferred_element_type=jnp.float32)
    out_ref[...] = jax.nn.sigmoid(h + bf3_ref[...])                   # (B, 128) lane-dense


# ---------------------------------------------------------------------------
# Parameters (BN scale folded into conv weights at init time)
# ---------------------------------------------------------------------------
def init_params(key):
    params = {}
    keys = iter(jax.random.split(key, 64))

    for name, k, _stride in CONV_SPECS:
        cin, cout = CONV_CHANNELS[name]
        bound = 1.0 / math.sqrt(cin * k)
        w = jax.random.uniform(next(keys), (cout, cin, k), jnp.float32, -bound, bound)
        b = jax.random.uniform(next(keys), (cout,), jnp.float32, -bound, bound)
        # Deterministic (inference-mode) BatchNorm parameters, folded.
        kbn = jax.random.split(next(keys), 4)
        gamma = 1.0 + 0.1 * jax.random.normal(kbn[0], (cout,), jnp.float32)
        beta = 0.1 * jax.random.normal(kbn[1], (cout,), jnp.float32)
        mean = 0.1 * jax.random.normal(kbn[2], (cout,), jnp.float32)
        var = 1.0 + 0.1 * jax.random.uniform(kbn[3], (cout,), jnp.float32)
        scale = gamma / jnp.sqrt(var + BN_EPS)                     # (cout,)
        w_folded = w * scale[:, None, None]                        # BN scale -> weights
        bias = (b - mean) * scale + beta                           # folded bias
        # (k*cin, cout): im2col matmul weight, row index = j*cin + c.
        w_mat = jnp.transpose(w_folded, (2, 1, 0)).reshape(k * cin, cout)
        params[name] = dict(w=w_mat.astype(jnp.bfloat16),
                            b=bias.reshape(1, cout).astype(jnp.float32))

    for name, fin, fout in FC_SPECS:
        bound = 1.0 / math.sqrt(fin)
        w = jax.random.uniform(next(keys), (fout, fin), jnp.float32, -bound, bound)
        b = jax.random.uniform(next(keys), (fout,), jnp.float32, -bound, bound)
        w_t = w.T                                                  # (fin, fout)
        bias = b.reshape(1, fout)
        if name == "fc3":
            # Pad the 7-class head to 128 lanes for an unmasked, lane-dense store.
            w_t = jnp.pad(w_t, ((0, 0), (0, FC3_PAD - fout)))
            bias = jnp.pad(bias, ((0, 0), (0, FC3_PAD - fout)))
        params[name] = dict(w=w_t.astype(jnp.bfloat16), b=bias.astype(jnp.float32))
    return params


# ---------------------------------------------------------------------------
# Forward wrapper: one pallas_call for the whole network
# ---------------------------------------------------------------------------
def _full_spec(shape):
    return pl.BlockSpec(tuple(shape), lambda *_: (0,) * len(shape))


def forward(params, x):
    """x: (B, L, 2) float32 — same layout the PyTorch forward receives
    (the reference module permutes it to (B, 2, L) internally for Conv1d)."""
    B, L, cin = x.shape
    k1 = CONV_SPECS[0][1]
    l_out1 = _conv_out_len(L, k1)

    # Wrapper-side im2col for conv1 (nearly free in XLA): removes the 64x
    # lane-sparse (cin=2) input and the K=2 matmuls from the kernel.
    # Column ordering is [tap j, channel c] -> j*cin + c (matches weight rows).
    taps = [x[:, j: j + 2 * l_out1 - 1: 2, :] for j in range(k1)]
    xcol = jnp.concatenate(taps, axis=-1).reshape(B * l_out1, k1 * cin)
    xcol = xcol.astype(jnp.bfloat16)

    inputs = [xcol]
    in_specs = [_full_spec(xcol.shape)]
    for name, _k, _s in CONV_SPECS:
        p = params[name]
        inputs += [p["w"], p["b"]]
        in_specs += [_full_spec(p["w"].shape), _full_spec(p["b"].shape)]
    for name, _fin, _fout in FC_SPECS:
        p = params[name]
        inputs += [p["w"], p["b"]]
        in_specs += [_full_spec(p["w"].shape), _full_spec(p["b"].shape)]

    kernel = functools.partial(fused_forward_kernel, batch=B, l_out1=l_out1)
    out_padded = pl.pallas_call(
        kernel,
        out_shape=jax.ShapeDtypeStruct((B, FC3_PAD), jnp.float32),
        in_specs=in_specs,
        out_specs=_full_spec((B, FC3_PAD)),
    )(*inputs)
    return out_padded[:, :NUM_CLASSES]


# ---------------------------------------------------------------------------
# Pure-JAX f32 reference of the same folded-BN network (sanity check only)
# ---------------------------------------------------------------------------
def reference_forward(params, x):
    B = x.shape[0]
    h = x
    for name, k, stride in CONV_SPECS:
        w = params[name]["w"].astype(jnp.float32)          # (k*cin, cout)
        b = params[name]["b"]
        l_in = h.shape[1]
        l_out = _conv_out_len(l_in, k, stride)
        taps = [h[:, j: j + stride * l_out - 1: stride, :] for j in range(k)]
        xc = jnp.concatenate(taps, axis=-1)                 # (B, l_out, k*cin)
        y = jnp.maximum(jnp.einsum("blk,kn->bln", xc, w) + b, 0.0)
        l_pool = l_out // 2
        h = y[:, :2 * l_pool, :].reshape(B, l_pool, 2, -1).max(axis=2)
    feat = jnp.mean(h, axis=1)                              # (B, 32)
    for name, _fin, _fout in FC_SPECS:
        w = params[name]["w"].astype(jnp.float32)
        b = params[name]["b"]
        feat = feat @ w + b
        if name != "fc3":
            feat = jnp.maximum(feat, 0.0)
    return jax.nn.sigmoid(feat)[:, :NUM_CLASSES]


if __name__ == "__main__":
    key = jax.random.PRNGKey(0)
    pkey, xkey = jax.random.split(key)
    params = init_params(pkey)

    B, L, C_IN = 2, 512, 2  # L=512 keeps every conv/pool stage non-empty
    x = jax.random.normal(xkey, (B, L, C_IN), jnp.float32)

    out = jax.jit(forward)(params, x)
    out = jax.block_until_ready(out)

    assert out.shape == (B, NUM_CLASSES), out.shape
    assert bool(jnp.all(jnp.isfinite(out)))
    assert bool(jnp.all((out >= 0.0) & (out <= 1.0)))       # sigmoid output range

    ref = reference_forward(params, x)
    max_err = float(jnp.max(jnp.abs(out - ref)))
    assert max_err < 0.08, f"mismatch vs f32 reference: {max_err}"

    print("KERNEL_OK")
</pallas_src>

<mosaic_0001>
module attributes {stable_mosaic.version = 11 : i64} {
  func.func @fused_forward_kernel(%arg0: memref<508x10xbf16, #tpu.memory_space<vmem>>, %arg1: memref<10x128xbf16, #tpu.memory_space<vmem>>, %arg2: memref<1x128xf32, #tpu.memory_space<vmem>>, %arg3: memref<640x128xbf16, #tpu.memory_space<vmem>>, %arg4: memref<1x128xf32, #tpu.memory_space<vmem>>, %arg5: memref<384x64xbf16, #tpu.memory_space<vmem>>, %arg6: memref<1x64xf32, #tpu.memory_space<vmem>>, %arg7: memref<128x32xbf16, #tpu.memory_space<vmem>>, %arg8: memref<1x32xf32, #tpu.memory_space<vmem>>, %arg9: memref<32x128xbf16, #tpu.memory_space<vmem>>, %arg10: memref<1x128xf32, #tpu.memory_space<vmem>>, %arg11: memref<128x64xbf16, #tpu.memory_space<vmem>>, %arg12: memref<1x64xf32, #tpu.memory_space<vmem>>, %arg13: memref<64x128xbf16, #tpu.memory_space<vmem>>, %arg14: memref<1x128xf32, #tpu.memory_space<vmem>>, %arg15: memref<2x128xf32, #tpu.memory_space<vmem>>) attributes {dimension_semantics = [], scalar_prefetch = 0 : i64, scratch_operands = 0 : i64, tpu.core_type = #tpu.core_type<tc>} {
    %c0 = arith.constant 0 : index
    %c0_0 = arith.constant 0 : index
    %0 = vector.load %arg0[%c0, %c0_0] : memref<508x10xbf16, #tpu.memory_space<vmem>>, vector<508x10xbf16>
    %c0_1 = arith.constant 0 : index
    %c0_2 = arith.constant 0 : index
    %1 = vector.load %arg1[%c0_1, %c0_2] : memref<10x128xbf16, #tpu.memory_space<vmem>>, vector<10x128xbf16>
    %cst = arith.constant dense<0.000000e+00> : vector<508x128xf32>
    %2 = tpu.matmul %0, %1, %cst {dimension_numbers = #tpu.dot_dimension_numbers<[1], [0], [0], [1], [0, 0, 1, 1], [], []>} : vector<508x10xbf16>, vector<10x128xbf16>, vector<508x128xf32> -> vector<508x128xf32>
    %c0_3 = arith.constant 0 : index
    %c0_4 = arith.constant 0 : index
    %3 = vector.load %arg2[%c0_3, %c0_4] : memref<1x128xf32, #tpu.memory_space<vmem>>, vector<1x128xf32>
    %4 = vector.broadcast %3 : vector<1x128xf32> to vector<508x128xf32>
    %5 = arith.addf %2, %4 : vector<508x128xf32>
    %cst_5 = arith.constant 0.000000e+00 : f32
    %6 = vector.broadcast %cst_5 : f32 to vector<508x128xf32>
    %7 = arith.maximumf %5, %6 : vector<508x128xf32>
    %8 = vector.shape_cast %7 : vector<508x128xf32> to vector<2x254x128xf32>
    %9 = vector.shape_cast %8 : vector<2x254x128xf32> to vector<2x127x2x128xf32>
    %10 = vector.extract_strided_slice %9 {offsets = [0, 0, 0, 0], sizes = [2, 127, 1, 128], strides = [1, 1, 1, 1]} : vector<2x127x2x128xf32> to vector<2x127x1x128xf32>
    %11 = vector.shape_cast %10 : vector<2x127x1x128xf32> to vector<2x127x128xf32>
    %12 = vector.extract_strided_slice %9 {offsets = [0, 0, 1, 0], sizes = [2, 127, 1, 128], strides = [1, 1, 1, 1]} : vector<2x127x2x128xf32> to vector<2x127x1x128xf32>
    %13 = vector.shape_cast %12 : vector<2x127x1x128xf32> to vector<2x127x128xf32>
    %14 = arith.maximumf %11, %13 : vector<2x127x128xf32>
    %15 = arith.truncf %14 : vector<2x127x128xf32> to vector<2x127x128xbf16>
    %cst_6 = arith.constant 0.000000e+00 : bf16
    %16 = vector.broadcast %cst_6 : bf16 to vector<2x1x128xbf16>
    %17 = tpu.concatenate %15, %16 in 1 : vector<2x127x128xbf16>, vector<2x1x128xbf16> -> vector<2x128x128xbf16>
    %18 = vector.shape_cast %17 : vector<2x128x128xbf16> to vector<2x64x2x128xbf16>
    %19 = vector.extract_strided_slice %18 {offsets = [0, 0, 0, 0], sizes = [2, 64, 1, 128], strides = [1, 1, 1, 1]} : vector<2x64x2x128xbf16> to vector<2x64x1x128xbf16>
    %20 = vector.shape_cast %19 : vector<2x64x1x128xbf16> to vector<2x64x128xbf16>
    %21 = vector.extract_strided_slice %18 {offsets = [0, 0, 1, 0], sizes = [2, 64, 1, 128], strides = [1, 1, 1, 1]} : vector<2x64x2x128xbf16> to vector<2x64x1x128xbf16>
    %22 = vector.shape_cast %21 : vector<2x64x1x128xbf16> to vector<2x64x128xbf16>
    %23 = vector.extract_strided_slice %20 {offsets = [0, 0, 0], sizes = [2, 62, 128], strides = [1, 1, 1]} : vector<2x64x128xbf16> to vector<2x62x128xbf16>
    %24 = vector.extract_strided_slice %22 {offsets = [0, 0, 0], sizes = [2, 62, 128], strides = [1, 1, 1]} : vector<2x64x128xbf16> to vector<2x62x128xbf16>
    %25 = vector.extract_strided_slice %20 {offsets = [0, 1, 0], sizes = [2, 62, 128], strides = [1, 1, 1]} : vector<2x64x128xbf16> to vector<2x62x128xbf16>
    %26 = vector.extract_strided_slice %22 {offsets = [0, 1, 0], sizes = [2, 62, 128], strides = [1, 1, 1]} : vector<2x64x128xbf16> to vector<2x62x128xbf16>
    %27 = vector.extract_strided_slice %20 {offsets = [0, 2, 0], sizes = [2, 62, 128], strides = [1, 1, 1]} : vector<2x64x128xbf16> to vector<2x62x128xbf16>
    %28 = tpu.concatenate %23, %24, %25, %26, %27 in 2 : vector<2x62x128xbf16>, vector<2x62x128xbf16>, vector<2x62x128xbf16>, vector<2x62x128xbf16>, vector<2x62x128xbf16> -> vector<2x62x640xbf16>
    %29 = vector.shape_cast %28 : vector<2x62x640xbf16> to vector<124x640xbf16>
    %c0_7 = arith.constant 0 : index
    %c0_8 = arith.constant 0 : index
    %30 = vector.load %arg3[%c0_7, %c0_8] : memref<640x128xbf16, #tpu.memory_space<vmem>>, vector<640x128xbf16>
    %cst_9 = arith.constant dense<0.000000e+00> : vector<124x128xf32>
    %31 = tpu.matmul %29, %30, %cst_9 {dimension_numbers = #tpu.dot_dimension_numbers<[1], [0], [0], [1], [0, 0, 1, 1], [], []>} : vector<124x640xbf16>, vector<640x128xbf16>, vector<124x128xf32> -> vector<124x128xf32>
    %c0_10 = arith.constant 0 : index
    %c0_11 = arith.constant 0 : index
    %32 = vector.load %arg4[%c0_10, %c0_11] : memref<1x128xf32, #tpu.memory_space<vmem>>, vector<1x128xf32>
    %33 = vector.broadcast %32 : vector<1x128xf32> to vector<124x128xf32>
    %34 = arith.addf %31, %33 : vector<124x128xf32>
    %cst_12 = arith.constant 0.000000e+00 : f32
    %35 = vector.broadcast %cst_12 : f32 to vector<124x128xf32>
    %36 = arith.maximumf %34, %35 : vector<124x128xf32>
    %37 = vector.shape_cast %36 : vector<124x128xf32> to vector<2x62x128xf32>
    %38 = vector.shape_cast %37 : vector<2x62x128xf32> to vector<2x31x2x128xf32>
    %39 = vector.extract_strided_slice %38 {offsets = [0, 0, 0, 0], sizes = [2, 31, 1, 128], strides = [1, 1, 1, 1]} : vector<2x31x2x128xf32> to vector<2x31x1x128xf32>
    %40 = vector.shape_cast %39 : vector<2x31x1x128xf32> to vector<2x31x128xf32>
    %41 = vector.extract_strided_slice %38 {offsets = [0, 0, 1, 0], sizes = [2, 31, 1, 128], strides = [1, 1, 1, 1]} : vector<2x31x2x128xf32> to vector<2x31x1x128xf32>
    %42 = vector.shape_cast %41 : vector<2x31x1x128xf32> to vector<2x31x128xf32>
    %43 = arith.maximumf %40, %42 : vector<2x31x128xf32>
    %44 = arith.truncf %43 : vector<2x31x128xf32> to vector<2x31x128xbf16>
    %cst_13 = arith.constant 0.000000e+00 : bf16
    %45 = vector.broadcast %cst_13 : bf16 to vector<2x1x128xbf16>
    %46 = tpu.concatenate %44, %45 in 1 : vector<2x31x128xbf16>, vector<2x1x128xbf16> -> vector<2x32x128xbf16>
    %47 = vector.shape_cast %46 : vector<2x32x128xbf16> to vector<2x16x2x128xbf16>
    %48 = vector.extract_strided_slice %47 {offsets = [0, 0, 0, 0], sizes = [2, 16, 1, 128], strides = [1, 1, 1, 1]} : vector<2x16x2x128xbf16> to vector<2x16x1x128xbf16>
    %49 = vector.shape_cast %48 : vector<2x16x1x128xbf16> to vector<2x16x128xbf16>
    %50 = vector.extract_strided_slice %47 {offsets = [0, 0, 1, 0], sizes = [2, 16, 1, 128], strides = [1, 1, 1, 1]} : vector<2x16x2x128xbf16> to vector<2x16x1x128xbf16>
    %51 = vector.shape_cast %50 : vector<2x16x1x128xbf16> to vector<2x16x128xbf16>
    %52 = vector.extract_strided_slice %49 {offsets = [0, 0, 0], sizes = [2, 15, 128], strides = [1, 1, 1]} : vector<2x16x128xbf16> to vector<2x15x128xbf16>
    %53 = vector.extract_strided_slice %51 {offsets = [0, 0, 0], sizes = [2, 15, 128], strides = [1, 1, 1]} : vector<2x16x128xbf16> to vector<2x15x128xbf16>
    %54 = vector.extract_strided_slice %49 {offsets = [0, 1, 0], sizes = [2, 15, 128], strides = [1, 1, 1]} : vector<2x16x128xbf16> to vector<2x15x128xbf16>
    %55 = tpu.concatenate %52, %53, %54 in 2 : vector<2x15x128xbf16>, vector<2x15x128xbf16>, vector<2x15x128xbf16> -> vector<2x15x384xbf16>
    %56 = vector.shape_cast %55 : vector<2x15x384xbf16> to vector<30x384xbf16>
    %c0_14 = arith.constant 0 : index
    %c0_15 = arith.constant 0 : index
    %57 = vector.load %arg5[%c0_14, %c0_15] : memref<384x64xbf16, #tpu.memory_space<vmem>>, vector<384x64xbf16>
    %cst_16 = arith.constant dense<0.000000e+00> : vector<30x64xf32>
    %58 = tpu.matmul %56, %57, %cst_16 {dimension_numbers = #tpu.dot_dimension_numbers<[1], [0], [0], [1], [0, 0, 1, 1], [], []>} : vector<30x384xbf16>, vector<384x64xbf16>, vector<30x64xf32> -> vector<30x64xf32>
    %c0_17 = arith.constant 0 : index
    %c0_18 = arith.constant 0 : index
    %59 = vector.load %arg6[%c0_17, %c0_18] : memref<1x64xf32, #tpu.memory_space<vmem>>, vector<1x64xf32>
    %60 = vector.broadcast %59 : vector<1x64xf32> to vector<30x64xf32>
    %61 = arith.addf %58, %60 : vector<30x64xf32>
    %cst_19 = arith.constant 0.000000e+00 : f32
    %62 = vector.broadcast %cst_19 : f32 to vector<30x64xf32>
    %63 = arith.maximumf %61, %62 : vector<30x64xf32>
    %64 = vector.shape_cast %63 : vector<30x64xf32> to vector<2x15x64xf32>
    %65 = vector.extract_strided_slice %64 {offsets = [0, 0, 0], sizes = [2, 14, 64], strides = [1, 1, 1]} : vector<2x15x64xf32> to vector<2x14x64xf32>
    %66 = vector.shape_cast %65 : vector<2x14x64xf32> to vector<2x7x2x64xf32>
    %67 = vector.extract_strided_slice %66 {offsets = [0, 0, 0, 0], sizes = [2, 7, 1, 64], strides = [1, 1, 1, 1]} : vector<2x7x2x64xf32> to vector<2x7x1x64xf32>
    %68 = vector.shape_cast %67 : vector<2x7x1x64xf32> to vector<2x7x64xf32>
    %69 = vector.extract_strided_slice %66 {offsets = [0, 0, 1, 0], sizes = [2, 7, 1, 64], strides = [1, 1, 1, 1]} : vector<2x7x2x64xf32> to vector<2x7x1x64xf32>
    %70 = vector.shape_cast %69 : vector<2x7x1x64xf32> to vector<2x7x64xf32>
    %71 = arith.maximumf %68, %70 : vector<2x7x64xf32>
    %72 = arith.truncf %71 : vector<2x7x64xf32> to vector<2x7x64xbf16>
    %cst_20 = arith.constant 0.000000e+00 : bf16
    %73 = vector.broadcast %cst_20 : bf16 to vector<2x1x64xbf16>
    %74 = tpu.concatenate %72, %73 in 1 : vector<2x7x64xbf16>, vector<2x1x64xbf16> -> vector<2x8x64xbf16>
    %75 = vector.shape_cast %74 : vector<2x8x64xbf16> to vector<2x4x2x64xbf16>
    %76 = vector.extract_strided_slice %75 {offsets = [0, 0, 0, 0], sizes = [2, 4, 1, 64], strides = [1, 1, 1, 1]} : vector<2x4x2x64xbf16> to vector<2x4x1x64xbf16>
    %77 = vector.shape_cast %76 : vector<2x4x1x64xbf16> to vector<2x4x64xbf16>
    %78 = vector.extract_strided_slice %75 {offsets = [0, 0, 1, 0], sizes = [2, 4, 1, 64], strides = [1, 1, 1, 1]} : vector<2x4x2x64xbf16> to vector<2x4x1x64xbf16>
    %79 = vector.shape_cast %78 : vector<2x4x1x64xbf16> to vector<2x4x64xbf16>
    %80 = vector.extract_strided_slice %77 {offsets = [0, 0, 0], sizes = [2, 3, 64], strides = [1, 1, 1]} : vector<2x4x64xbf16> to vector<2x3x64xbf16>
    %81 = vector.extract_strided_slice %79 {offsets = [0, 0, 0], sizes = [2, 3, 64], strides = [1, 1, 1]} : vector<2x4x64xbf16> to vector<2x3x64xbf16>
    %82 = tpu.concatenate %80, %81 in 2 : vector<2x3x64xbf16>, vector<2x3x64xbf16> -> vector<2x3x128xbf16>
    %83 = vector.shape_cast %82 : vector<2x3x128xbf16> to vector<6x128xbf16>
    %c0_21 = arith.constant 0 : index
    %c0_22 = arith.constant 0 : index
    %84 = vector.load %arg7[%c0_21, %c0_22] : memref<128x32xbf16, #tpu.memory_space<vmem>>, vector<128x32xbf16>
    %cst_23 = arith.constant dense<0.000000e+00> : vector<6x32xf32>
    %85 = tpu.matmul %83, %84, %cst_23 {dimension_numbers = #tpu.dot_dimension_numbers<[1], [0], [0], [1], [0, 0, 1, 1], [], []>} : vector<6x128xbf16>, vector<128x32xbf16>, vector<6x32xf32> -> vector<6x32xf32>
    %c0_24 = arith.constant 0 : index
    %c0_25 = arith.constant 0 : index
    %86 = vector.load %arg8[%c0_24, %c0_25] : memref<1x32xf32, #tpu.memory_space<vmem>>, vector<1x32xf32>
    %87 = vector.broadcast %86 : vector<1x32xf32> to vector<6x32xf32>
    %88 = arith.addf %85, %87 : vector<6x32xf32>
    %cst_26 = arith.constant 0.000000e+00 : f32
    %89 = vector.broadcast %cst_26 : f32 to vector<6x32xf32>
    %90 = arith.maximumf %88, %89 : vector<6x32xf32>
    %91 = vector.shape_cast %90 : vector<6x32xf32> to vector<2x3x32xf32>
    %92 = vector.extract_strided_slice %91 {offsets = [0, 0, 0], sizes = [2, 2, 32], strides = [1, 1, 1]} : vector<2x3x32xf32> to vector<2x2x32xf32>
    %93 = vector.shape_cast %92 : vector<2x2x32xf32> to vector<2x1x2x32xf32>
    %94 = vector.extract_strided_slice %93 {offsets = [0, 0, 0, 0], sizes = [2, 1, 1, 32], strides = [1, 1, 1, 1]} : vector<2x1x2x32xf32> to vector<2x1x1x32xf32>
    %95 = vector.shape_cast %94 : vector<2x1x1x32xf32> to vector<2x1x32xf32>
    %96 = vector.extract_strided_slice %93 {offsets = [0, 0, 1, 0], sizes = [2, 1, 1, 32], strides = [1, 1, 1, 1]} : vector<2x1x2x32xf32> to vector<2x1x1x32xf32>
    %97 = vector.shape_cast %96 : vector<2x1x1x32xf32> to vector<2x1x32xf32>
    %98 = arith.maximumf %95, %97 : vector<2x1x32xf32>
    %cst_27 = arith.constant dense<0.000000e+00> : vector<2x32xf32>
    %99 = vector.multi_reduction <add>, %98, %cst_27 [1] : vector<2x1x32xf32> to vector<2x32xf32>
    %cst_28 = arith.constant 1.000000e+00 : f32
    %100 = vector.broadcast %cst_28 : f32 to vector<2x32xf32>
    %101 = arith.divf %99, %100 : vector<2x32xf32>
    %102 = arith.truncf %101 : vector<2x32xf32> to vector<2x32xbf16>
    %c0_29 = arith.constant 0 : index
    %c0_30 = arith.constant 0 : index
    %103 = vector.load %arg9[%c0_29, %c0_30] : memref<32x128xbf16, #tpu.memory_space<vmem>>, vector<32x128xbf16>
    %cst_31 = arith.constant dense<0.000000e+00> : vector<2x128xf32>
    %104 = tpu.matmul %102, %103, %cst_31 {dimension_numbers = #tpu.dot_dimension_numbers<[1], [0], [0], [1], [0, 0, 1, 1], [], []>} : vector<2x32xbf16>, vector<32x128xbf16>, vector<2x128xf32> -> vector<2x128xf32>
    %c0_32 = arith.constant 0 : index
    %c0_33 = arith.constant 0 : index
    %105 = vector.load %arg10[%c0_32, %c0_33] : memref<1x128xf32, #tpu.memory_space<vmem>>, vector<1x128xf32>
    %106 = vector.broadcast %105 : vector<1x128xf32> to vector<2x128xf32>
    %107 = arith.addf %104, %106 : vector<2x128xf32>
    %cst_34 = arith.constant 0.000000e+00 : f32
    %108 = vector.broadcast %cst_34 : f32 to vector<2x128xf32>
    %109 = arith.maximumf %107, %108 : vector<2x128xf32>
    %110 = arith.truncf %109 : vector<2x128xf32> to vector<2x128xbf16>
    %c0_35 = arith.constant 0 : index
    %c0_36 = arith.constant 0 : index
    %111 = vector.load %arg11[%c0_35, %c0_36] : memref<128x64xbf16, #tpu.memory_space<vmem>>, vector<128x64xbf16>
    %cst_37 = arith.constant dense<0.000000e+00> : vector<2x64xf32>
    %112 = tpu.matmul %110, %111, %cst_37 {dimension_numbers = #tpu.dot_dimension_numbers<[1], [0], [0], [1], [0, 0, 1, 1], [], []>} : vector<2x128xbf16>, vector<128x64xbf16>, vector<2x64xf32> -> vector<2x64xf32>
    %c0_38 = arith.constant 0 : index
    %c0_39 = arith.constant 0 : index
    %113 = vector.load %arg12[%c0_38, %c0_39] : memref<1x64xf32, #tpu.memory_space<vmem>>, vector<1x64xf32>
    %114 = vector.broadcast %113 : vector<1x64xf32> to vector<2x64xf32>
    %115 = arith.addf %112, %114 : vector<2x64xf32>
    %cst_40 = arith.constant 0.000000e+00 : f32
    %116 = vector.broadcast %cst_40 : f32 to vector<2x64xf32>
    %117 = arith.maximumf %115, %116 : vector<2x64xf32>
    %118 = arith.truncf %117 : vector<2x64xf32> to vector<2x64xbf16>
    %c0_41 = arith.constant 0 : index
    %c0_42 = arith.constant 0 : index
    %119 = vector.load %arg13[%c0_41, %c0_42] : memref<64x128xbf16, #tpu.memory_space<vmem>>, vector<64x128xbf16>
    %cst_43 = arith.constant dense<0.000000e+00> : vector<2x128xf32>
    %120 = tpu.matmul %118, %119, %cst_43 {dimension_numbers = #tpu.dot_dimension_numbers<[1], [0], [0], [1], [0, 0, 1, 1], [], []>} : vector<2x64xbf16>, vector<64x128xbf16>, vector<2x128xf32> -> vector<2x128xf32>
    %c0_44 = arith.constant 0 : index
    %c0_45 = arith.constant 0 : index
    %121 = vector.load %arg14[%c0_44, %c0_45] : memref<1x128xf32, #tpu.memory_space<vmem>>, vector<1x128xf32>
    %122 = vector.broadcast %121 : vector<1x128xf32> to vector<2x128xf32>
    %123 = arith.addf %120, %122 : vector<2x128xf32>
    %124 = arith.negf %123 : vector<2x128xf32>
    %125 = math.exp %124 : vector<2x128xf32>
    %cst_46 = arith.constant 1.000000e+00 : f32
    %126 = vector.broadcast %cst_46 : f32 to vector<2x128xf32>
    %127 = arith.addf %126, %125 : vector<2x128xf32>
    %128 = arith.divf %126, %127 : vector<2x128xf32>
    %c0_47 = arith.constant 0 : index
    %c0_48 = arith.constant 0 : index
    %129 = vector.load %arg15[%c0_47, %c0_48] : memref<2x128xf32, #tpu.memory_space<vmem>>, vector<2x128xf32>
    tpu.vector_store %arg15[%c0_47, %c0_48], %128 {strides = array<i32>} : memref<2x128xf32, #tpu.memory_space<vmem>>, vector<2x128xf32>,
    return
  }
}

</mosaic_0001>

<bundles_post_ra>
// kernel: forward.1
= control target key start
LH: loop header
LB: loop body
LE: loop exit
PB: predicated region body
PF: predicated region fallthrough
CT: control target
= control target key end

     0   :  { %vm387_vm0 = vcmask 1044480   ;;  %vm290_vm1 = vcmask 80896   ;;  %s20307_s0 = inlined_call_operand.vmem [shape: bf16[508,10], index: 0, kind: input, shape index: {}]   ;;  %s20308_s1 = inlined_call_operand.vmem [shape: bf16[10,128], index: 1, kind: input, shape index: {}]   ;;  %s20309_s2 = inlined_call_operand.vmem [shape: f32[1,128], index: 2, kind: input, shape index: {}]   ;;  %s20310_s3 = inlined_call_operand.vmem [shape: bf16[640,128], index: 3, kind: input, shape index: {}]   ;;  %s20311_s4 = inlined_call_operand.vmem [shape: f32[1,128], index: 4, kind: input, shape index: {}]   ;;  %s20312_s5 = inlined_call_operand.vmem [shape: bf16[384,64], index: 5, kind: input, shape index: {}]   ;;  %s20313_s6 = inlined_call_operand.vmem [shape: f32[1,64], index: 6, kind: input, shape index: {}]   ;;  %s20314_s7 = inlined_call_operand.vmem [shape: bf16[128,32], index: 7, kind: input, shape index: {}]   ;;  %s20315_s8 = inlined_call_operand.vmem [shape: f32[1,32], index: 8, kind: input, shape index: {}]   ;;  %s20316_s9 = inlined_call_operand.vmem [shape: bf16[32,128], index: 9, kind: input, shape index: {}]   ;;  %s20317_s10 = inlined_call_operand.vmem [shape: f32[1,128], index: 10, kind: input, shape index: {}]   ;;  %s20318_s11 = inlined_call_operand.vmem [shape: bf16[128,64], index: 11, kind: input, shape index: {}]   ;;  %s20319_s12 = inlined_call_operand.vmem [shape: f32[1,64], index: 12, kind: input, shape index: {}]   ;;  %s20320_s13 = inlined_call_operand.vmem [shape: bf16[64,128], index: 13, kind: input, shape index: {}]   ;;  %s20321_s14 = inlined_call_operand.vmem [shape: f32[1,128], index: 14, kind: input, shape index: {}]   ;;  %s20322_s15 = inlined_call_operand.hbm [shape: f32[2,128], index: 15, kind: output, shape index: {}]  }
   0x1   :  { %v14904_v0 = vld [vmem:[%s20308_s1] sm:$0x1f]   ;;  %v14906_v3 = vld [vmem:[%s20307_s0 + $0x8] sm:$0xff]   ;;  %v14907_v4 = vld [vmem:[%s20307_s0 + $0x10] sm:$0xff]  }
   0x2   :  { %v14905_v1 = vld [vmem:[%s20307_s0] sm:$0xff]   ;;  %14897 = vmatprep.subr.msk.bf16.mxu0 %vm387_vm0, %v14904_v0  ;;  %v389_v2 = vsel %vm387_vm0, %v14904_v0, 0  ;;  %v14908_v5 = vld [vmem:[%s20307_s0 + $0x18] sm:$0xff]   ;;  %v14910_v7 = vld [vmem:[%s20307_s0 + $0x28] sm:$0xff]  }
   0x3   :  { %14720 = vmatpush3.bf16.msra.mxu0 %v389_v2  ;;  %14721 = vmatprep.mubr.msk.bf16.mxu0 %vm290_vm1, %v14905_v1  ;;  %v14909_v6 = vld [vmem:[%s20307_s0 + $0x20] sm:$0xff]   ;;  %v14911_v8 = vld [vmem:[%s20307_s0 + $0x30] sm:$0xff]   ;;  %v14912_v9 = vld [vmem:[%s20307_s0 + $0x38] sm:$0xff]  }
   0x4   :  { %v14913_v10 = vld [vmem:[%s20307_s0 + $0x40] sm:$0xff]   ;;  %v14914_v11 = vld [vmem:[%s20307_s0 + $0x48] sm:$0xff]   ;;  %v14915_v12 = vld [vmem:[%s20307_s0 + $0x50] sm:$0xff]  }
   0x5   :  { %v14916_v13 = vld [vmem:[%s20307_s0 + $0x58] sm:$0xff]   ;;  %v14917_v14 = vld [vmem:[%s20307_s0 + $0x60] sm:$0xff]   ;;  %v14918_v15 = vld [vmem:[%s20307_s0 + $0x68] sm:$0xff]  }
   0x6   :  { %14722 = vmatmul.mubr.msk.bf16.vlgmr.msra.gmra.mrb[0].mxu0 %vm290_vm1, %v14906_v3  ;;  %v14919_v16 = vld [vmem:[%s20307_s0 + $0x70] sm:$0xff]   ;;  %v14920_v17 = vld [vmem:[%s20307_s0 + $0x78] sm:$0xff]   ;;  %v14921_v18 = vld [vmem:[%s20307_s0 + $0x80] sm:$0xff]  }
   0x7   :  { %14725 = vmatprep.mubr.msk.bf16.mxu0 %vm290_vm1, %v14907_v4  ;;  %v14922_v19 = vld [vmem:[%s20307_s0 + $0x88] sm:$0xff]   ;;  %v14923_v20 = vld [vmem:[%s20307_s0 + $0x90] sm:$0xff]   ;;  %v14924_v21 = vld [vmem:[%s20307_s0 + $0x98] sm:$0xff]  }
   0x8   :  { %v14925_v22 = vld [vmem:[%s20307_s0 + $0xa0] sm:$0xff]   ;;  %v14926_v23 = vld [vmem:[%s20307_s0 + $0xa8] sm:$0xff]   ;;  %v14927_v24 = vld [vmem:[%s20307_s0 + $0xb0] sm:$0xff]  }
   0x9   :  { %v14928_v25 = vld [vmem:[%s20307_s0 + $0xb8] sm:$0xff]   ;;  %v14929_v26 = vld [vmem:[%s20307_s0 + $0xc0] sm:$0xff]  }
   0xe   :  { %14726 = vmatmul.mubr.msk.bf16.gmra.mrb[4].mxu0 %vm290_vm1, %v14908_v5 }
   0xf   :  { %14729 = vmatprep.mubr.msk.bf16.mxu0 %vm290_vm1, %v14909_v6 }
  0x16   :  { %14730 = vmatmul.mubr.msk.bf16.gmra.mrb[8].mxu0 %vm290_vm1, %v14910_v7 }
  0x17   :  { %14733 = vmatprep.mubr.msk.bf16.mxu0 %vm290_vm1, %v14911_v8 }
  0x1e   :  { %14734 = vmatmul.mubr.msk.bf16.gmra.mrb[12].mxu0 %vm290_vm1, %v14912_v9 }
  0x1f   :  { %14737 = vmatprep.mubr.msk.bf16.mxu0 %vm290_vm1, %v14913_v10 }
  0x26   :  { %14738 = vmatmul.mubr.msk.bf16.gmra.mrb[16].mxu0 %vm290_vm1, %v14914_v11 }
  0x27   :  { %14741 = vmatprep.mubr.msk.bf16.mxu0 %vm290_vm1, %v14915_v12 }
  0x2e   :  { %14742 = vmatmul.mubr.msk.bf16.gmra.mrb[20].mxu0 %vm290_vm1, %v14916_v13 }
  0x2f   :  { %14745 = vmatprep.mubr.msk.bf16.mxu0 %vm290_vm1, %v14917_v14 }
  0x36   :  { %14746 = vmatmul.mubr.msk.bf16.gmra.mrb[24].mxu0 %vm290_vm1, %v14918_v15 }
  0x37   :  { %14749 = vmatprep.mubr.msk.bf16.mxu0 %vm290_vm1, %v14919_v16 }
  0x3e   :  { %14750 = vmatmul.mubr.msk.bf16.gmra.mrb[28].mxu0 %vm290_vm1, %v14920_v17 }
  0x3f   :  { %14753 = vmatprep.mubr.msk.bf16.mxu0 %vm290_vm1, %v14921_v18 }
  0x46   :  { %14754 = vmatmul.mubr.msk.bf16.gmra.mrb[32].mxu0 %vm290_vm1, %v14922_v19 }
  0x47   :  { %14757 = vmatprep.mubr.msk.bf16.mxu0 %vm290_vm1, %v14923_v20 }
  0x4e   :  { %14758 = vmatmul.mubr.msk.bf16.gmra.mrb[36].mxu0 %vm290_vm1, %v14924_v21 }
  0x4f   :  { %14761 = vmatprep.mubr.msk.bf16.mxu0 %vm290_vm1, %v14925_v22 }
  0x56   :  { %14762 = vmatmul.mubr.msk.bf16.gmra.mrb[40].mxu0 %vm290_vm1, %v14926_v23 }
  0x57   :  { %14765 = vmatprep.mubr.msk.bf16.mxu0 %vm290_vm1, %v14927_v24 }
  0x58   :  { %20 = vsyncpa [#allocation3], 0  ;;  %v14930_v27 = vld [vmem:[%s20307_s0 + $0xc8] sm:$0xff]   ;;  %v14931_v28 = vld [vmem:[%s20307_s0 + $0xd0] sm:$0xff]   ;;  %v15056_v34 = vmov 1983009808   ;;  %v812_v36 = vlaneseq }
  0x59   :  { %v14932_v29 = vld [vmem:[%s20307_s0 + $0xd8] sm:$0xff]   ;;  %v14933_v30 = vld [vmem:[%s20307_s0 + $0xe0] sm:$0xff]   ;;  %v14934_v31 = vld [vmem:[%s20307_s0 + $0xe8] sm:$0xff]   ;;  %v810_v35 = vunpack.c.l.s4 %v15056_v34  ;;  %v15057_v40 = vmov 1966171168   ;;  %vm3920_vm2 = vcmask 1041409  }
  0x5a   :  { %v14935_v32 = vld [vmem:[%s20307_s0 + $0xf0] sm:$0xff]   ;;  %v14936_v33 = vld [vmem:[%s20307_s0 + $0xf8] sm:$0x3f]   ;;  %v813_v38 = vshrl.u32 %v812_v36, 7  ;;  %v15276_v39 = vld [vmem:[%s20309_s2] ss:$0 sm:$0xff]  ;;  %v4397_v41 = vunpack.c.l.s4 %v15057_v40 }
  0x5b   :  { %v811_v37 = vunpack.c.0.s8 %v810_v35  ;;  %vm3923_vm3 = vcmask 1042434   ;;  %vm3926_vm4 = vcmask 1043459   ;;  %vm3929_vm5 = vcmask 1044484   ;;  %s15059_s22 = smov 64  }
  0x5c   :  { %v4398_v48 = vunpack.c.0.s8 %v4397_v41  ;;  %vm3932_vm6 = vcmask 1045509   ;;  %vm3935_vm7 = vcmask 1046534   ;;  %vm3938_vm8 = vcmask 1047559  }
  0x5d   :  { %v15279_v44 = vsub.s32 %v811_v37, %v813_v38  ;;  %vm4388_vm9 = vcmask 1047552   ;;  %vm4389_vm10 = vsmask.f32 7424  ;;  %vm13160_vm12 = vcmask 1043456  }
  0x5e   :  { %14766 = vmatmul.mubr.msk.bf16.gmra.mrb[44].mxu0 %vm290_vm1, %v14928_v25  ;;  %v15286_v59 = vsub.s32 %v4398_v48, %v813_v38  ;;  %vm16073_vm11 = vmand %vm4388_vm9, %vm4389_vm10  ;;  %vm13161_vm13 = vsmask.f32 3328  ;;  %vm15060_vm15 = vmmov 0   ;;  %vm13327_vm0 = vcmask 523264  }
  0x5f   :  { %14769 = vmatprep.mubr.msk.bf16.mxu0 %vm290_vm1, %v14929_v26  ;;  %20515 = vst [vmem:[#allocation5_spill] sm:$0xff] %v15279_v44  ;;  %vm20138_vm14 = vmand %vm13160_vm12, %vm13161_vm13 }
  0x66   :  { %14770 = vmatmul.mubr.msk.bf16.gmra.mrb[48].mxu0 %vm290_vm1, %v14930_v27 }
  0x67   :  { %14773 = vmatprep.mubr.msk.bf16.mxu0 %vm290_vm1, %v14931_v28 }
  0x6e   :  { %14774 = vmatmul.mubr.msk.bf16.gmra.mrb[52].mxu0 %vm290_vm1, %v14932_v29 }
  0x6f   :  { %14777 = vmatprep.mubr.msk.bf16.mxu0 %vm290_vm1, %v14933_v30 }
  0x76   :  { %14778 = vmatmul.mubr.msk.bf16.gmra.mrb[56].mxu0 %vm290_vm1, %v14934_v31 }
  0x77   :  { %14781 = vmatprep.mubr.msk.bf16.mxu0 %vm290_vm1, %v14935_v32 }
  0x7e   :  { %14782 = vmatmul.mubr.msk.bf16.gmra.mrb[60].mxu0 %vm290_vm1, %v14936_v33  ;;  %vm13604_vm1 = vcmask 261120  }
  0xd9   :  { %v14723_v42 = vpop.f32.mrb[0].mxu0 }
  0xda   :  { %v434_v43 = vadd.f32 %v14723_v42, %v15276_v39  ;;  %v425_v45 = vpop.f32.mrb[1].mxu0 }
  0xdb   :  { %v426_v46 = vadd.f32 %v15276_v39, %v425_v45  ;;  %v14724_v47 = vpop.f32.mrb[2].mxu0 }
  0xdc   :  { %v682_v49 = vmax.f32 %v434_v43, 0.0  ;;  %v437_v50 = vadd.f32 %v14724_v47, %v15276_v39  ;;  %v428_v51 = vpop.f32.mrb[3].mxu0 }
  0xdd   :  { %v680_v52 = vmax.f32 %v426_v46, 0.0  ;;  %v429_v53 = vadd.f32 %v15276_v39, %v428_v51 }
  0xde   :  { %v842_v54 = vcombine.high %v682_v49, %v682_v49  ;;  %v849_v55 = vrot.slane %v682_v49, %v15279_v44  ;;  %v683_v56 = vmax.f32 %v437_v50, 0.0 }
  0xdf   :  { %v808_v57 = vcombine.high %v680_v52, %v680_v52  ;;  %v815_v58 = vrot.slane %v680_v52, %v15279_v44  ;;  %v15288_v60 = vmax.f32 %v429_v53, 0.0 }
  0xe0   :  { %v856_v61 = vrot.slane %v842_v54, %v15279_v44  ;;  %v857_v62 = vcombine.high %v849_v55, %v849_v55  ;;  %v13940_v63 = vrot.slane %v849_v55, 9  ;;  %v859_v0 = vcombine.high %v683_v56, %v683_v56 }
  0xe1   :  { %v822_v1 = vrot.slane %v808_v57, %v15279_v44  ;;  %v823_v2 = vcombine.high %v815_v58, %v815_v58  ;;  %v13932_v3 = vrot.slane %v815_v58, 9  ;;  %v15293_v4 = vrot.slane %v683_v56, %v15279_v44  ;;  %v15295_v5 = vpop.f32.mrb[4].mxu0 }
  0xe2   :  { %v858_v6 = vcombine.high %v856_v61, %v856_v61  ;;  %v13941_v7 = vrot.slane %v857_v62, 9  ;;  %v13942_v8 = vrot.slane %v856_v61, 9  ;;  %v2911_v9 = vmax.f32 %v849_v55, %v13940_v63  ;;  %v15297_v10 = vpop.f32.mrb[5].mxu0 }
  0xe3   :  { %v824_v11 = vcombine.high %v822_v1, %v822_v1  ;;  %v13933_v12 = vrot.slane %v823_v2, 9  ;;  %v13934_v13 = vrot.slane %v822_v1, 9  ;;  %v2903_v14 = vmax.f32 %v815_v58, %v13932_v3  ;;  %v15299_v15 = vpop.f32.mrb[6].mxu0 }
  0xe4   :  { %v13943_v16 = vrot.slane %v858_v6, 9  ;;  %v2912_v17 = vmax.f32 %v857_v62, %v13941_v7  ;;  %v2913_v18 = vmax.f32 %v856_v61, %v13942_v8  ;;  %v3165_v19 = vpack.c.bf16 %v2911_v9, %v2911_v9  ;;  %v15301_v20 = vpop.f32.mrb[7].mxu0 }
  0xe5   :  { %v13935_v21 = vrot.slane %v824_v11, 9  ;;  %v2904_v22 = vmax.f32 %v823_v2, %v13933_v12  ;;  %v2905_v23 = vmax.f32 %v822_v1, %v13934_v13  ;;  %v3157_v24 = vpack.c.bf16 %v2903_v14, %v2903_v14 }
  0xe6   :  { %v2914_v25 = vmax.f32 %v858_v6, %v13943_v16  ;;  %v3166_v26 = vpack.c.bf16 %v2912_v17, %v2912_v17  ;;  %v3167_v27 = vpack.c.bf16 %v2913_v18, %v2913_v18  ;;  %v3673_v28 = vunpack.c.l.b16 %v3165_v19 }
  0xe7   :  { %v2906_v29 = vmax.f32 %v824_v11, %v13935_v21  ;;  %v3158_v30 = vpack.c.bf16 %v2904_v22, %v2904_v22  ;;  %v3159_v31 = vpack.c.bf16 %v2905_v23, %v2905_v23  ;;  %v3665_v32 = vunpack.c.l.b16 %v3157_v24 }
  0xe8   :  { %v3168_v33 = vpack.c.bf16 %v2914_v25, %v2914_v25  ;;  %v3674_v34 = vunpack.c.l.b16 %v3166_v26  ;;  %v3675_v35 = vunpack.c.l.b16 %v3167_v27  ;;  %v873_v36 = vrot.slane %v859_v0, %v15279_v44 }
  0xe9   :  { %v3160_v37 = vpack.c.bf16 %v2906_v29, %v2906_v29  ;;  %v3666_v38 = vunpack.c.l.b16 %v3158_v30  ;;  %v3667_v40 = vunpack.c.l.b16 %v3159_v31  ;;  %v874_v41 = vcombine.high %v15293_v4, %v15293_v4  ;;  %v15306_v42 = vpop.f32.mrb[8].mxu0 }
  0xea   :  { %v3676_v43 = vunpack.c.l.b16 %v3168_v33  ;;  %v3940_v45 = vrot.slane %v3674_v34, 7  ;;  %v3942_v46 = vrot.slane %v3675_v35, 6  ;;  %v875_v47 = vcombine.high %v873_v36, %v873_v36  ;;  %v15308_v48 = vpop.f32.mrb[9].mxu0 }
  0xeb   :  { %v3668_v49 = vunpack.c.l.b16 %v3160_v37  ;;  %v3919_v50 = vrot.slane %v3666_v38, 7  ;;  %v3922_v51 = vrot.slane %v3667_v40, 6  ;;  %v13944_v52 = vrot.slane %v15293_v4, 9  ;;  %v15311_v53 = vpop.f32.mrb[10].mxu0 }
  0xec   :  { %v3941_v54 = vsel %vm3920_vm2, %v3940_v45, %v3673_v28  ;;  %v3944_v55 = vrot.slane %v3676_v43, 5  ;;  %v13945_v56 = vrot.slane %v874_v41, 9  ;;  %v13946_v57 = vrot.slane %v873_v36, 9  ;;  %v15314_v58 = vpop.f32.mrb[11].mxu0 }
  0xed   :  { %v3943_v61 = vsel %vm3923_vm3, %v3942_v46, %v3941_v54  ;;  %v3921_v62 = vsel %vm3920_vm2, %v3919_v50, %v3665_v32  ;;  %v3925_v63 = vrot.slane %v3668_v49, 5  ;;  %v13947_v0 = vrot.slane %v875_v47, 9 }
  0xee   :  { %v3924_v1 = vsel %vm3923_vm3, %v3922_v51, %v3921_v62  ;;  %v2915_v2 = vmax.f32 %v15293_v4, %v13944_v52  ;;  %v2916_v3 = vmax.f32 %v874_v41, %v13945_v56  ;;  %v2917_v6 = vmax.f32 %v873_v36, %v13946_v57 }
  0xef   :  { %v2918_v7 = vmax.f32 %v875_v47, %v13947_v0  ;;  %v3945_v8 = vsel %vm3926_vm4, %v3944_v55, %v3943_v61  ;;  %v825_v9 = vcombine.high %v15288_v60, %v15288_v60  ;;  %v832_v11 = vrot.slane %v15288_v60, %v15279_v44 }
  0xf0   :  { %v3169_v12 = vpack.c.bf16 %v2915_v2, %v2915_v2  ;;  %v3170_v13 = vpack.c.bf16 %v2916_v3, %v2916_v3  ;;  %v3171_v14 = vpack.c.bf16 %v2917_v6, %v2917_v6  ;;  %v3927_v16 = vsel %vm3926_vm4, %v3925_v63, %v3924_v1 }
  0xf1   :  { %v3172_v17 = vpack.c.bf16 %v2918_v7, %v2918_v7  ;;  %v839_v4 = vrot.slane %v825_v9, %v15279_v44  ;;  %v840_v18 = vcombine.high %v832_v11, %v832_v11  ;;  %v13936_v19 = vrot.slane %v832_v11, 9  ;;  %v15327_v21 = vpop.f32.mrb[12].mxu0 }
  0xf2   :  { %v3677_v22 = vunpack.c.l.b16 %v3169_v12  ;;  %v3678_v23 = vunpack.c.l.b16 %v3170_v13  ;;  %v3679_v24 = vunpack.c.l.b16 %v3171_v14  ;;  %v450_v25 = vadd.f32 %v15295_v5, %v15276_v39  ;;  %v15331_v26 = vpop.f32.mrb[13].mxu0 }
  0xf3   :  { %v3680_v60 = vunpack.c.l.b16 %v3172_v17  ;;  %v841_v27 = vcombine.high %v839_v4, %v839_v4  ;;  %v13937_v28 = vrot.slane %v840_v18, 9  ;;  %v13938_v29 = vrot.slane %v839_v4, 9  ;;  %v15333_v30 = vpop.f32.mrb[14].mxu0 }
  0xf4   :  { %v3946_v31 = vrot.slane %v3677_v22, 4  ;;  %v3948_v32 = vrot.slane %v3678_v23, 3  ;;  %v3950_v33 = vrot.slane %v3679_v24, 2  ;;  %v2907_v34 = vmax.f32 %v832_v11, %v13936_v19  ;;  %v15335_v35 = vpop.f32.mrb[15].mxu0 }
  0xf5   :  { %v3952_v36 = vrot.slane %v3680_v60, 1  ;;  %v13939_v37 = vrot.slane %v841_v27, 9  ;;  %v2908_v38 = vmax.f32 %v840_v18, %v13937_v28  ;;  %v2909_v40 = vmax.f32 %v839_v4, %v13938_v29 }
  0xf6   :  { %v3947_v5 = vsel %vm3929_vm5, %v3946_v31, %v3945_v8  ;;  %v3161_v41 = vpack.c.bf16 %v2907_v34, %v2907_v34  ;;  %v686_v43 = vmax.f32 %v450_v25, 0.0  ;;  %v442_v45 = vadd.f32 %v15276_v39, %v15297_v10 }
  0xf7   :  { %v3949_v46 = vsel %vm3932_vm6, %v3948_v32, %v3947_v5  ;;  %v2910_v47 = vmax.f32 %v841_v27, %v13939_v37  ;;  %v3162_v49 = vpack.c.bf16 %v2908_v38, %v2908_v38  ;;  %v3163_v50 = vpack.c.bf16 %v2909_v40, %v2909_v40 }
  0xf8   :  { %v3951_v51 = vsel %vm3935_vm7, %v3950_v33, %v3949_v46  ;;  %v3669_v52 = vunpack.c.l.b16 %v3161_v41  ;;  %v910_v54 = vcombine.high %v686_v43, %v686_v43  ;;  %v917_v55 = vrot.slane %v686_v43, %v15279_v44 }
  0xf9   :  { %v3953_v56 = vsel %vm3938_vm8, %v3952_v36, %v3951_v51  ;;  %v3164_v57 = vpack.c.bf16 %v2910_v47, %v2910_v47  ;;  %v3670_v61 = vunpack.c.l.b16 %v3162_v49  ;;  %v3671_v62 = vunpack.c.l.b16 %v3163_v50  ;;  %v15344_v63 = vpop.f32.mrb[16].mxu0 }
  0xfa   :  { %v14186_v0 = vpack.c.b16 %v3953_v56, %v3953_v56  ;;  %v3928_v10 = vrot.slane %v3669_v52, 4  ;;  %v924_v1 = vrot.slane %v910_v54, %v15279_v44  ;;  %v925_v2 = vcombine.high %v917_v55, %v917_v55  ;;  %v15347_v3 = vpop.f32.mrb[17].mxu0 }
  0xfb   :  { %v3672_v6 = vunpack.c.l.b16 %v3164_v57  ;;  %v3931_v7 = vrot.slane %v3670_v61, 3  ;;  %v3934_v8 = vrot.slane %v3671_v62, 2  ;;  %v13956_v9 = vrot.slane %v917_v55, 9  ;;  %v15349_v11 = vpop.f32.mrb[18].mxu0 }
  0xfc   :  { %v4409_v12 = vrot.slane %v14186_v0, %v15286_v59  ;;  %v3930_v13 = vsel %vm3929_vm5, %v3928_v10, %v3927_v16  ;;  %v926_v14 = vcombine.high %v924_v1, %v924_v1  ;;  %v13957_v17 = vrot.slane %v925_v2, 9  ;;  %v15368_v50 = vpop.f32.mrb[19].mxu0 }
  0xfd   :  { %v3933_v4 = vsel %vm3932_vm6, %v3931_v7, %v3930_v13  ;;  %v3937_v18 = vrot.slane %v3672_v6, 1  ;;  %v13958_v19 = vrot.slane %v924_v1, 9  ;;  %v2927_v22 = vmax.f32 %v917_v55, %v13956_v9 }
  0xfe   :  { %v4411_v23 = vcombine.high %v4409_v12, %v4409_v12  ;;  %v4425_v24 = vrot.slane %v4409_v12, %v15286_v59  ;;  %v3936_v25 = vsel %vm3935_vm7, %v3934_v8, %v3933_v4  ;;  %v13959_v60 = vrot.slane %v926_v14, 9 }
  0xff   :  { %v3939_v27 = vsel %vm3938_vm8, %v3937_v18, %v3936_v25  ;;  %v2928_v28 = vmax.f32 %v925_v2, %v13957_v17  ;;  %v2929_v29 = vmax.f32 %v924_v1, %v13958_v19  ;;  %v3181_v31 = vpack.c.bf16 %v2927_v22, %v2927_v22 }
 0x100   :  { %v15358_v16 = vrot.slane %v4411_v23, %v15286_v59  ;;  %v4441_v32 = vcombine.high %v4425_v24, %v4425_v24  ;;  %v5241_v33 = vrot.slane %v4425_v24, %v15286_v59  ;;  %v4370_v34 = vpack.c.b16 %v3953_v56, %v3939_v27 }
 0x101   :  { %v2930_v36 = vmax.f32 %v926_v14, %v13959_v60  ;;  %v3182_v37 = vpack.c.bf16 %v2928_v28, %v2928_v28  ;;  %v3183_v38 = vpack.c.bf16 %v2929_v29, %v2929_v29  ;;  %v3689_v54 = vunpack.c.l.b16 %v3181_v31 }
 0x102   :  { %v5248_v40 = vrot.slane %v5241_v33, %v15286_v59  ;;  %v5255_v5 = vrot.slane %v15358_v16, %v15286_v59  ;;  %v15365_v41 = vrot.slane %v4441_v32, %v15286_v59  ;;  %v4402_v43 = vrot.slane %v4370_v34, %v15286_v59 }
 0x103   :  { %v3184_v46 = vpack.c.bf16 %v2930_v36, %v2930_v36  ;;  %v3690_v47 = vunpack.c.l.b16 %v3182_v37  ;;  %v3691_v49 = vunpack.c.l.b16 %v3183_v38  ;;  %v684_v55 = vmax.f32 %v442_v45, 0.0  ;;  %v15394_v36 = vpop.f32.mrb[20].mxu0 }
 0x104   :  { %v5262_v52 = vrot.slane %v5255_v5, %v15286_v59  ;;  %v4410_v56 = vcombine.high %v4402_v43, %v4402_v43  ;;  %v4418_v57 = vrot.slane %v4402_v43, %v15286_v59  ;;  %v15376_v10 = vunpack.c.l.b16 %v5248_v40 }
 0x105   :  { %v3692_v61 = vunpack.c.l.b16 %v3184_v46  ;;  %v3968_v62 = vrot.slane %v3690_v47, 7  ;;  %v876_v1 = vcombine.high %v684_v55, %v684_v55  ;;  %v883_v2 = vrot.slane %v684_v55, %v15279_v44 }
 0x106   :  { %v4432_v6 = vrot.slane %v4410_v56, %v15286_v59  ;;  %v4440_v7 = vcombine.high %v4418_v57, %v4418_v57  ;;  %v5185_v8 = vrot.slane %v4418_v57, %v15286_v59  ;;  %v3970_v9 = vrot.slane %v3691_v49, 6 }
 0x107   :  { %v3969_v45 = vsel %vm3920_vm2, %v3968_v62, %v3689_v54  ;;  %v3972_v12 = vrot.slane %v3692_v61, 5  ;;  %v890_v13 = vrot.slane %v876_v1, %v15279_v44  ;;  %v891_v14 = vcombine.high %v883_v2, %v883_v2 }
 0x108   :  { %v4442_v17 = vcombine.high %v4432_v6, %v4432_v6  ;;  %v15384_v4 = vrot.slane %v5185_v8, %v15286_v59  ;;  %v5199_v18 = vrot.slane %v4432_v6, %v15286_v59  ;;  %v5213_v19 = vrot.slane %v4440_v7, %v15286_v59 }
 0x109   :  { %v892_v22 = vcombine.high %v890_v13, %v890_v13  ;;  %v13948_v23 = vrot.slane %v883_v2, 9  ;;  %v13949_v24 = vrot.slane %v891_v14, 9  ;;  %v13950_v25 = vrot.slane %v890_v13, 9 }
 0x10a   :  { %v5206_v60 = vrot.slane %v5199_v18, %v15286_v59  ;;  %v5220_v27 = vrot.slane %v5213_v19, %v15286_v59  ;;  %v15391_v28 = vrot.slane %v4442_v17, %v15286_v59  ;;  %v20323_v29 = vunpack.c.l.b16 %v15384_v4 }
 0x10b   :  { %v13951_v31 = vrot.slane %v892_v22, 9  ;;  %v2919_v32 = vmax.f32 %v883_v2, %v13948_v23  ;;  %v2920_v33 = vmax.f32 %v891_v14, %v13949_v24  ;;  %v2921_v34 = vmax.f32 %v890_v13, %v13950_v25 }
 0x10c   :  { %v15396_v37 = vunpack.c.l.b16 %v5262_v52  ;;  %v5234_v38 = vrot.slane %v15391_v28, %v15286_v59  ;;  %v15400_v40 = vunpack.c.l.b16 %v5206_v60  ;;  %v3971_v5 = vsel %vm3923_vm3, %v3970_v9, %v3969_v45 }
 0x10d   :  { %v2922_v43 = vmax.f32 %v892_v22, %v13951_v31  ;;  %v3173_v46 = vpack.c.bf16 %v2919_v32, %v2919_v32  ;;  %v3174_v47 = vpack.c.bf16 %v2920_v33, %v2920_v33  ;;  %v3175_v49 = vpack.c.bf16 %v2921_v34, %v2921_v34 }
 0x10e   :  { %v15403_v54 = vunpack.c.l.b16 %v5220_v27  ;;  %v15407_v55 = vrot.slane %v20323_v29, 1  ;;  %v453_v52 = vadd.f32 %v15299_v15, %v15276_v39  ;;  %v445_v56 = vadd.f32 %v15276_v39, %v15301_v20 }
 0x10f   :  { %v3176_v57 = vpack.c.bf16 %v2922_v43, %v2922_v43  ;;  %v3682_v61 = vunpack.c.l.b16 %v3174_v47  ;;  %v3683_v62 = vunpack.c.l.b16 %v3175_v49  ;;  %v3973_v1 = vsel %vm3926_vm4, %v3972_v12, %v3971_v5 }
 0x110   :  { %20516 = vst [vmem:[#allocation6_spill] sm:$0xff] %v15407_v55  ;;  %v687_v2 = vmax.f32 %v453_v52, 0.0  ;;  %v685_v6 = vmax.f32 %v445_v56, 0.0  ;;  %v466_v7 = vadd.f32 %v15306_v42, %v15276_v39  ;;  %v458_v8 = vadd.f32 %v15276_v39, %v15308_v48 }
 0x111   :  { %v3681_v9 = vunpack.c.l.b16 %v3173_v46  ;;  %v3684_v45 = vunpack.c.l.b16 %v3176_v57  ;;  %v3954_v13 = vrot.slane %v3682_v61, 7  ;;  %v3956_v15 = vrot.slane %v3683_v62, 6  ;;  %v15427_v46 = vpop.f32.mrb[21].mxu0 }
 0x112   :  { %v927_v14 = vcombine.high %v687_v2, %v687_v2  ;;  %v934_v20 = vrot.slane %v687_v2, %v15279_v44  ;;  %v893_v17 = vcombine.high %v685_v6, %v685_v6  ;;  %v900_v18 = vrot.slane %v685_v6, %v15279_v44 }
 0x113   :  { %v3955_v12 = vsel %vm3920_vm2, %v3954_v13, %v3681_v9  ;;  %v3958_v19 = vrot.slane %v3684_v45, 5  ;;  %v690_v22 = vmax.f32 %v466_v7, 0.0  ;;  %v15421_v23 = vmax.f32 %v458_v8, 0.0 }
 0x114   :  { %v3957_v42 = vsel %vm3923_vm3, %v3956_v15, %v3955_v12  ;;  %v941_v48 = vrot.slane %v927_v14, %v15279_v44  ;;  %v942_v24 = vcombine.high %v934_v20, %v934_v20  ;;  %v13960_v25 = vrot.slane %v934_v20, 9 }
 0x115   :  { %v907_v60 = vrot.slane %v893_v17, %v15279_v44  ;;  %v908_v27 = vcombine.high %v900_v18, %v900_v18  ;;  %v13952_v31 = vrot.slane %v900_v18, 9  ;;  %v3959_v32 = vsel %vm3926_vm4, %v3958_v19, %v3957_v42 }
 0x116   :  { %v943_v33 = vcombine.high %v941_v48, %v941_v48  ;;  %v13961_v34 = vrot.slane %v942_v24, 9  ;;  %v13962_v5 = vrot.slane %v941_v48, 9  ;;  %v2931_v43 = vmax.f32 %v934_v20, %v13960_v25 }
 0x117   :  { %v909_v47 = vcombine.high %v907_v60, %v907_v60  ;;  %v13953_v49 = vrot.slane %v908_v27, 9  ;;  %v13954_v52 = vrot.slane %v907_v60, 9  ;;  %v2923_v56 = vmax.f32 %v900_v18, %v13952_v31 }
 0x118   :  { %v13963_v57 = vrot.slane %v943_v33, 9  ;;  %v2932_v61 = vmax.f32 %v942_v24, %v13961_v34  ;;  %v2933_v62 = vmax.f32 %v941_v48, %v13962_v5  ;;  %v3185_v2 = vpack.c.bf16 %v2931_v43, %v2931_v43 }
 0x119   :  { %v13955_v6 = vrot.slane %v909_v47, 9  ;;  %v2924_v7 = vmax.f32 %v908_v27, %v13953_v49  ;;  %v2925_v8 = vmax.f32 %v907_v60, %v13954_v52  ;;  %v3177_v9 = vpack.c.bf16 %v2923_v56, %v2923_v56 }
 0x11a   :  { %v2934_v45 = vmax.f32 %v943_v33, %v13963_v57  ;;  %v3186_v13 = vpack.c.bf16 %v2932_v61, %v2932_v61  ;;  %v3187_v15 = vpack.c.bf16 %v2933_v62, %v2933_v62  ;;  %v3693_v14 = vunpack.c.l.b16 %v3185_v2 }
 0x11b   :  { %v2926_v17 = vmax.f32 %v909_v47, %v13955_v6  ;;  %v3178_v20 = vpack.c.bf16 %v2924_v7, %v2924_v7  ;;  %v3179_v12 = vpack.c.bf16 %v2925_v8, %v2925_v8  ;;  %v3685_v19 = vunpack.c.l.b16 %v3177_v9 }
 0x11c   :  { %v3188_v42 = vpack.c.bf16 %v2934_v45, %v2934_v45  ;;  %v3694_v25 = vunpack.c.l.b16 %v3186_v13  ;;  %v3695_v29 = vunpack.c.l.b16 %v3187_v15  ;;  %v3974_v18 = vrot.slane %v3693_v14, 4 }
 0x11d   :  { %v3180_v31 = vpack.c.bf16 %v2926_v17, %v2926_v17  ;;  %v3686_v24 = vunpack.c.l.b16 %v3178_v20  ;;  %v3687_v48 = vunpack.c.l.b16 %v3179_v12  ;;  %v3960_v34 = vrot.slane %v3685_v19, 4  ;;  %v15445_v19 = vpop.f32.mrb[22].mxu0 }
 0x11e   :  { %v3696_v5 = vunpack.c.l.b16 %v3188_v42  ;;  %v3975_v60 = vsel %vm3929_vm5, %v3974_v18, %v3973_v1  ;;  %v3976_v27 = vrot.slane %v3694_v25, 3  ;;  %v3978_v33 = vrot.slane %v3695_v29, 2 }
 0x11f   :  { %v3688_v43 = vunpack.c.l.b16 %v3180_v31  ;;  %v3961_v49 = vsel %vm3929_vm5, %v3960_v34, %v3959_v32  ;;  %v3962_v47 = vrot.slane %v3686_v24, 3  ;;  %v3964_v52 = vrot.slane %v3687_v48, 2 }
 0x120   :  { %v3977_v56 = vsel %vm3932_vm6, %v3976_v27, %v3975_v60  ;;  %v3980_v57 = vrot.slane %v3696_v5, 1  ;;  %v978_v61 = vcombine.high %v690_v22, %v690_v22  ;;  %v985_v62 = vrot.slane %v690_v22, %v15279_v44 }
 0x121   :  { %v3979_v2 = vsel %vm3935_vm7, %v3978_v33, %v3977_v56  ;;  %v3963_v6 = vsel %vm3932_vm6, %v3962_v47, %v3961_v49  ;;  %v3966_v7 = vrot.slane %v3688_v43, 1  ;;  %v944_v1 = vcombine.high %v15421_v23, %v15421_v23 }
 0x122   :  { %v3981_v29 = vsel %vm3938_vm8, %v3980_v57, %v3979_v2  ;;  %v3965_v32 = vsel %vm3935_vm7, %v3964_v52, %v3963_v6  ;;  %v992_v8 = vrot.slane %v978_v61, %v15279_v44  ;;  %v993_v9 = vcombine.high %v985_v62, %v985_v62  ;;  %v15467_v61 = vpop.f32.mrb[23].mxu0 }
 0x123   :  { %v14187_v45 = vpack.c.b16 %v3981_v29, %v3981_v29  ;;  %v3967_v13 = vsel %vm3938_vm8, %v3966_v7, %v3965_v32  ;;  %v13972_v15 = vrot.slane %v985_v62, 9  ;;  %v15443_v22 = vrot.slane %v15421_v23, %v15279_v44 }
 0x124   :  { %v4371_v14 = vpack.c.b16 %v3981_v29, %v3967_v13  ;;  %v994_v17 = vcombine.high %v992_v8, %v992_v8  ;;  %v13973_v20 = vrot.slane %v993_v9, 9  ;;  %v13974_v12 = vrot.slane %v992_v8, 9 }
 0x125   :  { %v15450_v42 = vunpack.c.l.b16 %v5234_v38  ;;  %v4458_v25 = vrot.slane %v14187_v45, %v15286_v59  ;;  %v2943_v18 = vmax.f32 %v985_v62, %v13972_v15  ;;  %v958_v31 = vrot.slane %v944_v1, %v15279_v44 }
 0x126   :  { %v4451_v24 = vrot.slane %v4371_v14, %v15286_v59  ;;  %v13975_v23 = vrot.slane %v994_v17, 9  ;;  %v2944_v48 = vmax.f32 %v993_v9, %v13973_v20  ;;  %v2945_v34 = vmax.f32 %v992_v8, %v13974_v12  ;;  %v15518_v12 = vpop.f32.mrb[24].mxu0 }
 0x127   :  { %v4460_v5 = vcombine.high %v4458_v25, %v4458_v25  ;;  %v4474_v60 = vrot.slane %v4458_v25, %v15286_v59  ;;  %v959_v27 = vcombine.high %v15443_v22, %v15443_v22  ;;  %v469_v28 = vadd.f32 %v15311_v53, %v15276_v39 }
 0x128   :  { %v4459_v38 = vcombine.high %v4451_v24, %v4451_v24  ;;  %v15461_v33 = vrot.slane %v4451_v24, %v15286_v59  ;;  %v2946_v43 = vmax.f32 %v994_v17, %v13975_v23  ;;  %v3197_v49 = vpack.c.bf16 %v2943_v18, %v2943_v18 }
 0x129   :  { %v15464_v47 = vrot.slane %v4460_v5, %v15286_v59  ;;  %v4490_v52 = vcombine.high %v4474_v60, %v4474_v60  ;;  %v5353_v56 = vrot.slane %v4474_v60, %v15286_v59  ;;  %v3198_v57 = vpack.c.bf16 %v2944_v48, %v2944_v48 }
 0x12a   :  { %v4481_v62 = vrot.slane %v4459_v38, %v15286_v59  ;;  %v4489_v53 = vcombine.high %v15461_v33, %v15461_v33  ;;  %v3199_v2 = vpack.c.bf16 %v2945_v34, %v2945_v34  ;;  %v960_v6 = vcombine.high %v958_v31, %v958_v31 }
 0x12b   :  { %v5360_v7 = vrot.slane %v5353_v56, %v15286_v59  ;;  %v5367_v1 = vrot.slane %v15464_v47, %v15286_v59  ;;  %v15476_v29 = vrot.slane %v4490_v52, %v15286_v59  ;;  %v3200_v32 = vpack.c.bf16 %v2946_v43, %v2946_v43  ;;  %v14937_v52 = vld [vmem:[%s20310_s3 + $0x40] sm:$0xff]  }
 0x12c   :  { %v4491_v8 = vcombine.high %v4481_v62, %v4481_v62  ;;  %v5311_v45 = vrot.slane %v4481_v62, %v15286_v59  ;;  %v15482_v13 = vrot.slane %v4489_v53, %v15286_v59  ;;  %v3705_v17 = vunpack.c.l.b16 %v3197_v49  ;;  %14511 = vmatprep.subr.bf16.mxu1 %v14937_v52 }
 0x12d   :  { %v5374_v14 = vrot.slane %v5367_v1, %v15286_v59  ;;  %v3706_v20 = vunpack.c.l.b16 %v3198_v57  ;;  %v3707_v24 = vunpack.c.l.b16 %v3199_v2  ;;  %v15493_v23 = vunpack.c.l.b16 %v5360_v7  ;;  %v14938_v2 = vld [vmem:[%s20310_s3] sm:$0xff]  }
 0x12e   :  { %v5318_v25 = vrot.slane %v5311_v45, %v15286_v59  ;;  %v15491_v18 = vrot.slane %v4491_v8, %v15286_v59  ;;  %v3708_v48 = vunpack.c.l.b16 %v3200_v32  ;;  %v13964_v5 = vrot.slane %v15443_v22, 9  ;;  %14512 = vmatpush3.bf16.msra.mxu1 %v14938_v2 }
 0x12f   :  { %20517 = vst [vmem:[#allocation7_spill] sm:$0xff] %v15493_v23  ;;  %v3996_v34 = vrot.slane %v3706_v20, 7  ;;  %v15496_v60 = vunpack.c.l.b16 %v5374_v14  ;;  %v3998_v49 = vrot.slane %v3707_v24, 6  ;;  %v13965_v62 = vrot.slane %v959_v27, 9 }
 0x130   :  { %v4000_v57 = vrot.slane %v3708_v48, 5  ;;  %v13966_v53 = vrot.slane %v958_v31, 9  ;;  %v15509_v7 = vunpack.c.l.b16 %v5318_v25  ;;  %v13967_v32 = vrot.slane %v960_v6, 9 }
 0x131   :  { %20518 = vst [vmem:[#allocation8_spill] sm:$0xff] %v15496_v60  ;;  %v3997_v56 = vsel %vm3920_vm2, %v3996_v34, %v3705_v17  ;;  %v2935_v8 = vmax.f32 %v15443_v22, %v13964_v5  ;;  %v2936_v45 = vmax.f32 %v959_v27, %v13965_v62  ;;  %v691_v20 = vmax.f32 %v469_v28, 0.0 }
 0x132   :  { %20519 = vst [vmem:[#allocation9_spill] sm:$0xff] %v15509_v7  ;;  %v3999_v1 = vsel %vm3923_vm3, %v3998_v49, %v3997_v56  ;;  %v2937_v14 = vmax.f32 %v958_v31, %v13966_v53  ;;  %v2938_v24 = vmax.f32 %v960_v6, %v13967_v32  ;;  %v461_v34 = vadd.f32 %v15276_v39, %v15314_v58 }
 0x133   :  { %v4001_v17 = vsel %vm3926_vm4, %v4000_v57, %v3999_v1  ;;  %v3189_v48 = vpack.c.bf16 %v2935_v8, %v2935_v8  ;;  %v482_v25 = vadd.f32 %v15327_v21, %v15276_v39  ;;  %v3190_v49 = vpack.c.bf16 %v2936_v45, %v2936_v45 }
 0x134   :  { %v3191_v56 = vpack.c.bf16 %v2937_v14, %v2937_v14  ;;  %v995_v22 = vcombine.high %v691_v20, %v691_v20  ;;  %v1002_v27 = vrot.slane %v691_v20, %v15279_v44  ;;  %v3192_v31 = vpack.c.bf16 %v2938_v24, %v2938_v24 }
 0x135   :  { %v3697_v28 = vunpack.c.l.b16 %v3189_v48  ;;  %v689_v5 = vmax.f32 %v461_v34, 0.0  ;;  %v15521_v52 = vmax.f32 %v482_v25, 0.0  ;;  %v3698_v6 = vunpack.c.l.b16 %v3190_v49 }
 0x136   :  { %v3699_v57 = vunpack.c.l.b16 %v3191_v56  ;;  %v1009_v62 = vrot.slane %v995_v22, %v15279_v44  ;;  %v1010_v58 = vcombine.high %v1002_v27, %v1002_v27  ;;  %v3700_v53 = vunpack.c.l.b16 %v3192_v31 }
 0x137   :  { %v13976_v2 = vrot.slane %v1002_v27, 9  ;;  %v961_v21 = vcombine.high %v689_v5, %v689_v5  ;;  %v968_v1 = vrot.slane %v689_v5, %v15279_v44  ;;  %v3982_v32 = vrot.slane %v3698_v6, 7 }
 0x138   :  { %v3984_v8 = vrot.slane %v3699_v57, 6  ;;  %v1011_v45 = vcombine.high %v1009_v62, %v1009_v62  ;;  %v13977_v14 = vrot.slane %v1010_v58, 9  ;;  %v3986_v20 = vrot.slane %v3700_v53, 5 }
 0x139   :  { %v13978_v24 = vrot.slane %v1009_v62, 9  ;;  %v2947_v48 = vmax.f32 %v1002_v27, %v13976_v2  ;;  %v975_v34 = vrot.slane %v961_v21, %v15279_v44  ;;  %v3983_v25 = vsel %vm3920_vm2, %v3982_v32, %v3697_v28 }
 0x13a   :  { %v13979_v49 = vrot.slane %v1011_v45, 9  ;;  %v2948_v56 = vmax.f32 %v1010_v58, %v13977_v14  ;;  %v976_v22 = vcombine.high %v968_v1, %v968_v1  ;;  %v3985_v31 = vsel %vm3923_vm3, %v3984_v8, %v3983_v25 }
 0x13b   :  { %v2949_v0 = vmax.f32 %v1009_v62, %v13978_v24  ;;  %v3201_v15 = vpack.c.bf16 %v2947_v48, %v2947_v48  ;;  %v977_v9 = vcombine.high %v975_v34, %v975_v34  ;;  %v13968_v57 = vrot.slane %v968_v1, 9 }
 0x13c   :  { %v2950_v5 = vmax.f32 %v1011_v45, %v13979_v49  ;;  %v3202_v6 = vpack.c.bf16 %v2948_v56, %v2948_v56  ;;  %v13969_v51 = vrot.slane %v976_v22, 9  ;;  %v13970_v38 = vrot.slane %v975_v34, 9  ;;  %v15528_v45 = vpop.f32.mrb[25].mxu0 }
 0x13d   :  { %v3203_v43 = vpack.c.bf16 %v2949_v0, %v2949_v0  ;;  %v3709_v53 = vunpack.c.l.b16 %v3201_v15  ;;  %v13971_v27 = vrot.slane %v977_v9, 9  ;;  %v2939_v55 = vmax.f32 %v968_v1, %v13968_v57 }
 0x13e   :  { %v3204_v2 = vpack.c.bf16 %v2950_v5, %v2950_v5  ;;  %v3710_v21 = vunpack.c.l.b16 %v3202_v6  ;;  %v2940_v28 = vmax.f32 %v976_v22, %v13969_v51  ;;  %v2941_v14 = vmax.f32 %v975_v34, %v13970_v38 }
 0x13f   :  { %v3711_v32 = vunpack.c.l.b16 %v3203_v43  ;;  %v4002_v58 = vrot.slane %v3709_v53, 4  ;;  %v2942_v60 = vmax.f32 %v977_v9, %v13971_v27  ;;  %v3193_v24 = vpack.c.bf16 %v2939_v55, %v2939_v55 }
 0x140   :  { %v3712_v8 = vunpack.c.l.b16 %v3204_v2  ;;  %v4004_v62 = vrot.slane %v3710_v21, 3  ;;  %v3194_v48 = vpack.c.bf16 %v2940_v28, %v2940_v28  ;;  %v3195_v15 = vpack.c.bf16 %v2941_v14, %v2941_v14 }
 0x141   :  { %v4003_v25 = vsel %vm3929_vm5, %v4002_v58, %v4001_v17  ;;  %v4006_v0 = vrot.slane %v3711_v32, 2  ;;  %v3196_v49 = vpack.c.bf16 %v2942_v60, %v2942_v60  ;;  %v3701_v1 = vunpack.c.l.b16 %v3193_v24 }
 0x142   :  { %v4005_v56 = vsel %vm3932_vm6, %v4004_v62, %v4003_v25  ;;  %v4008_v5 = vrot.slane %v3712_v8, 1  ;;  %v3702_v51 = vunpack.c.l.b16 %v3194_v48  ;;  %v3703_v38 = vunpack.c.l.b16 %v3195_v15 }
 0x143   :  { %v4007_v43 = vsel %vm3935_vm7, %v4006_v0, %v4005_v56  ;;  %v3704_v9 = vunpack.c.l.b16 %v3196_v49  ;;  %v3987_v34 = vsel %vm3926_vm4, %v3986_v20, %v3985_v31  ;;  %v20520_v55 = vrot.slane %v15482_v13, %v15286_v59 }
 0x144   :  { %v4009_v17 = vsel %vm3938_vm8, %v4008_v5, %v4007_v43  ;;  %v3988_v6 = vrot.slane %v3701_v1, 4  ;;  %v1046_v60 = vcombine.high %v15521_v52, %v15521_v52  ;;  %v20522_v57 = vrot.slane %v15491_v18, %v15286_v59 }
 0x145   :  { %v15537_v22 = vunpack.c.l.b16 %v20520_v55  ;;  %v14188_v27 = vpack.c.b16 %v4009_v17, %v4009_v17  ;;  %v3990_v2 = vrot.slane %v3702_v51, 3  ;;  %v1053_v20 = vrot.slane %v15521_v52, %v15279_v44  ;;  %v15558_v51 = vpop.f32.mrb[26].mxu0 }
 0x146   :  { %v15545_v53 = vunpack.c.l.b16 %v20522_v57  ;;  %v3989_v13 = vsel %vm3929_vm5, %v3988_v6, %v3987_v34  ;;  %v3992_v31 = vrot.slane %v3703_v38, 2  ;;  %v3994_v21 = vrot.slane %v3704_v9, 1 }
 0x147   :  { %20521 = vst [vmem:[#allocation10_spill] sm:$0xff] %v15537_v22  ;;  %v1060_v28 = vrot.slane %v1046_v60, %v15279_v44  ;;  %v4507_v32 = vrot.slane %v14188_v27, %v15286_v59  ;;  %v3991_v58 = vsel %vm3932_vm6, %v3990_v2, %v3989_v13  ;;  %v1061_v14 = vcombine.high %v1053_v20, %v1053_v20  ;;  %v14939_v2 = vld [vmem:[%s20310_s3 + $0x48] sm:$0xff]  }
 0x148   :  { %20523 = vst [vmem:[#allocation11_spill] sm:$0xff] %v15545_v53  ;;  %v13988_v8 = vrot.slane %v1053_v20, 9  ;;  %v3993_v18 = vsel %vm3935_vm7, %v3992_v31, %v3991_v58  ;;  %v474_v48 = vadd.f32 %v15276_v39, %v15331_v26  ;;  %14513 = vmatprep.subr.bf16.mxu1 %v14939_v2 }
 0x149   :  { %v1062_v62 = vcombine.high %v1060_v28, %v1060_v28  ;;  %v13990_v24 = vrot.slane %v1060_v28, 9  ;;  %v4509_v52 = vcombine.high %v4507_v32, %v4507_v32  ;;  %v4523_v25 = vrot.slane %v4507_v32, %v15286_v59 }
 0x14a   :  { %v3995_v0 = vsel %vm3938_vm8, %v3994_v21, %v3993_v18  ;;  %v13989_v15 = vrot.slane %v1061_v14, 9  ;;  %v2959_v5 = vmax.f32 %v1053_v20, %v13988_v8  ;;  %v692_v6 = vmax.f32 %v474_v48, 0.0 }
 0x14b   :  { %v4372_v49 = vpack.c.b16 %v4009_v17, %v3995_v0  ;;  %v13991_v56 = vrot.slane %v1062_v62, 9  ;;  %v2961_v1 = vmax.f32 %v1060_v28, %v13990_v24  ;;  %v4537_v43 = vrot.slane %v4509_v52, %v15286_v59  ;;  %v15585_v24 = vld [vmem:[%s20309_s2] ss:$0 sm:$0xff]  ;;  %v15589_v52 = vpop.f32.mrb[27].mxu0 }
 0x14c   :  { %v4539_v38 = vcombine.high %v4523_v25, %v4523_v25  ;;  %v5465_v9 = vrot.slane %v4523_v25, %v15286_v59  ;;  %v2960_v34 = vmax.f32 %v1061_v14, %v13989_v15  ;;  %v3213_v55 = vpack.c.bf16 %v2959_v5, %v2959_v5 }
 0x14d   :  { %v4500_v39 = vrot.slane %v4372_v49, %v15286_v59  ;;  %v2962_v26 = vmax.f32 %v1062_v62, %v13991_v56  ;;  %v4541_v60 = vcombine.high %v4537_v43, %v4537_v43  ;;  %v5479_v17 = vrot.slane %v4537_v43, %v15286_v59  ;;  %v14941_v56 = vld [vmem:[%s20310_s3 + $0x50] sm:$0xff]  }
 0x14e   :  { %v5472_v57 = vrot.slane %v5465_v9, %v15286_v59  ;;  %v5493_v27 = vrot.slane %v4539_v38, %v15286_v59  ;;  %v3214_v31 = vpack.c.bf16 %v2960_v34, %v2960_v34  ;;  %v3215_v21 = vpack.c.bf16 %v2961_v1, %v2961_v1 }
 0x14f   :  { %v4508_v20 = vcombine.high %v4500_v39, %v4500_v39  ;;  %v15570_v13 = vrot.slane %v4500_v39, %v15286_v59  ;;  %v5486_v28 = vrot.slane %v5479_v17, %v15286_v59  ;;  %v3216_v14 = vpack.c.bf16 %v2962_v26, %v2962_v26 }
 0x150   :  { %v5500_v32 = vrot.slane %v5493_v27, %v15286_v59  ;;  %v15574_v58 = vunpack.c.l.b16 %v5472_v57  ;;  %v15577_v8 = vrot.slane %v4541_v60, %v15286_v59  ;;  %v485_v48 = vadd.f32 %v15585_v24, %v15333_v30 }
 0x151   :  { %v4530_v18 = vrot.slane %v4508_v20, %v15286_v59  ;;  %v4538_v62 = vcombine.high %v15570_v13, %v15570_v13  ;;  %v15591_v25 = vunpack.c.l.b16 %v5486_v28  ;;  %v3721_v49 = vunpack.c.l.b16 %v3213_v55 }
 0x152   :  { %20524 = vst [vmem:[#allocation12_spill] sm:$0xff] %v15574_v58  ;;  %20525 = vst [vmem:[#allocation13_spill] sm:$0xff] %v15577_v8  ;;  %v15593_v0 = vunpack.c.l.b16 %v5500_v32  ;;  %v3722_v38 = vunpack.c.l.b16 %v3214_v31  ;;  %v3723_v30 = vunpack.c.l.b16 %v3215_v21  ;;  %v3724_v9 = vunpack.c.l.b16 %v3216_v14  ;;  %v14940_v32 = vld [vmem:[%s20310_s3 + $0x8] sm:$0xff]  }
 0x153   :  { %20526 = vst [vmem:[#allocation14_spill] sm:$0xff] %v15591_v25  ;;  %v4540_v5 = vcombine.high %v4530_v18, %v4530_v18  ;;  %v5423_v1 = vrot.slane %v4530_v18, %v15286_v59  ;;  %v15600_v43 = vrot.slane %v4538_v62, %v15286_v59  ;;  %v1012_v34 = vcombine.high %v692_v6, %v692_v6 }
 0x154   :  { %20527 = vst [vmem:[#allocation15_spill] sm:$0xff] %v15593_v0  ;;  %v1019_v55 = vrot.slane %v692_v6, %v15279_v44  ;;  %v4024_v57 = vrot.slane %v3722_v38, 7  ;;  %v4026_v17 = vrot.slane %v3723_v30, 6  ;;  %v4028_v27 = vrot.slane %v3724_v9, 5  ;;  %14514 = vmatpush3.bf16.msra.mxu1 %v14940_v32 }
 0x155   :  { %v5430_v26 = vrot.slane %v5423_v1, %v15286_v59  ;;  %v15605_v60 = vrot.slane %v4540_v5, %v15286_v59  ;;  %v1026_v2 = vrot.slane %v1012_v34, %v15279_v44  ;;  %v695_v30 = vmax.f32 %v485_v48, 0.0  ;;  %v14942_v48 = vld [vmem:[%s20310_s3 + $0x10] sm:$0xff]   ;;  %14515 = vmatprep.subr.bf16.mxu1 %v14941_v56 }
 0x156   :  { %v1027_v28 = vcombine.high %v1019_v55, %v1019_v55  ;;  %v4025_v6 = vsel %vm3920_vm2, %v4024_v57, %v3721_v49  ;;  %v13980_v18 = vrot.slane %v1019_v55, 9 }
 0x157   :  { %v1028_v14 = vcombine.high %v1026_v2, %v1026_v2  ;;  %v13982_v62 = vrot.slane %v1026_v2, 9  ;;  %v15618_v5 = vunpack.c.l.b16 %v5430_v26  ;;  %v4027_v1 = vsel %vm3923_vm3, %v4026_v17, %v4025_v6 }
 0x158   :  { %v13981_v38 = vrot.slane %v1027_v28, 9  ;;  %v2951_v34 = vmax.f32 %v1019_v55, %v13980_v18  ;;  %v4029_v39 = vsel %vm3926_vm4, %v4028_v27, %v4027_v1  ;;  %v1063_v57 = vcombine.high %v695_v30, %v695_v30  ;;  %14516 = vmatpush3.bf16.msra.mxu1 %v14942_v48 }
 0x159   :  { %20528 = vst [vmem:[#allocation16_spill] sm:$0xff] %v15618_v5  ;;  %v13983_v9 = vrot.slane %v1028_v14, 9  ;;  %v2953_v20 = vmax.f32 %v1026_v2, %v13982_v62  ;;  %v1070_v15 = vrot.slane %v695_v30, %v15279_v44  ;;  %v477_v26 = vadd.f32 %v15585_v24, %v15335_v35  ;;  %v15636_v30 = vpop.f32.mrb[28].mxu0 }
 0x15a   :  { %v2952_v49 = vmax.f32 %v1027_v28, %v13981_v38  ;;  %v3205_v55 = vpack.c.bf16 %v2951_v34, %v2951_v34  ;;  %v15633_v27 = vadd.f32 %v15585_v24, %v15344_v63  ;;  %v1077_v28 = vrot.slane %v1063_v57, %v15279_v44 }
 0x15b   :  { %v2954_v17 = vmax.f32 %v1028_v14, %v13983_v9  ;;  %v3207_v2 = vpack.c.bf16 %v2953_v20, %v2953_v20  ;;  %v1078_v6 = vcombine.high %v1070_v15, %v1070_v15  ;;  %v13992_v18 = vrot.slane %v1070_v15, 9 }
 0x15c   :  { %v3206_v32 = vpack.c.bf16 %v2952_v49, %v2952_v49  ;;  %v3713_v35 = vunpack.c.l.b16 %v3205_v55  ;;  %v693_v38 = vmax.f32 %v477_v26, 0.0  ;;  %v1079_v9 = vcombine.high %v1077_v28, %v1077_v28 }
 0x15d   :  { %v3208_v62 = vpack.c.bf16 %v2954_v17, %v2954_v17  ;;  %v3715_v1 = vunpack.c.l.b16 %v3207_v2  ;;  %v13993_v20 = vrot.slane %v1078_v6, 9  ;;  %v13994_v34 = vrot.slane %v1077_v28, 9 }
 0x15e   :  { %v3714_v14 = vunpack.c.l.b16 %v3206_v32  ;;  %v2963_v31 = vmax.f32 %v1070_v15, %v13992_v18  ;;  %v1029_v56 = vcombine.high %v693_v38, %v693_v38  ;;  %v13995_v0 = vrot.slane %v1079_v9, 9 }
 0x15f   :  { %v3716_v21 = vunpack.c.l.b16 %v3208_v62  ;;  %v4012_v63 = vrot.slane %v3715_v1, 6  ;;  %v2964_v57 = vmax.f32 %v1078_v6, %v13993_v20  ;;  %v2965_v25 = vmax.f32 %v1077_v28, %v13994_v34 }
 0x160   :  { %v4010_v49 = vrot.slane %v3714_v14, 7  ;;  %v3217_v48 = vpack.c.bf16 %v2963_v31, %v2963_v31  ;;  %v1036_v17 = vrot.slane %v693_v38, %v15279_v44  ;;  %v1043_v26 = vrot.slane %v1029_v56, %v15279_v44 }
 0x161   :  { %v4014_v58 = vrot.slane %v3716_v21, 5  ;;  %v2966_v2 = vmax.f32 %v1079_v9, %v13995_v0  ;;  %v3218_v32 = vpack.c.bf16 %v2964_v57, %v2964_v57  ;;  %v3219_v8 = vpack.c.bf16 %v2965_v25, %v2965_v25  ;;  %v15642_v0 = vpop.f32.mrb[29].mxu0 }
 0x162   :  { %v4011_v55 = vsel %vm3920_vm2, %v4010_v49, %v3713_v35  ;;  %v3725_v1 = vunpack.c.l.b16 %v3217_v48  ;;  %v1044_v15 = vcombine.high %v1036_v17, %v1036_v17  ;;  %v1045_v18 = vcombine.high %v1043_v26, %v1043_v26 }
 0x163   :  { %v4013_v62 = vsel %vm3923_vm3, %v4012_v63, %v4011_v55  ;;  %v3220_v14 = vpack.c.bf16 %v2966_v2, %v2966_v2  ;;  %v3726_v5 = vunpack.c.l.b16 %v3218_v32  ;;  %v3727_v6 = vunpack.c.l.b16 %v3219_v8 }
 0x164   :  { %v13984_v28 = vrot.slane %v1036_v17, 9  ;;  %v4030_v21 = vrot.slane %v3725_v1, 4  ;;  %v13985_v31 = vrot.slane %v1044_v15, 9  ;;  %v13986_v20 = vrot.slane %v1043_v26, 9 }
 0x165   :  { %v13987_v38 = vrot.slane %v1045_v18, 9  ;;  %v3728_v34 = vunpack.c.l.b16 %v3220_v14  ;;  %v4032_v56 = vrot.slane %v3726_v5, 3  ;;  %v4034_v23 = vrot.slane %v3727_v6, 2 }
 0x166   :  { %v2955_v35 = vmax.f32 %v1036_v17, %v13984_v28  ;;  %v4031_v25 = vsel %vm3929_vm5, %v4030_v21, %v4029_v39  ;;  %v2956_v9 = vmax.f32 %v1044_v15, %v13985_v31  ;;  %v2957_v63 = vmax.f32 %v1043_v26, %v13986_v20 }
 0x167   :  { %v2958_v49 = vmax.f32 %v1045_v18, %v13987_v38  ;;  %v4033_v57 = vsel %vm3932_vm6, %v4032_v56, %v4031_v25  ;;  %v4036_v48 = vrot.slane %v3728_v34, 1  ;;  %v4015_v55 = vsel %vm3926_vm4, %v4014_v58, %v4013_v62 }
 0x168   :  { %v3209_v8 = vpack.c.bf16 %v2955_v35, %v2955_v35  ;;  %v4035_v2 = vsel %vm3935_vm7, %v4034_v23, %v4033_v57  ;;  %v3210_v32 = vpack.c.bf16 %v2956_v9, %v2956_v9  ;;  %v3211_v1 = vpack.c.bf16 %v2957_v63, %v2957_v63 }
 0x169   :  { %v3212_v5 = vpack.c.bf16 %v2958_v49, %v2958_v49  ;;  %v4037_v17 = vsel %vm3938_vm8, %v4036_v48, %v4035_v2  ;;  %v698_v6 = vmax.f32 %v15633_v27, 0.0  ;;  %v490_v39 = vadd.f32 %v15585_v24, %v15347_v3 }
 0x16a   :  { %v3717_v14 = vunpack.c.l.b16 %v3209_v8  ;;  %v14189_v26 = vpack.c.b16 %v4037_v17, %v4037_v17  ;;  %v3718_v15 = vunpack.c.l.b16 %v3210_v32  ;;  %v3719_v18 = vunpack.c.l.b16 %v3211_v1  ;;  %v15666_v32 = vpop.f32.mrb[30].mxu0 }
 0x16b   :  { %v3720_v28 = vunpack.c.l.b16 %v3212_v5  ;;  %v20529_v58 = vrot.slane %v15600_v43, %v15286_v59  ;;  %v1114_v21 = vcombine.high %v698_v6, %v698_v6  ;;  %v1121_v31 = vrot.slane %v698_v6, %v15279_v44 }
 0x16c   :  { %v4016_v23 = vrot.slane %v3717_v14, 4  ;;  %v4556_v20 = vrot.slane %v14189_v26, %v15286_v59  ;;  %v4018_v38 = vrot.slane %v3718_v15, 3  ;;  %v4020_v27 = vrot.slane %v3719_v18, 2 }
 0x16d   :  { %v15655_v62 = vunpack.c.l.b16 %v20529_v58  ;;  %v15659_v34 = vmax.f32 %v490_v39, 0.0  ;;  %v1128_v56 = vrot.slane %v1114_v21, %v15279_v44  ;;  %v1129_v35 = vcombine.high %v1121_v31, %v1121_v31 }
 0x16e   :  { %v4017_v3 = vsel %vm3929_vm5, %v4016_v23, %v4015_v55  ;;  %v14004_v25 = vrot.slane %v1121_v31, 9  ;;  %v4558_v9 = vcombine.high %v4556_v20, %v4556_v20  ;;  %v4572_v43 = vrot.slane %v4556_v20, %v15286_v59 }
 0x16f   :  { %20530 = vst [vmem:[#allocation17_spill] sm:$0xff] %v15655_v62  ;;  %v4019_v63 = vsel %vm3932_vm6, %v4018_v38, %v4017_v3  ;;  %v4022_v49 = vrot.slane %v3720_v28, 1  ;;  %v1130_v48 = vcombine.high %v1128_v56, %v1128_v56  ;;  %v14005_v8 = vrot.slane %v1129_v35, 9 }
 0x170   :  { %v4021_v57 = vsel %vm3935_vm7, %v4020_v27, %v4019_v63  ;;  %v14006_v2 = vrot.slane %v1128_v56, 9  ;;  %v4586_v1 = vrot.slane %v4558_v9, %v15286_v59  ;;  %v4588_v55 = vcombine.high %v4572_v43, %v4572_v43 }
 0x171   :  { %v5577_v5 = vrot.slane %v4572_v43, %v15286_v59  ;;  %v4023_v14 = vsel %vm3938_vm8, %v4022_v49, %v4021_v57  ;;  %v14007_v39 = vrot.slane %v1130_v48, 9  ;;  %v2975_v26 = vmax.f32 %v1121_v31, %v14004_v25 }
 0x172   :  { %v4373_v6 = vpack.c.b16 %v4037_v17, %v4023_v14  ;;  %v2976_v15 = vmax.f32 %v1129_v35, %v14005_v8  ;;  %v4590_v18 = vcombine.high %v4586_v1, %v4586_v1  ;;  %v5591_v58 = vrot.slane %v4586_v1, %v15286_v59 }
 0x173   :  { %v5584_v28 = vrot.slane %v5577_v5, %v15286_v59  ;;  %v5605_v23 = vrot.slane %v4588_v55, %v15286_v59  ;;  %v20531_v21 = vrot.slane %v15605_v60, %v15286_v59  ;;  %v2977_v27 = vmax.f32 %v1128_v56, %v14006_v2 }
 0x174   :  { %v4549_v38 = vrot.slane %v4373_v6, %v15286_v59  ;;  %v1080_v17 = vcombine.high %v15659_v34, %v15659_v34  ;;  %v5598_v31 = vrot.slane %v5591_v58, %v15286_v59  ;;  %v2978_v25 = vmax.f32 %v1130_v48, %v14007_v39 }
 0x175   :  { %v15677_v20 = vunpack.c.l.b16 %v20531_v21  ;;  %v5612_v3 = vrot.slane %v5605_v23, %v15286_v59  ;;  %v15684_v35 = vunpack.c.l.b16 %v5584_v28  ;;  %v3230_v63 = vpack.c.bf16 %v2976_v15, %v2976_v15  ;;  %v14943_v15 = vld [vmem:[%s20310_s3 + $0x58] sm:$0xff]  }
 0x176   :  { %v4557_v9 = vcombine.high %v4549_v38, %v4549_v38  ;;  %v4565_v43 = vrot.slane %v4549_v38, %v15286_v59  ;;  %v3231_v60 = vpack.c.bf16 %v2977_v27, %v2977_v27  ;;  %v15688_v49 = vrot.slane %v4590_v18, %v15286_v59  ;;  %14517 = vmatprep.subr.bf16.mxu1 %v14943_v15 }
 0x177   :  { %20532 = vst [vmem:[#allocation18_spill] sm:$0xff] %v15677_v20  ;;  %20533 = vst [vmem:[#allocation19_spill] sm:$0xff] %v15684_v35  ;;  %v15690_v57 = vunpack.c.l.b16 %v5598_v31  ;;  %v15692_v56 = vunpack.c.l.b16 %v5612_v3  ;;  %v3229_v8 = vpack.c.bf16 %v2975_v26, %v2975_v26  ;;  %v3232_v14 = vpack.c.bf16 %v2978_v25, %v2978_v25 }
 0x178   :  { %20534 = vst [vmem:[#allocation20_spill] sm:$0xff] %v15688_v49  ;;  %v4579_v1 = vrot.slane %v4557_v9, %v15286_v59  ;;  %v4587_v55 = vcombine.high %v4565_v43, %v4565_v43  ;;  %v5521_v48 = vrot.slane %v4565_v43, %v15286_v59  ;;  %v3738_v6 = vunpack.c.l.b16 %v3230_v63  ;;  %v15709_v43 = vpop.f32.mrb[31].mxu0  ;;  %v14944_v63 = vld [vmem:[%s20310_s3 + $0x18] sm:$0xff]  }
 0x179   :  { %20535 = vst [vmem:[#allocation21_spill] sm:$0xff] %v15690_v57  ;;  %20536 = vst [vmem:[#allocation22_spill] sm:$0xff] %v15692_v56  ;;  %v3739_v39 = vunpack.c.l.b16 %v3231_v60  ;;  %v3737_v23 = vunpack.c.l.b16 %v3229_v8  ;;  %v3740_v21 = vunpack.c.l.b16 %v3232_v14  ;;  %v1087_v27 = vrot.slane %v15659_v34, %v15279_v44  ;;  %14518 = vmatpush3.bf16.msra.mxu1 %v14944_v63 }
 0x17a   :  { %v4589_v18 = vcombine.high %v4579_v1, %v4579_v1  ;;  %v5528_v28 = vrot.slane %v5521_v48, %v15286_v59  ;;  %v5535_v26 = vrot.slane %v4579_v1, %v15286_v59  ;;  %v5549_v58 = vrot.slane %v4587_v55, %v15286_v59 }
 0x17b   :  { %v4052_v38 = vrot.slane %v3738_v6, 7  ;;  %v4054_v9 = vrot.slane %v3739_v39, 6  ;;  %v1094_v34 = vrot.slane %v1080_v17, %v15279_v44  ;;  %v1095_v1 = vcombine.high %v1087_v27, %v1087_v27  ;;  %v14946_v17 = vld [vmem:[%s20310_s3 + $0x100] sm:$0xff]  }
 0x17c   :  { %v5542_v3 = vrot.slane %v5535_v26, %v15286_v59  ;;  %v5563_v25 = vrot.slane %v4589_v18, %v15286_v59  ;;  %v5556_v60 = vrot.slane %v5549_v58, %v15286_v59  ;;  %v15718_v48 = vunpack.c.l.b16 %v5528_v28  ;;  %v14945_v58 = vld [vmem:[%s20310_s3 + $0x60] sm:$0xff]   ;;  %14785 = vmatprep.subr.bf16.mxu0 %v14946_v17 }
 0x17d   :  { %v4053_v8 = vsel %vm3920_vm2, %v4052_v38, %v3737_v23  ;;  %v4056_v6 = vrot.slane %v3740_v21, 5  ;;  %v1096_v39 = vcombine.high %v1094_v34, %v1094_v34  ;;  %v13996_v15 = vrot.slane %v1087_v27, 9  ;;  %14519 = vmatprep.subr.bf16.mxu1 %v14945_v58  ;;  %14786 = vmatpush3.bf16.msra.mxu0 %v14946_v17 }
 0x17e   :  { %v5570_v55 = vrot.slane %v5563_v25, %v15286_v59  ;;  %20537 = vst [vmem:[#allocation23_spill] sm:$0xff] %v15718_v48  ;;  %v15720_v14 = vunpack.c.l.b16 %v5542_v3  ;;  %v13997_v18 = vrot.slane %v1095_v1, 9  ;;  %v13998_v26 = vrot.slane %v1094_v34, 9  ;;  %v14947_v3 = vld [vmem:[%s20310_s3 + $0x20] sm:$0xff]  }
 0x17f   :  { %v4055_v38 = vsel %vm3923_vm3, %v4054_v9, %v4053_v8  ;;  %v501_v21 = vadd.f32 %v15585_v24, %v15349_v11  ;;  %v13999_v25 = vrot.slane %v1096_v39, 9  ;;  %v2967_v63 = vmax.f32 %v1087_v27, %v13996_v15  ;;  %14520 = vmatpush3.bf16.msra.mxu1 %v14947_v3  ;;  %v15744_v27 = vpop.f32.mrb[32].mxu0 }
 0x180   :  { %20538 = vst [vmem:[#allocation24_spill] sm:$0xff] %v15720_v14  ;;  %v15728_v23 = vunpack.c.l.b16 %v5570_v55  ;;  %v7081_v28 = vrot.slane %v15720_v14, 7  ;;  %v2968_v31 = vmax.f32 %v1095_v1, %v13997_v18  ;;  %v2969_v5 = vmax.f32 %v1094_v34, %v13998_v26 }
 0x181   :  { %v15737_v2 = vunpack.c.l.b16 %v5556_v60  ;;  %v699_v8 = vmax.f32 %v501_v21, 0.0  ;;  %v2970_v11 = vmax.f32 %v1096_v39, %v13999_v25  ;;  %v3221_v35 = vpack.c.bf16 %v2967_v63, %v2967_v63 }
 0x182   :  { %20539 = vst [vmem:[#allocation25_spill] sm:$0xff] %v15728_v23  ;;  %v15741_v55 = vsel %vm3920_vm2, %v7081_v28, %v15718_v48  ;;  %v3222_v56 = vpack.c.bf16 %v2968_v31, %v2968_v31  ;;  %v3223_v57 = vpack.c.bf16 %v2969_v5, %v2969_v5  ;;  %v4057_v60 = vsel %vm3926_vm4, %v4056_v6, %v4055_v38 }
 0x183   :  { %20540 = vst [vmem:[#allocation26_spill] sm:$0xff] %v15737_v2  ;;  %20541 = vst [vmem:[#allocation27_spill] sm:$0xff] %v15741_v55  ;;  %v1131_v34 = vcombine.high %v699_v8, %v699_v8  ;;  %v1138_v1 = vrot.slane %v699_v8, %v15279_v44  ;;  %v493_v15 = vadd.f32 %v15585_v24, %v15368_v50  ;;  %v3729_v26 = vunpack.c.l.b16 %v3221_v35 }
 0x184   :  { %v3224_v18 = vpack.c.bf16 %v2970_v11, %v2970_v11  ;;  %v3730_v58 = vunpack.c.l.b16 %v3222_v56  ;;  %v3731_v28 = vunpack.c.l.b16 %v3223_v57  ;;  %v514_v63 = vadd.f32 %v15585_v24, %v15394_v36 }
 0x185   :  { %v1145_v17 = vrot.slane %v1131_v34, %v15279_v44  ;;  %v1146_v39 = vcombine.high %v1138_v1, %v1138_v1  ;;  %v14008_v21 = vrot.slane %v1138_v1, 9  ;;  %v697_v31 = vmax.f32 %v493_v15, 0.0 }
 0x186   :  { %v3732_v5 = vunpack.c.l.b16 %v3224_v18  ;;  %v4038_v3 = vrot.slane %v3730_v58, 7  ;;  %v4040_v25 = vrot.slane %v3731_v28, 6 }
 0x187   :  { %v1147_v8 = vcombine.high %v1145_v17, %v1145_v17  ;;  %v14009_v6 = vrot.slane %v1146_v39, 9  ;;  %v14010_v38 = vrot.slane %v1145_v17, 9  ;;  %v2979_v9 = vmax.f32 %v1138_v1, %v14008_v21 }
 0x188   :  { %v4039_v50 = vsel %vm3920_vm2, %v4038_v3, %v3729_v26  ;;  %v4042_v35 = vrot.slane %v3732_v5, 5  ;;  %v1097_v56 = vcombine.high %v697_v31, %v697_v31  ;;  %v1104_v57 = vrot.slane %v697_v31, %v15279_v44 }
 0x189   :  { %v4041_v11 = vsel %vm3923_vm3, %v4040_v25, %v4039_v50  ;;  %v14011_v34 = vrot.slane %v1147_v8, 9  ;;  %v2980_v15 = vmax.f32 %v1146_v39, %v14009_v6  ;;  %v2981_v18 = vmax.f32 %v1145_v17, %v14010_v38  ;;  %v15758_v39 = vpop.f32.mrb[33].mxu0 }
 0x18a   :  { %v3233_v58 = vpack.c.bf16 %v2979_v9, %v2979_v9  ;;  %v1111_v28 = vrot.slane %v1097_v56, %v15279_v44  ;;  %v1112_v48 = vcombine.high %v1104_v57, %v1104_v57  ;;  %v14000_v36 = vrot.slane %v1104_v57, 9 }
 0x18b   :  { %v2982_v55 = vmax.f32 %v1147_v8, %v14011_v34  ;;  %v3234_v49 = vpack.c.bf16 %v2980_v15, %v2980_v15  ;;  %v3235_v20 = vpack.c.bf16 %v2981_v18, %v2981_v18  ;;  %v4043_v1 = vsel %vm3926_vm4, %v4042_v35, %v4041_v11 }
 0x18c   :  { %v3741_v26 = vunpack.c.l.b16 %v3233_v58  ;;  %v1113_v21 = vcombine.high %v1111_v28, %v1111_v28  ;;  %v14001_v5 = vrot.slane %v1112_v48, 9  ;;  %v14002_v3 = vrot.slane %v1111_v28, 9 }
 0x18d   :  { %v3236_v31 = vpack.c.bf16 %v2982_v55, %v2982_v55  ;;  %v3742_v62 = vunpack.c.l.b16 %v3234_v49  ;;  %v3743_v25 = vunpack.c.l.b16 %v3235_v20  ;;  %v2971_v50 = vmax.f32 %v1104_v57, %v14000_v36 }
 0x18e   :  { %v4058_v9 = vrot.slane %v3741_v26, 4  ;;  %v14003_v17 = vrot.slane %v1113_v21, 9  ;;  %v2972_v6 = vmax.f32 %v1112_v48, %v14001_v5  ;;  %v2973_v38 = vmax.f32 %v1111_v28, %v14002_v3 }
 0x18f   :  { %v3744_v56 = vunpack.c.l.b16 %v3236_v31  ;;  %v4060_v8 = vrot.slane %v3742_v62, 3  ;;  %v4062_v34 = vrot.slane %v3743_v25, 2  ;;  %v3225_v15 = vpack.c.bf16 %v2971_v50, %v2971_v50 }
 0x190   :  { %v4059_v35 = vsel %vm3929_vm5, %v4058_v9, %v4057_v60  ;;  %v2974_v11 = vmax.f32 %v1113_v21, %v14003_v17  ;;  %v3226_v18 = vpack.c.bf16 %v2972_v6, %v2972_v6  ;;  %v3227_v58 = vpack.c.bf16 %v2973_v38, %v2973_v38 }
 0x191   :  { %v4061_v55 = vsel %vm3932_vm6, %v4060_v8, %v4059_v35  ;;  %v4064_v49 = vrot.slane %v3744_v56, 1  ;;  %v3733_v20 = vunpack.c.l.b16 %v3225_v15  ;;  %v702_v57 = vmax.f32 %v514_v63, 0.0 }
 0x192   :  { %v4063_v36 = vsel %vm3935_vm7, %v4062_v34, %v4061_v55  ;;  %v3228_v26 = vpack.c.bf16 %v2974_v11, %v2974_v11  ;;  %v3734_v53 = vunpack.c.l.b16 %v3226_v18  ;;  %v3735_v48 = vunpack.c.l.b16 %v3227_v58 }
 0x193   :  { %v4065_v28 = vsel %vm3938_vm8, %v4064_v49, %v4063_v36  ;;  %v4044_v62 = vrot.slane %v3733_v20, 4  ;;  %v1182_v5 = vcombine.high %v702_v57, %v702_v57  ;;  %v1189_v3 = vrot.slane %v702_v57, %v15279_v44  ;;  %v15778_v49 = vpop.f32.mrb[34].mxu0 }
 0x194   :  { %v14190_v60 = vpack.c.b16 %v4065_v28, %v4065_v28  ;;  %v3736_v21 = vunpack.c.l.b16 %v3228_v26  ;;  %v4046_v31 = vrot.slane %v3734_v53, 3  ;;  %v4048_v25 = vrot.slane %v3735_v48, 2 }
 0x195   :  { %v4045_v50 = vsel %vm3929_vm5, %v4044_v62, %v4043_v1  ;;  %v1196_v9 = vrot.slane %v1182_v5, %v15279_v44  ;;  %v1197_v63 = vcombine.high %v1189_v3, %v1189_v3  ;;  %v14020_v17 = vrot.slane %v1189_v3, 9 }
 0x196   :  { %v20542_v6 = vrot.slane %v15728_v23, 7  ;;  %v4605_v56 = vrot.slane %v14190_v60, %v15286_v59  ;;  %v4047_v8 = vsel %vm3932_vm6, %v4046_v31, %v4045_v50  ;;  %v4050_v34 = vrot.slane %v3736_v21, 1 }
 0x197   :  { %v4049_v53 = vsel %vm3935_vm7, %v4048_v25, %v4047_v8  ;;  %v1198_v15 = vcombine.high %v1196_v9, %v1196_v9  ;;  %v14021_v35 = vrot.slane %v1197_v63, 9  ;;  %v14022_v1 = vrot.slane %v1196_v9, 9 }
 0x198   :  { %v15771_v38 = vsel %vm3920_vm2, %v20542_v6, %v15737_v2  ;;  %v4607_v11 = vcombine.high %v4605_v56, %v4605_v56  ;;  %v4621_v18 = vrot.slane %v4605_v56, %v15286_v59  ;;  %v4051_v58 = vsel %vm3938_vm8, %v4050_v34, %v4049_v53 }
 0x199   :  { %20543 = vst [vmem:[#allocation28_spill] sm:$0xff] %v15771_v38  ;;  %v2991_v55 = vmax.f32 %v1189_v3, %v14020_v17  ;;  %v4374_v20 = vpack.c.b16 %v4065_v28, %v4051_v58  ;;  %v14023_v57 = vrot.slane %v1198_v15, 9  ;;  %v2992_v36 = vmax.f32 %v1197_v63, %v14021_v35  ;;  %v14948_v28 = vld [vmem:[%s20310_s3 + $0x68] sm:$0xff]  }
 0x19a   :  { %v2993_v26 = vmax.f32 %v1196_v9, %v14022_v1  ;;  %v4635_v48 = vrot.slane %v4607_v11, %v15286_v59  ;;  %v4637_v62 = vcombine.high %v4621_v18, %v4621_v18  ;;  %v5689_v5 = vrot.slane %v4621_v18, %v15286_v59  ;;  %v14949_v3 = vld [vmem:[%s20310_s3 + $0x108] sm:$0xff]   ;;  %14521 = vmatprep.subr.bf16.mxu1 %v14948_v28  ;;  %v15800_v11 = vpop.f32.mrb[35].mxu0 }
 0x19b   :  { %v506_v60 = vadd.f32 %v15585_v24, %v15427_v46  ;;  %v4598_v21 = vrot.slane %v4374_v20, %v15286_v59  ;;  %v2994_v31 = vmax.f32 %v1198_v15, %v14023_v57  ;;  %v3245_v25 = vpack.c.bf16 %v2991_v55, %v2991_v55  ;;  %14787 = vmatprep.subr.bf16.mxu0 %v14949_v3 }
 0x19c   :  { %v3246_v50 = vpack.c.bf16 %v2992_v36, %v2992_v36  ;;  %v4639_v9 = vcombine.high %v4635_v48, %v4635_v48  ;;  %v5696_v63 = vrot.slane %v5689_v5, %v15286_v59  ;;  %v5703_v17 = vrot.slane %v4635_v48, %v15286_v59  ;;  %14788 = vmatpush3.bf16.msra.mxu0 %v14949_v3 }
 0x19d   :  { %v5717_v46 = vrot.slane %v4637_v62, %v15286_v59  ;;  %v4606_v56 = vcombine.high %v4598_v21, %v4598_v21  ;;  %v4614_v8 = vrot.slane %v4598_v21, %v15286_v59  ;;  %v3247_v34 = vpack.c.bf16 %v2993_v26, %v2993_v26 }
 0x19e   :  { %v5710_v53 = vrot.slane %v5703_v17, %v15286_v59  ;;  %v15798_v35 = vunpack.c.l.b16 %v5696_v63  ;;  %v3248_v1 = vpack.c.bf16 %v2994_v31, %v2994_v31  ;;  %v3754_v20 = vunpack.c.l.b16 %v3246_v50 }
 0x19f   :  { %v5724_v15 = vrot.slane %v5717_v46, %v15286_v59  ;;  %v4628_v18 = vrot.slane %v4606_v56, %v15286_v59  ;;  %v4636_v58 = vcombine.high %v4614_v8, %v4614_v8  ;;  %v5633_v55 = vrot.slane %v4614_v8, %v15286_v59 }
 0x1a0   :  { %20544 = vst [vmem:[#allocation29_spill] sm:$0xff] %v15798_v35  ;;  %v15805_v57 = vrot.slane %v4639_v9, %v15286_v59  ;;  %v15807_v36 = vunpack.c.l.b16 %v5710_v53  ;;  %v3753_v48 = vunpack.c.l.b16 %v3245_v25  ;;  %v3755_v3 = vunpack.c.l.b16 %v3247_v34 }
 0x1a1   :  { %v15809_v26 = vunpack.c.l.b16 %v5724_v15  ;;  %v4638_v21 = vcombine.high %v4628_v18, %v4628_v18  ;;  %v5647_v31 = vrot.slane %v4628_v18, %v15286_v59  ;;  %v5661_v28 = vrot.slane %v4636_v58, %v15286_v59 }
 0x1a2   :  { %20545 = vst [vmem:[#allocation30_spill] sm:$0xff] %v15805_v57  ;;  %20546 = vst [vmem:[#allocation31_spill] sm:$0xff] %v15807_v36  ;;  %v3756_v63 = vunpack.c.l.b16 %v3248_v1  ;;  %v4080_v50 = vrot.slane %v3754_v20, 7  ;;  %v5640_v9 = vrot.slane %v5633_v55, %v15286_v59  ;;  %v700_v56 = vmax.f32 %v506_v60, 0.0 }
 0x1a3   :  { %20547 = vst [vmem:[#allocation32_spill] sm:$0xff] %v15809_v26  ;;  %v5654_v17 = vrot.slane %v5647_v31, %v15286_v59  ;;  %v5675_v46 = vrot.slane %v4638_v21, %v15286_v59  ;;  %v5668_v25 = vrot.slane %v5661_v28, %v15286_v59  ;;  %v4082_v53 = vrot.slane %v3755_v3, 6  ;;  %v14950_v3 = vld [vmem:[%s20310_s3 + $0x28] sm:$0xff]  }
 0x1a4   :  { %v4081_v8 = vsel %vm3920_vm2, %v4080_v50, %v3753_v48  ;;  %v4084_v15 = vrot.slane %v3756_v63, 5  ;;  %v1148_v34 = vcombine.high %v700_v56, %v700_v56  ;;  %v1155_v1 = vrot.slane %v700_v56, %v15279_v44  ;;  %14522 = vmatpush3.bf16.msra.mxu1 %v14950_v3 }
 0x1a5   :  { %v5682_v18 = vrot.slane %v5675_v46, %v15286_v59  ;;  %v15821_v5 = vunpack.c.l.b16 %v5654_v17  ;;  %v4083_v55 = vsel %vm3923_vm3, %v4082_v53, %v4081_v8  ;;  %v517_v60 = vadd.f32 %v15585_v24, %v15445_v19 }
 0x1a6   :  { %v509_v20 = vadd.f32 %v15585_v24, %v15467_v61  ;;  %v15830_v48 = vunpack.c.l.b16 %v5640_v9  ;;  %v15832_v21 = vunpack.c.l.b16 %v5668_v25  ;;  %v1162_v31 = vrot.slane %v1148_v34, %v15279_v44 }
 0x1a7   :  { %v1163_v28 = vcombine.high %v1155_v1, %v1155_v1  ;;  %v15838_v63 = vunpack.c.l.b16 %v5682_v18  ;;  %v14012_v50 = vrot.slane %v1155_v1, 9  ;;  %v703_v17 = vmax.f32 %v517_v60, 0.0  ;;  %v14951_v18 = vld [vmem:[%s20310_s3 + $0x70] sm:$0xff]  }
 0x1a8   :  { %20548 = vst [vmem:[#allocation33_spill] sm:$0xff] %v15832_v21  ;;  %v701_v46 = vmax.f32 %v509_v20, 0.0  ;;  %v1164_v56 = vcombine.high %v1162_v31, %v1162_v31  ;;  %v15842_v9 = vsel %vm3926_vm4, %v4084_v15, %v4083_v55  ;;  %v14014_v25 = vrot.slane %v1162_v31, 9  ;;  %v14952_v60 = vld [vmem:[%s20310_s3 + $0x110] sm:$0xff]   ;;  %14523 = vmatprep.subr.bf16.mxu1 %v14951_v18  ;;  %v15857_v21 = vpop.f32.mrb[36].mxu0 }
 0x1a9   :  { %v14013_v61 = vrot.slane %v1163_v28, 9  ;;  %v2983_v8 = vmax.f32 %v1155_v1, %v14012_v50  ;;  %v1199_v53 = vcombine.high %v703_v17, %v703_v17  ;;  %v1206_v34 = vrot.slane %v703_v17, %v15279_v44  ;;  %v14953_v1 = vld [vmem:[%s20310_s3 + $0x30] sm:$0xff]   ;;  %14789 = vmatprep.subr.bf16.mxu0 %v14952_v60  ;;  %v15859_v57 = vpop.f32.mrb[37].mxu0 }
 0x1aa   :  { %v14015_v20 = vrot.slane %v1164_v56, 9  ;;  %v1165_v62 = vcombine.high %v701_v46, %v701_v46  ;;  %v1172_v15 = vrot.slane %v701_v46, %v15279_v44  ;;  %v2985_v55 = vmax.f32 %v1162_v31, %v14014_v25  ;;  %14524 = vmatpush3.bf16.msra.mxu1 %v14953_v1  ;;  %14790 = vmatpush3.bf16.msra.mxu0 %v14952_v60 }
 0x1ab   :  { %v2984_v58 = vmax.f32 %v1163_v28, %v14013_v61  ;;  %v3237_v3 = vpack.c.bf16 %v2983_v8, %v2983_v8  ;;  %v1213_v50 = vrot.slane %v1199_v53, %v15279_v44  ;;  %v1214_v17 = vcombine.high %v1206_v34, %v1206_v34 }
 0x1ac   :  { %v2986_v6 = vmax.f32 %v1164_v56, %v14015_v20  ;;  %v14024_v35 = vrot.slane %v1206_v34, 9  ;;  %v1179_v26 = vrot.slane %v1165_v62, %v15279_v44  ;;  %v3239_v28 = vpack.c.bf16 %v2985_v55, %v2985_v55 }
 0x1ad   :  { %v3238_v19 = vpack.c.bf16 %v2984_v58, %v2984_v58  ;;  %v3745_v61 = vunpack.c.l.b16 %v3237_v3  ;;  %v1215_v46 = vcombine.high %v1213_v50, %v1213_v50  ;;  %v14025_v36 = vrot.slane %v1214_v17, 9 }
 0x1ae   :  { %v3240_v31 = vpack.c.bf16 %v2986_v6, %v2986_v6  ;;  %v14026_v8 = vrot.slane %v1213_v50, 9  ;;  %v2995_v53 = vmax.f32 %v1206_v34, %v14024_v35  ;;  %v3747_v56 = vunpack.c.l.b16 %v3239_v28 }
 0x1af   :  { %v3746_v25 = vunpack.c.l.b16 %v3238_v19  ;;  %v14027_v58 = vrot.slane %v1215_v46, 9  ;;  %v2996_v18 = vmax.f32 %v1214_v17, %v14025_v36  ;;  %v1180_v20 = vcombine.high %v1172_v15, %v1172_v15 }
 0x1b0   :  { %v3748_v62 = vunpack.c.l.b16 %v3240_v31  ;;  %v2997_v1 = vmax.f32 %v1213_v50, %v14026_v8  ;;  %v3249_v55 = vpack.c.bf16 %v2995_v53, %v2995_v53  ;;  %v4068_v3 = vrot.slane %v3747_v56, 6 }
 0x1b1   :  { %v4066_v38 = vrot.slane %v3746_v25, 7  ;;  %v2998_v14 = vmax.f32 %v1215_v46, %v14027_v58  ;;  %v3250_v23 = vpack.c.bf16 %v2996_v18, %v2996_v18  ;;  %v1181_v60 = vcombine.high %v1179_v26, %v1179_v26 }
 0x1b2   :  { %v4070_v6 = vrot.slane %v3748_v62, 5  ;;  %v3251_v19 = vpack.c.bf16 %v2997_v1, %v2997_v1  ;;  %v3757_v22 = vunpack.c.l.b16 %v3249_v55  ;;  %v14016_v7 = vrot.slane %v1172_v15, 9 }
 0x1b3   :  { %v4067_v2 = vsel %vm3920_vm2, %v4066_v38, %v3745_v61  ;;  %v3252_v34 = vpack.c.bf16 %v2998_v14, %v2998_v14  ;;  %v3758_v28 = vunpack.c.l.b16 %v3250_v23  ;;  %v14017_v31 = vrot.slane %v1180_v20, 9 }
 0x1b4   :  { %v4069_v35 = vsel %vm3923_vm3, %v4068_v3, %v4067_v2  ;;  %v3759_v36 = vunpack.c.l.b16 %v3251_v19  ;;  %v4086_v17 = vrot.slane %v3757_v22, 4  ;;  %v14018_v25 = vrot.slane %v1179_v26, 9 }
 0x1b5   :  { %v3760_v50 = vunpack.c.l.b16 %v3252_v34  ;;  %v4088_v8 = vrot.slane %v3758_v28, 3  ;;  %v14019_v53 = vrot.slane %v1181_v60, 9  ;;  %v2987_v46 = vmax.f32 %v1172_v15, %v14016_v7 }
 0x1b6   :  { %v4087_v56 = vsel %vm3929_vm5, %v4086_v17, %v15842_v9  ;;  %v4090_v38 = vrot.slane %v3759_v36, 2  ;;  %v2988_v61 = vmax.f32 %v1180_v20, %v14017_v31  ;;  %v2989_v58 = vmax.f32 %v1179_v26, %v14018_v25 }
 0x1b7   :  { %v4089_v18 = vsel %vm3932_vm6, %v4088_v8, %v4087_v56  ;;  %v4092_v2 = vrot.slane %v3760_v50, 1  ;;  %v2990_v14 = vmax.f32 %v1181_v60, %v14019_v53  ;;  %v3241_v23 = vpack.c.bf16 %v2987_v46, %v2987_v46 }
 0x1b8   :  { %v4091_v62 = vsel %vm3935_vm7, %v4090_v38, %v4089_v18  ;;  %v3242_v22 = vpack.c.bf16 %v2988_v61, %v2988_v61  ;;  %v3243_v1 = vpack.c.bf16 %v2989_v58, %v2989_v58  ;;  %v4071_v55 = vsel %vm3926_vm4, %v4070_v6, %v4069_v35 }
 0x1b9   :  { %v4093_v3 = vsel %vm3938_vm8, %v4092_v2, %v4091_v62  ;;  %v3244_v7 = vpack.c.bf16 %v2990_v14, %v2990_v14  ;;  %v3749_v15 = vunpack.c.l.b16 %v3241_v23  ;;  %v530_v9 = vadd.f32 %v15585_v24, %v15518_v12 }
 0x1ba   :  { %v14191_v20 = vpack.c.b16 %v4093_v3, %v4093_v3  ;;  %v3750_v26 = vunpack.c.l.b16 %v3242_v22  ;;  %v3751_v19 = vunpack.c.l.b16 %v3243_v1  ;;  %v522_v60 = vadd.f32 %v15585_v24, %v15528_v45 }
 0x1bb   :  { %v20549_v34 = vrot.slane %v15821_v5, 7  ;;  %v3752_v6 = vunpack.c.l.b16 %v3244_v7  ;;  %v4072_v35 = vrot.slane %v3749_v15, 4  ;;  %v706_v36 = vmax.f32 %v530_v9, 0.0 }
 0x1bc   :  { %v4654_v31 = vrot.slane %v14191_v20, %v15286_v59  ;;  %v4074_v12 = vrot.slane %v3750_v26, 3  ;;  %v4076_v25 = vrot.slane %v3751_v19, 2  ;;  %v15883_v53 = vmax.f32 %v522_v60, 0.0  ;;  %v15892_v20 = vpop.f32.mrb[38].mxu0 }
 0x1bd   :  { %v15877_v28 = vsel %vm3920_vm2, %v20549_v34, %v15830_v48  ;;  %v4073_v50 = vsel %vm3929_vm5, %v4072_v35, %v4071_v55  ;;  %v1250_v8 = vcombine.high %v706_v36, %v706_v36  ;;  %v1257_v45 = vrot.slane %v706_v36, %v15279_v44 }
 0x1be   :  { %v4656_v46 = vcombine.high %v4654_v31, %v4654_v31  ;;  %v4670_v56 = vrot.slane %v4654_v31, %v15286_v59  ;;  %v4075_v38 = vsel %vm3932_vm6, %v4074_v12, %v4073_v50  ;;  %v4078_v61 = vrot.slane %v3752_v6, 1 }
 0x1bf   :  { %v4077_v58 = vsel %vm3935_vm7, %v4076_v25, %v4075_v38  ;;  %v1264_v18 = vrot.slane %v1250_v8, %v15279_v44  ;;  %v1265_v2 = vcombine.high %v1257_v45, %v1257_v45  ;;  %v14036_v14 = vrot.slane %v1257_v45, 9 }
 0x1c0   :  { %v4684_v23 = vrot.slane %v4656_v46, %v15286_v59  ;;  %v4686_v62 = vcombine.high %v4670_v56, %v4670_v56  ;;  %v5801_v22 = vrot.slane %v4670_v56, %v15286_v59  ;;  %v4079_v1 = vsel %vm3938_vm8, %v4078_v61, %v4077_v58 }
 0x1c1   :  { %v4375_v55 = vpack.c.b16 %v4093_v3, %v4079_v1  ;;  %v1266_v7 = vcombine.high %v1264_v18, %v1264_v18  ;;  %v14037_v15 = vrot.slane %v1265_v2, 9  ;;  %v14038_v9 = vrot.slane %v1264_v18, 9 }
 0x1c2   :  { %v4688_v26 = vcombine.high %v4684_v23, %v4684_v23  ;;  %v5808_v19 = vrot.slane %v5801_v22, %v15286_v59  ;;  %v5815_v60 = vrot.slane %v4684_v23, %v15286_v59  ;;  %v5829_v34 = vrot.slane %v4686_v62, %v15286_v59 }
 0x1c3   :  { %v4647_v6 = vrot.slane %v4375_v55, %v15286_v59  ;;  %v14039_v35 = vrot.slane %v1266_v7, 9  ;;  %v3007_v36 = vmax.f32 %v1257_v45, %v14036_v14  ;;  %v533_v31 = vadd.f32 %v15585_v24, %v15558_v51  ;;  %v14954_v55 = vld [vmem:[%s20310_s3 + $0x78] sm:$0xff]  }
 0x1c4   :  { %v5822_v3 = vrot.slane %v5815_v60, %v15286_v59  ;;  %v5836_v12 = vrot.slane %v5829_v34, %v15286_v59  ;;  %v15902_v25 = vunpack.c.l.b16 %v5808_v19  ;;  %v3008_v50 = vmax.f32 %v1265_v2, %v14037_v15  ;;  %14525 = vmatprep.subr.bf16.mxu1 %v14954_v55 }
 0x1c5   :  { %v4655_v8 = vcombine.high %v4647_v6, %v4647_v6  ;;  %v4663_v46 = vrot.slane %v4647_v6, %v15286_v59  ;;  %v3009_v56 = vmax.f32 %v1264_v18, %v14038_v9  ;;  %v3010_v38 = vmax.f32 %v1266_v7, %v14039_v35  ;;  %v14955_v7 = vld [vmem:[%s20310_s3 + $0x118] sm:$0xff]  }
 0x1c6   :  { %20550 = vst [vmem:[#allocation34_spill] sm:$0xff] %v15902_v25  ;;  %v15906_v61 = vrot.slane %v4688_v26, %v15286_v59  ;;  %v15908_v58 = vunpack.c.l.b16 %v5822_v3  ;;  %v15910_v45 = vunpack.c.l.b16 %v5836_v12  ;;  %v1216_v51 = vcombine.high %v15883_v53, %v15883_v53  ;;  %14791 = vmatprep.subr.bf16.mxu0 %v14955_v7 }
 0x1c7   :  { %v4677_v14 = vrot.slane %v4655_v8, %v15286_v59  ;;  %v4685_v2 = vcombine.high %v4663_v46, %v4663_v46  ;;  %v5745_v23 = vrot.slane %v4663_v46, %v15286_v59  ;;  %v3261_v62 = vpack.c.bf16 %v3007_v36, %v3007_v36  ;;  %v15933_v8 = vpop.f32.mrb[39].mxu0  ;;  %14792 = vmatpush3.bf16.msra.mxu0 %v14955_v7 }
 0x1c8   :  { %20551 = vst [vmem:[#allocation35_spill] sm:$0xff] %v15908_v58  ;;  %20552 = vst [vmem:[#allocation36_spill] sm:$0xff] %v15910_v45  ;;  %v3262_v18 = vpack.c.bf16 %v3008_v50, %v3008_v50  ;;  %v3263_v22 = vpack.c.bf16 %v3009_v56, %v3009_v56  ;;  %v3264_v1 = vpack.c.bf16 %v3010_v38, %v3010_v38 }
 0x1c9   :  { %v4687_v15 = vcombine.high %v4677_v14, %v4677_v14  ;;  %v5752_v9 = vrot.slane %v5745_v23, %v15286_v59  ;;  %v5759_v26 = vrot.slane %v4677_v14, %v15286_v59  ;;  %v5773_v19 = vrot.slane %v4685_v2, %v15286_v59 }
 0x1ca   :  { %v3770_v6 = vunpack.c.l.b16 %v3262_v18  ;;  %v3771_v35 = vunpack.c.l.b16 %v3263_v22  ;;  %v15931_v50 = vunpack.c.l.b16 %v3264_v1  ;;  %v3769_v56 = vunpack.c.l.b16 %v3261_v62  ;;  %v14956_v62 = vld [vmem:[%s20310_s3 + $0x38] sm:$0xff]  }
 0x1cb   :  { %v5766_v36 = vrot.slane %v5759_v26, %v15286_v59  ;;  %v5780_v3 = vrot.slane %v5773_v19, %v15286_v59  ;;  %v5787_v12 = vrot.slane %v4687_v15, %v15286_v59  ;;  %v15935_v46 = vunpack.c.l.b16 %v5752_v9  ;;  %14526 = vmatpush3.bf16.msra.mxu1 %v14956_v62 }
 0x1cc   :  { %v4108_v38 = vrot.slane %v3770_v6, 7  ;;  %v1223_v14 = vrot.slane %v15883_v53, %v15279_v44  ;;  %v4110_v18 = vrot.slane %v3771_v35, 6  ;;  %v1230_v22 = vrot.slane %v1216_v51, %v15279_v44 }
 0x1cd   :  { %20553 = vst [vmem:[#allocation37_spill] sm:$0xff] %v15935_v46  ;;  %v5794_v2 = vrot.slane %v5787_v12, %v15286_v59  ;;  %v15940_v23 = vunpack.c.l.b16 %v5766_v36  ;;  %v707_v26 = vmax.f32 %v533_v31, 0.0  ;;  %v15947_v7 = vunpack.c.l.b16 %v5780_v3 }
 0x1ce   :  { %v4109_v1 = vsel %vm3920_vm2, %v4108_v38, %v3769_v56  ;;  %v1231_v55 = vcombine.high %v1223_v14, %v1223_v14  ;;  %v14028_v15 = vrot.slane %v1223_v14, 9  ;;  %v4112_v19 = vrot.slane %v15931_v50, 5 }
 0x1cf   :  { %20554 = vst [vmem:[#allocation38_spill] sm:$0xff] %v15940_v23  ;;  %20555 = vst [vmem:[#allocation39_spill] sm:$0xff] %v15947_v7  ;;  %v15949_v9 = vunpack.c.l.b16 %v5794_v2  ;;  %v7109_v53 = vrot.slane %v15940_v23, 7  ;;  %v1232_v6 = vcombine.high %v1230_v22, %v1230_v22  ;;  %v14030_v51 = vrot.slane %v1230_v22, 9 }
 0x1d0   :  { %v14029_v35 = vrot.slane %v1231_v55, 9  ;;  %v2999_v36 = vmax.f32 %v1223_v14, %v14028_v15  ;;  %v4111_v31 = vsel %vm3923_vm3, %v4110_v18, %v4109_v1  ;;  %v1267_v56 = vcombine.high %v707_v26, %v707_v26 }
 0x1d1   :  { %20556 = vst [vmem:[#allocation40_spill] sm:$0xff] %v15949_v9  ;;  %v1274_v38 = vrot.slane %v707_v26, %v15279_v44  ;;  %v14031_v3 = vrot.slane %v1232_v6, 9  ;;  %v3001_v2 = vmax.f32 %v1230_v22, %v14030_v51  ;;  %v15958_v60 = vsel %vm3920_vm2, %v7109_v53, %v15935_v46  ;;  %v15964_v53 = vld [vmem:[%s20309_s2] ss:$0 sm:$0xff] }
 0x1d2   :  { %v3000_v34 = vmax.f32 %v1231_v55, %v14029_v35  ;;  %v3253_v17 = vpack.c.bf16 %v2999_v36, %v2999_v36  ;;  %20557 = vst [vmem:[#allocation41_spill] sm:$0xff] %v15958_v60  ;;  %v1281_v50 = vrot.slane %v1267_v56, %v15279_v44  ;;  %v525_v35 = vadd.f32 %v15964_v53, %v15589_v52 }
 0x1d3   :  { %v1282_v24 = vcombine.high %v1274_v38, %v1274_v38  ;;  %v14040_v14 = vrot.slane %v1274_v38, 9  ;;  %v3002_v15 = vmax.f32 %v1232_v6, %v14031_v3  ;;  %v3255_v12 = vpack.c.bf16 %v3001_v2, %v3001_v2 }
 0x1d4   :  { %v3254_v62 = vpack.c.bf16 %v3000_v34, %v3000_v34  ;;  %v3761_v23 = vunpack.c.l.b16 %v3253_v17  ;;  %v1283_v18 = vcombine.high %v1281_v50, %v1281_v50  ;;  %v14042_v45 = vrot.slane %v1281_v50, 9 }
 0x1d5   :  { %v14041_v1 = vrot.slane %v1282_v24, 9  ;;  %v3011_v26 = vmax.f32 %v1274_v38, %v14040_v14  ;;  %v3256_v25 = vpack.c.bf16 %v3002_v15, %v3002_v15  ;;  %v3763_v22 = vunpack.c.l.b16 %v3255_v12 }
 0x1d6   :  { %v3762_v55 = vunpack.c.l.b16 %v3254_v62  ;;  %v14043_v51 = vrot.slane %v1283_v18, 9  ;;  %v3013_v34 = vmax.f32 %v1281_v50, %v14042_v45  ;;  %v705_v2 = vmax.f32 %v525_v35, 0.0 }
 0x1d7   :  { %v3012_v6 = vmax.f32 %v1282_v24, %v14041_v1  ;;  %v3265_v36 = vpack.c.bf16 %v3011_v26, %v3011_v26  ;;  %v3764_v17 = vunpack.c.l.b16 %v3256_v25  ;;  %v4096_v3 = vrot.slane %v3763_v22, 6 }
 0x1d8   :  { %v4094_v56 = vrot.slane %v3762_v55, 7  ;;  %v3014_v38 = vmax.f32 %v1283_v18, %v14043_v51  ;;  %v3267_v15 = vpack.c.bf16 %v3013_v34, %v3013_v34  ;;  %v4113_v46 = vsel %vm3926_vm4, %v4112_v19, %v4111_v31 }
 0x1d9   :  { %v3266_v14 = vpack.c.bf16 %v3012_v6, %v3012_v6  ;;  %v3773_v12 = vunpack.c.l.b16 %v3265_v36  ;;  %v1233_v58 = vcombine.high %v705_v2, %v705_v2  ;;  %v1240_v60 = vrot.slane %v705_v2, %v15279_v44 }
 0x1da   :  { %v4095_v62 = vsel %vm3920_vm2, %v4094_v56, %v3761_v23  ;;  %v4098_v52 = vrot.slane %v3764_v17, 5  ;;  %v3268_v7 = vpack.c.bf16 %v3014_v38, %v3014_v38  ;;  %v3775_v45 = vunpack.c.l.b16 %v3267_v15 }
 0x1db   :  { %v3774_v24 = vunpack.c.l.b16 %v3266_v14  ;;  %v4114_v50 = vrot.slane %v3773_v12, 4  ;;  %v1247_v25 = vrot.slane %v1233_v58, %v15279_v44  ;;  %v1248_v1 = vcombine.high %v1240_v60, %v1240_v60 }
 0x1dc   :  { %v14032_v26 = vrot.slane %v1240_v60, 9  ;;  %v4097_v18 = vsel %vm3923_vm3, %v4096_v3, %v4095_v62  ;;  %v3776_v55 = vunpack.c.l.b16 %v3268_v7  ;;  %v4118_v35 = vrot.slane %v3775_v45, 2 }
 0x1dd   :  { %v4116_v22 = vrot.slane %v3774_v24, 3  ;;  %v4115_v23 = vsel %vm3929_vm5, %v4114_v50, %v4113_v46  ;;  %v1249_v19 = vcombine.high %v1247_v25, %v1247_v25  ;;  %v14033_v31 = vrot.slane %v1248_v1, 9 }
 0x1de   :  { %v14034_v51 = vrot.slane %v1247_v25, 9  ;;  %v4120_v34 = vrot.slane %v3776_v55, 1  ;;  %v3003_v36 = vmax.f32 %v1240_v60, %v14032_v26  ;;  %v546_v17 = vadd.f32 %v15964_v53, %v15636_v30 }
 0x1df   :  { %v4117_v6 = vsel %vm3932_vm6, %v4116_v22, %v4115_v23  ;;  %v14035_v56 = vrot.slane %v1249_v19, 9  ;;  %v3004_v2 = vmax.f32 %v1248_v1, %v14033_v31  ;;  %v4099_v46 = vsel %vm3926_vm4, %v4098_v52, %v4097_v18 }
 0x1e0   :  { %v4119_v58 = vsel %vm3935_vm7, %v4118_v35, %v4117_v6  ;;  %v3005_v3 = vmax.f32 %v1247_v25, %v14034_v51  ;;  %v3257_v38 = vpack.c.bf16 %v3003_v36, %v3003_v36  ;;  %v710_v14 = vmax.f32 %v546_v17, 0.0 }
 0x1e1   :  { %v4121_v7 = vsel %vm3938_vm8, %v4120_v34, %v4119_v58  ;;  %v3006_v12 = vmax.f32 %v1249_v19, %v14035_v56  ;;  %v3258_v62 = vpack.c.bf16 %v3004_v2, %v3004_v2  ;;  %v538_v30 = vadd.f32 %v15964_v53, %v15642_v0 }
 0x1e2   :  { %v14192_v15 = vpack.c.b16 %v4121_v7, %v4121_v7  ;;  %v3259_v24 = vpack.c.bf16 %v3005_v3, %v3005_v3  ;;  %v3765_v45 = vunpack.c.l.b16 %v3257_v38  ;;  %v1318_v60 = vcombine.high %v710_v14, %v710_v14 }
 0x1e3   :  { %v1325_v50 = vrot.slane %v710_v14, %v15279_v44  ;;  %v3260_v25 = vpack.c.bf16 %v3006_v12, %v3006_v12  ;;  %v3766_v26 = vunpack.c.l.b16 %v3258_v62 }
 0x1e4   :  { %v4703_v1 = vrot.slane %v14192_v15, %v15286_v59  ;;  %v3767_v55 = vunpack.c.l.b16 %v3259_v24  ;;  %v4100_v22 = vrot.slane %v3765_v45, 4  ;;  %v1332_v52 = vrot.slane %v1318_v60, %v15279_v44 }
 0x1e5   :  { %v1333_v18 = vcombine.high %v1325_v50, %v1325_v50  ;;  %v14052_v35 = vrot.slane %v1325_v50, 9  ;;  %v3768_v31 = vunpack.c.l.b16 %v3260_v25  ;;  %v4102_v51 = vrot.slane %v3766_v26, 3 }
 0x1e6   :  { %v4705_v23 = vcombine.high %v4703_v1, %v4703_v1  ;;  %v4719_v19 = vrot.slane %v4703_v1, %v15286_v59  ;;  %v4101_v6 = vsel %vm3929_vm5, %v4100_v22, %v4099_v46  ;;  %v4104_v34 = vrot.slane %v3767_v55, 2 }
 0x1e7   :  { %v1334_v36 = vcombine.high %v1332_v52, %v1332_v52  ;;  %v14053_v0 = vrot.slane %v1333_v18, 9  ;;  %v4103_v2 = vsel %vm3932_vm6, %v4102_v51, %v4101_v6  ;;  %v4106_v38 = vrot.slane %v3768_v31, 1 }
 0x1e8   :  { %v4733_v17 = vrot.slane %v4705_v23, %v15286_v59  ;;  %v4735_v58 = vcombine.high %v4719_v19, %v4719_v19  ;;  %v5913_v56 = vrot.slane %v4719_v19, %v15286_v59  ;;  %v4105_v3 = vsel %vm3935_vm7, %v4104_v34, %v4103_v2 }
 0x1e9   :  { %v14054_v14 = vrot.slane %v1332_v52, 9  ;;  %v14055_v15 = vrot.slane %v1334_v36, 9  ;;  %v4107_v45 = vsel %vm3938_vm8, %v4106_v38, %v4105_v3  ;;  %v3023_v60 = vmax.f32 %v1325_v50, %v14052_v35 }
 0x1ea   :  { %v4737_v12 = vcombine.high %v4733_v17, %v4733_v17  ;;  %v5920_v62 = vrot.slane %v5913_v56, %v15286_v59  ;;  %v5927_v46 = vrot.slane %v4733_v17, %v15286_v59  ;;  %v5941_v24 = vrot.slane %v4735_v58, %v15286_v59 }
 0x1eb   :  { %v3024_v1 = vmax.f32 %v1333_v18, %v14053_v0  ;;  %v3025_v25 = vmax.f32 %v1332_v52, %v14054_v14  ;;  %v708_v23 = vmax.f32 %v538_v30, 0.0  ;;  %v4376_v19 = vpack.c.b16 %v4121_v7, %v4107_v45 }
 0x1ec   :  { %v5934_v26 = vrot.slane %v5927_v46, %v15286_v59  ;;  %v5948_v55 = vrot.slane %v5941_v24, %v15286_v59  ;;  %v15997_v22 = vunpack.c.l.b16 %v5920_v62  ;;  %v3026_v31 = vmax.f32 %v1334_v36, %v14055_v15 }
 0x1ed   :  { %v3277_v51 = vpack.c.bf16 %v3023_v60, %v3023_v60  ;;  %v3278_v6 = vpack.c.bf16 %v3024_v1, %v3024_v1  ;;  %v16001_v17 = vrot.slane %v4737_v12, %v15286_v59  ;;  %v4696_v18 = vrot.slane %v4376_v19, %v15286_v59 }
 0x1ee   :  { %20558 = vst [vmem:[#allocation42_spill] sm:$0xff] %v15997_v22  ;;  %v16003_v58 = vunpack.c.l.b16 %v5934_v26  ;;  %v16005_v50 = vunpack.c.l.b16 %v5948_v55  ;;  %v3279_v35 = vpack.c.bf16 %v3025_v25, %v3025_v25  ;;  %v3280_v0 = vpack.c.bf16 %v3026_v31, %v3026_v31 }
 0x1ef   :  { %20559 = vst [vmem:[#allocation43_spill] sm:$0xff] %v16001_v17  ;;  %v3786_v30 = vunpack.c.l.b16 %v3278_v6  ;;  %v1284_v36 = vcombine.high %v708_v23, %v708_v23  ;;  %v1291_v56 = vrot.slane %v708_v23, %v15279_v44  ;;  %v4704_v2 = vcombine.high %v4696_v18, %v4696_v18 }
 0x1f0   :  { %20560 = vst [vmem:[#allocation44_spill] sm:$0xff] %v16003_v58  ;;  %20561 = vst [vmem:[#allocation45_spill] sm:$0xff] %v16005_v50  ;;  %v4712_v3 = vrot.slane %v4696_v18, %v15286_v59  ;;  %v3785_v38 = vunpack.c.l.b16 %v3277_v51  ;;  %v3787_v14 = vunpack.c.l.b16 %v3279_v35  ;;  %v3788_v1 = vunpack.c.l.b16 %v3280_v0 }
 0x1f1   :  { %v4136_v15 = vrot.slane %v3786_v30, 7  ;;  %v1298_v12 = vrot.slane %v1284_v36, %v15279_v44  ;;  %v1299_v62 = vcombine.high %v1291_v56, %v1291_v56  ;;  %v14044_v46 = vrot.slane %v1291_v56, 9 }
 0x1f2   :  { %v4726_v24 = vrot.slane %v4704_v2, %v15286_v59  ;;  %v4734_v45 = vcombine.high %v4712_v3, %v4712_v3  ;;  %v5857_v60 = vrot.slane %v4712_v3, %v15286_v59  ;;  %v4138_v26 = vrot.slane %v3787_v14, 6 }
 0x1f3   :  { %v1300_v55 = vcombine.high %v1298_v12, %v1298_v12  ;;  %v14045_v23 = vrot.slane %v1299_v62, 9  ;;  %v4137_v6 = vsel %vm3920_vm2, %v4136_v15, %v3785_v38  ;;  %v14046_v35 = vrot.slane %v1298_v12, 9 }
 0x1f4   :  { %v4736_v19 = vcombine.high %v4726_v24, %v4726_v24  ;;  %v5871_v31 = vrot.slane %v4726_v24, %v15286_v59  ;;  %v5885_v51 = vrot.slane %v4734_v45, %v15286_v59  ;;  %v5864_v18 = vrot.slane %v5857_v60, %v15286_v59 }
 0x1f5   :  { %v14047_v30 = vrot.slane %v1300_v55, 9  ;;  %v3015_v36 = vmax.f32 %v1291_v56, %v14044_v46  ;;  %v4140_v14 = vrot.slane %v3788_v1, 5  ;;  %v3016_v25 = vmax.f32 %v1299_v62, %v14045_v23 }
 0x1f6   :  { %v5878_v2 = vrot.slane %v5871_v31, %v15286_v59  ;;  %v5892_v0 = vrot.slane %v5885_v51, %v15286_v59  ;;  %v5899_v3 = vrot.slane %v4736_v19, %v15286_v59  ;;  %v3017_v7 = vmax.f32 %v1298_v12, %v14046_v35 }
 0x1f7   :  { %v3018_v52 = vmax.f32 %v1300_v55, %v14047_v30  ;;  %v3269_v24 = vpack.c.bf16 %v3015_v36, %v3015_v36  ;;  %v4139_v38 = vsel %vm3923_vm3, %v4138_v26, %v4137_v6  ;;  %v549_v56 = vadd.f32 %v15964_v53, %v15666_v32 }
 0x1f8   :  { %v5906_v45 = vrot.slane %v5899_v3, %v15286_v59  ;;  %v16024_v34 = vunpack.c.l.b16 %v5878_v2  ;;  %v16029_v15 = vunpack.c.l.b16 %v5864_v18  ;;  %v3270_v46 = vpack.c.bf16 %v3016_v25, %v3016_v25 }
 0x1f9   :  { %v3271_v60 = vpack.c.bf16 %v3017_v7, %v3017_v7  ;;  %v3272_v31 = vpack.c.bf16 %v3018_v52, %v3018_v52  ;;  %v16031_v19 = vunpack.c.l.b16 %v5892_v0  ;;  %v3777_v62 = vunpack.c.l.b16 %v3269_v24 }
 0x1fa   :  { %20562 = vst [vmem:[#allocation46_spill] sm:$0xff] %v16024_v34  ;;  %20563 = vst [vmem:[#allocation47_spill] sm:$0xff] %v16029_v15  ;;  %v7123_v12 = vrot.slane %v16024_v34, 7  ;;  %v711_v1 = vmax.f32 %v549_v56, 0.0  ;;  %v3778_v55 = vunpack.c.l.b16 %v3270_v46  ;;  %v541_v26 = vadd.f32 %v15964_v53, %v15709_v43 }
 0x1fb   :  { %20564 = vst [vmem:[#allocation48_spill] sm:$0xff] %v16031_v19  ;;  %v3779_v23 = vunpack.c.l.b16 %v3271_v60  ;;  %v3780_v51 = vunpack.c.l.b16 %v3272_v31  ;;  %v16036_v6 = vunpack.c.l.b16 %v5906_v45  ;;  %v4141_v7 = vsel %vm3926_vm4, %v4140_v14, %v4139_v38 }
 0x1fc   :  { %v1335_v32 = vcombine.high %v711_v1, %v711_v1  ;;  %v1342_v18 = vrot.slane %v711_v1, %v15279_v44  ;;  %v16042_v52 = vsel %vm3920_vm2, %v7123_v12, %v16029_v15  ;;  %v4122_v25 = vrot.slane %v3778_v55, 7 }
 0x1fd   :  { %20565 = vst [vmem:[#allocation49_spill] sm:$0xff] %v16036_v6  ;;  %20566 = vst [vmem:[#allocation50_spill] sm:$0xff] %v16042_v52  ;;  %v4124_v35 = vrot.slane %v3779_v23, 6  ;;  %v709_v30 = vmax.f32 %v541_v26, 0.0  ;;  %v4126_v36 = vrot.slane %v3780_v51, 5  ;;  %v562_v14 = vadd.f32 %v15964_v53, %v15744_v27 }
 0x1fe   :  { %v1349_v2 = vrot.slane %v1335_v32, %v15279_v44  ;;  %v1350_v0 = vcombine.high %v1342_v18, %v1342_v18  ;;  %v14056_v3 = vrot.slane %v1342_v18, 9  ;;  %v4123_v43 = vsel %vm3920_vm2, %v4122_v25, %v3777_v62 }
 0x1ff   :  { %v1301_v24 = vcombine.high %v709_v30, %v709_v30  ;;  %v1308_v45 = vrot.slane %v709_v30, %v15279_v44  ;;  %v4125_v38 = vsel %vm3923_vm3, %v4124_v35, %v4123_v43 }
 0x200   :  { %v1351_v56 = vcombine.high %v1349_v2, %v1349_v2  ;;  %v14057_v46 = vrot.slane %v1350_v0, 9  ;;  %v14058_v60 = vrot.slane %v1349_v2, 9  ;;  %v3027_v31 = vmax.f32 %v1342_v18, %v14056_v3 }
 0x201   :  { %v1315_v12 = vrot.slane %v1301_v24, %v15279_v44  ;;  %v1316_v1 = vcombine.high %v1308_v45, %v1308_v45  ;;  %v14048_v55 = vrot.slane %v1308_v45, 9  ;;  %v4127_v62 = vsel %vm3926_vm4, %v4126_v36, %v4125_v38 }
 0x202   :  { %v14059_v23 = vrot.slane %v1351_v56, 9  ;;  %v3028_v51 = vmax.f32 %v1350_v0, %v14057_v46  ;;  %v3029_v26 = vmax.f32 %v1349_v2, %v14058_v60  ;;  %v3281_v32 = vpack.c.bf16 %v3027_v31, %v3027_v31 }
 0x203   :  { %v1317_v25 = vcombine.high %v1315_v12, %v1315_v12  ;;  %v14049_v30 = vrot.slane %v1316_v1, 9  ;;  %v14050_v22 = vrot.slane %v1315_v12, 9  ;;  %v3019_v43 = vmax.f32 %v1308_v45, %v14048_v55 }
 0x204   :  { %v3030_v27 = vmax.f32 %v1351_v56, %v14059_v23  ;;  %v3282_v50 = vpack.c.bf16 %v3028_v51, %v3028_v51  ;;  %v3283_v35 = vpack.c.bf16 %v3029_v26, %v3029_v26  ;;  %v3789_v18 = vunpack.c.l.b16 %v3281_v32 }
 0x205   :  { %v14051_v3 = vrot.slane %v1317_v25, 9  ;;  %v3020_v24 = vmax.f32 %v1316_v1, %v14049_v30  ;;  %v3021_v58 = vmax.f32 %v1315_v12, %v14050_v22  ;;  %v3273_v2 = vpack.c.bf16 %v3019_v43, %v3019_v43 }
 0x206   :  { %v3284_v52 = vpack.c.bf16 %v3030_v27, %v3030_v27  ;;  %v3790_v17 = vunpack.c.l.b16 %v3282_v50  ;;  %v3791_v0 = vunpack.c.l.b16 %v3283_v35  ;;  %v4142_v46 = vrot.slane %v3789_v18, 4 }
 0x207   :  { %v3022_v36 = vmax.f32 %v1317_v25, %v14051_v3  ;;  %v3274_v38 = vpack.c.bf16 %v3020_v24, %v3020_v24  ;;  %v3275_v60 = vpack.c.bf16 %v3021_v58, %v3021_v58  ;;  %v3781_v51 = vunpack.c.l.b16 %v3273_v2 }
 0x208   :  { %v16052_v31 = vunpack.c.l.b16 %v3284_v52  ;;  %v4144_v56 = vrot.slane %v3790_v17, 3  ;;  %v4146_v23 = vrot.slane %v3791_v0, 2  ;;  %v4143_v45 = vsel %vm3929_vm5, %v4142_v46, %v4141_v7 }
 0x209   :  { %v3276_v55 = vpack.c.bf16 %v3022_v36, %v3022_v36  ;;  %v3782_v26 = vunpack.c.l.b16 %v3274_v38  ;;  %v3783_v32 = vunpack.c.l.b16 %v3275_v60  ;;  %v4128_v12 = vrot.slane %v3781_v51, 4 }
 0x20a   :  { %v4145_v22 = vsel %vm3932_vm6, %v4144_v56, %v4143_v45  ;;  %v714_v50 = vmax.f32 %v562_v14, 0.0  ;;  %v554_v1 = vadd.f32 %v15964_v53, %v15758_v39  ;;  %v565_v14 = vadd.f32 %v15964_v53, %v15778_v49 }
 0x20b   :  { %v4147_v25 = vsel %vm3935_vm7, %v4146_v23, %v4145_v22  ;;  %v3784_v58 = vunpack.c.l.b16 %v3276_v55  ;;  %v4130_v52 = vrot.slane %v3782_v26, 3  ;;  %v4132_v30 = vrot.slane %v3783_v32, 2 }
 0x20c   :  { %v4129_v17 = vsel %vm3929_vm5, %v4128_v12, %v4127_v62  ;;  %v1386_v27 = vcombine.high %v714_v50, %v714_v50  ;;  %v1393_v7 = vrot.slane %v714_v50, %v15279_v44  ;;  %v712_v35 = vmax.f32 %v554_v1, 0.0 }
 0x20d   :  { %v4131_v43 = vsel %vm3932_vm6, %v4130_v52, %v4129_v17  ;;  %v4134_v18 = vrot.slane %v3784_v58, 1  ;;  %v16066_v39 = vadd.f32 %v15964_v53, %v15800_v11  ;;  %v20567_v46 = vmov 0 }
 0x20e   :  { %v4133_v3 = vsel %vm3935_vm7, %v4132_v30, %v4131_v43  ;;  %v1400_v24 = vrot.slane %v1386_v27, %v15279_v44  ;;  %v1401_v0 = vcombine.high %v1393_v7, %v1393_v7  ;;  %v14068_v62 = vrot.slane %v1393_v7, 9 }
 0x20f   :  { %v4135_v2 = vsel %vm3938_vm8, %v4134_v18, %v4133_v3  ;;  %v20568_v46 = vsel %vm16073_vm11, 4294967295, %v20567_v46  ;;  %v1352_v36 = vcombine.high %v712_v35, %v712_v35  ;;  %v1359_v49 = vrot.slane %v712_v35, %v15279_v44 }
 0x210   :  { %20569 = vst [vmem:[#allocation51_spill] sm:$0xff] %v20568_v46  ;;  %v16078_v38 = vmax.f32 %v565_v14, 0.0  ;;  %v4377_v11 = vpack.c.b16 %v4147_v25, %v4135_v2  ;;  %v1402_v60 = vcombine.high %v1400_v24, %v1400_v24  ;;  %v14069_v56 = vrot.slane %v1401_v0, 9 }
 0x211   :  { %v14070_v23 = vrot.slane %v1400_v24, 9  ;;  %v3039_v51 = vmax.f32 %v1393_v7, %v14068_v62  ;;  %v1366_v45 = vrot.slane %v1352_v36, %v15279_v44  ;;  %v1367_v55 = vcombine.high %v1359_v49, %v1359_v49 }
 0x212   :  { %v14060_v26 = vrot.slane %v1359_v49, 9  ;;  %v4391_v32 = vsel %vm16073_vm11, %v4377_v11, 0  ;;  %v14071_v22 = vrot.slane %v1402_v60, 9  ;;  %v3040_v12 = vmax.f32 %v1401_v0, %v14069_v56 }
 0x213   :  { %v3041_v50 = vmax.f32 %v1400_v24, %v14070_v23  ;;  %v4738_v1 = vcombine.high %v4391_v32, %v4391_v32  ;;  %v4745_v58 = vrot.slane %v4391_v32, %v15286_v59  ;;  %v3293_v52 = vpack.c.bf16 %v3039_v51, %v3039_v51 }
 0x214   :  { %v1368_v30 = vcombine.high %v1366_v45, %v1366_v45  ;;  %v3042_v25 = vmax.f32 %v1402_v60, %v14071_v22  ;;  %v3294_v17 = vpack.c.bf16 %v3040_v12, %v3040_v12  ;;  %v14061_v35 = vrot.slane %v1367_v55, 9 }
 0x215   :  { %v3295_v27 = vpack.c.bf16 %v3041_v50, %v3041_v50  ;;  %v4752_v7 = vrot.slane %v4738_v1, %v15286_v59  ;;  %v4753_v43 = vcombine.high %v4745_v58, %v4745_v58  ;;  %v4761_v18 = vrot.slane %v4745_v58, %v15286_v59 }
 0x216   :  { %v16086_v14 = vunpack.c.l.b16 %v3293_v52  ;;  %v3296_v3 = vpack.c.bf16 %v3042_v25, %v3042_v25  ;;  %v16088_v62 = vunpack.c.l.b16 %v3294_v17  ;;  %v14062_v0 = vrot.slane %v1366_v45, 9 }
 0x217   :  { %v16090_v24 = vunpack.c.l.b16 %v3295_v27  ;;  %v4754_v2 = vcombine.high %v4752_v7, %v4752_v7  ;;  %v4768_v36 = vrot.slane %v4752_v7, %v15286_v59  ;;  %v4775_v11 = vrot.slane %v4753_v43, %v15286_v59 }
 0x218   :  { %v4783_v60 = vcombine.high %v4761_v18, %v4761_v18  ;;  %v5969_v56 = vrot.slane %v4761_v18, %v15286_v59  ;;  %v16095_v23 = vunpack.c.l.b16 %v3296_v3  ;;  %v14063_v27 = vrot.slane %v1368_v30, 9 }
 0x219   :  { %v16100_v22 = vrot.slane %v4754_v2, %v15286_v59  ;;  %v4784_v12 = vcombine.high %v4768_v36, %v4768_v36  ;;  %v4785_v50 = vcombine.high %v4775_v11, %v4775_v11  ;;  %v5983_v1 = vrot.slane %v4775_v11, %v15286_v59 }
 0x21a   :  { %v5976_v58 = vrot.slane %v5969_v56, %v15286_v59  ;;  %v5997_v52 = vrot.slane %v4783_v60, %v15286_v59  ;;  %v6025_v25 = vrot.slane %v4768_v36, %v15286_v59  ;;  %v3031_v18 = vmax.f32 %v1359_v49, %v14060_v26 }
 0x21b   :  { %20570 = vst [vmem:[#allocation52_spill] sm:$0xff] %v16100_v22  ;;  %v5990_v7 = vrot.slane %v5983_v1, %v15286_v59  ;;  %v6011_v43 = vrot.slane %v4785_v50, %v15286_v59  ;;  %v16118_v36 = vrot.slane %v4784_v12, %v15286_v59  ;;  %v1403_v12 = vcombine.high %v16078_v38, %v16078_v38 }
 0x21c   :  { %v6004_v3 = vrot.slane %v5997_v52, %v15286_v59  ;;  %v6032_v2 = vrot.slane %v6025_v25, %v15286_v59  ;;  %v16115_v11 = vunpack.c.l.b16 %v5976_v58  ;;  %v3032_v52 = vmax.f32 %v1367_v55, %v14061_v35 }
 0x21d   :  { %20572 = vst [vmem:[#allocation54_spill] sm:$0xff] %v16118_v36  ;;  %v6018_v60 = vrot.slane %v6011_v43, %v15286_v59  ;;  %v16121_v56 = vunpack.c.l.b16 %v5990_v7  ;;  %v3033_v58 = vmax.f32 %v1366_v45, %v14062_v0  ;;  %v3034_v25 = vmax.f32 %v1368_v30, %v14063_v27 }
 0x21e   :  { %20571 = vst [vmem:[#allocation53_spill] sm:$0xff] %v16115_v11  ;;  %v16124_v50 = vunpack.c.l.b16 %v6004_v3  ;;  %v16126_v17 = vunpack.c.l.b16 %v6032_v2  ;;  %v3285_v51 = vpack.c.bf16 %v3031_v18, %v3031_v18  ;;  %v3286_v43 = vpack.c.bf16 %v3032_v52, %v3032_v52  ;;  %v14957_v3 = vld [vmem:[%s20310_s3 + $0x120] sm:$0xff]   ;;  %v16143_v11 = vpop.f32.mrb[40].mxu0 }
 0x21f   :  { %20573 = vst [vmem:[#allocation55_spill] sm:$0xff] %v16121_v56  ;;  %v16128_v32 = vunpack.c.l.b16 %v6018_v60  ;;  %v1410_v7 = vrot.slane %v16078_v38, %v15279_v44  ;;  %v713_v1 = vmax.f32 %v16066_v39, 0.0  ;;  %v3287_v49 = vpack.c.bf16 %v3033_v58, %v3033_v58  ;;  %14793 = vmatprep.subr.bf16.mxu0 %v14957_v3 }
 0x220   :  { %20574 = vst [vmem:[#allocation56_spill] sm:$0xff] %v16124_v50  ;;  %20575 = vst [vmem:[#allocation57_spill] sm:$0xff] %v16126_v17  ;;  %v3288_v55 = vpack.c.bf16 %v3034_v25, %v3034_v25  ;;  %v1417_v26 = vrot.slane %v1403_v12, %v15279_v44  ;;  %v578_v45 = vadd.f32 %v15964_v53, %v15857_v21  ;;  %v3793_v30 = vunpack.c.l.b16 %v3285_v51 }
 0x221   :  { %20576 = vst [vmem:[#allocation58_spill] sm:$0xff] %v16128_v32  ;;  %v3794_v35 = vunpack.c.l.b16 %v3286_v43  ;;  %v1418_v0 = vcombine.high %v1410_v7, %v1410_v7  ;;  %v14072_v27 = vrot.slane %v1410_v7, 9  ;;  %v3795_v18 = vunpack.c.l.b16 %v3287_v49  ;;  %14794 = vmatpush3.bf16.msra.mxu0 %v14957_v3 }
 0x222   :  { %v3796_v38 = vunpack.c.l.b16 %v3288_v55  ;;  %v1419_v2 = vcombine.high %v1417_v26, %v1417_v26  ;;  %v14074_v39 = vrot.slane %v1417_v26, 9  ;;  %v4148_v60 = vrot.slane %v3793_v30, 7 }
 0x223   :  { %v4150_v52 = vrot.slane %v3794_v35, 6  ;;  %v14073_v36 = vrot.slane %v1418_v0, 9  ;;  %v3043_v58 = vmax.f32 %v1410_v7, %v14072_v27  ;;  %v4152_v25 = vrot.slane %v3795_v18, 5  ;;  %v16147_v35 = vpop.f32.mrb[41].mxu0 }
 0x224   :  { %v4154_v46 = vrot.slane %v3796_v38, 4  ;;  %v14075_v12 = vrot.slane %v1419_v2, 9  ;;  %v3045_v17 = vmax.f32 %v1417_v26, %v14074_v39  ;;  %v4149_v21 = vsel %vm3920_vm2, %v4148_v60, %v16052_v31 }
 0x225   :  { %v3044_v51 = vmax.f32 %v1418_v0, %v14073_v36  ;;  %v3297_v43 = vpack.c.bf16 %v3043_v58, %v3043_v58  ;;  %v1369_v32 = vcombine.high %v713_v1, %v713_v1  ;;  %v4151_v49 = vsel %vm3923_vm3, %v4150_v52, %v4149_v21 }
 0x226   :  { %v3046_v55 = vmax.f32 %v1419_v2, %v14075_v12  ;;  %v3299_v3 = vpack.c.bf16 %v3045_v17, %v3045_v17  ;;  %v1376_v30 = vrot.slane %v713_v1, %v15279_v44  ;;  %v4153_v7 = vsel %vm3926_vm4, %v4152_v25, %v4151_v49 }
 0x227   :  { %v3298_v27 = vpack.c.bf16 %v3044_v51, %v3044_v51  ;;  %v16150_v26 = vunpack.c.l.b16 %v3297_v43  ;;  %v1383_v31 = vrot.slane %v1369_v32, %v15279_v44  ;;  %v4155_v51 = vsel %vm3929_vm5, %v4154_v46, %v4153_v7  ;;  %v14958_v43 = vld [vmem:[%s20310_s3 + $0x128] sm:$0xff]   ;;  %v16174_v46 = vpop.f32.mrb[42].mxu0 }
 0x228   :  { %v3300_v36 = vpack.c.bf16 %v3046_v55, %v3046_v55  ;;  %v16153_v0 = vunpack.c.l.b16 %v3299_v3  ;;  %v1384_v18 = vcombine.high %v1376_v30, %v1376_v30  ;;  %v14064_v38 = vrot.slane %v1376_v30, 9  ;;  %14795 = vmatprep.subr.bf16.mxu0 %v14958_v43 }
 0x229   :  { %v16155_v39 = vunpack.c.l.b16 %v3298_v27  ;;  %v1385_v2 = vcombine.high %v1383_v31, %v1383_v31  ;;  %v14066_v1 = vrot.slane %v1383_v31, 9  ;;  %v718_v3 = vmax.f32 %v578_v45, 0.0  ;;  %14796 = vmatpush3.bf16.msra.mxu0 %v14958_v43 }
 0x22a   :  { %v16158_v60 = vunpack.c.l.b16 %v3300_v36  ;;  %v14065_v58 = vrot.slane %v1384_v18, 9  ;;  %v3035_v25 = vmax.f32 %v1376_v30, %v14064_v38  ;;  %v570_v27 = vadd.f32 %v15964_v53, %v15859_v57 }
 0x22b   :  { %v14067_v32 = vrot.slane %v1385_v2, 9  ;;  %v3037_v21 = vmax.f32 %v1383_v31, %v14066_v1  ;;  %v581_v30 = vadd.f32 %v15964_v53, %v15892_v20  ;;  %v16172_v31 = vadd.f32 %v15964_v53, %v15933_v8  ;;  %v16177_v1 = vpop.f32.mrb[43].mxu0  ;;  %v14959_v20 = vld [vmem:[%s20310_s3 + $0x130] sm:$0xff]  }
 0x22c   :  { %v3036_v49 = vmax.f32 %v1384_v18, %v14065_v58  ;;  %v3289_v55 = vpack.c.bf16 %v3035_v25, %v3035_v25  ;;  %v1454_v18 = vcombine.high %v718_v3, %v718_v3  ;;  %v1461_v45 = vrot.slane %v718_v3, %v15279_v44  ;;  %14797 = vmatprep.subr.bf16.mxu0 %v14959_v20  ;;  %v16190_v50 = vpop.f32.mrb[44].mxu0 }
 0x22d   :  { %v3038_v36 = vmax.f32 %v1385_v2, %v14067_v32  ;;  %v3291_v52 = vpack.c.bf16 %v3037_v21, %v3037_v21  ;;  %v716_v58 = vmax.f32 %v570_v27, 0.0  ;;  %v16179_v25 = vmax.f32 %v581_v30, 0.0  ;;  %14798 = vmatpush3.bf16.msra.mxu0 %v14959_v20  ;;  %v16196_v56 = vpop.f32.mrb[45].mxu0 }
 0x22e   :  { %v3290_v7 = vpack.c.bf16 %v3036_v49, %v3036_v49  ;;  %v3797_v38 = vunpack.c.l.b16 %v3289_v55  ;;  %v1468_v32 = vrot.slane %v1454_v18, %v15279_v44  ;;  %v1469_v21 = vcombine.high %v1461_v45, %v1461_v45 }
 0x22f   :  { %v3292_v57 = vpack.c.bf16 %v3038_v36, %v3038_v36  ;;  %v3799_v2 = vunpack.c.l.b16 %v3291_v52  ;;  %v14084_v3 = vrot.slane %v1461_v45, 9  ;;  %v1420_v12 = vcombine.high %v716_v58, %v716_v58 }
 0x230   :  { %v3798_v8 = vunpack.c.l.b16 %v3290_v7  ;;  %v4156_v53 = vrot.slane %v3797_v38, 3  ;;  %v1470_v27 = vcombine.high %v1468_v32, %v1468_v32  ;;  %v14085_v36 = vrot.slane %v1469_v21, 9 }
 0x231   :  { %v3800_v49 = vunpack.c.l.b16 %v3292_v57  ;;  %v4160_v55 = vrot.slane %v3799_v2, 1  ;;  %v20577_v30 = vrot.slane %v16086_v14, 7  ;;  %v14086_v7 = vrot.slane %v1468_v32, 9 }
 0x232   :  { %v4157_v43 = vsel %vm3932_vm6, %v4156_v53, %v4155_v51  ;;  %v4158_v52 = vrot.slane %v3798_v8, 2  ;;  %v3055_v38 = vmax.f32 %v1461_v45, %v14084_v3  ;;  %v1427_v18 = vrot.slane %v716_v58, %v15279_v44 }
 0x233   :  { %v4163_v17 = vsel %vm3920_vm2, %v20577_v30, %v3800_v49  ;;  %v20578_v2 = vrot.slane %v16088_v62, 6  ;;  %v14087_v8 = vrot.slane %v1470_v27, 9  ;;  %v3056_v53 = vmax.f32 %v1469_v21, %v14085_v36 }
 0x234   :  { %v4159_v57 = vsel %vm3935_vm7, %v4158_v52, %v4157_v43  ;;  %v20579_v20 = vrot.slane %v16090_v24, 5  ;;  %v3057_v49 = vmax.f32 %v1468_v32, %v14086_v7  ;;  %v3309_v58 = vpack.c.bf16 %v3055_v38, %v3055_v38 }
 0x235   :  { %v4165_v51 = vsel %vm3923_vm3, %v20578_v2, %v4163_v17  ;;  %v4161_v14 = vsel %vm3938_vm8, %v4160_v55, %v4159_v57  ;;  %v20580_v3 = vrot.slane %v16095_v23, 4  ;;  %v3058_v52 = vmax.f32 %v1470_v27, %v14087_v8 }
 0x236   :  { %v4167_v45 = vsel %vm3926_vm4, %v20579_v20, %v4165_v51  ;;  %v3310_v62 = vpack.c.bf16 %v3056_v53, %v3056_v53  ;;  %v1434_v17 = vrot.slane %v1420_v12, %v15279_v44  ;;  %v20581_v21 = vrot.slane %v16150_v26, 3 }
 0x237   :  { %v4169_v43 = vsel %vm3929_vm5, %v20580_v3, %v4167_v45  ;;  %v3311_v30 = vpack.c.bf16 %v3057_v49, %v3057_v49  ;;  %v16209_v55 = vunpack.c.l.b16 %v3309_v58  ;;  %v1435_v24 = vcombine.high %v1427_v18, %v1427_v18 }
 0x238   :  { %v4171_v36 = vsel %vm3932_vm6, %v20581_v21, %v4169_v43  ;;  %v20582_v57 = vrot.slane %v16155_v39, 2  ;;  %v3312_v7 = vpack.c.bf16 %v3058_v52, %v3058_v52  ;;  %v16214_v23 = vunpack.c.l.b16 %v3310_v62 }
 0x239   :  { %v1436_v38 = vcombine.high %v1434_v17, %v1434_v17  ;;  %v20583_v27 = vrot.slane %v16153_v0, 1  ;;  %v16219_v2 = vunpack.c.l.b16 %v3311_v30  ;;  %v14076_v51 = vrot.slane %v1427_v18, 9 }
 0x23a   :  { %v4173_v32 = vsel %vm3935_vm7, %v20582_v57, %v4171_v36  ;;  %v16222_v20 = vunpack.c.l.b16 %v3312_v7  ;;  %v14077_v49 = vrot.slane %v1435_v24, 9  ;;  %v14078_v58 = vrot.slane %v1434_v17, 9 }
 0x23b   :  { %v4175_v12 = vsel %vm3938_vm8, %v20583_v27, %v4173_v32  ;;  %v14079_v3 = vrot.slane %v1436_v38, 9  ;;  %v3047_v62 = vmax.f32 %v1427_v18, %v14076_v51 }
 0x23c   :  { %v4378_v8 = vpack.c.b16 %v4175_v12, %v4161_v14  ;;  %v14193_v53 = vpack.c.b16 %v4175_v12, %v4175_v12  ;;  %v3048_v21 = vmax.f32 %v1435_v24, %v14077_v49  ;;  %v16229_v36 = vmax.f32 %v1434_v17, %v14078_v58 }
 0x23d   :  { %v16231_v14 = vmax.f32 %v1436_v38, %v14079_v3  ;;  %v3301_v12 = vpack.c.bf16 %v3047_v62, %v3047_v62 }
 0x23e   :  { %v4794_v0 = vrot.slane %v4378_v8, %v15286_v59  ;;  %v4801_v43 = vrot.slane %v14193_v53, %v15286_v59  ;;  %v3302_v8 = vpack.c.bf16 %v3048_v21, %v3048_v21  ;;  %v3303_v53 = vpack.c.bf16 %v16229_v36, %v16229_v36 }
 0x23f   :  { %v3304_v18 = vpack.c.bf16 %v16231_v14, %v16231_v14  ;;  %v3809_v3 = vunpack.c.l.b16 %v3301_v12 }
 0x240   :  { %v4802_v57 = vcombine.high %v4794_v0, %v4794_v0  ;;  %v4803_v32 = vcombine.high %v4801_v43, %v4801_v43  ;;  %v4810_v7 = vrot.slane %v4794_v0, %v15286_v59  ;;  %v4817_v27 = vrot.slane %v4801_v43, %v15286_v59 }
 0x241   :  { %v3810_v0 = vunpack.c.l.b16 %v3302_v8 }
 0x242   :  { %v4824_v17 = vrot.slane %v4802_v57, %v15286_v59  ;;  %v4831_v24 = vrot.slane %v4803_v32, %v15286_v59  ;;  %v4832_v38 = vcombine.high %v4810_v7, %v4810_v7  ;;  %v4833_v51 = vcombine.high %v4817_v27, %v4817_v27 }
 0x243   :  { %v6053_v49 = vrot.slane %v4810_v7, %v15286_v59  ;;  %v6109_v58 = vrot.slane %v4817_v27, %v15286_v59 }
 0x244   :  { %v4834_v43 = vcombine.high %v4824_v17, %v4824_v17  ;;  %v4835_v62 = vcombine.high %v4831_v24, %v4831_v24  ;;  %v6067_v21 = vrot.slane %v4824_v17, %v15286_v59  ;;  %v6081_v36 = vrot.slane %v4832_v38, %v15286_v59 }
 0x245   :  { %v6060_v14 = vrot.slane %v6053_v49, %v15286_v59  ;;  %v6116_v57 = vrot.slane %v6109_v58, %v15286_v59  ;;  %v6123_v32 = vrot.slane %v4831_v24, %v15286_v59  ;;  %v6137_v52 = vrot.slane %v4833_v51, %v15286_v59  ;;  %v16259_v58 = vpop.f32.mrb[46].mxu0 }
 0x246   :  { %v6074_v7 = vrot.slane %v6067_v21, %v15286_v59  ;;  %v6088_v27 = vrot.slane %v6081_v36, %v15286_v59  ;;  %v6095_v12 = vrot.slane %v4834_v43, %v15286_v59  ;;  %v6151_v8 = vrot.slane %v4835_v62, %v15286_v59 }
 0x247   :  { %v6130_v17 = vrot.slane %v6123_v32, %v15286_v59  ;;  %v6144_v38 = vrot.slane %v6137_v52, %v15286_v59  ;;  %v6977_v45 = vunpack.c.l.b16 %v6060_v14  ;;  %v16257_v49 = vunpack.c.l.b16 %v6116_v57 }
 0x248   :  { %v6102_v24 = vrot.slane %v6095_v12, %v15286_v59  ;;  %v6158_v51 = vrot.slane %v6151_v8, %v15286_v59  ;;  %v6978_v21 = vunpack.c.l.b16 %v6074_v7  ;;  %v6979_v39 = vunpack.c.l.b16 %v6088_v27 }
 0x249   :  { %20584 = vst [vmem:[#allocation59_spill] sm:$0xff] %v16257_v49  ;;  %v16263_v36 = vunpack.c.l.b16 %v6130_v17  ;;  %v16265_v43 = vunpack.c.l.b16 %v6144_v38  ;;  %v7371_v32 = vrot.slane %v6977_v45, 1  ;;  %v4176_v17 = vrot.slane %v3809_v3, 7 }
 0x24a   :  { %v16268_v26 = vunpack.c.l.b16 %v6102_v24  ;;  %v16270_v52 = vunpack.c.l.b16 %v6158_v51  ;;  %v7147_v14 = vrot.slane %v6978_v21, 7  ;;  %v7149_v57 = vrot.slane %v6979_v39, 6 }
 0x24b   :  { %20585 = vst [vmem:[#allocation60_spill] sm:$0xff] %v16263_v36  ;;  %20586 = vst [vmem:[#allocation61_spill] sm:$0xff] %v16265_v43  ;;  %v7372_v30 = vsel %vm3920_vm2, %v6978_v21, %v7371_v32  ;;  %v7373_v12 = vrot.slane %v6979_v39, 7  ;;  %v7743_v7 = vrot.slane %v6978_v21, 1 }
 0x24c   :  { %20587 = vst [vmem:[#allocation62_spill] sm:$0xff] %v16268_v26  ;;  %20588 = vst [vmem:[#allocation63_spill] sm:$0xff] %v16270_v52  ;;  %v7148_v27 = vsel %vm3920_vm2, %v7147_v14, %v6977_v45  ;;  %v20373_v62 = vrot.slane %v16268_v26, 7  ;;  %v717_v14 = vmax.f32 %v16172_v31, 0.0  ;;  %v16318_v52 = vpop.f32.mrb[47].mxu0 }
 0x24d   :  { %v16279_v24 = vsel %vm3923_vm3, %v7149_v57, %v7148_v27  ;;  %v16282_v51 = vsel %vm3923_vm3, %v7373_v12, %v7372_v30  ;;  %v16285_v32 = vsel %vm3920_vm2, %v7373_v12, %v6978_v21  ;;  %v16288_v8 = vsel %vm3920_vm2, %v6979_v39, %v7743_v7 }
 0x24e   :  { %20589 = vst [vmem:[#allocation64_spill] sm:$0xff] %v16279_v24  ;;  %20590 = vst [vmem:[#allocation65_spill] sm:$0xff] %v16282_v51  ;;  %v16295_v38 = vsel %vm3920_vm2, %v20373_v62, %v6979_v39  ;;  %v3811_v57 = vunpack.c.l.b16 %v3303_v53  ;;  %v3812_v27 = vunpack.c.l.b16 %v3304_v18  ;;  %v4178_v30 = vrot.slane %v3810_v0, 6 }
 0x24f   :  { %20591 = vst [vmem:[#allocation66_spill] sm:$0xff] %v16285_v32  ;;  %20592 = vst [vmem:[#allocation67_spill] sm:$0xff] %v16288_v8  ;;  %v1478_v21 = vrot.slane %v16179_v25, %v15279_v44  ;;  %v20594_v7 = vcombine.high %v16179_v25, %v16179_v25  ;;  %v20595_v39 = vcombine.high %v15358_v16, %v15358_v16 }
 0x250   :  { %20593 = vst [vmem:[#allocation68_spill] sm:$0xff] %v16295_v38  ;;  %v4180_v12 = vrot.slane %v3811_v57, 5  ;;  %v4177_v53 = vsel %vm3920_vm2, %v4176_v17, %v16158_v60  ;;  %v4182_v18 = vrot.slane %v3812_v27, 4  ;;  %v14960_v57 = vld [vmem:[%s20310_s3 + $0x138] sm:$0xff]   ;;  %v1437_v31 = vcombine.high %v717_v14, %v717_v14 }
 0x251   :  { %v1485_v45 = vrot.slane %v20594_v7, %v15279_v44  ;;  %v5283_v62 = vrot.slane %v20595_v39, %v15286_v59  ;;  %v1486_v3 = vcombine.high %v1478_v21, %v1478_v21  ;;  %v14088_v0 = vrot.slane %v1478_v21, 9  ;;  %14799 = vmatprep.subr.bf16.mxu0 %v14960_v57 }
 0x252   :  { %v4179_v25 = vsel %vm3923_vm3, %v4178_v30, %v4177_v53  ;;  %v1444_v39 = vrot.slane %v717_v14, %v15279_v44  ;;  %v1451_v27 = vrot.slane %v1437_v31, %v15279_v44  ;;  %14800 = vmatpush3.bf16.msra.mxu0 %v14960_v57 }
 0x253   :  { %v1487_v7 = vcombine.high %v1485_v45, %v1485_v45  ;;  %v14090_v38 = vrot.slane %v1485_v45, 9  ;;  %v4181_v8 = vsel %vm3926_vm4, %v4180_v12, %v4179_v25  ;;  %v14089_v32 = vrot.slane %v1486_v3, 9 }
 0x254   :  { %v3059_v16 = vmax.f32 %v1478_v21, %v14088_v0  ;;  %v4183_v51 = vsel %vm3929_vm5, %v4182_v18, %v4181_v8  ;;  %v1452_v43 = vcombine.high %v1444_v39, %v1444_v39  ;;  %v14080_v36 = vrot.slane %v1444_v39, 9 }
 0x255   :  { %v14091_v60 = vrot.slane %v1487_v7, 9  ;;  %v3061_v17 = vmax.f32 %v1485_v45, %v14090_v38  ;;  %v3060_v30 = vmax.f32 %v1486_v3, %v14089_v32  ;;  %v1453_v25 = vcombine.high %v1451_v27, %v1451_v27 }
 0x256   :  { %v3313_v53 = vpack.c.bf16 %v3059_v16, %v3059_v16  ;;  %v14082_v21 = vrot.slane %v1451_v27, 9  ;;  %v14081_v26 = vrot.slane %v1452_v43, 9  ;;  %v3051_v24 = vmax.f32 %v1444_v39, %v14080_v36 }
 0x257   :  { %v3062_v49 = vmax.f32 %v1487_v7, %v14091_v60  ;;  %v3315_v12 = vpack.c.bf16 %v3061_v17, %v3061_v17  ;;  %v3314_v0 = vpack.c.bf16 %v3060_v30, %v3060_v30  ;;  %v14083_v31 = vrot.slane %v1453_v25, 9 }
 0x258   :  { %v3821_v14 = vunpack.c.l.b16 %v3313_v53  ;;  %v3053_v22 = vmax.f32 %v1451_v27, %v14082_v21  ;;  %v3052_v19 = vmax.f32 %v1452_v43, %v14081_v26  ;;  %v3305_v57 = vpack.c.bf16 %v3051_v24, %v3051_v24 }
 0x259   :  { %v3316_v38 = vpack.c.bf16 %v3062_v49, %v3062_v49  ;;  %v3823_v45 = vunpack.c.l.b16 %v3315_v12  ;;  %v3822_v8 = vunpack.c.l.b16 %v3314_v0  ;;  %v3054_v16 = vmax.f32 %v1453_v25, %v14083_v31 }
 0x25a   :  { %v4198_v18 = vrot.slane %v3821_v14, 3  ;;  %v3307_v7 = vpack.c.bf16 %v3053_v22, %v3053_v22  ;;  %v3306_v17 = vpack.c.bf16 %v3052_v19, %v3052_v19  ;;  %v3813_v6 = vunpack.c.l.b16 %v3305_v57 }
 0x25b   :  { %v16320_v32 = vunpack.c.l.b16 %v3316_v38  ;;  %v4202_v3 = vrot.slane %v3823_v45, 1  ;;  %v4200_v60 = vrot.slane %v3822_v8, 2  ;;  %v5290_v30 = vrot.slane %v5283_v62, %v15286_v59 }
 0x25c   :  { %v3308_v53 = vpack.c.bf16 %v3054_v16, %v3054_v16  ;;  %v3815_v36 = vunpack.c.l.b16 %v3307_v7  ;;  %v20596_v49 = vrot.slane %v15461_v33, %v15286_v59  ;;  %v20597_v26 = vcombine.high %v15464_v47, %v15464_v47 }
 0x25d   :  { %v3814_v24 = vunpack.c.l.b16 %v3306_v17  ;;  %v4184_v27 = vrot.slane %v3813_v6, 3  ;;  %v20598_v19 = vrot.slane %v15570_v13, %v15286_v59  ;;  %v20599_v62 = vrot.slane %v15365_v41, %v15286_v59 }
 0x25e   :  { %v5304_v39 = vrot.slane %v20596_v49, %v15286_v59  ;;  %v5395_v43 = vrot.slane %v20597_v26, %v15286_v59  ;;  %v3816_v25 = vunpack.c.l.b16 %v3308_v53  ;;  %v4188_v33 = vrot.slane %v3815_v36, 1 }
 0x25f   :  { %v5416_v22 = vrot.slane %v20598_v19, %v15286_v59  ;;  %v16338_v12 = vunpack.c.l.b16 %v20599_v62  ;;  %v16341_v0 = vunpack.c.l.b16 %v5290_v30  ;;  %v4185_v47 = vsel %vm3932_vm6, %v4184_v27, %v4183_v51 }
 0x260   :  { %v5402_v21 = vrot.slane %v5395_v43, %v15286_v59  ;;  %v4186_v14 = vrot.slane %v3814_v24, 2  ;;  %v16344_v6 = vunpack.c.l.b16 %v5304_v39  ;;  %v20600_v13 = vrot.slane %v15476_v29, %v15286_v59 }
 0x261   :  { %v20601_v41 = vrot.slane %v16209_v55, 7  ;;  %v16356_v8 = vunpack.c.l.b16 %v5416_v22  ;;  %v7039_v57 = vrot.slane %v15400_v40, 7  ;;  %v20602_v16 = vrot.slane %v16214_v23, 6  ;;  %v20606_v22 = vld [vmem:[#allocation9_spill] sm:$0xff] }
 0x262   :  { %v16349_v38 = vunpack.c.l.b16 %v20600_v13  ;;  %v16354_v31 = vunpack.c.l.b16 %v5402_v21  ;;  %v4187_v51 = vsel %vm3935_vm7, %v4186_v14, %v4185_v47  ;;  %v7041_v29 = vrot.slane %v15403_v54, 6  ;;  %v20608_v47 = vld [vmem:[#allocation11_spill] sm:$0xff] }
 0x263   :  { %v4191_v45 = vsel %vm3920_vm2, %v20601_v41, %v3816_v25  ;;  %v7043_v17 = vrot.slane %v15450_v42, 5  ;;  %v4189_v55 = vsel %vm3938_vm8, %v4188_v33, %v4187_v51  ;;  %v20603_v30 = vrot.slane %v16219_v2, 5  ;;  %v20607_v33 = vld [vmem:[#allocation10_spill] sm:$0xff] }
 0x264   :  { %v4193_v7 = vsel %vm3923_vm3, %v20602_v16, %v4191_v45  ;;  %v20604_v36 = vunpack.c.l.b16 %v15384_v4  ;;  %v7045_v39 = vrot.slane %v15376_v10, 4  ;;  %v20605_v23 = vrot.slane %v16222_v20, 4  ;;  %v20609_v45 = vld [vmem:[#allocation7_spill] sm:$0xff] }
 0x265   :  { %v4195_v53 = vsel %vm3926_vm4, %v20603_v30, %v4193_v7  ;;  %v7047_v24 = vrot.slane %v15396_v37, 3  ;;  %v7049_v27 = vrot.slane %v16338_v12, 2  ;;  %v7051_v4 = vrot.slane %v16341_v0, 1  ;;  %v20610_v30 = vld [vmem:[#allocation8_spill] sm:$0xff] }
 0x266   :  { %v7040_v49 = vsel %vm3920_vm2, %v7039_v57, %v20604_v36  ;;  %v4197_v26 = vsel %vm3929_vm5, %v20605_v23, %v4195_v53  ;;  %v7053_v62 = vrot.slane %v20606_v22, 7  ;;  %v7055_v21 = vrot.slane %v20607_v33, 6 }
 0x267   :  { %v7042_v43 = vsel %vm3923_vm3, %v7041_v29, %v7040_v49  ;;  %v4199_v2 = vsel %vm3932_vm6, %v4198_v18, %v4197_v26  ;;  %v7057_v14 = vrot.slane %v20608_v47, 5  ;;  %v7059_v57 = vrot.slane %v20609_v45, 4  ;;  %v20611_v26 = vld [vmem:[#allocation16_spill] sm:$0xff] }
 0x268   :  { %v7044_v19 = vsel %vm3926_vm4, %v7043_v17, %v7042_v43  ;;  %v4201_v25 = vsel %vm3935_vm7, %v4200_v60, %v4199_v2  ;;  %v7054_v18 = vsel %vm3920_vm2, %v7053_v62, %v16344_v6  ;;  %v7063_v53 = vrot.slane %v16349_v38, 2 }
 0x269   :  { %v7046_v20 = vsel %vm3929_vm5, %v7045_v39, %v7044_v19  ;;  %v4203_v13 = vsel %vm3938_vm8, %v4202_v3, %v4201_v25  ;;  %v7056_v60 = vsel %vm3923_vm3, %v7055_v21, %v7054_v18  ;;  %v7061_v3 = vrot.slane %v20610_v30, 3 }
 0x26a   :  { %v7048_v41 = vsel %vm3932_vm6, %v7047_v24, %v7046_v20  ;;  %v4379_v51 = vpack.c.b16 %v4203_v13, %v4189_v55  ;;  %v14194_v16 = vpack.c.b16 %v4203_v13, %v4203_v13  ;;  %v7058_v17 = vsel %vm3926_vm4, %v7057_v14, %v7056_v60  ;;  %v20612_v24 = vld [vmem:[#allocation6_spill] sm:$0xff] }
 0x26b   :  { %v7050_v7 = vsel %vm3935_vm7, %v7049_v27, %v7048_v41  ;;  %v7060_v55 = vsel %vm3929_vm5, %v7059_v57, %v7058_v17  ;;  %v7065_v39 = vrot.slane %v16354_v31, 1  ;;  %v7067_v43 = vrot.slane %v20611_v26, 7 }
 0x26c   :  { %v16395_v29 = vsel %vm3938_vm8, %v7051_v4, %v7050_v7  ;;  %v4843_v36 = vrot.slane %v4379_v51, %v15286_v59  ;;  %v4850_v49 = vrot.slane %v14194_v16, %v15286_v59  ;;  %v7062_v23 = vsel %vm3932_vm6, %v7061_v3, %v7060_v55 }
 0x26d   :  { %v7264_v27 = vsel %vm3920_vm2, %v15400_v40, %v20612_v24  ;;  %v20389_v2 = vrot.slane %v15403_v54, 7  ;;  %v7064_v20 = vsel %vm3935_vm7, %v7063_v53, %v7062_v23  ;;  %v16415_v21 = vsel %vm3920_vm2, %v7067_v43, %v16356_v8 }
 0x26e   :  { %v4851_v19 = vcombine.high %v4843_v36, %v4843_v36  ;;  %v4852_v4 = vcombine.high %v4850_v49, %v4850_v49  ;;  %v4859_v62 = vrot.slane %v4843_v36, %v15286_v59  ;;  %v4866_v25 = vrot.slane %v4850_v49, %v15286_v59 }
 0x26f   :  { %v7266_v14 = vsel %vm3923_vm3, %v20389_v2, %v7264_v27  ;;  %v20388_v13 = vrot.slane %v15450_v42, 6  ;;  %v16426_v60 = vsel %vm3938_vm8, %v7065_v39, %v7064_v20  ;;  %v7287_v2 = vrot.slane %v16349_v38, 3 }
 0x270   :  { %v4873_v41 = vrot.slane %v4851_v19, %v15286_v59  ;;  %v4880_v18 = vrot.slane %v4852_v4, %v15286_v59  ;;  %v4881_v57 = vcombine.high %v4859_v62, %v4859_v62  ;;  %v4882_v51 = vcombine.high %v4866_v25, %v4866_v25 }
 0x271   :  { %v6165_v16 = vrot.slane %v4859_v62, %v15286_v59  ;;  %v6221_v7 = vrot.slane %v4866_v25, %v15286_v59  ;;  %v7268_v17 = vsel %vm3926_vm4, %v20388_v13, %v7266_v14  ;;  %v7285_v13 = vrot.slane %v20610_v30, 4 }
 0x272   :  { %v4883_v3 = vcombine.high %v4873_v41, %v4873_v41  ;;  %v4884_v53 = vcombine.high %v4880_v18, %v4880_v18  ;;  %v6179_v36 = vrot.slane %v4873_v41, %v15286_v59  ;;  %v6193_v49 = vrot.slane %v4881_v57, %v15286_v59 }
 0x273   :  { %v6172_v55 = vrot.slane %v6165_v16, %v15286_v59  ;;  %v6228_v23 = vrot.slane %v6221_v7, %v15286_v59  ;;  %v6235_v43 = vrot.slane %v4880_v18, %v15286_v59  ;;  %v6249_v24 = vrot.slane %v4882_v51, %v15286_v59 }
 0x274   :  { %v6186_v39 = vrot.slane %v6179_v36, %v15286_v59  ;;  %v6200_v27 = vrot.slane %v6193_v49, %v15286_v59  ;;  %v6207_v19 = vrot.slane %v4883_v3, %v15286_v59  ;;  %v6263_v4 = vrot.slane %v4884_v53, %v15286_v59 }
 0x275   :  { %v6242_v62 = vrot.slane %v6235_v43, %v15286_v59  ;;  %v6256_v25 = vrot.slane %v6249_v24, %v15286_v59  ;;  %v16443_v20 = vunpack.c.l.b16 %v6172_v55  ;;  %v16445_v14 = vunpack.c.l.b16 %v6228_v23 }
 0x276   :  { %v6214_v41 = vrot.slane %v6207_v19, %v15286_v59  ;;  %v6270_v18 = vrot.slane %v6263_v4, %v15286_v59  ;;  %v16449_v57 = vunpack.c.l.b16 %v6186_v39  ;;  %v16451_v51 = vunpack.c.l.b16 %v6200_v27 }
 0x277   :  { %20613 = vst [vmem:[#allocation9_spill] sm:$0xff] %v16443_v20  ;;  %20614 = vst [vmem:[#allocation10_spill] sm:$0xff] %v16445_v14  ;;  %v16453_v16 = vunpack.c.l.b16 %v6242_v62  ;;  %v16455_v7 = vunpack.c.l.b16 %v6256_v25  ;;  %v7269_v53 = vrot.slane %v15376_v10, 5  ;;  %v7271_v3 = vrot.slane %v15396_v37, 4 }
 0x278   :  { %20615 = vst [vmem:[#allocation11_spill] sm:$0xff] %v16449_v57  ;;  %20616 = vst [vmem:[#allocation7_spill] sm:$0xff] %v16451_v51  ;;  %v16459_v36 = vunpack.c.l.b16 %v6214_v41  ;;  %v16461_v49 = vunpack.c.l.b16 %v6270_v18  ;;  %v7161_v55 = vrot.slane %v16449_v57, 7  ;;  %v7163_v23 = vrot.slane %v16451_v51, 6 }
 0x279   :  { %20617 = vst [vmem:[#allocation8_spill] sm:$0xff] %v16453_v16  ;;  %20618 = vst [vmem:[#allocation16_spill] sm:$0xff] %v16455_v7  ;;  %v20386_v43 = vrot.slane %v16451_v51, 7  ;;  %v7273_v62 = vrot.slane %v16338_v12, 3  ;;  %v7270_v4 = vsel %vm3929_vm5, %v7269_v53, %v7268_v17  ;;  %v7281_v27 = vrot.slane %v20608_v47, 6 }
 0x27a   :  { %20619 = vst [vmem:[#allocation6_spill] sm:$0xff] %v16459_v36  ;;  %20620 = vst [vmem:[#allocation69_spill] sm:$0xff] %v16461_v49  ;;  %v7162_v19 = vsel %vm3920_vm2, %v7161_v55, %v16443_v20  ;;  %v20387_v25 = vrot.slane %v16459_v36, 7  ;;  %v7283_v39 = vrot.slane %v20609_v45, 5  ;;  %v7272_v24 = vsel %vm3932_vm6, %v7271_v3, %v7270_v4  ;;  %v20624_v4 = vld [vmem:[#allocation17_spill] sm:$0xff] }
 0x27b   :  { %v16475_v41 = vsel %vm3923_vm3, %v7163_v23, %v7162_v19  ;;  %v16481_v18 = vsel %vm3920_vm2, %v20386_v43, %v16449_v57  ;;  %v7275_v23 = vrot.slane %v16341_v0, 2  ;;  %v7277_v19 = vrot.slane %v16344_v6, 1 }
 0x27c   :  { %20621 = vst [vmem:[#allocation70_spill] sm:$0xff] %v16475_v41  ;;  %20622 = vst [vmem:[#allocation71_spill] sm:$0xff] %v16481_v18  ;;  %v16489_v55 = vsel %vm3920_vm2, %v20387_v25, %v16451_v51  ;;  %v7279_v43 = vrot.slane %v20607_v33, 7  ;;  %v7274_v18 = vsel %vm3935_vm7, %v7273_v62, %v7272_v24  ;;  %v7289_v17 = vrot.slane %v16354_v31, 2 }
 0x27d   :  { %20623 = vst [vmem:[#allocation72_spill] sm:$0xff] %v16489_v55  ;;  %v7278_v25 = vsel %vm3920_vm2, %v20606_v22, %v7277_v19  ;;  %v7291_v41 = vrot.slane %v16356_v8, 1  ;;  %v7276_v7 = vsel %vm3938_vm8, %v7275_v23, %v7274_v18  ;;  %v20411_v14 = vrot.slane %v20624_v4, 7 }
 0x27e   :  { %v7280_v36 = vsel %vm3923_vm3, %v7279_v43, %v7278_v25  ;;  %v20625_v55 = vrot.slane %v15403_v54, 7  ;;  %v20626_v25 = vrot.slane %v15450_v42, 6  ;;  %v7524_v18 = vsel %vm3920_vm2, %v7279_v43, %v20606_v22 }
 0x27f   :  { %v7282_v16 = vsel %vm3926_vm4, %v7281_v27, %v7280_v36  ;;  %v7292_v24 = vsel %vm3920_vm2, %v20611_v26, %v7291_v41 }
 0x280   :  { %v7517_v51 = vsel %vm3920_vm2, %v20625_v55, %v15400_v40  ;;  %v7284_v49 = vsel %vm3929_vm5, %v7283_v39, %v7282_v16  ;;  %v16526_v20 = vsel %vm3923_vm3, %v20411_v14, %v7292_v24  ;;  %v7525_v16 = vsel %vm3923_vm3, %v7281_v27, %v7524_v18 }
 0x281   :  { %v7518_v57 = vsel %vm3923_vm3, %v20626_v25, %v7517_v51  ;;  %v7286_v36 = vsel %vm3932_vm6, %v7285_v13, %v7284_v49  ;;  %v7526_v51 = vsel %vm3926_vm4, %v7283_v39, %v7525_v16  ;;  %v7635_v25 = vrot.slane %v15400_v40, 1 }
 0x282   :  { %v7519_v55 = vsel %vm3926_vm4, %v7269_v53, %v7518_v57  ;;  %v7288_v34 = vsel %vm3935_vm7, %v7287_v2, %v7286_v36  ;;  %v7527_v9 = vsel %vm3929_vm5, %v7285_v13, %v7526_v51  ;;  %v7637_v24 = vrot.slane %v15450_v42, 7  ;;  %v20627_v51 = vld [vmem:[#allocation18_spill] sm:$0xff] }
 0x283   :  { %v7520_v15 = vsel %vm3929_vm5, %v7271_v3, %v7519_v55  ;;  %v7290_v43 = vsel %vm3938_vm8, %v7289_v17, %v7288_v34  ;;  %v7528_v53 = vsel %vm3932_vm6, %v7287_v2, %v7527_v9  ;;  %v7636_v27 = vsel %vm3920_vm2, %v15403_v54, %v7635_v25 }
 0x284   :  { %v7521_v49 = vsel %vm3932_vm6, %v7273_v62, %v7520_v15  ;;  %v7639_v3 = vrot.slane %v15376_v10, 6  ;;  %v7529_v40 = vsel %vm3935_vm7, %v7289_v17, %v7528_v53  ;;  %v7638_v34 = vsel %vm3923_vm3, %v7637_v24, %v7636_v27 }
 0x285   :  { %v7522_v57 = vsel %vm3935_vm7, %v7275_v23, %v7521_v49  ;;  %v7641_v15 = vrot.slane %v15396_v37, 5  ;;  %v7530_v13 = vsel %vm3938_vm8, %v7291_v41, %v7529_v40  ;;  %v7643_v62 = vrot.slane %v16338_v12, 4 }
 0x286   :  { %v7523_v39 = vsel %vm3938_vm8, %v7277_v19, %v7522_v57  ;;  %v7640_v42 = vsel %vm3926_vm4, %v7639_v3, %v7638_v34  ;;  %v7645_v9 = vrot.slane %v16341_v0, 3  ;;  %v7647_v10 = vrot.slane %v16344_v6, 2 }
 0x287   :  { %v7642_v2 = vsel %vm3929_vm5, %v7641_v15, %v7640_v42  ;;  %v7649_v23 = vrot.slane %v20606_v22, 1  ;;  %v7651_v19 = vrot.slane %v20608_v47, 7  ;;  %v7653_v37 = vrot.slane %v20609_v45, 6 }
 0x288   :  { %v7644_v17 = vsel %vm3932_vm6, %v7643_v62, %v7642_v2  ;;  %v7655_v41 = vrot.slane %v20610_v30, 5  ;;  %v7657_v18 = vrot.slane %v16349_v38, 4  ;;  %v7659_v36 = vrot.slane %v16354_v31, 3 }
 0x289   :  { %v7646_v12 = vsel %vm3935_vm7, %v7645_v9, %v7644_v17  ;;  %v7650_v0 = vsel %vm3920_vm2, %v20607_v33, %v7649_v23  ;;  %v7661_v6 = vrot.slane %v16356_v8, 2  ;;  %v14200_v55 = vpack.c.b16 %v7276_v7, %v16395_v29 }
 0x28a   :  { %v7648_v22 = vsel %vm3938_vm8, %v7647_v10, %v7646_v12  ;;  %v7652_v47 = vsel %vm3923_vm3, %v7651_v19, %v7650_v0  ;;  %v14201_v45 = vpack.c.b16 %v7290_v43, %v16426_v60  ;;  %v7663_v16 = vrot.slane %v20611_v26, 1 }
 0x28b   :  { %v7654_v30 = vsel %vm3926_vm4, %v7653_v37, %v7652_v47  ;;  %v14202_v38 = vpack.c.b16 %v7648_v22, %v7523_v39  ;;  %v7665_v25 = vrot.slane %v20627_v51, 7  ;;  %v8018_v31 = vrot.slane %v14200_v55, %v15286_v59 }
 0x28c   :  { %v7656_v49 = vsel %vm3929_vm5, %v7655_v41, %v7654_v30  ;;  %v8025_v8 = vrot.slane %v14201_v45, %v15286_v59  ;;  %v7889_v57 = vsel %vm3920_vm2, %v7637_v24, %v15403_v54  ;;  %v7664_v7 = vsel %vm3920_vm2, %v20624_v4, %v7663_v16 }
 0x28d   :  { %v7658_v29 = vsel %vm3932_vm6, %v7657_v18, %v7656_v49  ;;  %v8032_v60 = vrot.slane %v14202_v38, %v15286_v59  ;;  %v7890_v43 = vsel %vm3923_vm3, %v7639_v3, %v7889_v57  ;;  %v16583_v27 = vsel %vm3923_vm3, %v7665_v25, %v7664_v7 }
 0x28e   :  { %v7660_v53 = vsel %vm3935_vm7, %v7659_v36, %v7658_v29  ;;  %v7891_v39 = vsel %vm3926_vm4, %v7641_v15, %v7890_v43  ;;  %v7896_v40 = vsel %vm3920_vm2, %v7651_v19, %v20607_v33  ;;  %v16594_v12 = vsel %vm3920_vm2, %v7665_v25, %v20624_v4 }
 0x28f   :  { %v7662_v54 = vsel %vm3938_vm8, %v7661_v6, %v7660_v53  ;;  %v8054_v24 = vcombine.low %v8018_v31, %v8032_v60  ;;  %v8055_v34 = vcombine.high %v8018_v31, %v8032_v60  ;;  %v7892_v42 = vsel %vm3929_vm5, %v7643_v62, %v7891_v39 }
 0x290   :  { %v14203_v2 = vpack.c.b16 %v7662_v54, %v7530_v13  ;;  %v7893_v17 = vsel %vm3932_vm6, %v7645_v9, %v7892_v42  ;;  %v7897_v3 = vsel %vm3923_vm3, %v7653_v37, %v7896_v40  ;;  %v16606_v9 = vld [vmem:[%s20309_s2] ss:$0 sm:$0xff] }
 0x291   :  { %v8066_v15 = vrot.slane %v8054_v24, %v15286_v59  ;;  %v8080_v0 = vrot.slane %v8055_v34, %v15286_v59  ;;  %v7894_v33 = vsel %vm3935_vm7, %v7647_v10, %v7893_v17  ;;  %v7898_v19 = vsel %vm3926_vm4, %v7655_v41, %v7897_v3 }
 0x292   :  { %v8039_v22 = vrot.slane %v14203_v2, %v15286_v59  ;;  %v7895_v13 = vsel %vm3938_vm8, %v7649_v23, %v7894_v33  ;;  %v7899_v62 = vsel %vm3929_vm5, %v7657_v18, %v7898_v19  ;;  %v594_v37 = vadd.f32 %v16606_v9, %v16143_v11 }
 0x293   :  { %v14241_v47 = vcombine.low %v8066_v15, %v8080_v0  ;;  %v14243_v55 = vcombine.high %v8066_v15, %v8080_v0  ;;  %v7900_v10 = vsel %vm3932_vm6, %v7659_v36, %v7899_v62  ;;  %v586_v41 = vadd.f32 %v16606_v9, %v16147_v35 }
 0x294   :  { %v8056_v45 = vcombine.low %v8025_v8, %v8039_v22  ;;  %v8057_v30 = vcombine.high %v8025_v8, %v8039_v22  ;;  %v7901_v23 = vsel %vm3935_vm7, %v7661_v6, %v7900_v10  ;;  %v722_v18 = vmax.f32 %v594_v37, 0.0 }
 0x295   :  { %v9042_v38 = vrot.slane %v14241_v47, %v15286_v59  ;;  %v9056_v25 = vrot.slane %v14243_v55, %v15286_v59  ;;  %v7902_v49 = vsel %vm3938_vm8, %v7663_v16, %v7901_v23  ;;  %v16617_v31 = vmax.f32 %v586_v41, 0.0 }
 0x296   :  { %v8073_v11 = vrot.slane %v8056_v45, %v15286_v59  ;;  %v8087_v36 = vrot.slane %v8057_v30, %v15286_v59  ;;  %v7999_v57 = vpack.c.b16 %v7902_v49, %v7895_v13  ;;  %v14204_v29 = vpack.c.b16 %v7902_v49, %v7902_v49 }
 0x297   :  { %v9093_v35 = vcombine.high %v9042_v38, %v9056_v25  ;;  %v9092_v60 = vcombine.low %v9042_v38, %v9056_v25  ;;  %v1522_v8 = vcombine.high %v722_v18, %v722_v18  ;;  %v1529_v6 = vrot.slane %v722_v18, %v15279_v44 }
 0x298   :  { %v14245_v7 = vcombine.low %v8073_v11, %v8087_v36  ;;  %v14247_v43 = vcombine.high %v8073_v11, %v8087_v36  ;;  %v8046_v53 = vrot.slane %v7999_v57, %v15286_v59  ;;  %v8053_v39 = vrot.slane %v14204_v29, %v15286_v59 }
 0x299   :  { %v16625_v16 = vrot.slane %v9093_v35, %v15286_v59  ;;  %v16628_v40 = vrot.slane %v9092_v60, %v15286_v59  ;;  %v1536_v54 = vrot.slane %v1522_v8, %v15279_v44  ;;  %v1537_v24 = vcombine.high %v1529_v6, %v1529_v6 }
 0x29a   :  { %v9070_v34 = vrot.slane %v14245_v7, %v15286_v59  ;;  %v9084_v42 = vrot.slane %v14247_v43, %v15286_v59  ;;  %v8058_v2 = vcombine.high %v8046_v53, %v8046_v53  ;;  %v8059_v17 = vcombine.high %v8053_v39, %v8053_v39 }
 0x29b   :  { %20628 = vst [vmem:[#allocation17_spill] sm:$0xff] %v16625_v16  ;;  %20629 = vst [vmem:[#allocation18_spill] sm:$0xff] %v16628_v40  ;;  %v8094_v3 = vrot.slane %v8046_v53, %v15286_v59  ;;  %v8101_v15 = vrot.slane %v8053_v39, %v15286_v59  ;;  %v1538_v0 = vcombine.high %v1536_v54, %v1536_v54  ;;  %v14100_v33 = vrot.slane %v1529_v6, 9 }
 0x29c   :  { %v9096_v19 = vcombine.high %v9070_v34, %v9084_v42  ;;  %v9095_v22 = vcombine.low %v9070_v34, %v9084_v42  ;;  %v8108_v13 = vrot.slane %v8058_v2, %v15286_v59  ;;  %v8115_v62 = vrot.slane %v8059_v17, %v15286_v59 }
 0x29d   :  { %v14101_v37 = vrot.slane %v1537_v24, 9  ;;  %v14102_v47 = vrot.slane %v1536_v54, 9  ;;  %v14103_v55 = vrot.slane %v1538_v0, 9  ;;  %v3071_v10 = vmax.f32 %v1529_v6, %v14100_v33 }
 0x29e   :  { %v16638_v41 = vrot.slane %v9096_v19, %v15286_v59  ;;  %v16641_v45 = vrot.slane %v9095_v22, %v15286_v59  ;;  %v14242_v30 = vcombine.low %v8094_v3, %v8108_v13  ;;  %v14244_v23 = vcombine.high %v8094_v3, %v8108_v13 }
 0x29f   :  { %v14246_v18 = vcombine.low %v8101_v15, %v8115_v62  ;;  %v14248_v38 = vcombine.high %v8101_v15, %v8115_v62  ;;  %v3072_v25 = vmax.f32 %v1537_v24, %v14101_v37  ;;  %v3073_v49 = vmax.f32 %v1536_v54, %v14102_v47 }
 0x2a0   :  { %20630 = vst [vmem:[#allocation73_spill] sm:$0xff] %v16638_v41  ;;  %20631 = vst [vmem:[#allocation74_spill] sm:$0xff] %v16641_v45  ;;  %v9143_v11 = vcombine.low %v16625_v16, %v16638_v41  ;;  %v9140_v36 = vcombine.low %v16628_v40, %v16641_v45  ;;  %v9049_v29 = vrot.slane %v14242_v30, %v15286_v59 }
 0x2a1   :  { %v9063_v35 = vrot.slane %v14244_v23, %v15286_v59  ;;  %v9077_v60 = vrot.slane %v14246_v18, %v15286_v59  ;;  %v9091_v8 = vrot.slane %v14248_v38, %v15286_v59  ;;  %v3074_v6 = vmax.f32 %v1538_v0, %v14103_v55  ;;  %v16664_v0 = vpop.f32.mrb[48].mxu0 }
 0x2a2   :  { %10258 = vmatprep.mubr.bf16.mxu1 %v9143_v11  ;;  %v3325_v7 = vpack.c.bf16 %v3071_v10, %v3071_v10  ;;  %v3326_v43 = vpack.c.bf16 %v3072_v25, %v3072_v25  ;;  %v3327_v53 = vpack.c.bf16 %v3073_v49, %v3073_v49  ;;  %v1488_v39 = vcombine.high %v16617_v31, %v16617_v31  ;;  %v16670_v62 = vpop.f32.mrb[49].mxu0 }
 0x2a3   :  { %10259 = vmatmul.mubr.bf16.vlgmr.msra.gmra.mrb[0].mxu1 %v9140_v36  ;;  %v9094_v54 = vcombine.low %v9049_v29, %v9063_v35  ;;  %v9097_v24 = vcombine.low %v9077_v60, %v9091_v8  ;;  %v3328_v34 = vpack.c.bf16 %v3074_v6, %v3074_v6  ;;  %v1495_v42 = vrot.slane %v16617_v31, %v15279_v44 }
 0x2a4   :  { %v16657_v2 = vunpack.c.l.b16 %v3325_v7  ;;  %v16659_v17 = vunpack.c.l.b16 %v3326_v43  ;;  %v16661_v3 = vunpack.c.l.b16 %v3327_v53  ;;  %v1502_v15 = vrot.slane %v1488_v39, %v15279_v44 }
 0x2a5   :  { %v9111_v33 = vrot.slane %v9094_v54, %v15286_v59  ;;  %v9132_v19 = vrot.slane %v9097_v24, %v15286_v59  ;;  %v16668_v22 = vunpack.c.l.b16 %v3328_v34  ;;  %v1503_v13 = vcombine.high %v1495_v42, %v1495_v42 }
 0x2a6   :  { %v4218_v31 = vrot.slane %v16657_v2, 7  ;;  %v4220_v37 = vrot.slane %v16659_v17, 6  ;;  %v1504_v55 = vcombine.high %v1502_v15, %v1502_v15  ;;  %v14092_v23 = vrot.slane %v1495_v42, 9 }
 0x2a7   :  { %v9142_v10 = vcombine.low %v9111_v33, %v9132_v19  ;;  %v14093_v18 = vrot.slane %v1503_v13, 9  ;;  %v14094_v38 = vrot.slane %v1502_v15, 9  ;;  %v597_v49 = vadd.f32 %v16606_v9, %v16174_v46 }
 0x2a8   :  { %v14095_v25 = vrot.slane %v1504_v55, 9  ;;  %v589_v11 = vadd.f32 %v16606_v9, %v16177_v1  ;;  %v3063_v36 = vmax.f32 %v1495_v42, %v14092_v23  ;;  %v610_v35 = vadd.f32 %v16606_v9, %v16190_v50 }
 0x2a9   :  { %14801 = vmatprep.mubr.bf16.mxu0 %v9142_v10  ;;  %v3064_v29 = vmax.f32 %v1503_v13, %v14093_v18  ;;  %v602_v60 = vadd.f32 %v16606_v9, %v16196_v56  ;;  %v3065_v8 = vmax.f32 %v1502_v15, %v14094_v38  ;;  %v723_v7 = vmax.f32 %v597_v49, 0.0  ;;  %v16692_v49 = vpop.f32.mrb[50].mxu0 }
 0x2aa   :  { %v3066_v6 = vmax.f32 %v1504_v55, %v14095_v25  ;;  %v721_v43 = vmax.f32 %v589_v11, 0.0  ;;  %v3317_v53 = vpack.c.bf16 %v3063_v36, %v3063_v36  ;;  %v16684_v54 = vmax.f32 %v610_v35, 0.0 }
 0x2ab   :  { %v3318_v39 = vpack.c.bf16 %v3064_v29, %v3064_v29  ;;  %v16686_v46 = vmax.f32 %v602_v60, 0.0  ;;  %v3319_v1 = vpack.c.bf16 %v3065_v8, %v3065_v8  ;;  %v1539_v34 = vcombine.high %v723_v7, %v723_v7  ;;  %v16694_v60 = vpop.f32.mrb[51].mxu0 }
 0x2ac   :  { %v3320_v24 = vpack.c.bf16 %v3066_v6, %v3066_v6  ;;  %v1546_v42 = vrot.slane %v723_v7, %v15279_v44  ;;  %v3825_v33 = vunpack.c.l.b16 %v3317_v53  ;;  %v1505_v19 = vcombine.high %v721_v43, %v721_v43 }
 0x2ad   :  { %v3826_v50 = vunpack.c.l.b16 %v3318_v39  ;;  %v1512_v56 = vrot.slane %v721_v43, %v15279_v44  ;;  %v3827_v15 = vunpack.c.l.b16 %v3319_v1  ;;  %v1553_v55 = vrot.slane %v1539_v34, %v15279_v44 }
 0x2ae   :  { %v3828_v13 = vunpack.c.l.b16 %v3320_v24  ;;  %v1554_v10 = vcombine.high %v1546_v42, %v1546_v42  ;;  %v4204_v23 = vrot.slane %v3825_v33, 7  ;;  %v14104_v38 = vrot.slane %v1546_v42, 9 }
 0x2af   :  { %v4206_v18 = vrot.slane %v3826_v50, 6  ;;  %v1519_v25 = vrot.slane %v1505_v19, %v15279_v44  ;;  %v4208_v11 = vrot.slane %v3827_v15, 5  ;;  %v1555_v29 = vcombine.high %v1553_v55, %v1553_v55 }
 0x2b0   :  { %v4210_v36 = vrot.slane %v3828_v13, 4  ;;  %v14105_v35 = vrot.slane %v1554_v10, 9  ;;  %v4205_v8 = vsel %vm3920_vm2, %v4204_v23, %v16320_v32  ;;  %v14106_v6 = vrot.slane %v1553_v55, 9 }
 0x2b1   :  { %v3075_v7 = vmax.f32 %v1546_v42, %v14104_v38  ;;  %v1520_v43 = vcombine.high %v1512_v56, %v1512_v56  ;;  %v4207_v53 = vsel %vm3923_vm3, %v4206_v18, %v4205_v8  ;;  %v14107_v39 = vrot.slane %v1555_v29, 9  ;;  %v16700_v42 = vpop.f32.mrb[52].mxu0 }
 0x2b2   :  { %v3076_v1 = vmax.f32 %v1554_v10, %v14105_v35  ;;  %v1521_v24 = vcombine.high %v1519_v25, %v1519_v25  ;;  %v4209_v34 = vsel %vm3926_vm4, %v4208_v11, %v4207_v53  ;;  %v3077_v33 = vmax.f32 %v1553_v55, %v14106_v6  ;;  %v16702_v35 = vpop.f32.mrb[53].mxu0 }
 0x2b3   :  { %v3329_v50 = vpack.c.bf16 %v3075_v7, %v3075_v7  ;;  %v14096_v19 = vrot.slane %v1512_v56, 9  ;;  %v3078_v15 = vmax.f32 %v1555_v29, %v14107_v39  ;;  %v14097_v57 = vrot.slane %v1520_v43, 9 }
 0x2b4   :  { %v3330_v13 = vpack.c.bf16 %v3076_v1, %v3076_v1  ;;  %v14098_v14 = vrot.slane %v1519_v25, 9  ;;  %v3331_v30 = vpack.c.bf16 %v3077_v33, %v3077_v33  ;;  %v14099_v32 = vrot.slane %v1521_v24, 9 }
 0x2b5   :  { %v3837_v47 = vunpack.c.l.b16 %v3329_v50  ;;  %v3067_v23 = vmax.f32 %v1512_v56, %v14096_v19  ;;  %v3332_v38 = vpack.c.bf16 %v3078_v15, %v3078_v15  ;;  %v3068_v8 = vmax.f32 %v1520_v43, %v14097_v57 }
 0x2b6   :  { %v3838_v18 = vunpack.c.l.b16 %v3330_v13  ;;  %v3069_v10 = vmax.f32 %v1519_v25, %v14098_v14  ;;  %v3839_v11 = vunpack.c.l.b16 %v3331_v30  ;;  %v3070_v6 = vmax.f32 %v1521_v24, %v14099_v32 }
 0x2b7   :  { %v4226_v55 = vrot.slane %v3837_v47, 3  ;;  %v3321_v7 = vpack.c.bf16 %v3067_v23, %v3067_v23  ;;  %v16704_v29 = vunpack.c.l.b16 %v3332_v38  ;;  %v3322_v39 = vpack.c.bf16 %v3068_v8, %v3068_v8 }
 0x2b8   :  { %v4228_v53 = vrot.slane %v3838_v18, 2  ;;  %v3323_v1 = vpack.c.bf16 %v3069_v10, %v3069_v10  ;;  %v4230_v33 = vrot.slane %v3839_v11, 1  ;;  %v3324_v50 = vpack.c.bf16 %v3070_v6, %v3070_v6 }
 0x2b9   :  { %v3829_v56 = vunpack.c.l.b16 %v3321_v7  ;;  %v4211_v19 = vsel %vm3929_vm5, %v4210_v36, %v4209_v34  ;;  %v3830_v15 = vunpack.c.l.b16 %v3322_v39  ;;  %v1590_v14 = vcombine.high %v16684_v54, %v16684_v54 }
 0x2ba   :  { %v3831_v13 = vunpack.c.l.b16 %v3323_v1  ;;  %v1597_v57 = vrot.slane %v16684_v54, %v15279_v44  ;;  %v3832_v47 = vunpack.c.l.b16 %v3324_v50  ;;  %v1556_v25 = vcombine.high %v16686_v46, %v16686_v46 }
 0x2bb   :  { %v4212_v30 = vrot.slane %v3829_v56, 3  ;;  %v1563_v43 = vrot.slane %v16686_v46, %v15279_v44  ;;  %v4214_v24 = vrot.slane %v3830_v15, 2  ;;  %v1604_v36 = vrot.slane %v1590_v14, %v15279_v44 }
 0x2bc   :  { %v4216_v32 = vrot.slane %v3831_v13, 1  ;;  %v1605_v34 = vcombine.high %v1597_v57, %v1597_v57  ;;  %v4219_v38 = vsel %vm3920_vm2, %v4218_v31, %v3832_v47  ;;  %v14116_v54 = vrot.slane %v1597_v57, 9 }
 0x2bd   :  { %v4213_v23 = vsel %vm3932_vm6, %v4212_v30, %v4211_v19  ;;  %v1570_v18 = vrot.slane %v1556_v25, %v15279_v44  ;;  %v4221_v46 = vsel %vm3923_vm3, %v4220_v37, %v4219_v38  ;;  %v1606_v10 = vcombine.high %v1604_v36, %v1604_v36 }
 0x2be   :  { %v4215_v8 = vsel %vm3935_vm7, %v4214_v24, %v4213_v23  ;;  %v14117_v11 = vrot.slane %v1605_v34, 9  ;;  %v20632_v7 = vrot.slane %v16661_v3, 5  ;;  %v14118_v2 = vrot.slane %v1604_v36, 9 }
 0x2bf   :  { %v4217_v6 = vsel %vm3938_vm8, %v4216_v32, %v4215_v8  ;;  %v3087_v1 = vmax.f32 %v1597_v57, %v14116_v54  ;;  %v20633_v31 = vrot.slane %v16668_v22, 4  ;;  %v14119_v56 = vrot.slane %v1606_v10, 9 }
 0x2c0   :  { %v4223_v39 = vsel %vm3926_vm4, %v20632_v7, %v4221_v46  ;;  %v3088_v19 = vmax.f32 %v1605_v34, %v14117_v11  ;;  %v1571_v15 = vcombine.high %v1563_v43, %v1563_v43  ;;  %v3089_v37 = vmax.f32 %v1604_v36, %v14118_v2  ;;  %v16747_v7 = vpop.f32.mrb[54].mxu0 }
 0x2c1   :  { %v4225_v50 = vsel %vm3929_vm5, %v20633_v31, %v4223_v39  ;;  %v3341_v13 = vpack.c.bf16 %v3087_v1, %v3087_v1  ;;  %v1572_v14 = vcombine.high %v1570_v18, %v1570_v18  ;;  %v3090_v30 = vmax.f32 %v1606_v10, %v14119_v56 }
 0x2c2   :  { %v4227_v17 = vsel %vm3932_vm6, %v4226_v55, %v4225_v50  ;;  %v3342_v3 = vpack.c.bf16 %v3088_v19, %v3088_v19  ;;  %v14108_v25 = vrot.slane %v1563_v43, 9  ;;  %v3343_v57 = vpack.c.bf16 %v3089_v37, %v3089_v37 }
 0x2c3   :  { %v4229_v47 = vsel %vm3935_vm7, %v4228_v53, %v4227_v17  ;;  %v16735_v32 = vunpack.c.l.b16 %v3341_v13  ;;  %v14109_v22 = vrot.slane %v1571_v15, 9  ;;  %v3344_v34 = vpack.c.bf16 %v3090_v30, %v3090_v30 }
 0x2c4   :  { %v4231_v24 = vsel %vm3938_vm8, %v4230_v33, %v4229_v47  ;;  %v16737_v54 = vunpack.c.l.b16 %v3342_v3  ;;  %v16739_v55 = vunpack.c.l.b16 %v3343_v57  ;;  %v14110_v8 = vrot.slane %v1570_v18, 9 }
 0x2c5   :  { %v4380_v23 = vpack.c.b16 %v4231_v24, %v4217_v6  ;;  %v14195_v38 = vpack.c.b16 %v4231_v24, %v4231_v24  ;;  %v14111_v53 = vrot.slane %v1572_v14, 9  ;;  %v16744_v33 = vunpack.c.l.b16 %v3344_v34  ;;  %v20646_v6 = vld [vmem:[#allocation20_spill] sm:$0xff] }
 0x2c6   :  { %v3079_v39 = vmax.f32 %v1563_v43, %v14108_v25  ;;  %v3080_v2 = vmax.f32 %v1571_v15, %v14109_v22  ;;  %v3081_v1 = vmax.f32 %v1570_v18, %v14110_v8 }
 0x2c7   :  { %v4892_v46 = vrot.slane %v4380_v23, %v15286_v59  ;;  %v4899_v10 = vrot.slane %v14195_v38, %v15286_v59  ;;  %v3082_v37 = vmax.f32 %v1572_v14, %v14111_v53 }
 0x2c8   :  { %v3333_v13 = vpack.c.bf16 %v3079_v39, %v3079_v39  ;;  %v3334_v47 = vpack.c.bf16 %v3080_v2, %v3080_v2  ;;  %v3335_v15 = vpack.c.bf16 %v3081_v1, %v3081_v1 }
 0x2c9   :  { %v4900_v31 = vcombine.high %v4892_v46, %v4892_v46  ;;  %v4901_v50 = vcombine.high %v4899_v10, %v4899_v10  ;;  %v4908_v56 = vrot.slane %v4892_v46, %v15286_v59  ;;  %v4915_v19 = vrot.slane %v4899_v10, %v15286_v59 }
 0x2ca   :  { %v3336_v25 = vpack.c.bf16 %v3082_v37, %v3082_v37  ;;  %v16773_v37 = vpop.f32.mrb[55].mxu0 }
 0x2cb   :  { %v4922_v30 = vrot.slane %v4900_v31, %v15286_v59  ;;  %v4929_v3 = vrot.slane %v4901_v50, %v15286_v59  ;;  %v4930_v24 = vcombine.high %v4908_v56, %v4908_v56  ;;  %v4931_v57 = vcombine.high %v4915_v19, %v4915_v19 }
 0x2cc   :  { %v6277_v43 = vrot.slane %v4908_v56, %v15286_v59  ;;  %v6333_v18 = vrot.slane %v4915_v19, %v15286_v59 }
 0x2cd   :  { %v4932_v22 = vcombine.high %v4922_v30, %v4922_v30  ;;  %v4933_v23 = vcombine.high %v4929_v3, %v4929_v3  ;;  %v6291_v38 = vrot.slane %v4922_v30, %v15286_v59  ;;  %v6305_v14 = vrot.slane %v4930_v24, %v15286_v59 }
 0x2ce   :  { %v6284_v34 = vrot.slane %v6277_v43, %v15286_v59  ;;  %v6340_v8 = vrot.slane %v6333_v18, %v15286_v59  ;;  %v6347_v53 = vrot.slane %v4929_v3, %v15286_v59  ;;  %v6361_v46 = vrot.slane %v4931_v57, %v15286_v59 }
 0x2cf   :  { %v6298_v10 = vrot.slane %v6291_v38, %v15286_v59  ;;  %v6312_v39 = vrot.slane %v6305_v14, %v15286_v59  ;;  %v6319_v2 = vrot.slane %v4932_v22, %v15286_v59  ;;  %v6375_v1 = vrot.slane %v4933_v23, %v15286_v59 }
 0x2d0   :  { %v6354_v31 = vrot.slane %v6347_v53, %v15286_v59  ;;  %v6368_v50 = vrot.slane %v6361_v46, %v15286_v59  ;;  %v16769_v56 = vunpack.c.l.b16 %v6284_v34  ;;  %v16771_v19 = vunpack.c.l.b16 %v6340_v8 }
 0x2d1   :  { %v6326_v30 = vrot.slane %v6319_v2, %v15286_v59  ;;  %v6382_v3 = vrot.slane %v6375_v1, %v15286_v59  ;;  %v16777_v24 = vunpack.c.l.b16 %v6298_v10  ;;  %v16779_v57 = vunpack.c.l.b16 %v6312_v39 }
 0x2d2   :  { %20634 = vst [vmem:[#allocation75_spill] sm:$0xff] %v16769_v56  ;;  %20635 = vst [vmem:[#allocation76_spill] sm:$0xff] %v16771_v19  ;;  %v16781_v43 = vunpack.c.l.b16 %v6354_v31  ;;  %v16783_v18 = vunpack.c.l.b16 %v6368_v50  ;;  %v3841_v10 = vunpack.c.l.b16 %v3333_v13  ;;  %v3842_v39 = vunpack.c.l.b16 %v3334_v47 }
 0x2d3   :  { %20636 = vst [vmem:[#allocation77_spill] sm:$0xff] %v16777_v24  ;;  %20637 = vst [vmem:[#allocation78_spill] sm:$0xff] %v16779_v57  ;;  %v16787_v38 = vunpack.c.l.b16 %v6326_v30  ;;  %v16789_v14 = vunpack.c.l.b16 %v6382_v3  ;;  %v7175_v34 = vrot.slane %v16777_v24, 7  ;;  %v7177_v8 = vrot.slane %v16779_v57, 6 }
 0x2d4   :  { %20638 = vst [vmem:[#allocation79_spill] sm:$0xff] %v16781_v43  ;;  %20639 = vst [vmem:[#allocation80_spill] sm:$0xff] %v16783_v18  ;;  %v20412_v53 = vrot.slane %v16779_v57, 7  ;;  %v3843_v23 = vunpack.c.l.b16 %v3335_v15  ;;  %v3844_v31 = vunpack.c.l.b16 %v3336_v25  ;;  %v4234_v22 = vrot.slane %v3842_v39, 6 }
 0x2d5   :  { %20640 = vst [vmem:[#allocation81_spill] sm:$0xff] %v16787_v38  ;;  %20641 = vst [vmem:[#allocation82_spill] sm:$0xff] %v16789_v14  ;;  %v7176_v2 = vsel %vm3920_vm2, %v7175_v34, %v16769_v56  ;;  %v20413_v50 = vrot.slane %v16787_v38, 7  ;;  %v605_v1 = vadd.f32 %v16606_v9, %v16318_v52 }
 0x2d6   :  { %v16803_v30 = vsel %vm3923_vm3, %v7177_v8, %v7176_v2  ;;  %v16809_v3 = vsel %vm3920_vm2, %v20412_v53, %v16777_v24  ;;  %v613_v8 = vadd.f32 %v16606_v9, %v16259_v58  ;;  %v4232_v2 = vrot.slane %v3841_v10, 7  ;;  %v20645_v53 = vld [vmem:[#allocation13_spill] sm:$0xff] }
 0x2d7   :  { %20642 = vst [vmem:[#allocation83_spill] sm:$0xff] %v16803_v30  ;;  %20643 = vst [vmem:[#allocation84_spill] sm:$0xff] %v16809_v3  ;;  %v16815_v34 = vsel %vm3920_vm2, %v20413_v50, %v16779_v57  ;;  %v5514_v13 = vrot.slane %v20645_v53, %v15286_v59  ;;  %v4236_v47 = vrot.slane %v3843_v23, 5  ;;  %v4238_v46 = vrot.slane %v3844_v31, 4 }
 0x2d8   :  { %20644 = vst [vmem:[#allocation85_spill] sm:$0xff] %v16815_v34  ;;  %v727_v17 = vmax.f32 %v613_v8, 0.0  ;;  %v5626_v50 = vrot.slane %v20646_v6, %v15286_v59  ;;  %v4233_v15 = vsel %vm3920_vm2, %v4232_v2, %v16704_v29  ;;  %v725_v25 = vmax.f32 %v605_v1, 0.0 }
 0x2d9   :  { %v16827_v11 = vunpack.c.l.b16 %v5514_v13  ;;  %v7069_v58 = vrot.slane %v20624_v4, 6  ;;  %v4235_v10 = vsel %vm3923_vm3, %v4234_v22, %v4233_v15 }
 0x2da   :  { %v1607_v52 = vcombine.high %v727_v17, %v727_v17  ;;  %v1614_v39 = vrot.slane %v727_v17, %v15279_v44  ;;  %v16832_v53 = vunpack.c.l.b16 %v5626_v50  ;;  %v4237_v23 = vsel %vm3926_vm4, %v4236_v47, %v4235_v10 }
 0x2db   :  { %v1573_v31 = vcombine.high %v725_v25, %v725_v25  ;;  %v1580_v6 = vrot.slane %v725_v25, %v15279_v44  ;;  %v7070_v29 = vsel %vm3923_vm3, %v7069_v58, %v16415_v21  ;;  %v4239_v13 = vsel %vm3929_vm5, %v4238_v46, %v4237_v23 }
 0x2dc   :  { %v1621_v1 = vrot.slane %v1607_v52, %v15279_v44  ;;  %v1622_v8 = vcombine.high %v1614_v39, %v1614_v39  ;;  %v14120_v2 = vrot.slane %v1614_v39, 9  ;;  %v7071_v50 = vrot.slane %v20627_v51, 5 }
 0x2dd   :  { %v1587_v22 = vrot.slane %v1573_v31, %v15279_v44  ;;  %v1588_v15 = vcombine.high %v1580_v6, %v1580_v6  ;;  %v14112_v17 = vrot.slane %v1580_v6, 9 }
 0x2de   :  { %v1623_v36 = vcombine.high %v1621_v1, %v1621_v1  ;;  %v14121_v47 = vrot.slane %v1622_v8, 9  ;;  %v14122_v10 = vrot.slane %v1621_v1, 9  ;;  %v3091_v45 = vmax.f32 %v1614_v39, %v14120_v2 }
 0x2df   :  { %v1589_v25 = vcombine.high %v1587_v22, %v1587_v22  ;;  %v14113_v40 = vrot.slane %v1588_v15, 9  ;;  %v14114_v16 = vrot.slane %v1587_v22, 9  ;;  %v3083_v21 = vmax.f32 %v1580_v6, %v14112_v17 }
 0x2e0   :  { %v14123_v58 = vrot.slane %v1623_v36, 9  ;;  %v3092_v52 = vmax.f32 %v1622_v8, %v14121_v47  ;;  %v3093_v41 = vmax.f32 %v1621_v1, %v14122_v10  ;;  %v3345_v34 = vpack.c.bf16 %v3091_v45, %v3091_v45  ;;  %v20653_v10 = vld [vmem:[#allocation25_spill] sm:$0xff] }
 0x2e1   :  { %v14115_v3 = vrot.slane %v1589_v25, 9  ;;  %v3084_v46 = vmax.f32 %v1588_v15, %v14113_v40  ;;  %v3085_v23 = vmax.f32 %v1587_v22, %v14114_v16  ;;  %v3337_v31 = vpack.c.bf16 %v3083_v21, %v3083_v21  ;;  %v20647_v15 = vld [vmem:[#allocation12_spill] sm:$0xff] }
 0x2e2   :  { %v3094_v14 = vmax.f32 %v1623_v36, %v14123_v58  ;;  %v3346_v18 = vpack.c.bf16 %v3092_v52, %v3092_v52  ;;  %v3347_v43 = vpack.c.bf16 %v3093_v41, %v3093_v41  ;;  %v3853_v19 = vunpack.c.l.b16 %v3345_v34 }
 0x2e3   :  { %v3086_v38 = vmax.f32 %v1589_v25, %v14115_v3  ;;  %v3338_v30 = vpack.c.bf16 %v3084_v46, %v3084_v46  ;;  %v3339_v56 = vpack.c.bf16 %v3085_v23, %v3085_v23  ;;  %v3845_v39 = vunpack.c.l.b16 %v3337_v31  ;;  %v20655_v23 = vld [vmem:[#allocation21_spill] sm:$0xff] }
 0x2e4   :  { %v3348_v2 = vpack.c.bf16 %v3094_v14, %v3094_v14  ;;  %v3854_v57 = vunpack.c.l.b16 %v3346_v18  ;;  %v3855_v24 = vunpack.c.l.b16 %v3347_v43  ;;  %v4254_v6 = vrot.slane %v3853_v19, 3  ;;  %v20649_v19 = vld [vmem:[#allocation14_spill] sm:$0xff] }
 0x2e5   :  { %v3340_v17 = vpack.c.bf16 %v3086_v38, %v3086_v38  ;;  %v3846_v8 = vunpack.c.l.b16 %v3338_v30  ;;  %v3847_v1 = vunpack.c.l.b16 %v3339_v56  ;;  %v4240_v45 = vrot.slane %v3845_v39, 3  ;;  %v20650_v38 = vld [vmem:[#allocation15_spill] sm:$0xff] }
 0x2e6   :  { %v16842_v47 = vunpack.c.l.b16 %v3348_v2  ;;  %v4256_v16 = vrot.slane %v3854_v57, 2  ;;  %v4258_v40 = vrot.slane %v3855_v24, 1  ;;  %v7072_v36 = vsel %vm3926_vm4, %v7071_v50, %v7070_v29  ;;  %v20652_v50 = vld [vmem:[#allocation26_spill] sm:$0xff] }
 0x2e7   :  { %v3848_v41 = vunpack.c.l.b16 %v3340_v17  ;;  %v4241_v3 = vsel %vm3932_vm6, %v4240_v45, %v4239_v13  ;;  %v4242_v34 = vrot.slane %v3846_v8, 2  ;;  %v4244_v22 = vrot.slane %v3847_v1, 1  ;;  %v20657_v17 = vld [vmem:[#allocation27_spill] sm:$0xff]  ;;  %v20658_v1 = vld [vmem:[#allocation22_spill] sm:$0xff] }
 0x2e8   :  { %v20648_v14 = vrot.slane %v20647_v15, 4  ;;  %v7075_v18 = vrot.slane %v20649_v19, 3  ;;  %v7077_v56 = vrot.slane %v20650_v38, 2  ;;  %v7079_v30 = vrot.slane %v16827_v11, 1 }
 0x2e9   :  { %v4243_v57 = vsel %vm3935_vm7, %v4242_v34, %v4241_v3  ;;  %v20651_v24 = vrot.slane %v16735_v32, 7  ;;  %v7083_v13 = vrot.slane %v20652_v50, 6  ;;  %v7085_v25 = vrot.slane %v20653_v10, 5 }
 0x2ea   :  { %v7074_v43 = vsel %vm3929_vm5, %v20648_v14, %v7072_v36  ;;  %v4245_v21 = vsel %vm3938_vm8, %v4244_v22, %v4243_v57  ;;  %v20654_v58 = vrot.slane %v16737_v54, 6  ;;  %v7089_v31 = vrot.slane %v20655_v23, 3  ;;  %v20660_v22 = vld [vmem:[#allocation19_spill] sm:$0xff] }
 0x2eb   :  { %v4247_v29 = vsel %vm3920_vm2, %v20651_v24, %v3848_v41  ;;  %v7076_v46 = vsel %vm3932_vm6, %v7075_v18, %v7074_v43  ;;  %v20656_v39 = vrot.slane %v16739_v55, 5  ;;  %v7084_v8 = vsel %vm3923_vm3, %v7083_v13, %v20657_v17 }
 0x2ec   :  { %v4249_v52 = vsel %vm3923_vm3, %v20654_v58, %v4247_v29  ;;  %v7078_v2 = vsel %vm3935_vm7, %v7077_v56, %v7076_v46  ;;  %v7091_v45 = vrot.slane %v20658_v1, 2  ;;  %v20659_v36 = vrot.slane %v16744_v33, 4 }
 0x2ed   :  { %v4251_v32 = vsel %vm3926_vm4, %v20656_v39, %v4249_v52  ;;  %v16875_v41 = vsel %vm3938_vm8, %v7079_v30, %v7078_v2  ;;  %v7086_v3 = vsel %vm3926_vm4, %v7085_v25, %v7084_v8  ;;  %v7093_v55 = vrot.slane %v16832_v53, 1  ;;  %v20662_v25 = vld [vmem:[#allocation23_spill] sm:$0xff] }
 0x2ee   :  { %v4253_v54 = vsel %vm3929_vm5, %v20659_v36, %v4251_v32  ;;  %v20661_v14 = vrot.slane %v20660_v22, 4  ;;  %v7295_v18 = vrot.slane %v20627_v51, 6  ;;  %v7299_v56 = vrot.slane %v20649_v19, 4  ;;  %v20664_v32 = vld [vmem:[#allocation24_spill] sm:$0xff] }
 0x2ef   :  { %v4255_v34 = vsel %vm3932_vm6, %v4254_v6, %v4253_v54  ;;  %v20435_v30 = vrot.slane %v20650_v38, 3  ;;  %v20434_v24 = vrot.slane %v16827_v11, 2  ;;  %v20432_v58 = vrot.slane %v20662_v25, 1 }
 0x2f0   :  { %v7088_v43 = vsel %vm3929_vm5, %v20661_v14, %v7086_v3  ;;  %v4257_v33 = vsel %vm3935_vm7, %v4256_v16, %v4255_v34  ;;  %v7296_v13 = vsel %vm3926_vm4, %v7295_v18, %v16526_v20  ;;  %v7307_v2 = vrot.slane %v20652_v50, 7 }
 0x2f1   :  { %v7090_v57 = vsel %vm3932_vm6, %v7089_v31, %v7088_v43  ;;  %v4259_v29 = vsel %vm3938_vm8, %v4258_v40, %v4257_v33  ;;  %v20663_v31 = vrot.slane %v20647_v15, 5  ;;  %v7306_v20 = vsel %vm3920_vm2, %v20664_v32, %v20432_v58 }
 0x2f2   :  { %v7092_v6 = vsel %vm3935_vm7, %v7091_v45, %v7090_v57  ;;  %v4381_v52 = vpack.c.b16 %v4259_v29, %v4245_v21  ;;  %v14196_v46 = vpack.c.b16 %v4259_v29, %v4259_v29  ;;  %v7309_v21 = vrot.slane %v20653_v10, 6 }
 0x2f3   :  { %v16897_v16 = vsel %vm3938_vm8, %v7093_v55, %v7092_v6  ;;  %v7298_v39 = vsel %vm3929_vm5, %v20663_v31, %v7296_v13  ;;  %v7313_v36 = vrot.slane %v20655_v23, 4  ;;  %v7308_v3 = vsel %vm3923_vm3, %v7307_v2, %v7306_v20 }
 0x2f4   :  { %v7300_v40 = vsel %vm3932_vm6, %v7299_v56, %v7298_v39  ;;  %v4941_v17 = vrot.slane %v4381_v52, %v15286_v59  ;;  %v4948_v8 = vrot.slane %v14196_v46, %v15286_v59  ;;  %v7315_v55 = vrot.slane %v20658_v1, 3 }
 0x2f5   :  { %v7302_v45 = vsel %vm3935_vm7, %v20435_v30, %v7300_v40  ;;  %v7317_v34 = vrot.slane %v16832_v53, 2  ;;  %v7310_v29 = vsel %vm3926_vm4, %v7309_v21, %v7308_v3  ;;  %v20433_v6 = vrot.slane %v15830_v48, 1 }
 0x2f6   :  { %v16920_v54 = vsel %vm3938_vm8, %v20434_v24, %v7302_v45  ;;  %v4949_v14 = vcombine.high %v4941_v17, %v4941_v17  ;;  %v4950_v43 = vcombine.high %v4948_v8, %v4948_v8  ;;  %v4957_v33 = vrot.slane %v4941_v17, %v15286_v59 }
 0x2f7   :  { %v4964_v57 = vrot.slane %v4948_v8, %v15286_v59  ;;  %v20665_v13 = vrot.slane %v20624_v4, 7  ;;  %v7538_v46 = vsel %vm3920_vm2, %v7307_v2, %v20664_v32  ;;  %v20666_v45 = vrot.slane %v20660_v22, 5 }
 0x2f8   :  { %v4971_v31 = vrot.slane %v4949_v14, %v15286_v59  ;;  %v4978_v39 = vrot.slane %v4950_v43, %v15286_v59  ;;  %v4979_v40 = vcombine.high %v4957_v33, %v4957_v33  ;;  %v6389_v17 = vrot.slane %v4957_v33, %v15286_v59 }
 0x2f9   :  { %v7531_v52 = vsel %vm3920_vm2, %v20665_v13, %v20611_v26  ;;  %v4980_v20 = vcombine.high %v4964_v57, %v4964_v57  ;;  %v6445_v8 = vrot.slane %v4964_v57, %v15286_v59  ;;  %v7312_v3 = vsel %vm3929_vm5, %v20666_v45, %v7310_v29 }
 0x2fa   :  { %v16948_v26 = vsel %vm3920_vm2, %v15821_v5, %v20433_v6  ;;  %v4981_v4 = vcombine.high %v4971_v31, %v4971_v31  ;;  %v4982_v2 = vcombine.high %v4978_v39, %v4978_v39  ;;  %v6403_v14 = vrot.slane %v4971_v31, %v15286_v59 }
 0x2fb   :  { %v6417_v43 = vrot.slane %v4979_v40, %v15286_v59  ;;  %v6396_v33 = vrot.slane %v6389_v17, %v15286_v59  ;;  %v6452_v57 = vrot.slane %v6445_v8, %v15286_v59  ;;  %v6459_v13 = vrot.slane %v4978_v39, %v15286_v59 }
 0x2fc   :  { %v6473_v29 = vrot.slane %v4980_v20, %v15286_v59  ;;  %v6410_v45 = vrot.slane %v6403_v14, %v15286_v59  ;;  %v6431_v6 = vrot.slane %v4981_v4, %v15286_v59  ;;  %v6487_v24 = vrot.slane %v4982_v2, %v15286_v59 }
 0x2fd   :  { %v6424_v58 = vrot.slane %v6417_v43, %v15286_v59  ;;  %v6466_v31 = vrot.slane %v6459_v13, %v15286_v59  ;;  %v16962_v30 = vunpack.c.l.b16 %v6396_v33  ;;  %v16964_v17 = vunpack.c.l.b16 %v6452_v57 }
 0x2fe   :  { %v6480_v40 = vrot.slane %v6473_v29, %v15286_v59  ;;  %v6438_v39 = vrot.slane %v6431_v6, %v15286_v59  ;;  %v6494_v20 = vrot.slane %v6487_v24, %v15286_v59  ;;  %v16968_v8 = vunpack.c.l.b16 %v6410_v45  ;;  %v17182_v45 = vpop.f32.mrb[56].mxu0 }
 0x2ff   :  { %20667 = vst [vmem:[#allocation13_spill] sm:$0xff] %v16964_v17  ;;  %v16970_v14 = vunpack.c.l.b16 %v6424_v58  ;;  %v16972_v43 = vunpack.c.l.b16 %v6466_v31  ;;  %v7314_v31 = vsel %vm3932_vm6, %v7313_v36, %v7312_v3  ;;  %v7539_v51 = vsel %vm3923_vm3, %v7309_v21, %v7538_v46 }
 0x300   :  { %v16974_v4 = vunpack.c.l.b16 %v6480_v40  ;;  %v16978_v33 = vunpack.c.l.b16 %v6438_v39  ;;  %v16980_v57 = vunpack.c.l.b16 %v6494_v20  ;;  %v7189_v6 = vrot.slane %v16968_v8, 7 }
 0x301   :  { %20668 = vst [vmem:[#allocation20_spill] sm:$0xff] %v16972_v43  ;;  %v7191_v24 = vrot.slane %v16970_v14, 6  ;;  %v20436_v29 = vrot.slane %v16970_v14, 7  ;;  %v20673_v20 = vrot.slane %v20647_v15, 5  ;;  %v20674_v3 = vrot.slane %v20660_v22, 5 }
 0x302   :  { %20669 = vst [vmem:[#allocation12_spill] sm:$0xff] %v16974_v4  ;;  %20670 = vst [vmem:[#allocation14_spill] sm:$0xff] %v16978_v33  ;;  %v7190_v40 = vsel %vm3920_vm2, %v7189_v6, %v16962_v30  ;;  %v20437_v13 = vrot.slane %v16978_v33, 7  ;;  %v7532_v6 = vsel %vm3923_vm3, %v7295_v18, %v7531_v52 }
 0x303   :  { %v16994_v2 = vsel %vm3923_vm3, %v7191_v24, %v7190_v40  ;;  %v17000_v58 = vsel %vm3920_vm2, %v20436_v29, %v16968_v8  ;;  %v7316_v40 = vsel %vm3935_vm7, %v7315_v55, %v7314_v31  ;;  %v7533_v29 = vsel %vm3926_vm4, %v20673_v20, %v7532_v6 }
 0x304   :  { %20671 = vst [vmem:[#allocation15_spill] sm:$0xff] %v16994_v2  ;;  %20672 = vst [vmem:[#allocation26_spill] sm:$0xff] %v17000_v58  ;;  %v17012_v24 = vsel %vm3920_vm2, %v20437_v13, %v16970_v14  ;;  %v7318_v18 = vsel %vm3938_vm8, %v7317_v34, %v7316_v40  ;;  %v7534_v52 = vsel %vm3929_vm5, %v7299_v56, %v7533_v29  ;;  %v20675_v13 = vrot.slane %v20647_v15, 6 }
 0x305   :  { %v7540_v31 = vsel %vm3926_vm4, %v20674_v3, %v7539_v51  ;;  %v20676_v6 = vrot.slane %v20650_v38, 3  ;;  %v7669_v40 = vrot.slane %v20649_v19, 5  ;;  %v7671_v56 = vrot.slane %v20650_v38, 4 }
 0x306   :  { %v7668_v20 = vsel %vm3926_vm4, %v20675_v13, %v16583_v27  ;;  %v7541_v46 = vsel %vm3929_vm5, %v7313_v36, %v7540_v31  ;;  %v20677_v29 = vrot.slane %v16827_v11, 2  ;;  %v7673_v13 = vrot.slane %v16827_v11, 3 }
 0x307   :  { %v7535_v21 = vsel %vm3932_vm6, %v20676_v6, %v7534_v52  ;;  %v7542_v27 = vsel %vm3932_vm6, %v7315_v55, %v7541_v46  ;;  %v7675_v52 = vrot.slane %v20662_v25, 2  ;;  %v20678_v3 = vrot.slane %v20662_v25, 1 }
 0x308   :  { %v7536_v51 = vsel %vm3935_vm7, %v20677_v29, %v7535_v21  ;;  %v7543_v19 = vsel %vm3935_vm7, %v7317_v34, %v7542_v27  ;;  %v7670_v38 = vsel %vm3929_vm5, %v7669_v40, %v7668_v20  ;;  %v20679_v31 = vrot.slane %v20664_v32, 1 }
 0x309   :  { %v7537_v36 = vsel %vm3938_vm8, %v20678_v3, %v7536_v51  ;;  %v20680_v55 = vrot.slane %v15830_v48, 1  ;;  %v7672_v21 = vsel %vm3932_vm6, %v7671_v56, %v7670_v38  ;;  %v20681_v25 = vrot.slane %v20653_v10, 7 }
 0x30a   :  { %v7678_v6 = vsel %vm3920_vm2, %v20652_v50, %v20679_v31  ;;  %v7683_v29 = vrot.slane %v20655_v23, 5  ;;  %v7674_v34 = vsel %vm3935_vm7, %v7673_v13, %v7672_v21  ;;  %v20682_v20 = vrot.slane %v20660_v22, 6 }
 0x30b   :  { %v7544_v11 = vsel %vm3938_vm8, %v20680_v55, %v7543_v19  ;;  %v7680_v46 = vsel %vm3923_vm3, %v20681_v25, %v7678_v6  ;;  %v7685_v50 = vrot.slane %v20658_v1, 4  ;;  %v7687_v27 = vrot.slane %v16832_v53, 3 }
 0x30c   :  { %v7682_v51 = vsel %vm3926_vm4, %v20682_v20, %v7680_v46  ;;  %v7676_v3 = vsel %vm3938_vm8, %v7675_v52, %v7674_v34  ;;  %v7689_v10 = vrot.slane %v15830_v48, 2  ;;  %v14205_v38 = vpack.c.b16 %v16920_v54, %v16875_v41  ;;  %v20684_v48 = vld [vmem:[#allocation28_spill] sm:$0xff] }
 0x30d   :  { %v7684_v19 = vsel %vm3929_vm5, %v7683_v29, %v7682_v51  ;;  %v14206_v31 = vpack.c.b16 %v7318_v18, %v16897_v16  ;;  %v14207_v6 = vpack.c.b16 %v7676_v3, %v7537_v36  ;;  %v20438_v55 = vrot.slane %v15821_v5, 1 }
 0x30e   :  { %v7686_v23 = vsel %vm3932_vm6, %v7685_v50, %v7684_v19  ;;  %v8135_v53 = vrot.slane %v14205_v38, %v15286_v59  ;;  %v20683_v21 = vrot.slane %v20647_v15, 6  ;;  %v20685_v46 = vmov %v20682_v20 }
 0x30f   :  { %v7688_v1 = vsel %vm3935_vm7, %v7687_v27, %v7686_v23  ;;  %v7911_v41 = vsel %vm3923_vm3, %v20685_v46, %v20684_v48  ;;  %v8142_v16 = vrot.slane %v14206_v31, %v15286_v59  ;;  %v8149_v18 = vrot.slane %v14207_v6, %v15286_v59 }
 0x310   :  { %v7904_v25 = vsel %vm3923_vm3, %v20683_v21, %v16594_v12  ;;  %v7690_v54 = vsel %vm3938_vm8, %v7689_v10, %v7688_v1  ;;  %v7912_v15 = vsel %vm3926_vm4, %v7683_v29, %v7911_v41  ;;  %v626_v12 = vadd.f32 %v16606_v9, %v16664_v0 }
 0x311   :  { %v7905_v36 = vsel %vm3926_vm4, %v7669_v40, %v7904_v25  ;;  %v14208_v34 = vpack.c.b16 %v7690_v54, %v7544_v11  ;;  %v8171_v51 = vcombine.low %v8135_v53, %v8149_v18  ;;  %v8172_v22 = vcombine.high %v8135_v53, %v8149_v18 }
 0x312   :  { %v7906_v20 = vsel %vm3929_vm5, %v7671_v56, %v7905_v36  ;;  %v7913_v19 = vsel %vm3929_vm5, %v7685_v50, %v7912_v15  ;;  %v730_v11 = vmax.f32 %v626_v12, 0.0  ;;  %v20686_v31 = vrot.slane %v20664_v32, 1 }
 0x313   :  { %v7907_v3 = vsel %vm3932_vm6, %v7673_v13, %v7906_v20  ;;  %v8156_v38 = vrot.slane %v14208_v34, %v15286_v59  ;;  %v7914_v40 = vsel %vm3932_vm6, %v7687_v27, %v7913_v19  ;;  %v8183_v56 = vrot.slane %v8171_v51, %v15286_v59 }
 0x314   :  { %v7908_v23 = vsel %vm3935_vm7, %v7675_v52, %v7907_v3  ;;  %v8197_v29 = vrot.slane %v8172_v22, %v15286_v59  ;;  %v7915_v0 = vsel %vm3935_vm7, %v7689_v10, %v7914_v40  ;;  %v1658_v52 = vcombine.high %v730_v11, %v730_v11 }
 0x315   :  { %v7909_v9 = vsel %vm3938_vm8, %v20686_v31, %v7908_v23  ;;  %v8173_v13 = vcombine.low %v8142_v16, %v8156_v38  ;;  %v8174_v6 = vcombine.high %v8142_v16, %v8156_v38  ;;  %v7916_v50 = vsel %vm3938_vm8, %v20438_v55, %v7915_v0 }
 0x316   :  { %v14249_v1 = vcombine.low %v8183_v56, %v8197_v29  ;;  %v14251_v27 = vcombine.high %v8183_v56, %v8197_v29  ;;  %v8000_v53 = vpack.c.b16 %v7916_v50, %v7909_v9  ;;  %v14209_v21 = vpack.c.b16 %v7916_v50, %v7916_v50 }
 0x317   :  { %v8190_v25 = vrot.slane %v8173_v13, %v15286_v59  ;;  %v8204_v48 = vrot.slane %v8174_v6, %v15286_v59  ;;  %v1665_v32 = vrot.slane %v730_v11, %v15279_v44  ;;  %v1672_v46 = vrot.slane %v1658_v52, %v15279_v44 }
 0x318   :  { %v9159_v10 = vrot.slane %v14249_v1, %v15286_v59  ;;  %v9173_v41 = vrot.slane %v14251_v27, %v15286_v59  ;;  %v8163_v54 = vrot.slane %v8000_v53, %v15286_v59  ;;  %v8170_v16 = vrot.slane %v14209_v21, %v15286_v59 }
 0x319   :  { %v14253_v18 = vcombine.low %v8190_v25, %v8204_v48  ;;  %v14255_v36 = vcombine.high %v8190_v25, %v8204_v48  ;;  %v1673_v34 = vcombine.high %v1665_v32, %v1665_v32  ;;  %v1674_v20 = vcombine.high %v1672_v46, %v1672_v46 }
 0x31a   :  { %v9210_v15 = vcombine.high %v9159_v10, %v9173_v41  ;;  %v9209_v12 = vcombine.low %v9159_v10, %v9173_v41  ;;  %v8175_v51 = vcombine.high %v8163_v54, %v8163_v54  ;;  %v8176_v22 = vcombine.high %v8170_v16, %v8170_v16 }
 0x31b   :  { %v9187_v3 = vrot.slane %v14253_v18, %v15286_v59  ;;  %v9201_v19 = vrot.slane %v14255_v36, %v15286_v59  ;;  %v8211_v38 = vrot.slane %v8163_v54, %v15286_v59  ;;  %v8218_v23 = vrot.slane %v8170_v16, %v15286_v59 }
 0x31c   :  { %v17130_v40 = vrot.slane %v9210_v15, %v15286_v59  ;;  %v17133_v11 = vrot.slane %v9209_v12, %v15286_v59  ;;  %v8225_v56 = vrot.slane %v8175_v51, %v15286_v59  ;;  %v8232_v29 = vrot.slane %v8176_v22, %v15286_v59 }
 0x31d   :  { %v9213_v31 = vcombine.high %v9187_v3, %v9201_v19  ;;  %v9212_v9 = vcombine.low %v9187_v3, %v9201_v19  ;;  %v14132_v0 = vrot.slane %v1665_v32, 9  ;;  %v14133_v13 = vrot.slane %v1673_v34, 9 }
 0x31e   :  { %20687 = vst [vmem:[#allocation25_spill] sm:$0xff] %v17130_v40  ;;  %20688 = vst [vmem:[#allocation21_spill] sm:$0xff] %v17133_v11  ;;  %v14250_v6 = vcombine.low %v8211_v38, %v8225_v56  ;;  %v14252_v50 = vcombine.high %v8211_v38, %v8225_v56  ;;  %v14254_v52 = vcombine.low %v8218_v23, %v8232_v29  ;;  %v14134_v21 = vrot.slane %v1672_v46, 9 }
 0x31f   :  { %v14256_v1 = vcombine.high %v8218_v23, %v8232_v29  ;;  %v17138_v27 = vrot.slane %v9213_v31, %v15286_v59  ;;  %v17141_v53 = vrot.slane %v9212_v9, %v15286_v59  ;;  %v14135_v25 = vrot.slane %v1674_v20, 9  ;;  %v17154_v23 = vld [vmem:[%s20309_s2] ss:$0 sm:$0xff] }
 0x320   :  { %v9166_v48 = vrot.slane %v14250_v6, %v15286_v59  ;;  %v9180_v10 = vrot.slane %v14252_v50, %v15286_v59  ;;  %v9194_v41 = vrot.slane %v14254_v52, %v15286_v59  ;;  %v3103_v36 = vmax.f32 %v1665_v32, %v14132_v0 }
 0x321   :  { %20689 = vst [vmem:[#allocation27_spill] sm:$0xff] %v17138_v27  ;;  %20690 = vst [vmem:[#allocation22_spill] sm:$0xff] %v17141_v53  ;;  %v9208_v54 = vrot.slane %v14256_v1, %v15286_v59  ;;  %v9260_v16 = vcombine.low %v17130_v40, %v17138_v27  ;;  %v9257_v18 = vcombine.low %v17133_v11, %v17141_v53  ;;  %v17184_v1 = vpop.f32.mrb[57].mxu0 }
 0x322   :  { %v3104_v15 = vmax.f32 %v1673_v34, %v14133_v13  ;;  %v9211_v12 = vcombine.low %v9166_v48, %v9180_v10  ;;  %v3105_v22 = vmax.f32 %v1672_v46, %v14134_v21  ;;  %v3106_v3 = vmax.f32 %v1674_v20, %v14135_v25 }
 0x323   :  { %v9214_v51 = vcombine.low %v9194_v41, %v9208_v54  ;;  %10266 = vmatprep.mubr.bf16.mxu1 %v9260_v16  ;;  %v3357_v19 = vpack.c.bf16 %v3103_v36, %v3103_v36  ;;  %v618_v56 = vadd.f32 %v17154_v23, %v16670_v62  ;;  %v629_v29 = vadd.f32 %v17154_v23, %v16692_v49 }
 0x324   :  { %v3358_v38 = vpack.c.bf16 %v3104_v15, %v3104_v15  ;;  %10267 = vmatmul.mubr.bf16.gmra.mrb[4].mxu1 %v9257_v18  ;;  %v9228_v32 = vrot.slane %v9211_v12, %v15286_v59  ;;  %v3359_v34 = vpack.c.bf16 %v3105_v22, %v3105_v22  ;;  %v3360_v20 = vpack.c.bf16 %v3106_v3, %v3106_v3 }
 0x325   :  { %v9249_v46 = vrot.slane %v9214_v51, %v15286_v59  ;;  %v17162_v31 = vunpack.c.l.b16 %v3357_v19  ;;  %v728_v0 = vmax.f32 %v618_v56, 0.0  ;;  %v731_v13 = vmax.f32 %v629_v29, 0.0 }
 0x326   :  { %v17164_v9 = vunpack.c.l.b16 %v3358_v38  ;;  %v17166_v50 = vunpack.c.l.b16 %v3359_v34  ;;  %v17168_v62 = vunpack.c.l.b16 %v3360_v20  ;;  %v621_v49 = vadd.f32 %v17154_v23, %v16694_v60 }
 0x327   :  { %v9259_v6 = vcombine.low %v9228_v32, %v9249_v46  ;;  %v1624_v21 = vcombine.high %v728_v0, %v728_v0  ;;  %v1631_v25 = vrot.slane %v728_v0, %v15279_v44  ;;  %v1675_v41 = vcombine.high %v731_v13, %v731_v13 }
 0x328   :  { %v1682_v54 = vrot.slane %v731_v13, %v15279_v44  ;;  %v729_v60 = vmax.f32 %v621_v49, 0.0  ;;  %v642_v22 = vadd.f32 %v17154_v23, %v16700_v42 }
 0x329   :  { %14802 = vmatmul.mubr.bf16.vlgmr.msra.gmra.mrb[64].mxu0 %v9259_v6  ;;  %v1638_v16 = vrot.slane %v1624_v21, %v15279_v44  ;;  %v1639_v18 = vcombine.high %v1631_v25, %v1631_v25  ;;  %v14124_v36 = vrot.slane %v1631_v25, 9  ;;  %v1689_v15 = vrot.slane %v1675_v41, %v15279_v44 }
 0x32a   :  { %v1690_v12 = vcombine.high %v1682_v54, %v1682_v54  ;;  %v14136_v51 = vrot.slane %v1682_v54, 9 }
 0x32b   :  { %v1640_v3 = vcombine.high %v1638_v16, %v1638_v16  ;;  %v14125_v19 = vrot.slane %v1639_v18, 9  ;;  %v14126_v38 = vrot.slane %v1638_v16, 9  ;;  %v3095_v56 = vmax.f32 %v1631_v25, %v14124_v36 }
 0x32c   :  { %v1691_v29 = vcombine.high %v1689_v15, %v1689_v15  ;;  %v14137_v32 = vrot.slane %v1690_v12, 9  ;;  %v14138_v46 = vrot.slane %v1689_v15, 9  ;;  %v3107_v34 = vmax.f32 %v1682_v54, %v14136_v51 }
 0x32d   :  { %v14127_v20 = vrot.slane %v1640_v3, 9  ;;  %v3096_v0 = vmax.f32 %v1639_v18, %v14125_v19  ;;  %v3097_v13 = vmax.f32 %v1638_v16, %v14126_v38  ;;  %v3349_v6 = vpack.c.bf16 %v3095_v56, %v3095_v56  ;;  %v17193_v56 = vpop.f32.mrb[58].mxu0 }
 0x32e   :  { %v14139_v49 = vrot.slane %v1691_v29, 9  ;;  %v3108_v21 = vmax.f32 %v1690_v12, %v14137_v32  ;;  %v3109_v41 = vmax.f32 %v1689_v15, %v14138_v46  ;;  %v3361_v39 = vpack.c.bf16 %v3107_v34, %v3107_v34 }
 0x32f   :  { %v3098_v55 = vmax.f32 %v1640_v3, %v14127_v20  ;;  %v3350_v42 = vpack.c.bf16 %v3096_v0, %v3096_v0  ;;  %v3351_v10 = vpack.c.bf16 %v3097_v13, %v3097_v13  ;;  %v3857_v48 = vunpack.c.l.b16 %v3349_v6  ;;  %v17201_v20 = vpop.f32.mrb[59].mxu0 }
 0x330   :  { %v3110_v25 = vmax.f32 %v1691_v29, %v14139_v49  ;;  %v3362_v36 = vpack.c.bf16 %v3108_v21, %v3108_v21  ;;  %v3363_v52 = vpack.c.bf16 %v3109_v41, %v3109_v41  ;;  %v17186_v54 = vunpack.c.l.b16 %v3361_v39 }
 0x331   :  { %v3352_v18 = vpack.c.bf16 %v3098_v55, %v3098_v55  ;;  %v3858_v16 = vunpack.c.l.b16 %v3350_v42  ;;  %v3859_v51 = vunpack.c.l.b16 %v3351_v10  ;;  %v4260_v19 = vrot.slane %v3857_v48, 7 }
 0x332   :  { %v3364_v12 = vpack.c.bf16 %v3110_v25, %v3110_v25  ;;  %v17188_v15 = vunpack.c.l.b16 %v3362_v36  ;;  %v17190_v38 = vunpack.c.l.b16 %v3363_v52  ;;  %v1641_v10 = vcombine.high %v729_v60, %v729_v60 }
 0x333   :  { %v3860_v32 = vunpack.c.l.b16 %v3352_v18  ;;  %v4261_v29 = vsel %vm3920_vm2, %v4260_v19, %v16842_v47  ;;  %v4262_v46 = vrot.slane %v3858_v16, 6  ;;  %v4264_v39 = vrot.slane %v3859_v51, 5 }
 0x334   :  { %v17197_v34 = vunpack.c.l.b16 %v3364_v12  ;;  %v1648_v13 = vrot.slane %v729_v60, %v15279_v44  ;;  %v734_v6 = vmax.f32 %v642_v22, 0.0  ;;  %v1655_v47 = vrot.slane %v1641_v10, %v15279_v44 }
 0x335   :  { %v4263_v52 = vsel %vm3923_vm3, %v4262_v46, %v4261_v29  ;;  %v4266_v0 = vrot.slane %v3860_v32, 4  ;;  %v634_v21 = vadd.f32 %v17154_v23, %v16702_v35  ;;  %v645_v41 = vadd.f32 %v17154_v23, %v16747_v7  ;;  %v17214_v46 = vpop.f32.mrb[60].mxu0 }
 0x336   :  { %v4265_v49 = vsel %vm3926_vm4, %v4264_v39, %v4263_v52  ;;  %v1656_v42 = vcombine.high %v1648_v13, %v1648_v13  ;;  %v14128_v25 = vrot.slane %v1648_v13, 9  ;;  %v1726_v18 = vcombine.high %v734_v6, %v734_v6 }
 0x337   :  { %v4267_v36 = vsel %vm3929_vm5, %v4266_v0, %v4265_v49  ;;  %v1657_v16 = vcombine.high %v1655_v47, %v1655_v47  ;;  %v14130_v51 = vrot.slane %v1655_v47, 9  ;;  %v1733_v60 = vrot.slane %v734_v6, %v15279_v44 }
 0x338   :  { %v732_v22 = vmax.f32 %v634_v21, 0.0  ;;  %v14129_v19 = vrot.slane %v1656_v42, 9  ;;  %v3099_v12 = vmax.f32 %v1648_v13, %v14128_v25  ;;  %v1740_v32 = vrot.slane %v1726_v18, %v15279_v44 }
 0x339   :  { %v735_v29 = vmax.f32 %v645_v41, 0.0  ;;  %v14131_v35 = vrot.slane %v1657_v16, 9  ;;  %v3101_v39 = vmax.f32 %v1655_v47, %v14130_v51  ;;  %v1741_v7 = vcombine.high %v1733_v60, %v1733_v60 }
 0x33a   :  { %v14148_v10 = vrot.slane %v1733_v60, 9  ;;  %v3100_v52 = vmax.f32 %v1656_v42, %v14129_v19  ;;  %v3353_v48 = vpack.c.bf16 %v3099_v12, %v3099_v12  ;;  %v1742_v0 = vcombine.high %v1740_v32, %v1740_v32 }
 0x33b   :  { %v14150_v49 = vrot.slane %v1740_v32, 9  ;;  %v3102_v55 = vmax.f32 %v1657_v16, %v14131_v35  ;;  %v3355_v3 = vpack.c.bf16 %v3101_v39, %v3101_v39  ;;  %v14149_v11 = vrot.slane %v1741_v7, 9 }
 0x33c   :  { %v3119_v6 = vmax.f32 %v1733_v60, %v14148_v10  ;;  %v3354_v21 = vpack.c.bf16 %v3100_v52, %v3100_v52  ;;  %v3861_v53 = vunpack.c.l.b16 %v3353_v48  ;;  %v14151_v13 = vrot.slane %v1742_v0, 9 }
 0x33d   :  { %v3121_v25 = vmax.f32 %v1740_v32, %v14150_v49  ;;  %v3356_v18 = vpack.c.bf16 %v3102_v55, %v3102_v55  ;;  %v3863_v41 = vunpack.c.l.b16 %v3355_v3  ;;  %v3120_v40 = vmax.f32 %v1741_v7, %v14149_v11 }
 0x33e   :  { %v3373_v27 = vpack.c.bf16 %v3119_v6, %v3119_v6  ;;  %v3862_v58 = vunpack.c.l.b16 %v3354_v21  ;;  %v4268_v47 = vrot.slane %v3861_v53, 3  ;;  %v3122_v51 = vmax.f32 %v1742_v0, %v14151_v13 }
 0x33f   :  { %v3375_v33 = vpack.c.bf16 %v3121_v25, %v3121_v25  ;;  %v3864_v42 = vunpack.c.l.b16 %v3356_v18  ;;  %v4272_v19 = vrot.slane %v3863_v41, 1  ;;  %v3374_v12 = vpack.c.bf16 %v3120_v40, %v3120_v40 }
 0x340   :  { %v17216_v2 = vunpack.c.l.b16 %v3373_v27  ;;  %v4269_v16 = vsel %vm3932_vm6, %v4268_v47, %v4267_v36  ;;  %v4270_v60 = vrot.slane %v3862_v58, 2  ;;  %v3376_v35 = vpack.c.bf16 %v3122_v51, %v3122_v51  ;;  %v17251_v47 = vpop.f32.mrb[61].mxu0 }
 0x341   :  { %v17219_v48 = vunpack.c.l.b16 %v3375_v33  ;;  %v20691_v55 = vrot.slane %v17162_v31, 7  ;;  %v17224_v3 = vunpack.c.l.b16 %v3374_v12  ;;  %v1692_v32 = vcombine.high %v732_v22, %v732_v22 }
 0x342   :  { %v4271_v39 = vsel %vm3935_vm7, %v4270_v60, %v4269_v16  ;;  %v20692_v40 = vrot.slane %v17164_v9, 6  ;;  %v17231_v36 = vunpack.c.l.b16 %v3376_v35  ;;  %v20693_v31 = vrot.slane %v17166_v50, 5 }
 0x343   :  { %v4275_v11 = vsel %vm3920_vm2, %v20691_v55, %v3864_v42  ;;  %v4273_v58 = vsel %vm3938_vm8, %v4272_v19, %v4271_v39  ;;  %v1699_v52 = vrot.slane %v732_v22, %v15279_v44  ;;  %v20694_v0 = vrot.slane %v17168_v62, 4 }
 0x344   :  { %v4277_v27 = vsel %vm3923_vm3, %v20692_v40, %v4275_v11  ;;  %v1706_v6 = vrot.slane %v1692_v32, %v15279_v44  ;;  %v1743_v21 = vcombine.high %v735_v29, %v735_v29  ;;  %v20695_v13 = vrot.slane %v17186_v54, 3 }
 0x345   :  { %v4279_v7 = vsel %vm3926_vm4, %v20693_v31, %v4277_v27  ;;  %v1707_v50 = vcombine.high %v1699_v52, %v1699_v52  ;;  %v14140_v18 = vrot.slane %v1699_v52, 9  ;;  %v17249_v41 = vrot.slane %v735_v29, %v15279_v44 }
 0x346   :  { %v4281_v9 = vsel %vm3929_vm5, %v20694_v0, %v4279_v7  ;;  %v20696_v62 = vrot.slane %v17188_v15, 2  ;;  %v1708_v51 = vcombine.high %v1706_v6, %v1706_v6  ;;  %v14142_v42 = vrot.slane %v1706_v6, 9 }
 0x347   :  { %v4283_v25 = vsel %vm3932_vm6, %v20695_v13, %v4281_v9  ;;  %v17257_v19 = vrot.slane %v1743_v21, %v15279_v44  ;;  %v20697_v54 = vrot.slane %v17190_v38, 1  ;;  %v14141_v16 = vrot.slane %v1707_v50, 9  ;;  %v17275_v21 = vpop.f32.mrb[62].mxu0 }
 0x348   :  { %v4285_v22 = vsel %vm3935_vm7, %v20696_v62, %v4283_v25  ;;  %v3111_v60 = vmax.f32 %v1699_v52, %v14140_v18  ;;  %v17264_v29 = vcombine.high %v17249_v41, %v17249_v41  ;;  %v14143_v15 = vrot.slane %v1708_v51, 9 }
 0x349   :  { %v4287_v12 = vsel %vm3938_vm8, %v20697_v54, %v4285_v22  ;;  %v3113_v11 = vmax.f32 %v1706_v6, %v14142_v42  ;;  %v3112_v32 = vmax.f32 %v1707_v50, %v14141_v16  ;;  %v17268_v40 = vcombine.high %v17257_v19, %v17257_v19 }
 0x34a   :  { %v4382_v35 = vpack.c.b16 %v4287_v12, %v4273_v58  ;;  %v14197_v55 = vpack.c.b16 %v4287_v12, %v4287_v12  ;;  %v3365_v39 = vpack.c.bf16 %v3111_v60, %v3111_v60  ;;  %v14152_v38 = vrot.slane %v17249_v41, 9 }
 0x34b   :  { %v3114_v7 = vmax.f32 %v1708_v51, %v14143_v15  ;;  %v3367_v52 = vpack.c.bf16 %v3113_v11, %v3113_v11  ;;  %v3366_v0 = vpack.c.bf16 %v3112_v32, %v3112_v32  ;;  %v14153_v58 = vrot.slane %v17264_v29, 9  ;;  %v17285_v32 = vpop.f32.mrb[63].mxu0 }
 0x34c   :  { %v4990_v27 = vrot.slane %v4382_v35, %v15286_v59  ;;  %v4997_v31 = vrot.slane %v14197_v55, %v15286_v59  ;;  %v3873_v9 = vunpack.c.l.b16 %v3365_v39  ;;  %v14154_v6 = vrot.slane %v17257_v19, 9 }
 0x34d   :  { %v3368_v62 = vpack.c.bf16 %v3114_v7, %v3114_v7  ;;  %v3874_v22 = vunpack.c.l.b16 %v3366_v0  ;;  %v3875_v42 = vunpack.c.l.b16 %v3367_v52 }
 0x34e   :  { %v4998_v13 = vcombine.high %v4990_v27, %v4990_v27  ;;  %v4999_v25 = vcombine.high %v4997_v31, %v4997_v31  ;;  %v5006_v50 = vrot.slane %v4990_v27, %v15286_v59  ;;  %v5013_v18 = vrot.slane %v4997_v31, %v15286_v59 }
 0x34f   :  { %v4288_v54 = vrot.slane %v3873_v9, 7  ;;  %v3876_v15 = vunpack.c.l.b16 %v3368_v62 }
 0x350   :  { %v5020_v51 = vrot.slane %v4998_v13, %v15286_v59  ;;  %v5027_v12 = vrot.slane %v4999_v25, %v15286_v59  ;;  %v5028_v16 = vcombine.high %v5006_v50, %v5006_v50  ;;  %v5029_v60 = vcombine.high %v5013_v18, %v5013_v18 }
 0x351   :  { %v6501_v35 = vrot.slane %v5006_v50, %v15286_v59  ;;  %v6557_v55 = vrot.slane %v5013_v18, %v15286_v59  ;;  %v4289_v11 = vsel %vm3920_vm2, %v4288_v54, %v17197_v34 }
 0x352   :  { %v5030_v39 = vcombine.high %v5020_v51, %v5020_v51  ;;  %v5031_v27 = vcombine.high %v5027_v12, %v5027_v12  ;;  %v6515_v31 = vrot.slane %v5020_v51, %v15286_v59  ;;  %v6529_v7 = vrot.slane %v5028_v16, %v15286_v59 }
 0x353   :  { %v6508_v52 = vrot.slane %v6501_v35, %v15286_v59  ;;  %v6564_v0 = vrot.slane %v6557_v55, %v15286_v59  ;;  %v6571_v9 = vrot.slane %v5027_v12, %v15286_v59  ;;  %v6585_v13 = vrot.slane %v5029_v60, %v15286_v59 }
 0x354   :  { %v6522_v25 = vrot.slane %v6515_v31, %v15286_v59  ;;  %v6536_v34 = vrot.slane %v6529_v7, %v15286_v59  ;;  %v6543_v50 = vrot.slane %v5030_v39, %v15286_v59  ;;  %v6599_v18 = vrot.slane %v5031_v27, %v15286_v59 }
 0x355   :  { %v6578_v62 = vrot.slane %v6571_v9, %v15286_v59  ;;  %v6592_v54 = vrot.slane %v6585_v13, %v15286_v59  ;;  %v17299_v51 = vunpack.c.l.b16 %v6508_v52  ;;  %v17301_v16 = vunpack.c.l.b16 %v6564_v0 }
 0x356   :  { %v6550_v12 = vrot.slane %v6543_v50, %v15286_v59  ;;  %v6606_v60 = vrot.slane %v6599_v18, %v15286_v59  ;;  %v17305_v35 = vunpack.c.l.b16 %v6522_v25  ;;  %v17307_v55 = vunpack.c.l.b16 %v6536_v34 }
 0x357   :  { %20698 = vst [vmem:[#allocation19_spill] sm:$0xff] %v17299_v51  ;;  %20699 = vst [vmem:[#allocation23_spill] sm:$0xff] %v17301_v16  ;;  %v17309_v31 = vunpack.c.l.b16 %v6578_v62  ;;  %v17311_v39 = vunpack.c.l.b16 %v6592_v54  ;;  %v4290_v50 = vrot.slane %v3874_v22, 6  ;;  %v4292_v18 = vrot.slane %v3875_v42, 5 }
 0x358   :  { %v17315_v52 = vunpack.c.l.b16 %v6550_v12  ;;  %v17317_v0 = vunpack.c.l.b16 %v6606_v60  ;;  %v7203_v9 = vrot.slane %v17305_v35, 7  ;;  %v7205_v13 = vrot.slane %v17307_v55, 6 }
 0x359   :  { %20700 = vst [vmem:[#allocation24_spill] sm:$0xff] %v17309_v31  ;;  %20701 = vst [vmem:[#allocation28_spill] sm:$0xff] %v17311_v39  ;;  %v20446_v25 = vrot.slane %v17307_v55, 7  ;;  %v4294_v12 = vrot.slane %v3876_v15, 4  ;;  %v14155_v54 = vrot.slane %v17268_v40, 9  ;;  %v3124_v22 = vmax.f32 %v17264_v29, %v14153_v58 }
 0x35a   :  { %20702 = vst [vmem:[#allocation86_spill] sm:$0xff] %v17315_v52  ;;  %20703 = vst [vmem:[#allocation87_spill] sm:$0xff] %v17317_v0  ;;  %v7204_v62 = vsel %vm3920_vm2, %v7203_v9, %v17299_v51  ;;  %v20445_v60 = vrot.slane %v17315_v52, 7  ;;  %v3125_v42 = vmax.f32 %v17257_v19, %v14154_v6  ;;  %v5850_v19 = vrot.slane %v15906_v61, %v15286_v59 }
 0x35b   :  { %v17331_v7 = vsel %vm3923_vm3, %v7205_v13, %v7204_v62  ;;  %v17337_v27 = vsel %vm3920_vm2, %v20446_v25, %v17305_v35  ;;  %v3123_v13 = vmax.f32 %v17249_v41, %v14152_v38  ;;  %v4291_v62 = vsel %vm3923_vm3, %v4290_v50, %v4289_v11  ;;  %v20707_v41 = vld [vmem:[#allocation30_spill] sm:$0xff] }
 0x35c   :  { %20704 = vst [vmem:[#allocation88_spill] sm:$0xff] %v17331_v7  ;;  %20705 = vst [vmem:[#allocation89_spill] sm:$0xff] %v17337_v27  ;;  %v17343_v9 = vsel %vm3920_vm2, %v20445_v60, %v17307_v55  ;;  %v637_v60 = vadd.f32 %v17154_v23, %v16773_v37  ;;  %v4293_v15 = vsel %vm3926_vm4, %v4292_v18, %v4291_v62  ;;  %v20714_v7 = vld [vmem:[#allocation41_spill] sm:$0xff] }
 0x35d   :  { %20706 = vst [vmem:[#allocation90_spill] sm:$0xff] %v17343_v9  ;;  %v3126_v25 = vmax.f32 %v17268_v40, %v14155_v54  ;;  %v3377_v34 = vpack.c.bf16 %v3123_v13, %v3123_v13  ;;  %v5738_v38 = vrot.slane %v20707_v41, %v15286_v59  ;;  %v3378_v11 = vpack.c.bf16 %v3124_v22, %v3124_v22 }
 0x35e   :  { %v3379_v50 = vpack.c.bf16 %v3125_v42, %v3125_v42  ;;  %v733_v49 = vmax.f32 %v637_v60, 0.0  ;;  %v4295_v29 = vsel %vm3929_vm5, %v4294_v12, %v4293_v15  ;;  %v17377_v12 = vunpack.c.l.b16 %v5850_v19  ;;  %v20710_v60 = vld [vmem:[#allocation32_spill] sm:$0xff] }
 0x35f   :  { %v3380_v58 = vpack.c.bf16 %v3126_v25, %v3126_v25  ;;  %v17363_v33 = vunpack.c.l.b16 %v3377_v34  ;;  %v17367_v37 = vunpack.c.l.b16 %v5738_v38  ;;  %v17369_v6 = vunpack.c.l.b16 %v3378_v11  ;;  %v20708_v25 = vld [vmem:[#allocation33_spill] sm:$0xff]  ;;  %v20709_v38 = vld [vmem:[#allocation31_spill] sm:$0xff] }
 0x360   :  { %v17371_v40 = vunpack.c.l.b16 %v3379_v50  ;;  %v1709_v18 = vcombine.high %v733_v49, %v733_v49  ;;  %v1716_v54 = vrot.slane %v733_v49, %v15279_v44  ;;  %v7097_v34 = vrot.slane %v20708_v25, 6 }
 0x361   :  { %v17374_v13 = vunpack.c.l.b16 %v3380_v58  ;;  %v7099_v49 = vrot.slane %v15838_v63, 5  ;;  %v7103_v11 = vrot.slane %v20709_v38, 3  ;;  %v7105_v10 = vrot.slane %v20710_v60, 2 }
 0x362   :  { %v1723_v22 = vrot.slane %v1709_v18, %v15279_v44  ;;  %v1724_v42 = vcombine.high %v1716_v54, %v1716_v54  ;;  %v14144_v15 = vrot.slane %v1716_v54, 9  ;;  %v7098_v41 = vsel %vm3923_vm3, %v7097_v34, %v15877_v28  ;;  %v20711_v18 = vld [vmem:[#allocation39_spill] sm:$0xff]  ;;  %v20712_v28 = vld [vmem:[#allocation29_spill] sm:$0xff] }
 0x363   :  { %v7100_v62 = vsel %vm3926_vm4, %v7099_v49, %v7098_v41  ;;  %v7107_v61 = vrot.slane %v17367_v37, 1  ;;  %v7111_v9 = vrot.slane %v20711_v18, 6  ;;  %v20713_v34 = vrot.slane %v20712_v28, 4 }
 0x364   :  { %v1725_v50 = vcombine.high %v1723_v22, %v1723_v22  ;;  %v14145_v58 = vrot.slane %v1724_v42, 9  ;;  %v14146_v19 = vrot.slane %v1723_v22, 9  ;;  %v3115_v53 = vmax.f32 %v1716_v54, %v14144_v15  ;;  %v20715_v54 = vld [vmem:[#allocation40_spill] sm:$0xff] }
 0x365   :  { %v7102_v39 = vsel %vm3929_vm5, %v20713_v34, %v7100_v62  ;;  %v7112_v51 = vsel %vm3923_vm3, %v7111_v9, %v20714_v7  ;;  %v7113_v15 = vrot.slane %v20715_v54, 5  ;;  %v20716_v62 = vld [vmem:[#allocation35_spill] sm:$0xff]  ;;  %v7323_v34 = vrot.slane %v15838_v63, 6 }
 0x366   :  { %v14147_v27 = vrot.slane %v1725_v50, 9  ;;  %v3116_v0 = vmax.f32 %v1724_v42, %v14145_v58  ;;  %v3117_v16 = vmax.f32 %v1723_v22, %v14146_v19  ;;  %v3369_v31 = vpack.c.bf16 %v3115_v53, %v3115_v53  ;;  %v20717_v19 = vld [vmem:[#allocation34_spill] sm:$0xff] }
 0x367   :  { %v7104_v52 = vsel %vm3932_vm6, %v7103_v11, %v7102_v39  ;;  %v7114_v42 = vsel %vm3926_vm4, %v7113_v15, %v7112_v51  ;;  %v7117_v53 = vrot.slane %v20716_v62, 3  ;;  %v20718_v7 = vrot.slane %v20717_v19, 4 }
 0x368   :  { %v3118_v41 = vmax.f32 %v1725_v50, %v14147_v27  ;;  %v3370_v49 = vpack.c.bf16 %v3116_v0, %v3116_v0  ;;  %v3371_v4 = vpack.c.bf16 %v3117_v16, %v3117_v16  ;;  %v7106_v43 = vsel %vm3935_vm7, %v7105_v10, %v7104_v52  ;;  %v20719_v0 = vld [vmem:[#allocation36_spill] sm:$0xff] }
 0x369   :  { %v3877_v17 = vunpack.c.l.b16 %v3369_v31  ;;  %v17400_v22 = vsel %vm3938_vm8, %v7107_v61, %v7106_v43  ;;  %v7116_v9 = vsel %vm3929_vm5, %v20718_v7, %v7114_v42  ;;  %v7119_v10 = vrot.slane %v20719_v0, 2 }
 0x36a   :  { %v3372_v58 = vpack.c.bf16 %v3118_v41, %v3118_v41  ;;  %v3878_v39 = vunpack.c.l.b16 %v3370_v49  ;;  %v3879_v11 = vunpack.c.l.b16 %v3371_v4  ;;  %v7118_v16 = vsel %vm3932_vm6, %v7117_v53, %v7116_v9 }
 0x36b   :  { %v4296_v27 = vrot.slane %v3877_v17, 3  ;;  %v7121_v31 = vrot.slane %v17377_v12, 1  ;;  %v7321_v51 = vrot.slane %v20708_v25, 7  ;;  %v7120_v4 = vsel %vm3935_vm7, %v7119_v10, %v7118_v16  ;;  %v20724_v10 = vld [vmem:[#allocation37_spill] sm:$0xff] }
 0x36c   :  { %v3880_v43 = vunpack.c.l.b16 %v3372_v58  ;;  %v4298_v52 = vrot.slane %v3878_v39, 2  ;;  %v4300_v61 = vrot.slane %v3879_v11, 1  ;;  %v7327_v15 = vrot.slane %v20709_v38, 4 }
 0x36d   :  { %v4297_v50 = vsel %vm3932_vm6, %v4296_v27, %v4295_v29  ;;  %v20720_v41 = vrot.slane %v17216_v2, 7  ;;  %v17420_v42 = vsel %vm3938_vm8, %v7121_v31, %v7120_v4  ;;  %v7322_v53 = vsel %vm3923_vm3, %v7321_v51, %v16948_v26 }
 0x36e   :  { %v4299_v17 = vsel %vm3935_vm7, %v4298_v52, %v4297_v50  ;;  %v20721_v58 = vrot.slane %v17224_v3, 6  ;;  %v7324_v11 = vsel %vm3926_vm4, %v7323_v34, %v7322_v53  ;;  %v7329_v7 = vrot.slane %v20710_v60, 3 }
 0x36f   :  { %v4303_v49 = vsel %vm3920_vm2, %v20720_v41, %v3880_v43  ;;  %v4301_v29 = vsel %vm3938_vm8, %v4300_v61, %v4299_v17  ;;  %v20722_v2 = vrot.slane %v17219_v48, 5  ;;  %v20723_v27 = vrot.slane %v20712_v28, 5  ;;  %v20727_v41 = vld [vmem:[#allocation38_spill] sm:$0xff] }
 0x370   :  { %v4305_v39 = vsel %vm3923_vm3, %v20721_v58, %v4303_v49  ;;  %v7331_v26 = vrot.slane %v17367_v37, 2  ;;  %v7333_v31 = vrot.slane %v20724_v10, 1  ;;  %v20725_v3 = vrot.slane %v17231_v36, 4 }
 0x371   :  { %v4307_v9 = vsel %vm3926_vm4, %v20722_v2, %v4305_v39  ;;  %v7326_v16 = vsel %vm3929_vm5, %v20723_v27, %v7324_v11  ;;  %v7335_v61 = vrot.slane %v20711_v18, 7  ;;  %v7337_v48 = vrot.slane %v20715_v54, 6 }
 0x372   :  { %v4309_v43 = vsel %vm3929_vm5, %v20725_v3, %v4307_v9  ;;  %v7328_v52 = vsel %vm3932_vm6, %v7327_v15, %v7326_v16  ;;  %v20726_v50 = vrot.slane %v17363_v33, 3  ;;  %v7334_v49 = vsel %vm3920_vm2, %v20727_v41, %v7333_v31  ;;  %v20730_v3 = vld [vmem:[#allocation47_spill] sm:$0xff] }
 0x373   :  { %v7330_v17 = vsel %vm3935_vm7, %v7329_v7, %v7328_v52  ;;  %v7341_v36 = vrot.slane %v20716_v62, 4  ;;  %v20728_v53 = vrot.slane %v17369_v6, 2  ;;  %v7336_v33 = vsel %vm3923_vm3, %v7335_v61, %v7334_v49 }
 0x374   :  { %v4311_v4 = vsel %vm3932_vm6, %v20726_v50, %v4309_v43  ;;  %v17457_v39 = vsel %vm3938_vm8, %v7331_v26, %v7330_v17  ;;  %v7343_v11 = vrot.slane %v20719_v0, 3  ;;  %v20729_v2 = vrot.slane %v17371_v40, 1  ;;  %v20732_v40 = vld [vmem:[#allocation46_spill] sm:$0xff] }
 0x375   :  { %v4313_v58 = vsel %vm3935_vm7, %v20728_v53, %v4311_v4  ;;  %v7338_v27 = vsel %vm3926_vm4, %v7337_v48, %v7336_v33  ;;  %v20464_v16 = vrot.slane %v17377_v12, 2  ;;  %v20463_v43 = vrot.slane %v20730_v3, 1 }
 0x376   :  { %v4315_v9 = vsel %vm3938_vm8, %v20729_v2, %v4313_v58  ;;  %v20731_v50 = vrot.slane %v20717_v19, 5  ;;  %v7545_v17 = vsel %vm3920_vm2, %v7321_v51, %v15821_v5 }
 0x377   :  { %v4383_v6 = vpack.c.b16 %v4315_v9, %v4301_v29  ;;  %v14198_v52 = vpack.c.b16 %v4315_v9, %v4315_v9  ;;  %v17477_v53 = vsel %vm3920_vm2, %v20732_v40, %v20463_v43  ;;  %v7546_v58 = vsel %vm3923_vm3, %v7323_v34, %v7545_v17 }
 0x378   :  { %v7340_v4 = vsel %vm3929_vm5, %v20731_v50, %v7338_v27  ;;  %v7552_v29 = vsel %vm3920_vm2, %v7335_v61, %v20727_v41  ;;  %v20733_v9 = vrot.slane %v20712_v28, 5 }
 0x379   :  { %v7342_v49 = vsel %vm3932_vm6, %v7341_v36, %v7340_v4  ;;  %v5039_v33 = vrot.slane %v4383_v6, %v15286_v59  ;;  %v5046_v2 = vrot.slane %v14198_v52, %v15286_v59  ;;  %v7553_v61 = vsel %vm3923_vm3, %v7337_v48, %v7552_v29 }
 0x37a   :  { %v7344_v51 = vsel %vm3935_vm7, %v7343_v11, %v7342_v49  ;;  %v7547_v27 = vsel %vm3926_vm4, %v20733_v9, %v7546_v58  ;;  %v20734_v6 = vrot.slane %v15821_v5, 1 }
 0x37b   :  { %v17493_v50 = vsel %vm3938_vm8, %v20464_v16, %v7344_v51  ;;  %v7548_v34 = vsel %vm3929_vm5, %v7327_v15, %v7547_v27  ;;  %v5047_v4 = vcombine.high %v5039_v33, %v5039_v33  ;;  %v5048_v17 = vcombine.high %v5046_v2, %v5046_v2 }
 0x37c   :  { %v7692_v52 = vsel %vm3920_vm2, %v20708_v25, %v20734_v6  ;;  %v5055_v49 = vrot.slane %v5039_v33, %v15286_v59  ;;  %v5062_v58 = vrot.slane %v5046_v2, %v15286_v59  ;;  %v7549_v9 = vsel %vm3932_vm6, %v7329_v7, %v7548_v34 }
 0x37d   :  { %v20735_v51 = vrot.slane %v20717_v19, 5  ;;  %v20736_v15 = vrot.slane %v15838_v63, 7  ;;  %v5069_v29 = vrot.slane %v5047_v4, %v15286_v59  ;;  %v5076_v27 = vrot.slane %v5048_v17, %v15286_v59 }
 0x37e   :  { %v5077_v6 = vcombine.high %v5055_v49, %v5055_v49  ;;  %v5078_v33 = vcombine.high %v5062_v58, %v5062_v58  ;;  %v6613_v2 = vrot.slane %v5055_v49, %v15286_v59  ;;  %v6669_v7 = vrot.slane %v5062_v58, %v15286_v59 }
 0x37f   :  { %v7554_v43 = vsel %vm3926_vm4, %v20735_v51, %v7553_v61  ;;  %v7694_v48 = vsel %vm3923_vm3, %v20736_v15, %v7692_v52  ;;  %v7550_v34 = vsel %vm3935_vm7, %v7331_v26, %v7549_v9  ;;  %v5079_v51 = vcombine.high %v5069_v29, %v5069_v29 }
 0x380   :  { %v7555_v61 = vsel %vm3929_vm5, %v7341_v36, %v7554_v43  ;;  %v5080_v16 = vcombine.high %v5076_v27, %v5076_v27  ;;  %v6627_v52 = vrot.slane %v5069_v29, %v15286_v59  ;;  %v6641_v15 = vrot.slane %v5077_v6, %v15286_v59 }
 0x381   :  { %v6620_v4 = vrot.slane %v6613_v2, %v15286_v59  ;;  %v6676_v17 = vrot.slane %v6669_v7, %v15286_v59  ;;  %v6683_v5 = vrot.slane %v5076_v27, %v15286_v59  ;;  %v6697_v49 = vrot.slane %v5078_v33, %v15286_v59 }
 0x382   :  { %v6634_v58 = vrot.slane %v6627_v52, %v15286_v59  ;;  %v6648_v26 = vrot.slane %v6641_v15, %v15286_v59  ;;  %v6655_v36 = vrot.slane %v5079_v51, %v15286_v59  ;;  %v6711_v43 = vrot.slane %v5080_v16, %v15286_v59 }
 0x383   :  { %v6690_v9 = vrot.slane %v6683_v5, %v15286_v59  ;;  %v6704_v29 = vrot.slane %v6697_v49, %v15286_v59  ;;  %v17529_v6 = vunpack.c.l.b16 %v6620_v4  ;;  %v17531_v2 = vunpack.c.l.b16 %v6676_v17 }
 0x384   :  { %v6662_v27 = vrot.slane %v6655_v36, %v15286_v59  ;;  %v6718_v33 = vrot.slane %v6711_v43, %v15286_v59  ;;  %v17535_v7 = vunpack.c.l.b16 %v6634_v58  ;;  %v17537_v52 = vunpack.c.l.b16 %v6648_v26 }
 0x385   :  { %20737 = vst [vmem:[#allocation30_spill] sm:$0xff] %v17531_v2  ;;  %v17539_v15 = vunpack.c.l.b16 %v6690_v9  ;;  %v17541_v51 = vunpack.c.l.b16 %v6704_v29  ;;  %v7551_v9 = vsel %vm3938_vm8, %v7333_v31, %v7550_v34  ;;  %v7699_v31 = vrot.slane %v20710_v60, 4  ;;  %v20823_v2 = vld [vmem:[#allocation66_spill] sm:$0xff] }
 0x386   :  { %v17545_v4 = vunpack.c.l.b16 %v6662_v27  ;;  %v17547_v17 = vunpack.c.l.b16 %v6718_v33  ;;  %v7217_v49 = vrot.slane %v17535_v7, 7  ;;  %v7219_v36 = vrot.slane %v17537_v52, 6 }
 0x387   :  { %20738 = vst [vmem:[#allocation33_spill] sm:$0xff] %v17539_v15  ;;  %20739 = vst [vmem:[#allocation31_spill] sm:$0xff] %v17541_v51  ;;  %v20465_v58 = vrot.slane %v17537_v52, 7  ;;  %v20745_v34 = vrot.slane %v20730_v3, 1  ;;  %v7711_v60 = vrot.slane %v20716_v62, 5  ;;  %v14210_v62 = vpack.c.b16 %v17457_v39, %v17400_v22 }
 0x388   :  { %20740 = vst [vmem:[#allocation32_spill] sm:$0xff] %v17545_v4  ;;  %v7218_v29 = vsel %vm3920_vm2, %v7217_v49, %v17529_v6  ;;  %v20466_v5 = vrot.slane %v17545_v4, 7  ;;  %v7556_v49 = vsel %vm3932_vm6, %v7343_v11, %v7555_v61  ;;  %v20746_v61 = vrot.slane %v20709_v38, 5 }
 0x389   :  { %v17561_v16 = vsel %vm3923_vm3, %v7219_v36, %v7218_v29  ;;  %v17567_v26 = vsel %vm3920_vm2, %v20465_v58, %v17535_v7  ;;  %v20743_v29 = vrot.slane %v17377_v12, 2  ;;  %v20744_v58 = vrot.slane %v20712_v28, 6 }
 0x38a   :  { %20741 = vst [vmem:[#allocation39_spill] sm:$0xff] %v17561_v16  ;;  %20742 = vst [vmem:[#allocation29_spill] sm:$0xff] %v17567_v26  ;;  %v17579_v36 = vsel %vm3920_vm2, %v20466_v5, %v17537_v52  ;;  %v7701_v5 = vrot.slane %v17367_v37, 3  ;;  %v7703_v26 = vrot.slane %v20724_v10, 2  ;;  %v7715_v37 = vrot.slane %v17377_v12, 3  ;;  %v20750_v12 = vld [vmem:[#allocation49_spill] sm:$0xff] }
 0x38b   :  { %v7557_v33 = vsel %vm3935_vm7, %v20743_v29, %v7556_v49  ;;  %v7696_v27 = vsel %vm3926_vm4, %v20744_v58, %v7694_v48  ;;  %v20747_v29 = vrot.slane %v20727_v41, 1  ;;  %v7713_v58 = vrot.slane %v20719_v0, 4 }
 0x38c   :  { %v7558_v11 = vsel %vm3938_vm8, %v20745_v34, %v7557_v33  ;;  %v7698_v43 = vsel %vm3929_vm5, %v20746_v61, %v7696_v27  ;;  %v20748_v34 = vrot.slane %v20715_v54, 7  ;;  %v7717_v10 = vrot.slane %v20730_v3, 2 }
 0x38d   :  { %v7700_v49 = vsel %vm3932_vm6, %v7699_v31, %v7698_v43  ;;  %v7706_v48 = vsel %vm3920_vm2, %v20711_v18, %v20747_v29  ;;  %v20749_v61 = vrot.slane %v20717_v19, 6  ;;  %v14211_v0 = vpack.c.b16 %v17493_v50, %v17420_v42  ;;  %v20752_v50 = vld [vmem:[#allocation48_spill] sm:$0xff] }
 0x38e   :  { %v7702_v33 = vsel %vm3935_vm7, %v7701_v5, %v7700_v49  ;;  %v7708_v27 = vsel %vm3923_vm3, %v20748_v34, %v7706_v48  ;;  %v7719_v48 = vrot.slane %v20732_v40, 1  ;;  %v20469_v34 = vrot.slane %v20750_v12, 7 }
 0x38f   :  { %v7704_v43 = vsel %vm3938_vm8, %v7703_v26, %v7702_v33  ;;  %v7710_v29 = vsel %vm3926_vm4, %v20749_v61, %v7708_v27  ;;  %v8252_v33 = vrot.slane %v14210_v62, %v15286_v59  ;;  %v8259_v16 = vrot.slane %v14211_v0, %v15286_v59 }
 0x390   :  { %v7712_v49 = vsel %vm3929_vm5, %v7711_v60, %v7710_v29  ;;  %v14212_v4 = vpack.c.b16 %v7704_v43, %v7551_v9  ;;  %v20751_v27 = vrot.slane %v15838_v63, 7  ;;  %v7720_v9 = vsel %vm3920_vm2, %v20752_v50, %v7719_v48 }
 0x391   :  { %v7714_v3 = vsel %vm3932_vm6, %v7713_v58, %v7712_v49  ;;  %v20753_v43 = vrot.slane %v20712_v28, 6  ;;  %v17638_v62 = vsel %vm3923_vm3, %v20469_v34, %v7720_v9  ;;  %v20754_v63 = vrot.slane %v20709_v38, 5 }
 0x392   :  { %v7917_v22 = vsel %vm3920_vm2, %v20751_v27, %v20708_v25  ;;  %v7716_v42 = vsel %vm3935_vm7, %v7715_v37, %v7714_v3  ;;  %v8266_v39 = vrot.slane %v14212_v4, %v15286_v59  ;;  %v20755_v4 = vrot.slane %v20715_v54, 7 }
 0x393   :  { %v7918_v61 = vsel %vm3923_vm3, %v20753_v43, %v7917_v22  ;;  %v7718_v29 = vsel %vm3938_vm8, %v7717_v10, %v7716_v42  ;;  %v20756_v42 = vrot.slane %v20717_v19, 6  ;;  %v658_v38 = vadd.f32 %v17154_v23, %v17182_v45 }
 0x394   :  { %v7919_v25 = vsel %vm3926_vm4, %v20754_v63, %v7918_v61  ;;  %v7924_v0 = vsel %vm3920_vm2, %v20755_v4, %v20711_v18  ;;  %v14213_v49 = vpack.c.b16 %v7718_v29, %v7558_v11  ;;  %v8288_v28 = vcombine.low %v8252_v33, %v8266_v39 }
 0x395   :  { %v8289_v3 = vcombine.high %v8252_v33, %v8266_v39  ;;  %v7920_v27 = vsel %vm3929_vm5, %v7699_v31, %v7919_v25  ;;  %v7925_v9 = vsel %vm3923_vm3, %v20756_v42, %v7924_v0  ;;  %v650_v43 = vadd.f32 %v17154_v23, %v17184_v1 }
 0x396   :  { %v7921_v22 = vsel %vm3932_vm6, %v7701_v5, %v7920_v27  ;;  %v8273_v54 = vrot.slane %v14213_v49, %v15286_v59  ;;  %v8300_v18 = vrot.slane %v8288_v28, %v15286_v59  ;;  %v20757_v5 = vrot.slane %v20727_v41, 1 }
 0x397   :  { %v8314_v11 = vrot.slane %v8289_v3, %v15286_v59  ;;  %v7922_v31 = vsel %vm3935_vm7, %v7703_v26, %v7921_v22  ;;  %v7926_v33 = vsel %vm3926_vm4, %v7711_v60, %v7925_v9  ;;  %v738_v39 = vmax.f32 %v658_v38, 0.0 }
 0x398   :  { %v7923_v19 = vsel %vm3938_vm8, %v20757_v5, %v7922_v31  ;;  %v17664_v61 = vmax.f32 %v650_v43, 0.0  ;;  %v8290_v45 = vcombine.low %v8259_v16, %v8273_v54  ;;  %v8291_v29 = vcombine.high %v8259_v16, %v8273_v54 }
 0x399   :  { %v14257_v23 = vcombine.low %v8300_v18, %v8314_v11  ;;  %v14259_v1 = vcombine.high %v8300_v18, %v8314_v11  ;;  %v7927_v63 = vsel %vm3929_vm5, %v7713_v58, %v7926_v33  ;;  %v1794_v25 = vcombine.high %v738_v39, %v738_v39 }
 0x39a   :  { %v1801_v4 = vrot.slane %v738_v39, %v15279_v44  ;;  %v1760_v26 = vcombine.high %v17664_v61, %v17664_v61  ;;  %v8307_v41 = vrot.slane %v8290_v45, %v15286_v59  ;;  %v8321_v0 = vrot.slane %v8291_v29, %v15286_v59 }
 0x39b   :  { %v9276_v60 = vrot.slane %v14257_v23, %v15286_v59  ;;  %v9290_v49 = vrot.slane %v14259_v1, %v15286_v59  ;;  %v7928_v16 = vsel %vm3932_vm6, %v7715_v37, %v7927_v63  ;;  %v1808_v28 = vrot.slane %v1794_v25, %v15279_v44 }
 0x39c   :  { %v1809_v3 = vcombine.high %v1801_v4, %v1801_v4  ;;  %v14164_v58 = vrot.slane %v1801_v4, 9  ;;  %v14261_v27 = vcombine.low %v8307_v41, %v8321_v0  ;;  %v14263_v22 = vcombine.high %v8307_v41, %v8321_v0 }
 0x39d   :  { %v9327_v42 = vcombine.high %v9276_v60, %v9290_v49  ;;  %v9326_v9 = vcombine.low %v9276_v60, %v9290_v49  ;;  %v7929_v38 = vsel %vm3935_vm7, %v7717_v10, %v7928_v16  ;;  %v1810_v43 = vcombine.high %v1808_v28, %v1808_v28 }
 0x39e   :  { %v14165_v54 = vrot.slane %v1809_v3, 9  ;;  %v14166_v18 = vrot.slane %v1808_v28, 9  ;;  %v9304_v11 = vrot.slane %v14261_v27, %v15286_v59  ;;  %v9318_v31 = vrot.slane %v14263_v22, %v15286_v59 }
 0x39f   :  { %v17680_v5 = vrot.slane %v9327_v42, %v15286_v59  ;;  %v17683_v37 = vrot.slane %v9326_v9, %v15286_v59  ;;  %v7930_v33 = vsel %vm3938_vm8, %v7719_v48, %v7929_v38  ;;  %v14167_v39 = vrot.slane %v1810_v43, 9 }
 0x3a0   :  { %v3135_v45 = vmax.f32 %v1801_v4, %v14164_v58  ;;  %v3136_v29 = vmax.f32 %v1809_v3, %v14165_v54  ;;  %v9330_v23 = vcombine.high %v9304_v11, %v9318_v31  ;;  %v9329_v10 = vcombine.low %v9304_v11, %v9318_v31 }
 0x3a1   :  { %20758 = vst [vmem:[#allocation41_spill] sm:$0xff] %v17680_v5  ;;  %20759 = vst [vmem:[#allocation40_spill] sm:$0xff] %v17683_v37  ;;  %v8001_v1 = vpack.c.b16 %v7930_v33, %v7923_v19  ;;  %v14214_v63 = vpack.c.b16 %v7930_v33, %v7930_v33  ;;  %v3137_v25 = vmax.f32 %v1808_v28, %v14166_v18 }
 0x3a2   :  { %v3138_v41 = vmax.f32 %v1810_v43, %v14167_v39  ;;  %v3389_v0 = vpack.c.bf16 %v3135_v45, %v3135_v45  ;;  %v3390_v60 = vpack.c.bf16 %v3136_v29, %v3136_v29  ;;  %v17687_v49 = vrot.slane %v9330_v23, %v15286_v59  ;;  %v17733_v29 = vld [vmem:[%s20309_s2] ss:$0 sm:$0xff] }
 0x3a3   :  { %v17690_v16 = vrot.slane %v9329_v10, %v15286_v59  ;;  %v8280_v27 = vrot.slane %v8001_v1, %v15286_v59  ;;  %v8287_v48 = vrot.slane %v14214_v63, %v15286_v59  ;;  %v3391_v4 = vpack.c.bf16 %v3137_v25, %v3137_v25 }
 0x3a4   :  { %20760 = vst [vmem:[#allocation35_spill] sm:$0xff] %v17687_v49  ;;  %v3392_v3 = vpack.c.bf16 %v3138_v41, %v3138_v41  ;;  %v17694_v58 = vunpack.c.l.b16 %v3389_v0  ;;  %v17696_v19 = vunpack.c.l.b16 %v3390_v60  ;;  %v9377_v28 = vcombine.low %v17680_v5, %v17687_v49 }
 0x3a5   :  { %20761 = vst [vmem:[#allocation34_spill] sm:$0xff] %v17690_v16  ;;  %v9374_v22 = vcombine.low %v17683_v37, %v17690_v16  ;;  %v8292_v42 = vcombine.high %v8280_v27, %v8280_v27  ;;  %v8293_v9 = vcombine.high %v8287_v48, %v8287_v48  ;;  %v8328_v38 = vrot.slane %v8280_v27, %v15286_v59 }
 0x3a6   :  { %v8335_v43 = vrot.slane %v8287_v48, %v15286_v59  ;;  %v17704_v54 = vunpack.c.l.b16 %v3391_v4  ;;  %v17706_v18 = vunpack.c.l.b16 %v3392_v3  ;;  %10274 = vmatprep.mubr.bf16.mxu1 %v9377_v28  ;;  %v1767_v23 = vrot.slane %v17664_v61, %v15279_v44  ;;  %v14961_v4 = vld [vmem:[%s20310_s3 + $0xc0] sm:$0xff]   ;;  %v14963_v61 = vld [vmem:[%s20310_s3 + $0xc8] sm:$0xff]  }
 0x3a7   :  { %v8342_v11 = vrot.slane %v8292_v42, %v15286_v59  ;;  %v8349_v31 = vrot.slane %v8293_v9, %v15286_v59  ;;  %10275 = vmatmul.mubr.bf16.gmra.mrb[8].mxu1 %v9374_v22  ;;  %v1774_v10 = vrot.slane %v1760_v26, %v15279_v44  ;;  %v14962_v3 = vld [vmem:[%s20310_s3 + $0x80] sm:$0xff]   ;;  %14575 = vmatprep.subr.bf16.mxu1 %v14961_v4 }
 0x3a8   :  { %v1775_v0 = vcombine.high %v1767_v23, %v1767_v23  ;;  %v14156_v27 = vrot.slane %v1767_v23, 9  ;;  %14576 = vmatpush3.bf16.msra.mxu1 %v14962_v3 }
 0x3a9   :  { %v14258_v1 = vcombine.low %v8328_v38, %v8342_v11  ;;  %v14260_v63 = vcombine.high %v8328_v38, %v8342_v11  ;;  %v14262_v25 = vcombine.low %v8335_v43, %v8349_v31  ;;  %v14264_v41 = vcombine.high %v8335_v43, %v8349_v31  ;;  %14577 = vmatprep.subr.bf16.mxu1 %v14963_v61 }
 0x3aa   :  { %v1776_v60 = vcombine.high %v1774_v10, %v1774_v10  ;;  %v14158_v48 = vrot.slane %v1774_v10, 9  ;;  %v14157_v9 = vrot.slane %v1775_v0, 9  ;;  %v3127_v43 = vmax.f32 %v1767_v23, %v14156_v27 }
 0x3ab   :  { %v9283_v26 = vrot.slane %v14258_v1, %v15286_v59  ;;  %v9297_v28 = vrot.slane %v14260_v63, %v15286_v59  ;;  %v9311_v22 = vrot.slane %v14262_v25, %v15286_v59  ;;  %v9325_v42 = vrot.slane %v14264_v41, %v15286_v59 }
 0x3ac   :  { %v14159_v38 = vrot.slane %v1776_v60, 9  ;;  %v3129_v11 = vmax.f32 %v1774_v10, %v14158_v48  ;;  %v661_v1 = vadd.f32 %v17733_v29, %v17193_v56  ;;  %v653_v63 = vadd.f32 %v17733_v29, %v17201_v20 }
 0x3ad   :  { %v9328_v31 = vcombine.low %v9283_v26, %v9297_v28  ;;  %v9331_v34 = vcombine.low %v9311_v22, %v9325_v42  ;;  %v3128_v25 = vmax.f32 %v1775_v0, %v14157_v9  ;;  %v3381_v45 = vpack.c.bf16 %v3127_v43, %v3127_v43 }
 0x3ae   :  { %v3130_v41 = vmax.f32 %v1776_v60, %v14159_v38  ;;  %v3383_v23 = vpack.c.bf16 %v3129_v11, %v3129_v11  ;;  %v739_v48 = vmax.f32 %v661_v1, 0.0  ;;  %v737_v4 = vmax.f32 %v653_v63, 0.0 }
 0x3af   :  { %v9345_v10 = vrot.slane %v9328_v31, %v15286_v59  ;;  %v9366_v27 = vrot.slane %v9331_v34, %v15286_v59  ;;  %v3382_v26 = vpack.c.bf16 %v3128_v25, %v3128_v25  ;;  %v3889_v22 = vunpack.c.l.b16 %v3381_v45 }
 0x3b0   :  { %v3384_v28 = vpack.c.bf16 %v3130_v41, %v3130_v41  ;;  %v3891_v42 = vunpack.c.l.b16 %v3383_v23  ;;  %v1811_v39 = vcombine.high %v739_v48, %v739_v48  ;;  %v1818_v20 = vrot.slane %v739_v48, %v15279_v44 }
 0x3b1   :  { %v9376_v56 = vcombine.low %v9345_v10, %v9366_v27  ;;  %v1777_v3 = vcombine.high %v737_v4, %v737_v4  ;;  %v3890_v0 = vunpack.c.l.b16 %v3382_v26  ;;  %v4316_v9 = vrot.slane %v3889_v22, 7 }
 0x3b2   :  { %v3892_v60 = vunpack.c.l.b16 %v3384_v28  ;;  %v4320_v38 = vrot.slane %v3891_v42, 5  ;;  %v1825_v61 = vrot.slane %v1811_v39, %v15279_v44  ;;  %v1826_v43 = vcombine.high %v1818_v20, %v1818_v20 }
 0x3b3   :  { %14805 = vmatprep.mubr.bf16.mxu0 %v9376_v56  ;;  %v14168_v34 = vrot.slane %v1818_v20, 9  ;;  %v1784_v11 = vrot.slane %v737_v4, %v15279_v44  ;;  %v4317_v45 = vsel %vm3920_vm2, %v4316_v9, %v17374_v13  ;;  %v4318_v31 = vrot.slane %v3890_v0, 6  ;;  %v14964_v4 = vld [vmem:[%s20310_s3 + $0x88] sm:$0xff]  }
 0x3b4   :  { %v4322_v1 = vrot.slane %v3892_v60, 4  ;;  %v1791_v63 = vrot.slane %v1777_v3, %v15279_v44  ;;  %v1827_v25 = vcombine.high %v1825_v61, %v1825_v61  ;;  %v14169_v41 = vrot.slane %v1826_v43, 9  ;;  %14578 = vmatpush3.bf16.msra.mxu1 %v14964_v4 }
 0x3b5   :  { %v14170_v23 = vrot.slane %v1825_v61, 9  ;;  %v3139_v10 = vmax.f32 %v1818_v20, %v14168_v34  ;;  %v4319_v27 = vsel %vm3923_vm3, %v4318_v31, %v4317_v45  ;;  %v1792_v48 = vcombine.high %v1784_v11, %v1784_v11 }
 0x3b6   :  { %v1793_v26 = vcombine.high %v1791_v63, %v1791_v63  ;;  %v14160_v39 = vrot.slane %v1784_v11, 9  ;;  %v4321_v28 = vsel %vm3926_vm4, %v4320_v38, %v4319_v27  ;;  %v14171_v13 = vrot.slane %v1827_v25, 9 }
 0x3b7   :  { %v3140_v22 = vmax.f32 %v1826_v43, %v14169_v41  ;;  %v3141_v42 = vmax.f32 %v1825_v61, %v14170_v23  ;;  %v3393_v56 = vpack.c.bf16 %v3139_v10, %v3139_v10  ;;  %v14161_v3 = vrot.slane %v1792_v48, 9 }
 0x3b8   :  { %v14162_v0 = vrot.slane %v1791_v63, 9  ;;  %v14163_v60 = vrot.slane %v1793_v26, 9  ;;  %v3142_v20 = vmax.f32 %v1827_v25, %v14171_v13  ;;  %v3131_v45 = vmax.f32 %v1784_v11, %v14160_v39 }
 0x3b9   :  { %v3394_v9 = vpack.c.bf16 %v3140_v22, %v3140_v22  ;;  %v3395_v34 = vpack.c.bf16 %v3141_v42, %v3141_v42  ;;  %v3901_v31 = vunpack.c.l.b16 %v3393_v56  ;;  %v3132_v33 = vmax.f32 %v1792_v48, %v14161_v3 }
 0x3ba   :  { %v3133_v37 = vmax.f32 %v1791_v63, %v14162_v0  ;;  %v3134_v16 = vmax.f32 %v1793_v26, %v14163_v60  ;;  %v3396_v5 = vpack.c.bf16 %v3142_v20, %v3142_v20  ;;  %v3385_v38 = vpack.c.bf16 %v3131_v45, %v3131_v45 }
 0x3bb   :  { %v3902_v49 = vunpack.c.l.b16 %v3394_v9  ;;  %v3903_v51 = vunpack.c.l.b16 %v3395_v34  ;;  %v4338_v27 = vrot.slane %v3901_v31, 3  ;;  %v3386_v43 = vpack.c.bf16 %v3132_v33, %v3132_v33 }
 0x3bc   :  { %v3387_v61 = vpack.c.bf16 %v3133_v37, %v3133_v37  ;;  %v3388_v41 = vpack.c.bf16 %v3134_v16, %v3134_v16  ;;  %v17752_v23 = vunpack.c.l.b16 %v3396_v5  ;;  %v3893_v25 = vunpack.c.l.b16 %v3385_v38 }
 0x3bd   :  { %v4340_v10 = vrot.slane %v3902_v49, 2  ;;  %v4342_v4 = vrot.slane %v3903_v51, 1  ;;  %v3894_v13 = vunpack.c.l.b16 %v3386_v43  ;;  %v4323_v48 = vsel %vm3929_vm5, %v4322_v1, %v4321_v28 }
 0x3be   :  { %v3895_v22 = vunpack.c.l.b16 %v3387_v61  ;;  %v3896_v11 = vunpack.c.l.b16 %v3388_v41  ;;  %v4324_v63 = vrot.slane %v3893_v25, 3  ;;  %v674_v26 = vadd.f32 %v17733_v29, %v17214_v46 }
 0x3bf   :  { %v666_v39 = vadd.f32 %v17733_v29, %v17251_v47  ;;  %v677_v37 = vadd.f32 %v17733_v29, %v17275_v21  ;;  %v4326_v5 = vrot.slane %v3894_v13, 2  ;;  %v20762_v51 = vrot.slane %v17694_v58, 7 }
 0x3c0   :  { %v4328_v16 = vrot.slane %v3895_v22, 1  ;;  %v669_v33 = vadd.f32 %v17733_v29, %v17285_v32  ;;  %v4325_v1 = vsel %vm3932_vm6, %v4324_v63, %v4323_v48  ;;  %v20763_v28 = vrot.slane %v17696_v19, 6 }
 0x3c1   :  { %v4331_v49 = vsel %vm3920_vm2, %v20762_v51, %v3896_v11  ;;  %v742_v42 = vmax.f32 %v674_v26, 0.0  ;;  %v740_v47 = vmax.f32 %v666_v39, 0.0  ;;  %v4327_v56 = vsel %vm3935_vm7, %v4326_v5, %v4325_v1 }
 0x3c2   :  { %v4333_v46 = vsel %vm3923_vm3, %v20763_v28, %v4331_v49  ;;  %v20764_v21 = vrot.slane %v17704_v54, 5  ;;  %v743_v58 = vmax.f32 %v677_v37, 0.0  ;;  %v17774_v0 = vmax.f32 %v669_v33, 0.0 }
 0x3c3   :  { %v4329_v60 = vsel %vm3938_vm8, %v4328_v16, %v4327_v56  ;;  %v20765_v32 = vrot.slane %v17706_v18, 4  ;;  %v1862_v19 = vcombine.high %v742_v42, %v742_v42  ;;  %v1869_v20 = vrot.slane %v742_v42, %v15279_v44 }
 0x3c4   :  { %v4335_v3 = vsel %vm3926_vm4, %v20764_v21, %v4333_v46  ;;  %v1828_v34 = vcombine.high %v740_v47, %v740_v47  ;;  %v17783_v45 = vrot.slane %v740_v47, %v15279_v44  ;;  %v17786_v54 = vrot.slane %v743_v58, %v15279_v44 }
 0x3c5   :  { %v4337_v29 = vsel %vm3929_vm5, %v20765_v32, %v4335_v3  ;;  %v1876_v38 = vrot.slane %v1862_v19, %v15279_v44  ;;  %v1877_v43 = vcombine.high %v1869_v20, %v1869_v20  ;;  %v14180_v18 = vrot.slane %v1869_v20, 9 }
 0x3c6   :  { %v4339_v9 = vsel %vm3932_vm6, %v4338_v27, %v4337_v29  ;;  %v17792_v41 = vrot.slane %v1828_v34, %v15279_v44  ;;  %v17796_v27 = vcombine.high %v17783_v45, %v17783_v45  ;;  %v14172_v25 = vrot.slane %v17783_v45, 9 }
 0x3c7   :  { %v4341_v31 = vsel %vm3935_vm7, %v4340_v10, %v4339_v9  ;;  %v1878_v11 = vcombine.high %v1876_v38, %v1876_v38  ;;  %v14181_v48 = vrot.slane %v1877_v43, 9  ;;  %v14182_v10 = vrot.slane %v1876_v38, 9 }
 0x3c8   :  { %v4343_v61 = vsel %vm3938_vm8, %v4342_v4, %v4341_v31  ;;  %v3151_v63 = vmax.f32 %v1869_v20, %v14180_v18  ;;  %v17801_v26 = vcombine.high %v17792_v41, %v17792_v41  ;;  %v14173_v4 = vrot.slane %v17796_v27, 9 }
 0x3c9   :  { %v4384_v13 = vpack.c.b16 %v4343_v61, %v4329_v60  ;;  %v14199_v22 = vpack.c.b16 %v4343_v61, %v4343_v61  ;;  %v14183_v5 = vrot.slane %v1878_v11, 9  ;;  %v3152_v16 = vmax.f32 %v1877_v43, %v14181_v48 }
 0x3ca   :  { %v17806_v51 = vmax.f32 %v1876_v38, %v14182_v10  ;;  %v3405_v49 = vpack.c.bf16 %v3151_v63, %v3151_v63  ;;  %v14174_v33 = vrot.slane %v17792_v41, 9  ;;  %v14175_v1 = vrot.slane %v17801_v26, 9 }
 0x3cb   :  { %v5088_v39 = vrot.slane %v4384_v13, %v15286_v59  ;;  %v5095_v37 = vrot.slane %v14199_v22, %v15286_v59  ;;  %v3154_v56 = vmax.f32 %v1878_v11, %v14183_v5  ;;  %v3406_v21 = vpack.c.bf16 %v3152_v16, %v3152_v16  ;;  %v14965_v13 = vld [vmem:[%s20310_s3 + $0xd0] sm:$0xff]   ;;  %v14967_v11 = vld [vmem:[%s20310_s3 + $0xd8] sm:$0xff]  }
 0x3cc   :  { %v3407_v3 = vpack.c.bf16 %v17806_v51, %v17806_v51  ;;  %v17814_v58 = vunpack.c.l.b16 %v3405_v49  ;;  %v14966_v22 = vld [vmem:[%s20310_s3 + $0x90] sm:$0xff]   ;;  %14579 = vmatprep.subr.bf16.mxu1 %v14965_v13 }
 0x3cd   :  { %v5096_v28 = vcombine.high %v5088_v39, %v5088_v39  ;;  %v5097_v46 = vcombine.high %v5095_v37, %v5095_v37  ;;  %v5104_v42 = vrot.slane %v5088_v39, %v15286_v59  ;;  %v5111_v47 = vrot.slane %v5095_v37, %v15286_v59  ;;  %14580 = vmatpush3.bf16.msra.mxu1 %v14966_v22  ;;  %v14968_v22 = vld [vmem:[%s20310_s3 + $0x98] sm:$0xff]  }
 0x3ce   :  { %v3408_v34 = vpack.c.bf16 %v3154_v56, %v3154_v56  ;;  %v17820_v31 = vunpack.c.l.b16 %v3406_v21  ;;  %14581 = vmatprep.subr.bf16.mxu1 %v14967_v11 }
 0x3cf   :  { %v5118_v60 = vrot.slane %v5096_v28, %v15286_v59  ;;  %v5125_v32 = vrot.slane %v5097_v46, %v15286_v59  ;;  %v5126_v29 = vcombine.high %v5104_v42, %v5104_v42  ;;  %v5127_v19 = vcombine.high %v5111_v47, %v5111_v47 }
 0x3d0   :  { %v6725_v20 = vrot.slane %v5104_v42, %v15286_v59  ;;  %v6781_v9 = vrot.slane %v5111_v47, %v15286_v59 }
 0x3d1   :  { %v5128_v38 = vcombine.high %v5118_v60, %v5118_v60  ;;  %v5129_v43 = vcombine.high %v5125_v32, %v5125_v32  ;;  %v6739_v18 = vrot.slane %v5118_v60, %v15286_v59  ;;  %v6753_v61 = vrot.slane %v5126_v29, %v15286_v59  ;;  %14582 = vmatpush3.bf16.msra.mxu1 %v14968_v22 }
 0x3d2   :  { %v6732_v48 = vrot.slane %v6725_v20, %v15286_v59  ;;  %v6788_v10 = vrot.slane %v6781_v9, %v15286_v59  ;;  %v6795_v63 = vrot.slane %v5125_v32, %v15286_v59  ;;  %v6809_v39 = vrot.slane %v5127_v19, %v15286_v59 }
 0x3d3   :  { %v6746_v37 = vrot.slane %v6739_v18, %v15286_v59  ;;  %v6760_v5 = vrot.slane %v6753_v61, %v15286_v59  ;;  %v6767_v16 = vrot.slane %v5128_v38, %v15286_v59  ;;  %v6823_v51 = vrot.slane %v5129_v43, %v15286_v59 }
 0x3d4   :  { %v6802_v49 = vrot.slane %v6795_v63, %v15286_v59  ;;  %v6816_v28 = vrot.slane %v6809_v39, %v15286_v59  ;;  %v17843_v46 = vunpack.c.l.b16 %v6732_v48  ;;  %v17845_v42 = vunpack.c.l.b16 %v6788_v10 }
 0x3d5   :  { %v6774_v47 = vrot.slane %v6767_v16, %v15286_v59  ;;  %v6830_v56 = vrot.slane %v6823_v51, %v15286_v59  ;;  %v17849_v21 = vunpack.c.l.b16 %v6746_v37  ;;  %v17851_v60 = vunpack.c.l.b16 %v6760_v5 }
 0x3d6   :  { %20766 = vst [vmem:[#allocation36_spill] sm:$0xff] %v17843_v46  ;;  %20767 = vst [vmem:[#allocation37_spill] sm:$0xff] %v17845_v42  ;;  %v17853_v32 = vunpack.c.l.b16 %v6802_v49  ;;  %v17855_v29 = vunpack.c.l.b16 %v6816_v28  ;;  %v17883_v16 = vunpack.c.l.b16 %v3407_v3  ;;  %v17885_v51 = vunpack.c.l.b16 %v3408_v34 }
 0x3d7   :  { %20768 = vst [vmem:[#allocation38_spill] sm:$0xff] %v17851_v60  ;;  %v17859_v9 = vunpack.c.l.b16 %v6774_v47  ;;  %v17861_v38 = vunpack.c.l.b16 %v6830_v56  ;;  %v7231_v43 = vrot.slane %v17849_v21, 7  ;;  %v7233_v18 = vrot.slane %v17851_v60, 6 }
 0x3d8   :  { %20769 = vst [vmem:[#allocation47_spill] sm:$0xff] %v17853_v32  ;;  %20770 = vst [vmem:[#allocation46_spill] sm:$0xff] %v17855_v29  ;;  %v20477_v61 = vrot.slane %v17851_v60, 7  ;;  %v3143_v56 = vmax.f32 %v17783_v45, %v14172_v25  ;;  %v3144_v34 = vmax.f32 %v17796_v27, %v14173_v4  ;;  %v1886_v45 = vcombine.high %v17786_v54, %v17786_v54 }
 0x3d9   :  { %20771 = vst [vmem:[#allocation49_spill] sm:$0xff] %v17859_v9  ;;  %20772 = vst [vmem:[#allocation48_spill] sm:$0xff] %v17861_v38  ;;  %v7232_v48 = vsel %vm3920_vm2, %v7231_v43, %v17843_v46  ;;  %v20476_v39 = vrot.slane %v17859_v9, 7  ;;  %v14184_v25 = vrot.slane %v17786_v54, 9  ;;  %v1845_v4 = vcombine.high %v17774_v0, %v17774_v0 }
 0x3da   :  { %v17875_v37 = vsel %vm3923_vm3, %v7233_v18, %v7232_v48  ;;  %v17881_v5 = vsel %vm3920_vm2, %v20477_v61, %v17849_v21  ;;  %v3145_v18 = vmax.f32 %v17792_v41, %v14174_v33  ;;  %v3146_v48 = vmax.f32 %v17801_v26, %v14175_v1 }
 0x3db   :  { %20773 = vst [vmem:[#allocation91_spill] sm:$0xff] %v17875_v37  ;;  %20774 = vst [vmem:[#allocation92_spill] sm:$0xff] %v17881_v5  ;;  %v17891_v49 = vsel %vm3920_vm2, %v20476_v39, %v17851_v60  ;;  %v3397_v11 = vpack.c.bf16 %v3143_v56, %v3143_v56  ;;  %v3398_v39 = vpack.c.bf16 %v3144_v34, %v3144_v34  ;;  %v14185_v1 = vrot.slane %v1886_v45, 9 }
 0x3dc   :  { %20775 = vst [vmem:[#allocation93_spill] sm:$0xff] %v17891_v49  ;;  %v3399_v27 = vpack.c.bf16 %v3145_v18, %v3145_v18  ;;  %v1852_v41 = vrot.slane %v17774_v0, %v15279_v44  ;;  %v3400_v33 = vpack.c.bf16 %v3146_v48, %v3146_v48  ;;  %v3155_v56 = vmax.f32 %v17786_v54, %v14184_v25 }
 0x3dd   :  { %v3905_v26 = vunpack.c.l.b16 %v3397_v11  ;;  %v3906_v20 = vunpack.c.l.b16 %v3398_v39  ;;  %v1859_v61 = vrot.slane %v1845_v4, %v15279_v44  ;;  %v3156_v18 = vmax.f32 %v1886_v45, %v14185_v1 }
 0x3de   :  { %v3907_v63 = vunpack.c.l.b16 %v3399_v27  ;;  %v1860_v19 = vcombine.high %v1852_v41, %v1852_v41  ;;  %v3908_v10 = vunpack.c.l.b16 %v3400_v33  ;;  %v3409_v13 = vpack.c.bf16 %v3155_v56, %v3155_v56 }
 0x3df   :  { %v4344_v34 = vrot.slane %v3905_v26, 7  ;;  %v4346_v3 = vrot.slane %v3906_v20, 6  ;;  %v1861_v47 = vcombine.high %v1859_v61, %v1859_v61  ;;  %v14176_v28 = vrot.slane %v1852_v41, 9 }
 0x3e0   :  { %v4348_v43 = vrot.slane %v3907_v63, 5  ;;  %v4350_v11 = vrot.slane %v3908_v10, 4  ;;  %v3410_v48 = vpack.c.bf16 %v3156_v18, %v3156_v18  ;;  %v3917_v54 = vunpack.c.l.b16 %v3409_v13  ;;  %v20776_v10 = vld [vmem:[#allocation43_spill] sm:$0xff] }
 0x3e1   :  { %v4345_v0 = vsel %vm3920_vm2, %v4344_v34, %v17752_v23  ;;  %v14177_v39 = vrot.slane %v1860_v19, 9  ;;  %v14178_v25 = vrot.slane %v1859_v61, 9  ;;  %v14179_v27 = vrot.slane %v1861_v47, 9 }
 0x3e2   :  { %v4347_v22 = vsel %vm3923_vm3, %v4346_v3, %v4345_v0  ;;  %v3918_v33 = vunpack.c.l.b16 %v3410_v48  ;;  %v4366_v45 = vrot.slane %v3917_v54, 3  ;;  %v3147_v26 = vmax.f32 %v1852_v41, %v14176_v28  ;;  %v20777_v3 = vld [vmem:[#allocation52_spill] sm:$0xff] }
 0x3e3   :  { %v4349_v4 = vsel %vm3926_vm4, %v4348_v43, %v4347_v22  ;;  %v3148_v20 = vmax.f32 %v1860_v19, %v14177_v39  ;;  %v3149_v63 = vmax.f32 %v1859_v61, %v14178_v25  ;;  %v3150_v1 = vmax.f32 %v1861_v47, %v14179_v27  ;;  %v20779_v39 = vld [vmem:[#allocation50_spill] sm:$0xff] }
 0x3e4   :  { %v4351_v56 = vsel %vm3929_vm5, %v4350_v11, %v4349_v4  ;;  %v4368_v44 = vrot.slane %v3918_v33, 2  ;;  %v3401_v23 = vpack.c.bf16 %v3147_v26, %v3147_v26  ;;  %v5962_v13 = vrot.slane %v20776_v10, %v15286_v59  ;;  %v20780_v33 = vld [vmem:[#allocation44_spill] sm:$0xff] }
 0x3e5   :  { %v20778_v34 = vrot.slane %v20777_v3, %v15286_v59  ;;  %v3402_v0 = vpack.c.bf16 %v3148_v20, %v3148_v20  ;;  %v3403_v43 = vpack.c.bf16 %v3149_v63, %v3149_v63  ;;  %v3404_v48 = vpack.c.bf16 %v3150_v1, %v3150_v1  ;;  %v20781_v20 = vld [vmem:[#allocation45_spill] sm:$0xff] }
 0x3e6   :  { %v7125_v28 = vrot.slane %v20752_v50, 6  ;;  %v3909_v19 = vunpack.c.l.b16 %v3401_v23  ;;  %v17933_v61 = vunpack.c.l.b16 %v5962_v13  ;;  %v7127_v41 = vrot.slane %v20750_v12, 5 }
 0x3e7   :  { %v6046_v18 = vrot.slane %v20778_v34, %v15286_v59  ;;  %v3910_v11 = vunpack.c.l.b16 %v3402_v0  ;;  %v3911_v54 = vunpack.c.l.b16 %v3403_v43  ;;  %v3912_v22 = vunpack.c.l.b16 %v3404_v48  ;;  %v20783_v34 = vld [vmem:[#allocation42_spill] sm:$0xff] }
 0x3e8   :  { %v7126_v25 = vsel %vm3923_vm3, %v7125_v28, %v20779_v39  ;;  %v4352_v27 = vrot.slane %v3909_v19, 3  ;;  %v7131_v26 = vrot.slane %v20780_v33, 3  ;;  %v7133_v63 = vrot.slane %v20781_v20, 2  ;;  %v20787_v39 = vld [vmem:[#allocation55_spill] sm:$0xff] }
 0x3e9   :  { %v17935_v47 = vunpack.c.l.b16 %v6046_v18  ;;  %v7128_v4 = vsel %vm3926_vm4, %v7127_v41, %v7126_v25  ;;  %v4354_v1 = vrot.slane %v3910_v11, 2  ;;  %v4356_v23 = vrot.slane %v3911_v54, 1 }
 0x3ea   :  { %v20782_v10 = vrot.slane %v17814_v58, 7  ;;  %v20784_v18 = vrot.slane %v20783_v34, 4  ;;  %v4353_v43 = vsel %vm3932_vm6, %v4352_v27, %v4351_v56  ;;  %v20785_v48 = vrot.slane %v17820_v31, 6 }
 0x3eb   :  { %v7135_v41 = vrot.slane %v17933_v61, 1  ;;  %v4355_v11 = vsel %vm3935_vm7, %v4354_v1, %v4353_v43  ;;  %v20786_v58 = vrot.slane %v17883_v16, 5  ;;  %v7137_v25 = vrot.slane %v20787_v39, 7  ;;  %v20790_v16 = vld [vmem:[#allocation53_spill] sm:$0xff] }
 0x3ec   :  { %v4359_v13 = vsel %vm3920_vm2, %v20782_v10, %v3912_v22  ;;  %v7130_v0 = vsel %vm3929_vm5, %v20784_v18, %v7128_v4  ;;  %v4357_v56 = vsel %vm3938_vm8, %v4356_v23, %v4355_v11  ;;  %v20788_v31 = vrot.slane %v17885_v51, 4  ;;  %v20791_v18 = vld [vmem:[#allocation58_spill] sm:$0xff] }
 0x3ed   :  { %v4361_v28 = vsel %vm3923_vm3, %v20785_v48, %v4359_v13  ;;  %v7132_v19 = vsel %vm3932_vm6, %v7131_v26, %v7130_v0  ;;  %v20789_v26 = vld [vmem:[#allocation56_spill] sm:$0xff]  ;;  %v7138_v13 = vsel %vm3920_vm2, %v7137_v25, %v20790_v16  ;;  %v20792_v0 = vld [vmem:[#allocation57_spill] sm:$0xff]  ;;  %v7145_v48 = vrot.slane %v17935_v47, 3 }
 0x3ee   :  { %v4363_v54 = vsel %vm3926_vm4, %v20786_v58, %v4361_v28  ;;  %v7134_v22 = vsel %vm3935_vm7, %v7133_v63, %v7132_v19  ;;  %v7139_v10 = vrot.slane %v20789_v26, 6  ;;  %v7141_v63 = vrot.slane %v20791_v18, 5  ;;  %v20793_v28 = vld [vmem:[#allocation64_spill] sm:$0xff]  ;;  %v20794_v19 = vld [vmem:[#allocation62_spill] sm:$0xff] }
 0x3ef   :  { %v4365_v27 = vsel %vm3929_vm5, %v20788_v31, %v4363_v54  ;;  %v17966_v4 = vsel %vm3938_vm8, %v7135_v41, %v7134_v22  ;;  %v7143_v43 = vrot.slane %v20792_v0, 4  ;;  %v20795_v41 = vrot.slane %v20794_v19, 5  ;;  %v20796_v54 = vld [vmem:[#allocation59_spill] sm:$0xff]  ;;  %v20798_v31 = vld [vmem:[#allocation60_spill] sm:$0xff] }
 0x3f0   :  { %v4367_v1 = vsel %vm3932_vm6, %v4366_v45, %v4365_v27  ;;  %v7140_v51 = vsel %vm3923_vm3, %v7139_v10, %v7138_v13  ;;  %v20797_v22 = vrot.slane %v20796_v54, 4  ;;  %v7155_v27 = vrot.slane %v20798_v31, 3  ;;  %v20800_v13 = vld [vmem:[#allocation63_spill] sm:$0xff] }
 0x3f1   :  { %v4369_v23 = vsel %vm3935_vm7, %v4368_v44, %v4367_v1  ;;  %v7152_v11 = vsel %vm3926_vm4, %v20795_v41, %v20793_v28  ;;  %v7142_v45 = vsel %vm3926_vm4, %v7141_v63, %v7140_v51  ;;  %v20799_v1 = vld [vmem:[#allocation61_spill] sm:$0xff]  ;;  %v7159_v49 = vrot.slane %v20800_v13, 1 }
 0x3f2   :  { %v4385_v58 = vpack.c.b16 %v4369_v23, %v4357_v56  ;;  %v7154_v25 = vsel %vm3929_vm5, %v20797_v22, %v7152_v11  ;;  %v7144_v44 = vsel %vm3929_vm5, %v7143_v43, %v7142_v45  ;;  %v7157_v10 = vrot.slane %v20799_v1, 2 }
 0x3f3   :  { %v20482_v5 = vrot.slane %v20752_v50, 7  ;;  %v17993_v56 = vsel %vm3932_vm6, %v7145_v48, %v7144_v44  ;;  %v7156_v63 = vsel %vm3932_vm6, %v7155_v27, %v7154_v25  ;;  %v20481_v23 = vrot.slane %v20750_v12, 6 }
 0x3f4   :  { %v4392_v28 = vsel %vm16073_vm11, %v4385_v58, 0  ;;  %v7158_v43 = vsel %vm3935_vm7, %v7157_v10, %v7156_v63  ;;  %v20484_v58 = vrot.slane %v20780_v33, 4  ;;  %v20802_v10 = vrot.slane %v20783_v34, 5  ;;  %v14971_v63 = vld [vmem:[%s20310_s3 + $0xe8] sm:$0xff]  }
 0x3f5   :  { %v5130_v51 = vcombine.high %v4392_v28, %v4392_v28  ;;  %v5137_v41 = vrot.slane %v4392_v28, %v15286_v59  ;;  %v7350_v11 = vsel %vm3923_vm3, %v20482_v5, %v17477_v53  ;;  %v18004_v45 = vsel %vm3938_vm8, %v7159_v49, %v7158_v43  ;;  %v14969_v49 = vld [vmem:[%s20310_s3 + $0xe0] sm:$0xff]  }
 0x3f6   :  { %v7352_v48 = vsel %vm3926_vm4, %v20481_v23, %v7350_v11  ;;  %v14970_v28 = vld [vmem:[%s20310_s3 + $0xa0] sm:$0xff]   ;;  %v20487_v43 = vrot.slane %v20790_v16, 1  ;;  %v7363_v11 = vrot.slane %v20789_v26, 7  ;;  %14583 = vmatprep.subr.bf16.mxu1 %v14969_v49  ;;  %v20803_v38 = vrot.slane %v20781_v20, 3 }
 0x3f7   :  { %v5144_v25 = vrot.slane %v5130_v51, %v15286_v59  ;;  %v5145_v27 = vcombine.high %v5137_v41, %v5137_v41  ;;  %v5153_v44 = vrot.slane %v5137_v41, %v15286_v59  ;;  %v7354_v53 = vsel %vm3929_vm5, %v20802_v10, %v7352_v48  ;;  %14584 = vmatpush3.bf16.msra.mxu1 %v14970_v28 }
 0x3f8   :  { %v7356_v51 = vsel %vm3932_vm6, %v20484_v58, %v7354_v53  ;;  %v7362_v53 = vsel %vm3920_vm2, %v20787_v39, %v20487_v43  ;;  %v7365_v58 = vrot.slane %v20791_v18, 6  ;;  %14585 = vmatprep.subr.bf16.mxu1 %v14971_v63 }
 0x3f9   :  { %v5146_v48 = vcombine.high %v5144_v25, %v5144_v25  ;;  %v5160_v10 = vrot.slane %v5144_v25, %v15286_v59  ;;  %v5167_v23 = vrot.slane %v5145_v27, %v15286_v59  ;;  %v5175_v5 = vcombine.high %v5153_v44, %v5153_v44 }
 0x3fa   :  { %v6837_v22 = vrot.slane %v5153_v44, %v15286_v59  ;;  %v7358_v29 = vsel %vm3935_vm7, %v20803_v38, %v7356_v51  ;;  %v20804_v51 = vrot.slane %v17933_v61, 2 }
 0x3fb   :  { %v5174_v25 = vrot.slane %v5146_v48, %v15286_v59  ;;  %v5176_v41 = vcombine.high %v5160_v10, %v5160_v10  ;;  %v5177_v27 = vcombine.high %v5167_v23, %v5167_v23  ;;  %v6851_v49 = vrot.slane %v5167_v23, %v15286_v59 }
 0x3fc   :  { %v6844_v44 = vrot.slane %v6837_v22, %v15286_v59  ;;  %v6865_v32 = vrot.slane %v5175_v5, %v15286_v59  ;;  %v6893_v38 = vrot.slane %v5160_v10, %v15286_v59  ;;  %v18050_v43 = vsel %vm3938_vm8, %v20804_v51, %v7358_v29 }
 0x3fd   :  { %v5178_v42 = vcombine.high %v5174_v25, %v5174_v25  ;;  %v6858_v28 = vrot.slane %v6851_v49, %v15286_v59  ;;  %v6879_v48 = vrot.slane %v5177_v27, %v15286_v59  ;;  %v6907_v9 = vrot.slane %v5174_v25, %v15286_v59 }
 0x3fe   :  { %v6872_v23 = vrot.slane %v6865_v32, %v15286_v59  ;;  %v6900_v22 = vrot.slane %v6893_v38, %v15286_v59  ;;  %v18057_v63 = vunpack.c.l.b16 %v6844_v44  ;;  %v7507_v5 = vrot.slane %v5176_v41, %v15286_v59 }
 0x3ff   :  { %v6886_v10 = vrot.slane %v6879_v48, %v15286_v59  ;;  %v6914_v29 = vrot.slane %v6907_v9, %v15286_v59  ;;  %v18062_v51 = vunpack.c.l.b16 %v6858_v28  ;;  %v18065_v49 = vrot.slane %v5178_v42, %v15286_v59 }
 0x400   :  { %20805 = vst [vmem:[#allocation43_spill] sm:$0xff] %v18057_v63  ;;  %v18067_v27 = vunpack.c.l.b16 %v6872_v23  ;;  %v18069_v25 = vunpack.c.l.b16 %v6900_v22  ;;  %v7514_v32 = vrot.slane %v7507_v5, %v15286_v59  ;;  %v7364_v44 = vsel %vm3923_vm3, %v7363_v11, %v7362_v53  ;;  %v20813_v22 = vld [vmem:[#allocation65_spill] sm:$0xff] }
 0x401   :  { %20806 = vst [vmem:[#allocation52_spill] sm:$0xff] %v18062_v51  ;;  %20807 = vst [vmem:[#allocation50_spill] sm:$0xff] %v18065_v49  ;;  %v18073_v38 = vunpack.c.l.b16 %v6886_v10  ;;  %v18075_v41 = vunpack.c.l.b16 %v6914_v29  ;;  %v7366_v48 = vsel %vm3926_vm4, %v7365_v58, %v7364_v44  ;;  %v7367_v9 = vrot.slane %v20792_v0, 5  ;;  %v14972_v53 = vld [vmem:[%s20310_s3 + $0xa8] sm:$0xff]   ;;  %v20819_v51 = vld [vmem:[#allocation11_spill] sm:$0xff] }
 0x402   :  { %20808 = vst [vmem:[#allocation44_spill] sm:$0xff] %v18067_v27  ;;  %20809 = vst [vmem:[#allocation45_spill] sm:$0xff] %v18069_v25  ;;  %v18079_v28 = vunpack.c.l.b16 %v7514_v32  ;;  %v7369_v23 = vrot.slane %v17935_v47, 4  ;;  %v20814_v27 = vrot.slane %v20794_v19, 6  ;;  %v20815_v32 = vrot.slane %v20796_v54, 5  ;;  %14586 = vmatpush3.bf16.msra.mxu1 %v14972_v53 }
 0x403   :  { %20810 = vst [vmem:[#allocation42_spill] sm:$0xff] %v18073_v38  ;;  %20811 = vst [vmem:[#allocation55_spill] sm:$0xff] %v18075_v41  ;;  %v7368_v29 = vsel %vm3929_vm5, %v7367_v9, %v7366_v48  ;;  %v7379_v42 = vrot.slane %v20798_v31, 4  ;;  %v7381_v49 = vrot.slane %v20799_v1, 3  ;;  %v20817_v48 = vld [vmem:[#allocation54_spill] sm:$0xff]  ;;  %v20820_v53 = vrot.slane %v20750_v12, 6 }
 0x404   :  { %20812 = vst [vmem:[#allocation56_spill] sm:$0xff] %v18079_v28  ;;  %v7376_v5 = vsel %vm3926_vm4, %v20814_v27, %v20813_v22  ;;  %v18097_v25 = vsel %vm3932_vm6, %v7369_v23, %v7368_v29  ;;  %v7383_v27 = vrot.slane %v20800_v13, 2  ;;  %v20816_v22 = vld [vmem:[#allocation9_spill] sm:$0xff]  ;;  %v7500_v38 = vrot.slane %v20817_v48, %v15286_v59 }
 0x405   :  { %v7378_v44 = vsel %vm3929_vm5, %v20815_v32, %v7376_v5  ;;  %v7385_v28 = vrot.slane %v20816_v22, 1  ;;  %v20818_v5 = vrot.slane %v20752_v50, 7  ;;  %v7566_v29 = vsel %vm3920_vm2, %v7363_v11, %v20787_v39 }
 0x406   :  { %v7380_v10 = vsel %vm3932_vm6, %v7379_v42, %v7378_v44  ;;  %v7567_v48 = vsel %vm3923_vm3, %v7365_v58, %v7566_v29  ;;  %v7515_v46 = vunpack.c.l.b16 %v7500_v38  ;;  %v20825_v38 = vrot.slane %v20783_v34, 6 }
 0x407   :  { %v7559_v32 = vsel %vm3920_vm2, %v20818_v5, %v20732_v40  ;;  %v7382_v41 = vsel %vm3935_vm7, %v7381_v49, %v7380_v10  ;;  %v18114_v63 = vsel %vm3920_vm2, %v20819_v51, %v7385_v28  ;;  %v20821_v40 = vrot.slane %v20783_v34, 5 }
 0x408   :  { %v7560_v44 = vsel %vm3923_vm3, %v20820_v53, %v7559_v32  ;;  %v18121_v37 = vsel %vm3938_vm8, %v7383_v27, %v7382_v41  ;;  %v7568_v10 = vsel %vm3926_vm4, %v7367_v9, %v7567_v48  ;;  %v20822_v5 = vrot.slane %v20780_v33, 4 }
 0x409   :  { %v7561_v11 = vsel %vm3926_vm4, %v20821_v40, %v7560_v44  ;;  %v7569_v60 = vsel %vm3929_vm5, %v7369_v23, %v7568_v10  ;;  %v20824_v32 = vrot.slane %v20794_v19, 6  ;;  %v7724_v41 = vsel %vm3926_vm4, %v20825_v38, %v17638_v62 }
 0x40a   :  { %v7562_v15 = vsel %vm3929_vm5, %v20822_v5, %v7561_v11  ;;  %v20826_v29 = vrot.slane %v20781_v20, 3  ;;  %v7570_v53 = vrot.slane %v7515_v46, 3  ;;  %v20827_v44 = vrot.slane %v20796_v54, 5 }
 0x40b   :  { %v7573_v58 = vsel %vm3923_vm3, %v20824_v32, %v20823_v2  ;;  %v7725_v23 = vrot.slane %v20780_v33, 5  ;;  %v20828_v40 = vrot.slane %v17933_v61, 2  ;;  %v7727_v10 = vrot.slane %v20781_v20, 4 }
 0x40c   :  { %v7563_v9 = vsel %vm3932_vm6, %v20826_v29, %v7562_v15  ;;  %v7574_v48 = vsel %vm3926_vm4, %v20827_v44, %v7573_v58  ;;  %v7729_v62 = vrot.slane %v17933_v61, 3  ;;  %v20829_v5 = vrot.slane %v20790_v16, 1 }
 0x40d   :  { %v7564_v2 = vsel %vm3935_vm7, %v20828_v40, %v7563_v9  ;;  %v7575_v11 = vsel %vm3929_vm5, %v7379_v42, %v7574_v48  ;;  %v7571_v32 = vsel %vm3932_vm6, %v7570_v53, %v7569_v60  ;;  %v7726_v38 = vsel %vm3929_vm5, %v7725_v23, %v7724_v41 }
 0x40e   :  { %v7565_v15 = vsel %vm3938_vm8, %v20829_v5, %v7564_v2  ;;  %v7576_v58 = vsel %vm3932_vm6, %v7381_v49, %v7575_v11  ;;  %v7728_v42 = vsel %vm3932_vm6, %v7727_v10, %v7726_v38  ;;  %v7731_v9 = vrot.slane %v20790_v16, 2  ;;  %v20830_v11 = vld [vmem:[#allocation67_spill] sm:$0xff] }
 0x40f   :  { %v7577_v29 = vsel %vm3935_vm7, %v7383_v27, %v7576_v58  ;;  %v7733_v44 = vrot.slane %v20787_v39, 1  ;;  %v7730_v60 = vsel %vm3935_vm7, %v7729_v62, %v7728_v42  ;;  %v7735_v49 = vrot.slane %v20791_v18, 7 }
 0x410   :  { %v7578_v48 = vsel %vm3938_vm8, %v7385_v28, %v7577_v29  ;;  %v7737_v41 = vrot.slane %v20792_v0, 6  ;;  %v7732_v27 = vsel %vm3938_vm8, %v7731_v9, %v7730_v60  ;;  %v7739_v40 = vrot.slane %v17935_v47, 5 }
 0x411   :  { %v7734_v53 = vsel %vm3920_vm2, %v20789_v26, %v7733_v44  ;;  %v7741_v28 = vrot.slane %v7515_v46, 4  ;;  %v20831_v5 = vrot.slane %v20794_v19, 7  ;;  %v7751_v0 = vrot.slane %v20799_v1, 4  ;;  %v20852_v1 = vld [vmem:[#allocation70_spill] sm:$0xff] }
 0x412   :  { %v7736_v2 = vsel %vm3923_vm3, %v7735_v49, %v7734_v53  ;;  %v7753_v58 = vrot.slane %v20800_v13, 3  ;;  %v20832_v29 = vrot.slane %v20796_v54, 6  ;;  %v20510_v47 = vrot.slane %v20816_v22, 2 }
 0x413   :  { %v7746_v18 = vsel %vm3923_vm3, %v20831_v5, %v20830_v11  ;;  %v7738_v38 = vsel %vm3926_vm4, %v7737_v41, %v7736_v2  ;;  %v20833_v46 = vcombine.high %v20777_v3, %v20777_v3  ;;  %v20834_v53 = vrot.slane %v20798_v31, 5 }
 0x414   :  { %v7748_v42 = vsel %vm3926_vm4, %v20832_v29, %v7746_v18  ;;  %v7740_v19 = vsel %vm3929_vm5, %v7739_v40, %v7738_v38  ;;  %v7938_v2 = vsel %vm3920_vm2, %v7735_v49, %v20789_v26  ;;  %v14215_v5 = vpack.c.b16 %v18050_v43, %v17966_v4 }
 0x415   :  { %v7865_v60 = vrot.slane %v20833_v46, %v15286_v59  ;;  %v7750_v11 = vsel %vm3929_vm5, %v20834_v53, %v7748_v42  ;;  %v7742_v18 = vsel %vm3932_vm6, %v7741_v28, %v7740_v19  ;;  %v7939_v38 = vsel %vm3923_vm3, %v7737_v41, %v7938_v2 }
 0x416   :  { %v7752_v29 = vsel %vm3932_vm6, %v7751_v0, %v7750_v11  ;;  %v7940_v46 = vsel %vm3926_vm4, %v7739_v40, %v7939_v38  ;;  %v14216_v26 = vpack.c.b16 %v18097_v25, %v17993_v56  ;;  %v14217_v4 = vpack.c.b16 %v7732_v27, %v7565_v15 }
 0x417   :  { %v7872_v3 = vrot.slane %v7865_v60, %v15286_v59  ;;  %v7754_v42 = vsel %vm3935_vm7, %v7753_v58, %v7752_v29  ;;  %v7941_v19 = vsel %vm3929_vm5, %v7741_v28, %v7940_v46  ;;  %v14218_v60 = vpack.c.b16 %v7742_v18, %v7571_v32  ;;  %v20835_v32 = vld [vmem:[#allocation69_spill] sm:$0xff]  ;;  %v20836_v46 = vld [vmem:[#allocation7_spill] sm:$0xff] }
 0x418   :  { %v7756_v43 = vsel %vm3938_vm8, %v20510_v47, %v7754_v42  ;;  %v8369_v41 = vrot.slane %v14215_v5, %v15286_v59  ;;  %v8376_v53 = vrot.slane %v14216_v26, %v15286_v59  ;;  %v8383_v11 = vrot.slane %v14217_v4, %v15286_v59 }
 0x419   :  { %v7887_v49 = vunpack.c.l.b16 %v7872_v3  ;;  %v14220_v40 = vpack.c.b16 %v18121_v37, %v18004_v45  ;;  %v8390_v56 = vrot.slane %v14218_v60, %v15286_v59  ;;  %v14222_v25 = vpack.c.b16 %v7756_v43, %v7578_v48 }
 0x41a   :  { %v20509_v15 = vrot.slane %v20819_v51, 1  ;;  %v8405_v27 = vcombine.low %v8369_v41, %v8383_v11  ;;  %v8406_v29 = vcombine.high %v8369_v41, %v8383_v11  ;;  %v20511_v5 = vrot.slane %v20835_v32, 3 }
 0x41b   :  { %v7942_v2 = vrot.slane %v7887_v49, 3  ;;  %v18228_v28 = vrot.slane %v14220_v40, %v15286_v59  ;;  %v8407_v3 = vcombine.low %v8376_v53, %v8390_v56  ;;  %v8408_v38 = vcombine.high %v8376_v53, %v8390_v56  ;;  %v14973_v56 = vld [vmem:[%s20310_s3 + $0xf0] sm:$0xff]  }
 0x41c   :  { %v18233_v42 = vrot.slane %v14222_v25, %v15286_v59  ;;  %v8417_v45 = vrot.slane %v8405_v27, %v15286_v59  ;;  %v8431_v48 = vrot.slane %v8406_v29, %v15286_v59  ;;  %v18241_v26 = vsel %vm3920_vm2, %v20836_v46, %v20509_v15  ;;  %v14974_v25 = vld [vmem:[%s20310_s3 + $0xb0] sm:$0xff]   ;;  %14587 = vmatprep.subr.bf16.mxu1 %v14973_v56  ;;  %v20843_v15 = vld [vmem:[#allocation72_spill] sm:$0xff] }
 0x41d   :  { %v7943_v18 = vsel %vm3932_vm6, %v7942_v2, %v7941_v19  ;;  %v8424_v4 = vrot.slane %v8407_v3, %v15286_v59  ;;  %v8438_v43 = vrot.slane %v8408_v38, %v15286_v59  ;;  %v20837_v19 = vld [vmem:[#allocation77_spill] sm:$0xff]  ;;  %v20838_v40 = vrot.slane %v20750_v12, 7  ;;  %v20839_v3 = vld [vmem:[#allocation78_spill] sm:$0xff]  ;;  %14588 = vmatpush3.bf16.msra.mxu1 %v14974_v25 }
 0x41e   :  { %v14219_v37 = vpack.c.b16 %v7943_v18, %v7943_v18  ;;  %v8521_v49 = vcombine.low %v18228_v28, %v18233_v42  ;;  %v7771_v60 = vrot.slane %v20837_v19, 1  ;;  %v14265_v53 = vcombine.low %v8417_v45, %v8431_v48 }
 0x41f   :  { %v14267_v11 = vcombine.high %v8417_v45, %v8431_v48  ;;  %v7931_v2 = vsel %vm3920_vm2, %v20838_v40, %v20752_v50  ;;  %v14269_v29 = vcombine.low %v8424_v4, %v8438_v43  ;;  %v20840_v12 = vrot.slane %v20783_v34, 6  ;;  %v20841_v40 = vld [vmem:[#allocation68_spill] sm:$0xff] }
 0x420   :  { %v8404_v41 = vrot.slane %v14219_v37, %v15286_v59  ;;  %v18260_v27 = vrot.slane %v8521_v49, %v15286_v59  ;;  %v18264_v38 = vsel %vm3920_vm2, %v20839_v3, %v7771_v60  ;;  %v9393_v45 = vrot.slane %v14265_v53, %v15286_v59  ;;  %v20844_v53 = vld [vmem:[#allocation10_spill] sm:$0xff] }
 0x421   :  { %v7932_v50 = vsel %vm3923_vm3, %v20840_v12, %v7931_v2  ;;  %v9407_v48 = vrot.slane %v14267_v11, %v15286_v59  ;;  %v9421_v43 = vrot.slane %v14269_v29, %v15286_v59  ;;  %v20842_v2 = vrot.slane %v20796_v54, 6 }
 0x422   :  { %v18270_v37 = vrot.slane %v8404_v41, %v15286_v59  ;;  %v7933_v49 = vsel %vm3926_vm4, %v7725_v23, %v7932_v50  ;;  %v20845_v47 = vrot.slane %v20844_v53, 6  ;;  %v20847_v50 = vld [vmem:[#allocation8_spill] sm:$0xff] }
 0x423   :  { %v7934_v34 = vsel %vm3929_vm5, %v7727_v10, %v7933_v49  ;;  %v7945_v12 = vsel %vm3923_vm3, %v20842_v2, %v20841_v40  ;;  %v9444_v23 = vcombine.high %v9393_v45, %v9407_v48  ;;  %v9443_v56 = vcombine.low %v9393_v45, %v9407_v48 }
 0x424   :  { %v7952_v11 = vsel %vm3923_vm3, %v20845_v47, %v20843_v15  ;;  %v8470_v33 = vcombine.high %v8424_v4, %v18270_v37  ;;  %v7935_v20 = vsel %vm3932_vm6, %v7729_v62, %v7934_v34  ;;  %v20846_v10 = vrot.slane %v20798_v31, 5  ;;  %v20850_v62 = vld [vmem:[#allocation16_spill] sm:$0xff] }
 0x425   :  { %v7936_v54 = vsel %vm3935_vm7, %v7731_v9, %v7935_v20  ;;  %v20848_v49 = vrot.slane %v20847_v50, 5  ;;  %v8410_v15 = vcombine.high %v8404_v41, %v8404_v41  ;;  %v18304_v25 = vrot.slane %v9444_v23, %v15286_v59 }
 0x426   :  { %v7946_v29 = vsel %vm3926_vm4, %v20846_v10, %v7945_v12  ;;  %v14271_v4 = vcombine.low %v8470_v33, %v18260_v27  ;;  %v18307_v61 = vrot.slane %v9443_v56, %v15286_v59  ;;  %v7937_v16 = vsel %vm3938_vm8, %v7733_v44, %v7936_v54  ;;  %v20853_v44 = vld [vmem:[#allocation6_spill] sm:$0xff] }
 0x427   :  { %v7953_v47 = vsel %vm3926_vm4, %v20848_v49, %v7952_v11  ;;  %v7947_v31 = vsel %vm3929_vm5, %v7751_v0, %v7946_v29  ;;  %v20851_v9 = vrot.slane %v20850_v62, 4  ;;  %v8002_v45 = vpack.c.b16 %v7943_v18, %v7937_v16  ;;  %v20856_v11 = vld [vmem:[#allocation75_spill] sm:$0xff] }
 0x428   :  { %20849 = vst [vmem:[#allocation53_spill] sm:$0xff] %v18307_v61  ;;  %v8466_v48 = vrot.slane %v8410_v15, %v15286_v59  ;;  %v9435_v34 = vrot.slane %v14271_v4, %v15286_v59  ;;  %v7948_v40 = vsel %vm3932_vm6, %v7753_v58, %v7947_v31  ;;  %v20854_v0 = vrot.slane %v20853_v44, 5 }
 0x429   :  { %v7954_v41 = vsel %vm3929_vm5, %v20851_v9, %v7953_v47  ;;  %v20855_v12 = vrot.slane %v20816_v22, 2  ;;  %v20857_v33 = vrot.slane %v20856_v11, 2  ;;  %v8397_v13 = vrot.slane %v8002_v45, %v15286_v59 }
 0x42a   :  { %v7955_v39 = vsel %vm3932_vm6, %v20511_v5, %v7954_v41  ;;  %v7166_v2 = vsel %vm3926_vm4, %v20854_v0, %v20852_v1  ;;  %v14270_v58 = vcombine.low %v18270_v37, %v8466_v48  ;;  %v9447_v56 = vcombine.high %v9421_v43, %v9435_v34  ;;  %v20861_v1 = vld [vmem:[#allocation81_spill] sm:$0xff] }
 0x42b   :  { %v7949_v18 = vsel %vm3935_vm7, %v20855_v12, %v7948_v40  ;;  %v7956_v23 = vsel %vm3935_vm7, %v20857_v33, %v7955_v39  ;;  %v9446_v20 = vcombine.low %v9421_v43, %v9435_v34  ;;  %v20858_v54 = vrot.slane %v20819_v51, 1  ;;  %v20860_v39 = vld [vmem:[#allocation83_spill] sm:$0xff] }
 0x42c   :  { %v18342_v29 = vsel %vm3938_vm8, %v7771_v60, %v7956_v23  ;;  %v8409_v49 = vcombine.high %v8397_v13, %v8397_v13  ;;  %v8445_v47 = vrot.slane %v8397_v13, %v15286_v59  ;;  %v9428_v15 = vrot.slane %v14270_v58, %v15286_v59  ;;  %v20863_v58 = vld [vmem:[#allocation76_spill] sm:$0xff] }
 0x42d   :  { %v7950_v10 = vsel %vm3938_vm8, %v20858_v54, %v7949_v18  ;;  %v18348_v4 = vrot.slane %v9447_v56, %v15286_v59  ;;  %v18351_v16 = vrot.slane %v9446_v20, %v15286_v59  ;;  %v20859_v51 = vrot.slane %v20844_v53, 4  ;;  %v20865_v54 = vld [vmem:[#allocation79_spill] sm:$0xff] }
 0x42e   :  { %v8003_v22 = vpack.c.b16 %v18342_v29, %v7950_v10  ;;  %v7169_v60 = vrot.slane %v20847_v50, 3  ;;  %v8459_v31 = vrot.slane %v8409_v49, %v15286_v59  ;;  %v7171_v41 = vrot.slane %v20850_v62, 2 }
 0x42f   :  { %v7168_v43 = vsel %vm3929_vm5, %v20859_v51, %v7166_v2  ;;  %v7173_v45 = vrot.slane %v20835_v32, 1  ;;  %v9494_v48 = vcombine.low %v18304_v25, %v18348_v4  ;;  %v9491_v34 = vcombine.low %v18307_v61, %v18351_v16 }
 0x430   :  { %v18359_v9 = vrot.slane %v8003_v22, %v15286_v59  ;;  %v7170_v40 = vsel %vm3932_vm6, %v7169_v60, %v7168_v43  ;;  %v20862_v0 = vrot.slane %v20861_v1, 5  ;;  %v14266_v18 = vcombine.low %v8445_v47, %v8459_v31  ;;  %v20866_v22 = vld [vmem:[#allocation80_spill] sm:$0xff]  ;;  %v20867_v60 = vld [vmem:[#allocation82_spill] sm:$0xff] }
 0x431   :  { %v14268_v33 = vcombine.high %v8445_v47, %v8459_v31  ;;  %v7172_v23 = vsel %vm3935_vm7, %v7171_v41, %v7170_v40  ;;  %10282 = vmatprep.mubr.bf16.mxu1 %v9494_v48  ;;  %v20864_v56 = vrot.slane %v20863_v58, 4  ;;  %v7183_v10 = vrot.slane %v20865_v54, 3 }
 0x432   :  { %v7180_v2 = vsel %vm3926_vm4, %v20862_v0, %v20860_v39  ;;  %v18374_v12 = vrot.slane %v18359_v9, %v15286_v59  ;;  %v18378_v13 = vsel %vm3938_vm8, %v7173_v45, %v7172_v23  ;;  %v7185_v49 = vrot.slane %v20866_v22, 2  ;;  %10283 = vmatmul.mubr.bf16.gmra.mrb[12].mxu1 %v9491_v34 }
 0x433   :  { %v7182_v20 = vsel %vm3929_vm5, %v20864_v56, %v7180_v2  ;;  %v9400_v47 = vrot.slane %v14266_v18, %v15286_v59  ;;  %v9414_v43 = vrot.slane %v14268_v33, %v15286_v59  ;;  %v7187_v31 = vrot.slane %v20867_v60, 1 }
 0x434   :  { %v8583_v51 = vcombine.low %v18260_v27, %v18374_v12  ;;  %v7184_v41 = vsel %vm3932_vm6, %v7183_v10, %v7182_v20  ;;  %v20868_v45 = vrot.slane %v20836_v46, 7  ;;  %v7393_v40 = vrot.slane %v20847_v50, 4 }
 0x435   :  { %v7395_v34 = vrot.slane %v20850_v62, 3  ;;  %v9445_v0 = vcombine.low %v9400_v47, %v9414_v43  ;;  %v7186_v2 = vsel %vm3935_vm7, %v7185_v49, %v7184_v41  ;;  %v20869_v18 = vrot.slane %v20853_v44, 6 }
 0x436   :  { %v7388_v48 = vsel %vm3923_vm3, %v20868_v45, %v18114_v63  ;;  %v14272_v39 = vcombine.high %v18270_v37, %v8583_v51  ;;  %v18403_v23 = vsel %vm3938_vm8, %v7187_v31, %v7186_v2  ;;  %v20870_v46 = vrot.slane %v20844_v53, 5 }
 0x437   :  { %v7390_v33 = vsel %vm3926_vm4, %v20869_v18, %v7388_v48  ;;  %v7397_v56 = vrot.slane %v20835_v32, 2  ;;  %v7399_v20 = vrot.slane %v20856_v11, 1  ;;  %v9462_v10 = vrot.slane %v9445_v0, %v15286_v59 }
 0x438   :  { %v7392_v63 = vsel %vm3929_vm5, %v20870_v46, %v7390_v33  ;;  %v9442_v37 = vrot.slane %v14272_v39, %v15286_v59  ;;  %v7407_v51 = vrot.slane %v20865_v54, 4  ;;  %v7409_v31 = vrot.slane %v20866_v22, 3  ;;  %v20873_v46 = vld [vmem:[#allocation71_spill] sm:$0xff] }
 0x439   :  { %v7394_v49 = vsel %vm3932_vm6, %v7393_v40, %v7392_v63  ;;  %v7400_v43 = vsel %vm3920_vm2, %v20837_v19, %v7399_v20  ;;  %v7411_v41 = vrot.slane %v20867_v60, 2  ;;  %v20871_v39 = vrot.slane %v20839_v3, 7 }
 0x43a   :  { %v7396_v47 = vsel %vm3935_vm7, %v7395_v34, %v7394_v49  ;;  %v9448_v45 = vcombine.low %v9428_v15, %v9442_v37  ;;  %v7413_v2 = vrot.slane %v16962_v30, 1  ;;  %v20872_v18 = vrot.slane %v20861_v1, 6  ;;  %v20875_v49 = vld [vmem:[#allocation84_spill] sm:$0xff] }
 0x43b   :  { %v7398_v48 = vsel %vm3938_vm8, %v7397_v56, %v7396_v47  ;;  %v7402_v0 = vsel %vm3923_vm3, %v20871_v39, %v7400_v43  ;;  %v20874_v19 = vrot.slane %v20853_v44, 6  ;;  %v20877_v3 = vrot.slane %v20853_v44, 7 }
 0x43c   :  { %v7404_v33 = vsel %vm3926_vm4, %v20872_v18, %v7402_v0  ;;  %v20876_v15 = vmov %v20872_v18  ;;  %v9483_v43 = vrot.slane %v9448_v45, %v15286_v59  ;;  %v20878_v39 = vrot.slane %v20863_v58, 5 }
 0x43d   :  { %v7580_v63 = vsel %vm3923_vm3, %v20874_v19, %v20873_v46  ;;  %v7587_v37 = vsel %vm3923_vm3, %v20876_v15, %v20875_v49  ;;  %v7760_v47 = vsel %vm3923_vm3, %v20877_v3, %v18241_v26  ;;  %v18445_v18 = vsel %vm3920_vm2, %v16968_v8, %v7413_v2 }
 0x43e   :  { %v7406_v0 = vsel %vm3929_vm5, %v20878_v39, %v7404_v33  ;;  %v20879_v46 = vrot.slane %v20844_v53, 5  ;;  %v20880_v26 = vmov %v20878_v39  ;;  %v20881_v15 = vrot.slane %v20844_v53, 6 }
 0x43f   :  { %v7408_v49 = vsel %vm3932_vm6, %v7407_v51, %v7406_v0  ;;  %v7588_v45 = vsel %vm3926_vm4, %v20880_v26, %v7587_v37  ;;  %v9493_v3 = vcombine.low %v9462_v10, %v9483_v43  ;;  %v20882_v53 = vrot.slane %v20847_v50, 5 }
 0x440   :  { %v7581_v19 = vsel %vm3926_vm4, %v20879_v46, %v7580_v63  ;;  %v7762_v33 = vsel %vm3926_vm4, %v20881_v15, %v7760_v47  ;;  %v7410_v39 = vsel %vm3935_vm7, %v7409_v31, %v7408_v49  ;;  %v7589_v61 = vsel %vm3929_vm5, %v7407_v51, %v7588_v45  ;;  %v14975_v63 = vld [vmem:[%s20310_s3 + $0xf8] sm:$0xff]  }
 0x441   :  { %v7582_v44 = vsel %vm3929_vm5, %v7393_v40, %v7581_v19  ;;  %v7412_v40 = vsel %vm3938_vm8, %v7411_v41, %v7410_v39  ;;  %v7590_v37 = vsel %vm3932_vm6, %v7409_v31, %v7589_v61  ;;  %v7764_v10 = vsel %vm3929_vm5, %v20882_v53, %v7762_v33  ;;  %14806 = vmatmul.mubr.bf16.gmra.mrb[68].mxu0 %v9493_v3 }
 0x442   :  { %v7583_v5 = vsel %vm3932_vm6, %v7395_v34, %v7582_v44  ;;  %v14976_v34 = vld [vmem:[%s20310_s3 + $0xb8] sm:$0xff]   ;;  %v7591_v47 = vsel %vm3935_vm7, %v7411_v41, %v7590_v37  ;;  %v20883_v43 = vrot.slane %v20850_v62, 4  ;;  %v20886_v19 = vrot.slane %v20863_v58, 6  ;;  %14589 = vmatprep.subr.bf16.mxu1 %v14975_v63 }
 0x443   :  { %v7584_v0 = vsel %vm3935_vm7, %v7397_v56, %v7583_v5  ;;  %v20884_v5 = vrot.slane %v20861_v1, 7  ;;  %v7592_v61 = vsel %vm3938_vm8, %v7413_v2, %v7591_v47  ;;  %v20885_v56 = vrot.slane %v20835_v32, 3  ;;  %14590 = vmatpush3.bf16.msra.mxu1 %v14976_v34 }
 0x444   :  { %v7585_v51 = vsel %vm3938_vm8, %v7399_v20, %v7584_v0  ;;  %v7766_v46 = vsel %vm3932_vm6, %v20883_v43, %v7764_v10  ;;  %v7779_v41 = vrot.slane %v20866_v22, 4  ;;  %v20887_v62 = vrot.slane %v20856_v11, 2 }
 0x445   :  { %v7774_v50 = vsel %vm3923_vm3, %v20884_v5, %v18264_v38  ;;  %v7768_v31 = vsel %vm3935_vm7, %v20885_v56, %v7766_v46  ;;  %v20888_v1 = vrot.slane %v20865_v54, 5  ;;  %v7781_v2 = vrot.slane %v20867_v60, 3 }
 0x446   :  { %v7776_v20 = vsel %vm3926_vm4, %v20886_v19, %v7774_v50  ;;  %v7770_v49 = vsel %vm3938_vm8, %v20887_v62, %v7768_v31  ;;  %v7783_v32 = vrot.slane %v16962_v30, 2  ;;  %v14221_v26 = vpack.c.b16 %v7398_v48, %v18378_v13  ;;  %v20889_v62 = vld [vmem:[#allocation85_spill] sm:$0xff] }
 0x447   :  { %v7778_v38 = vsel %vm3929_vm5, %v20888_v1, %v7776_v20  ;;  %v14223_v45 = vpack.c.b16 %v7770_v49, %v7585_v51  ;;  %v14224_v22 = vpack.c.b16 %v18342_v29, %v18342_v29  ;;  %v8522_v15 = vcombine.high %v18228_v28, %v18233_v42 }
 0x448   :  { %v7780_v44 = vsel %vm3932_vm6, %v7779_v41, %v7778_v38  ;;  %v8525_v33 = vcombine.high %v18359_v9, %v18359_v9  ;;  %v8584_v30 = vcombine.high %v18260_v27, %v18374_v12  ;;  %v8492_v3 = vrot.slane %v14221_v26, %v15286_v59  ;;  %v20891_v38 = vld [vmem:[#allocation13_spill] sm:$0xff] }
 0x449   :  { %v7782_v11 = vsel %vm3935_vm7, %v7781_v2, %v7780_v44  ;;  %v8506_v13 = vrot.slane %v14223_v45, %v15286_v59  ;;  %v8520_v48 = vrot.slane %v14224_v22, %v15286_v59  ;;  %v8547_v29 = vrot.slane %v8522_v15, %v15286_v59 }
 0x44a   :  { %v7784_v60 = vsel %vm3938_vm8, %v7783_v32, %v7782_v11  ;;  %v8575_v39 = vrot.slane %v8525_v33, %v15286_v59  ;;  %v14225_v28 = vpack.c.b16 %v7412_v40, %v18403_v23  ;;  %v7785_v40 = vrot.slane %v16968_v8, 1  ;;  %v20894_v33 = vld [vmem:[#allocation20_spill] sm:$0xff] }
 0x44b   :  { %v14227_v42 = vpack.c.b16 %v7784_v60, %v7592_v61  ;;  %v8523_v63 = vcombine.low %v8492_v3, %v8506_v13  ;;  %v8524_v9 = vcombine.high %v8492_v3, %v8506_v13  ;;  %v8526_v0 = vcombine.high %v8520_v48, %v8520_v48  ;;  %v20896_v13 = vld [vmem:[#allocation12_spill] sm:$0xff] }
 0x44c   :  { %v8568_v27 = vrot.slane %v8520_v48, %v15286_v59  ;;  %v8588_v37 = vcombine.high %v8547_v29, %v8575_v39  ;;  %v18518_v53 = vrot.slane %v14225_v28, %v15286_v59  ;;  %v14273_v34 = vcombine.low %v8547_v29, %v8584_v30 }
 0x44d   :  { %v18521_v10 = vrot.slane %v14227_v42, %v15286_v59  ;;  %v8540_v51 = vrot.slane %v8523_v63, %v15286_v59  ;;  %v8554_v47 = vrot.slane %v8524_v9, %v15286_v59  ;;  %v18526_v23 = vrot.slane %v8526_v0, %v15286_v59 }
 0x44e   :  { %v9510_v46 = vrot.slane %v14273_v34, %v15286_v59  ;;  %v7795_v5 = vrot.slane %v16980_v57, 3  ;;  %v7799_v50 = vrot.slane %v17305_v35, 1  ;;  %v18537_v19 = vsel %vm3920_vm2, %v16970_v14, %v7785_v40 }
 0x44f   :  { %v8638_v43 = vcombine.low %v18518_v53, %v18521_v10  ;;  %v8586_v61 = vcombine.high %v8540_v51, %v8568_v27  ;;  %v8590_v56 = vcombine.high %v8554_v47, %v18526_v23  ;;  %v14275_v31 = vcombine.low %v8588_v37, %v8540_v51 }
 0x450   :  { %v18544_v8 = vsel %vm3920_vm2, %v17307_v55, %v7799_v50  ;;  %v20890_v49 = vrot.slane %v20863_v58, 6  ;;  %v20892_v44 = vrot.slane %v20891_v38, 6  ;;  %v20893_v11 = vrot.slane %v20865_v54, 5 }
 0x451   :  { %v18540_v20 = vrot.slane %v8638_v43, %v15286_v59  ;;  %v14277_v45 = vcombine.low %v8554_v47, %v8586_v61  ;;  %v9524_v22 = vrot.slane %v14275_v31, %v15286_v59  ;;  %v20895_v30 = vrot.slane %v20894_v33, 5 }
 0x452   :  { %v7959_v1 = vsel %vm3923_vm3, %v20890_v49, %v20889_v62  ;;  %v7966_v26 = vsel %vm3923_vm3, %v20892_v44, %v17012_v24  ;;  %v20897_v48 = vrot.slane %v20896_v13, 4  ;;  %v8585_v24 = vcombine.low %v8540_v51, %v8568_v27 }
 0x453   :  { %v7960_v15 = vsel %vm3926_vm4, %v20893_v11, %v7959_v1  ;;  %v7967_v60 = vsel %vm3926_vm4, %v20895_v30, %v7966_v26  ;;  %v14279_v58 = vcombine.low %v8590_v56, %v18540_v20  ;;  %v9538_v42 = vrot.slane %v14277_v45, %v15286_v59  ;;  %v20900_v26 = vld [vmem:[#allocation15_spill] sm:$0xff]  ;;  %v20901_v45 = vld [vmem:[#allocation14_spill] sm:$0xff] }
 0x454   :  { %v7961_v3 = vsel %vm3929_vm5, %v7779_v41, %v7960_v15  ;;  %v7968_v28 = vsel %vm3929_vm5, %v20897_v48, %v7967_v60  ;;  %v9561_v63 = vcombine.high %v9510_v46, %v9524_v22  ;;  %v9560_v9 = vcombine.low %v9510_v46, %v9524_v22  ;;  %v20898_v46 = vld [vmem:[#allocation19_spill] sm:$0xff] }
 0x455   :  { %v7962_v54 = vsel %vm3932_vm6, %v7781_v2, %v7961_v3  ;;  %v9552_v0 = vrot.slane %v14279_v58, %v15286_v59  ;;  %v7969_v34 = vsel %vm3932_vm6, %v7795_v5, %v7968_v28  ;;  %v8587_v41 = vcombine.low %v8547_v29, %v8575_v39 }
 0x456   :  { %v7963_v37 = vsel %vm3935_vm7, %v7783_v32, %v7962_v54  ;;  %v18574_v43 = vrot.slane %v9561_v63, %v15286_v59  ;;  %v18577_v51 = vrot.slane %v9560_v9, %v15286_v59  ;;  %v20899_v56 = vrot.slane %v20898_v46, 2 }
 0x457   :  { %v7964_v61 = vsel %vm3938_vm8, %v7785_v40, %v7963_v37  ;;  %v9564_v31 = vcombine.high %v9538_v42, %v9552_v0  ;;  %v9563_v62 = vcombine.low %v9538_v42, %v9552_v0  ;;  %v8589_v49 = vcombine.low %v8554_v47, %v18526_v23  ;;  %v20904_v0 = vld [vmem:[#allocation88_spill] sm:$0xff]  ;;  %v20905_v37 = vld [vmem:[#allocation86_spill] sm:$0xff] }
 0x458   :  { %v7970_v2 = vsel %vm3935_vm7, %v20899_v56, %v7969_v34  ;;  %v14274_v1 = vcombine.high %v8587_v41, %v18374_v12  ;;  %v14276_v44 = vcombine.high %v8575_v39, %v8585_v24  ;;  %v20902_v22 = vrot.slane %v20901_v45, 5 }
 0x459   :  { %v18584_v32 = vsel %vm3938_vm8, %v7799_v50, %v7970_v2  ;;  %v18594_v11 = vrot.slane %v9564_v31, %v15286_v59  ;;  %v18597_v15 = vrot.slane %v9563_v62, %v15286_v59  ;;  %v14278_v50 = vcombine.high %v8589_v49, %v8568_v27  ;;  %v20908_v2 = vld [vmem:[#allocation28_spill] sm:$0xff] }
 0x45a   :  { %v8004_v29 = vpack.c.b16 %v18584_v32, %v7964_v61  ;;  %v7194_v40 = vsel %vm3926_vm4, %v20902_v22, %v20900_v26  ;;  %v20903_v30 = vrot.slane %v20891_v38, 4  ;;  %v9517_v12 = vrot.slane %v14274_v1, %v15286_v59  ;;  %v20907_v61 = vld [vmem:[#allocation24_spill] sm:$0xff]  ;;  %v20909_v1 = vld [vmem:[#allocation23_spill] sm:$0xff] }
 0x45b   :  { %v9531_v39 = vrot.slane %v14276_v44, %v15286_v59  ;;  %v7197_v58 = vrot.slane %v20894_v33, 3  ;;  %v9611_v3 = vcombine.low %v18574_v43, %v18594_v11  ;;  %v9608_v48 = vcombine.low %v18577_v51, %v18597_v15 }
 0x45c   :  { %v7196_v47 = vsel %vm3929_vm5, %v20903_v30, %v7194_v40  ;;  %v18603_v60 = vrot.slane %v8004_v29, %v15286_v59  ;;  %v9545_v27 = vrot.slane %v14278_v50, %v15286_v59  ;;  %v7199_v28 = vrot.slane %v20896_v13, 2  ;;  %v20911_v40 = vld [vmem:[#allocation87_spill] sm:$0xff] }
 0x45d   :  { %v9562_v42 = vcombine.low %v9517_v12, %v9531_v39  ;;  %v7198_v63 = vsel %vm3932_vm6, %v7197_v58, %v7196_v47  ;;  %v7201_v9 = vrot.slane %v16980_v57, 1  ;;  %10290 = vmatprep.mubr.bf16.mxu1 %v9611_v3  ;;  %v20906_v34 = vrot.slane %v20905_v37, 5 }
 0x45e   :  { %v18616_v24 = vrot.slane %v18603_v60, %v15286_v59  ;;  %v7200_v54 = vsel %vm3935_vm7, %v7199_v28, %v7198_v63  ;;  %v7211_v56 = vrot.slane %v20907_v61, 3  ;;  %v7213_v31 = vrot.slane %v20908_v2, 2  ;;  %10291 = vmatmul.mubr.bf16.gmra.mrb[16].mxu1 %v9608_v48 }
 0x45f   :  { %v7208_v41 = vsel %vm3926_vm4, %v20906_v34, %v20904_v0  ;;  %v9579_v49 = vrot.slane %v9562_v42, %v15286_v59  ;;  %v18631_v29 = vsel %vm3938_vm8, %v7201_v9, %v7200_v54  ;;  %v20910_v44 = vrot.slane %v20909_v1, 4 }
 0x460   :  { %v8700_v62 = vcombine.low %v18540_v20, %v18616_v24  ;;  %v7215_v50 = vrot.slane %v20911_v40, 1  ;;  %v20912_v30 = vrot.slane %v16970_v14, 7  ;;  %v7421_v12 = vrot.slane %v20894_v33, 4 }
 0x461   :  { %v7210_v26 = vsel %vm3929_vm5, %v20910_v44, %v7208_v41  ;;  %v20913_v3 = vrot.slane %v20901_v45, 6  ;;  %v7423_v28 = vrot.slane %v20896_v13, 3  ;;  %v20914_v63 = vrot.slane %v20891_v38, 5 }
 0x462   :  { %v7212_v22 = vsel %vm3932_vm6, %v7211_v56, %v7210_v26  ;;  %v7416_v47 = vsel %vm3923_vm3, %v20912_v30, %v18445_v18  ;;  %v14280_v39 = vcombine.high %v18526_v23, %v8700_v62  ;;  %v7425_v18 = vrot.slane %v16980_v57, 2  ;;  %v20916_v30 = vld [vmem:[#allocation26_spill] sm:$0xff] }
 0x463   :  { %v7214_v58 = vsel %vm3935_vm7, %v7213_v31, %v7212_v22  ;;  %v7418_v48 = vsel %vm3926_vm4, %v20913_v3, %v7416_v47  ;;  %v7427_v9 = vrot.slane %v20898_v46, 1  ;;  %v7435_v0 = vrot.slane %v20907_v61, 4 }
 0x464   :  { %v18650_v42 = vsel %vm3938_vm8, %v7215_v50, %v7214_v58  ;;  %v7420_v14 = vsel %vm3929_vm5, %v20914_v63, %v7418_v48  ;;  %v9559_v23 = vrot.slane %v14280_v39, %v15286_v59  ;;  %v7437_v34 = vrot.slane %v20908_v2, 3 }
 0x465   :  { %v7422_v54 = vsel %vm3932_vm6, %v7421_v12, %v7420_v14  ;;  %v7428_v56 = vsel %vm3920_vm2, %v17305_v35, %v7427_v9  ;;  %v7439_v31 = vrot.slane %v20911_v40, 2  ;;  %v7441_v62 = vrot.slane %v17529_v6, 1 }
 0x466   :  { %v7424_v41 = vsel %vm3935_vm7, %v7423_v28, %v7422_v54  ;;  %v9565_v44 = vcombine.low %v9545_v27, %v9559_v23  ;;  %v20915_v22 = vrot.slane %v17307_v55, 7  ;;  %v20917_v47 = vmov %v20913_v3  ;;  %v20920_v55 = vld [vmem:[#allocation89_spill] sm:$0xff] }
 0x467   :  { %v7426_v26 = vsel %vm3938_vm8, %v7425_v18, %v7424_v41  ;;  %v7594_v39 = vsel %vm3923_vm3, %v20917_v47, %v20916_v30  ;;  %v20918_v58 = vrot.slane %v20905_v37, 6  ;;  %v18679_v3 = vsel %vm3920_vm2, %v17535_v7, %v7441_v62 }
 0x468   :  { %v7430_v50 = vsel %vm3923_vm3, %v20915_v22, %v7428_v56  ;;  %v20919_v27 = vmov %v20914_v63  ;;  %v9600_v23 = vrot.slane %v9565_v44, %v15286_v59  ;;  %v20922_v54 = vrot.slane %v20909_v1, 5 }
 0x469   :  { %v7432_v35 = vsel %vm3926_vm4, %v20918_v58, %v7430_v50  ;;  %v7595_v48 = vsel %vm3926_vm4, %v20919_v27, %v7594_v39  ;;  %v20921_v63 = vmov %v20918_v58  ;;  %v20924_v58 = vrot.slane %v20901_v45, 7 }
 0x46a   :  { %v7601_v14 = vsel %vm3923_vm3, %v20921_v63, %v20920_v55  ;;  %v7434_v41 = vsel %vm3929_vm5, %v20922_v54, %v7432_v35  ;;  %v7596_v56 = vsel %vm3929_vm5, %v7421_v12, %v7595_v48  ;;  %v20923_v22 = vmov %v20922_v54 }
 0x46b   :  { %v7602_v50 = vsel %vm3926_vm4, %v20923_v22, %v7601_v14  ;;  %v7436_v30 = vsel %vm3932_vm6, %v7435_v0, %v7434_v41  ;;  %v7597_v47 = vsel %vm3932_vm6, %v7423_v28, %v7596_v56  ;;  %v7788_v44 = vsel %vm3923_vm3, %v20924_v58, %v18537_v19 }
 0x46c   :  { %v7603_v39 = vsel %vm3929_vm5, %v7435_v0, %v7602_v50  ;;  %v9610_v27 = vcombine.low %v9579_v49, %v9600_v23  ;;  %v7438_v35 = vsel %vm3935_vm7, %v7437_v34, %v7436_v30  ;;  %v7598_v12 = vsel %vm3935_vm7, %v7425_v18, %v7597_v47 }
 0x46d   :  { %v7604_v48 = vsel %vm3932_vm6, %v7437_v34, %v7603_v39  ;;  %v7440_v55 = vsel %vm3938_vm8, %v7439_v31, %v7438_v35  ;;  %v7599_v63 = vsel %vm3938_vm8, %v7427_v9, %v7598_v12  ;;  %v20925_v0 = vrot.slane %v20891_v38, 6 }
 0x46e   :  { %v7605_v28 = vsel %vm3935_vm7, %v7439_v31, %v7604_v48  ;;  %14809 = vmatprep.mubr.bf16.mxu0 %v9610_v27  ;;  %v20926_v45 = vrot.slane %v20894_v33, 5  ;;  %v20927_v18 = vrot.slane %v20905_v37, 7  ;;  %v7807_v9 = vrot.slane %v20908_v2, 4 }
 0x46f   :  { %v7790_v14 = vsel %vm3926_vm4, %v20925_v0, %v7788_v44  ;;  %v7606_v19 = vsel %vm3938_vm8, %v7441_v62, %v7605_v28  ;;  %v20928_v31 = vrot.slane %v20896_v13, 4  ;;  %v20929_v23 = vrot.slane %v20909_v1, 6  ;;  %v20937_v1 = vld [vmem:[#allocation38_spill] sm:$0xff] }
 0x470   :  { %v7792_v49 = vsel %vm3929_vm5, %v20926_v45, %v7790_v14  ;;  %v7802_v34 = vsel %vm3923_vm3, %v20927_v18, %v18544_v8  ;;  %v7809_v62 = vrot.slane %v20911_v40, 3  ;;  %v7811_v33 = vrot.slane %v17529_v6, 2  ;;  %v20932_v45 = vld [vmem:[#allocation90_spill] sm:$0xff] }
 0x471   :  { %v7794_v38 = vsel %vm3932_vm6, %v20928_v31, %v7792_v49  ;;  %v7804_v54 = vsel %vm3926_vm4, %v20929_v23, %v7802_v34  ;;  %v20930_v8 = vrot.slane %v20907_v61, 5  ;;  %v14226_v13 = vpack.c.b16 %v7426_v26, %v18631_v29 }
 0x472   :  { %v7796_v37 = vsel %vm3935_vm7, %v7795_v5, %v7794_v38  ;;  %v14229_v41 = vpack.c.b16 %v18584_v32, %v18584_v32  ;;  %v20931_v56 = vrot.slane %v20898_v46, 2  ;;  %v8639_v57 = vcombine.high %v18518_v53, %v18521_v10 }
 0x473   :  { %v7806_v2 = vsel %vm3929_vm5, %v20930_v8, %v7804_v54  ;;  %v8642_v6 = vcombine.high %v18603_v60, %v18603_v60  ;;  %v8609_v29 = vrot.slane %v14226_v13, %v15286_v59  ;;  %v8701_v47 = vcombine.high %v18540_v20, %v18616_v24 }
 0x474   :  { %v7798_v22 = vsel %vm3938_vm8, %v20931_v56, %v7796_v37  ;;  %v7808_v40 = vsel %vm3932_vm6, %v7807_v9, %v7806_v2  ;;  %v8637_v26 = vrot.slane %v14229_v41, %v15286_v59  ;;  %v8664_v46 = vrot.slane %v8639_v57, %v15286_v59 }
 0x475   :  { %v7810_v5 = vsel %vm3935_vm7, %v7809_v62, %v7808_v40  ;;  %v14228_v50 = vpack.c.b16 %v7798_v22, %v7599_v63  ;;  %v8692_v30 = vrot.slane %v8642_v6, %v15286_v59  ;;  %v14230_v39 = vpack.c.b16 %v7440_v55, %v18650_v42  ;;  %v20938_v40 = vld [vmem:[#allocation33_spill] sm:$0xff] }
 0x476   :  { %v7812_v32 = vsel %vm3938_vm8, %v7811_v33, %v7810_v5  ;;  %v8643_v10 = vcombine.high %v8637_v26, %v8637_v26  ;;  %v8685_v60 = vrot.slane %v8637_v26, %v15286_v59  ;;  %v14281_v27 = vcombine.low %v8664_v46, %v8701_v47  ;;  %v20940_v26 = vld [vmem:[#allocation31_spill] sm:$0xff] }
 0x477   :  { %v8623_v53 = vrot.slane %v14228_v50, %v15286_v59  ;;  %v8705_v58 = vcombine.high %v8664_v46, %v8692_v30  ;;  %v14232_v44 = vpack.c.b16 %v7812_v32, %v7606_v19  ;;  %v7813_v35 = vrot.slane %v17535_v7, 1 }
 0x478   :  { %v18759_v63 = vrot.slane %v8643_v10, %v15286_v59  ;;  %v18762_v28 = vrot.slane %v14230_v39, %v15286_v59  ;;  %v9627_v0 = vrot.slane %v14281_v27, %v15286_v59  ;;  %v20513_v55 = vrot.slane %v17547_v17, 3 }
 0x479   :  { %v8640_v12 = vcombine.low %v8609_v29, %v8623_v53  ;;  %v8641_v48 = vcombine.high %v8609_v29, %v8623_v53  ;;  %v18765_v20 = vrot.slane %v14232_v44, %v15286_v59  ;;  %v18770_v42 = vsel %vm3920_vm2, %v17537_v52, %v7813_v35 }
 0x47a   :  { %v7827_v19 = vrot.slane %v17849_v21, 1  ;;  %v20933_v49 = vmov %v20929_v23  ;;  %v20934_v31 = vmov %v20930_v8  ;;  %v20935_v23 = vld [vmem:[#allocation30_spill] sm:$0xff]  ;;  %v8704_v8 = vcombine.low %v8664_v46, %v8692_v30 }
 0x47b   :  { %v8657_v7 = vrot.slane %v8640_v12, %v15286_v59  ;;  %v8671_v14 = vrot.slane %v8641_v48, %v15286_v59  ;;  %v7973_v18 = vsel %vm3923_vm3, %v20933_v49, %v20932_v45  ;;  %v8755_v34 = vcombine.low %v18762_v28, %v18765_v20  ;;  %v20942_v12 = vld [vmem:[#allocation36_spill] sm:$0xff] }
 0x47c   :  { %v7974_v38 = vsel %vm3926_vm4, %v20934_v31, %v7973_v18  ;;  %v20936_v54 = vrot.slane %v20935_v23, 6  ;;  %v18792_v56 = vsel %vm3920_vm2, %v20937_v1, %v7827_v19  ;;  %v20939_v57 = vrot.slane %v20938_v40, 5 }
 0x47d   :  { %v8703_v2 = vcombine.high %v8657_v7, %v8685_v60  ;;  %v8707_v13 = vcombine.high %v8671_v14, %v18759_v63  ;;  %v14283_v41 = vcombine.low %v8705_v58, %v8657_v7  ;;  %v18795_v22 = vrot.slane %v8755_v34, %v15286_v59 }
 0x47e   :  { %v7980_v37 = vsel %vm3923_vm3, %v20936_v54, %v17579_v36  ;;  %v7975_v61 = vsel %vm3929_vm5, %v7807_v9, %v7974_v38  ;;  %v8702_v5 = vcombine.low %v8657_v7, %v8685_v60  ;;  %v20941_v32 = vrot.slane %v20940_v26, 4 }
 0x47f   :  { %v7981_v6 = vsel %vm3926_vm4, %v20939_v57, %v7980_v37  ;;  %v14285_v36 = vcombine.low %v8671_v14, %v8703_v2  ;;  %v9641_v50 = vrot.slane %v14283_v41, %v15286_v59  ;;  %v7976_v29 = vsel %vm3932_vm6, %v7809_v62, %v7975_v61  ;;  %v20945_v37 = vld [vmem:[#allocation32_spill] sm:$0xff] }
 0x480   :  { %v7982_v46 = vsel %vm3929_vm5, %v20941_v32, %v7981_v6  ;;  %v14287_v47 = vcombine.low %v8707_v13, %v18795_v22  ;;  %v7977_v53 = vsel %vm3935_vm7, %v7811_v33, %v7976_v29  ;;  %v8706_v10 = vcombine.low %v8671_v14, %v18759_v63 }
 0x481   :  { %v7983_v9 = vsel %vm3932_vm6, %v20513_v55, %v7982_v46  ;;  %v9655_v39 = vrot.slane %v14285_v36, %v15286_v59  ;;  %v9678_v58 = vcombine.high %v9627_v0, %v9641_v50  ;;  %v9677_v44 = vcombine.low %v9627_v0, %v9641_v50 }
 0x482   :  { %v7978_v62 = vsel %vm3938_vm8, %v7813_v35, %v7977_v53  ;;  %v9669_v27 = vrot.slane %v14287_v47, %v15286_v59  ;;  %v20943_v48 = vrot.slane %v20942_v12, 2  ;;  %v14282_v33 = vcombine.high %v8704_v8, %v18616_v24  ;;  %v20948_v47 = vld [vmem:[#allocation91_spill] sm:$0xff]  ;;  %v20949_v53 = vld [vmem:[#allocation49_spill] sm:$0xff] }
 0x483   :  { %v14284_v45 = vcombine.high %v8692_v30, %v8702_v5  ;;  %v18820_v49 = vrot.slane %v9678_v58, %v15286_v59  ;;  %v18823_v14 = vrot.slane %v9677_v44, %v15286_v59  ;;  %v14286_v0 = vcombine.high %v8706_v10, %v8685_v60  ;;  %v20944_v30 = vld [vmem:[#allocation39_spill] sm:$0xff]  ;;  %v20951_v44 = vld [vmem:[#allocation37_spill] sm:$0xff] }
 0x484   :  { %v7984_v7 = vsel %vm3935_vm7, %v20943_v48, %v7983_v9  ;;  %v9681_v35 = vcombine.high %v9655_v39, %v9669_v27  ;;  %v9680_v34 = vcombine.low %v9655_v39, %v9669_v27  ;;  %v9634_v38 = vrot.slane %v14282_v33, %v15286_v59  ;;  %v20953_v48 = vld [vmem:[#allocation47_spill] sm:$0xff] }
 0x485   :  { %v18826_v18 = vsel %vm3938_vm8, %v7827_v19, %v7984_v7  ;;  %v9648_v54 = vrot.slane %v14284_v45, %v15286_v59  ;;  %v9662_v24 = vrot.slane %v14286_v0, %v15286_v59  ;;  %v20946_v8 = vrot.slane %v20945_v37, 5  ;;  %v20954_v0 = vld [vmem:[#allocation46_spill] sm:$0xff] }
 0x486   :  { %v8005_v31 = vpack.c.b16 %v18826_v18, %v7978_v62  ;;  %v7225_v13 = vrot.slane %v20938_v40, 3  ;;  %v18838_v19 = vrot.slane %v9681_v35, %v15286_v59  ;;  %v18841_v60 = vrot.slane %v9680_v34, %v15286_v59  ;;  %v20955_v34 = vld [vmem:[#allocation48_spill] sm:$0xff] }
 0x487   :  { %v7222_v2 = vsel %vm3926_vm4, %v20946_v8, %v20944_v30  ;;  %v20947_v61 = vrot.slane %v20935_v23, 4  ;;  %v18849_v6 = vcombine.low %v9634_v38, %v9648_v54  ;;  %v7227_v36 = vrot.slane %v20940_v26, 2 }
 0x488   :  { %v18844_v41 = vrot.slane %v8005_v31, %v15286_v59  ;;  %v7229_v50 = vrot.slane %v17547_v17, 1  ;;  %v9728_v29 = vcombine.low %v18820_v49, %v18838_v19  ;;  %v9725_v32 = vcombine.low %v18823_v14, %v18841_v60 }
 0x489   :  { %v7224_v57 = vsel %vm3929_vm5, %v20947_v61, %v7222_v2  ;;  %v20950_v9 = vrot.slane %v20949_v53, 5  ;;  %v9696_v39 = vrot.slane %v18849_v6, %v15286_v59  ;;  %v20952_v62 = vrot.slane %v20951_v44, 4  ;;  %v18889_v61 = vpop.f32.mrb[64].mxu0 }
 0x48a   :  { %v7226_v5 = vsel %vm3932_vm6, %v7225_v13, %v7224_v57  ;;  %v18860_v46 = vrot.slane %v18844_v41, %v15286_v59  ;;  %v7239_v7 = vrot.slane %v20953_v48, 3  ;;  %10298 = vmatprep.mubr.bf16.mxu1 %v9728_v29  ;;  %v7241_v35 = vrot.slane %v20954_v0, 2  ;;  %v18887_v13 = vpop.f32.mrb[0].mxu1  ;;  %20957 = vst [vmem:[#allocation58_spill] sm:$0xff] %v18889_v61 }
 0x48b   :  { %v7236_v10 = vsel %vm3926_vm4, %v20950_v9, %v20948_v47  ;;  %v7228_v58 = vsel %vm3935_vm7, %v7227_v36, %v7226_v5  ;;  %v7243_v31 = vrot.slane %v20955_v34, 1  ;;  %10299 = vmatmul.mubr.bf16.gmra.mrb[20].mxu1 %v9725_v32  ;;  %v20956_v54 = vrot.slane %v17537_v52, 7 }
 0x48c   :  { %v7238_v27 = vsel %vm3929_vm5, %v20952_v62, %v7236_v10  ;;  %v8817_v33 = vcombine.low %v18795_v22, %v18860_v46  ;;  %v18876_v45 = vsel %vm3938_vm8, %v7229_v50, %v7228_v58  ;;  %v7449_v8 = vrot.slane %v20938_v40, 4  ;;  %v18897_v50 = vpop.f32.mrb[1].mxu1 }
 0x48d   :  { %v7240_v38 = vsel %vm3932_vm6, %v7239_v7, %v7238_v27  ;;  %v7444_v30 = vsel %vm3923_vm3, %v20956_v54, %v18679_v3  ;;  %v7451_v2 = vrot.slane %v20940_v26, 3  ;;  %v20958_v5 = vrot.slane %v20945_v37, 6  ;;  %v18899_v3 = vpop.f32.mrb[65].mxu0  ;;  %v18909_v10 = vpop.f32.mrb[2].mxu1 }
 0x48e   :  { %v14288_v57 = vcombine.high %v18759_v63, %v8817_v33  ;;  %v7242_v6 = vsel %vm3935_vm7, %v7241_v35, %v7240_v38  ;;  %v7453_v52 = vrot.slane %v17547_v17, 2  ;;  %20959 = vst [vmem:[#allocation57_spill] sm:$0xff] %v18899_v3  ;;  %v20960_v32 = vrot.slane %v20935_v23, 5  ;;  %v18911_v58 = vpop.f32.mrb[66].mxu0  ;;  %v18917_v35 = vpop.f32.mrb[3].mxu1 }
 0x48f   :  { %v7446_v36 = vsel %vm3926_vm4, %v20958_v5, %v7444_v30  ;;  %v18902_v29 = vsel %vm3938_vm8, %v7243_v31, %v7242_v6  ;;  %v7455_v63 = vrot.slane %v20942_v12, 1  ;;  %v7463_v9 = vrot.slane %v20953_v48, 4  ;;  %20961 = vst [vmem:[#allocation64_spill] sm:$0xff] %v18911_v58  ;;  %v18919_v31 = vpop.f32.mrb[67].mxu0  ;;  %v20963_v30 = vld [vmem:[#allocation43_spill] sm:$0xff]  ;;  %v20964_v5 = vld [vmem:[#allocation29_spill] sm:$0xff] }
 0x490   :  { %v7448_v47 = vsel %vm3929_vm5, %v20960_v32, %v7446_v36  ;;  %v9676_v62 = vrot.slane %v14288_v57, %v15286_v59  ;;  %v7465_v7 = vrot.slane %v20954_v0, 3  ;;  %v7467_v33 = vrot.slane %v20955_v34, 2  ;;  %20962 = vst [vmem:[#allocation62_spill] sm:$0xff] %v18919_v31  ;;  %v18929_v32 = vpop.f32.mrb[4].mxu1 }
 0x491   :  { %v7450_v27 = vsel %vm3932_vm6, %v7449_v8, %v7448_v47  ;;  %v7456_v54 = vsel %vm3920_vm2, %v17849_v21, %v7455_v63  ;;  %v20965_v57 = vrot.slane %v20945_v37, 6  ;;  %v20966_v58 = vrot.slane %v20937_v1, 7  ;;  %v18938_v31 = vpop.f32.mrb[5].mxu1 }
 0x492   :  { %v7452_v38 = vsel %vm3935_vm7, %v7451_v2, %v7450_v27  ;;  %v9682_v47 = vcombine.low %v9662_v24, %v9676_v62  ;;  %v20967_v27 = vrot.slane %v20935_v23, 5  ;;  %v20968_v6 = vrot.slane %v20949_v53, 6 }
 0x493   :  { %v7608_v36 = vsel %vm3923_vm3, %v20965_v57, %v20964_v5  ;;  %v7454_v55 = vsel %vm3938_vm8, %v7453_v52, %v7452_v38  ;;  %v7458_v61 = vsel %vm3923_vm3, %v20966_v58, %v7456_v54  ;;  %v20969_v57 = vld [vmem:[#allocation92_spill] sm:$0xff]  ;;  %v20971_v1 = vrot.slane %v20945_v37, 7  ;;  %v18952_v38 = vpop.f32.mrb[6].mxu1 }
 0x494   :  { %v7609_v21 = vsel %vm3926_vm4, %v20967_v27, %v7608_v36  ;;  %v7460_v3 = vsel %vm3926_vm4, %v20968_v6, %v7458_v61  ;;  %v20970_v24 = vmov %v20968_v6  ;;  %v9717_v54 = vrot.slane %v9682_v47, %v15286_v59 }
 0x495   :  { %v7610_v5 = vsel %vm3929_vm5, %v7449_v8, %v7609_v21  ;;  %v7615_v62 = vsel %vm3923_vm3, %v20970_v24, %v20969_v57  ;;  %v7816_v58 = vsel %vm3923_vm3, %v20971_v1, %v18770_v42  ;;  %v20972_v36 = vrot.slane %v20951_v44, 5  ;;  %v18962_v21 = vpop.f32.mrb[7].mxu1 }
 0x496   :  { %v7611_v8 = vsel %vm3932_vm6, %v7451_v2, %v7610_v5  ;;  %v20974_v47 = vrot.slane %v20935_v23, 6  ;;  %v18970_v1 = vpop.f32.mrb[8].mxu1 }
 0x497   :  { %v7462_v61 = vsel %vm3929_vm5, %v20972_v36, %v7460_v3  ;;  %v20973_v6 = vmov %v20972_v36  ;;  %v7612_v42 = vsel %vm3935_vm7, %v7453_v52, %v7611_v8  ;;  %v9727_v3 = vcombine.low %v9696_v39, %v9717_v54  ;;  %v18975_v36 = vpop.f32.mrb[9].mxu1 }
 0x498   :  { %v7616_v27 = vsel %vm3926_vm4, %v20973_v6, %v7615_v62  ;;  %v7464_v37 = vsel %vm3932_vm6, %v7463_v9, %v7462_v61  ;;  %v7818_v24 = vsel %vm3926_vm4, %v20974_v47, %v7816_v58  ;;  %v7613_v5 = vsel %vm3938_vm8, %v7455_v63, %v7612_v42  ;;  %v18986_v54 = vpop.f32.mrb[10].mxu1 }
 0x499   :  { %v7617_v57 = vsel %vm3929_vm5, %v7463_v9, %v7616_v27  ;;  %v7466_v2 = vsel %vm3935_vm7, %v7465_v7, %v7464_v37  ;;  %v20975_v9 = vrot.slane %v20938_v40, 5  ;;  %v20976_v58 = vrot.slane %v20949_v53, 7  ;;  %14810 = vmatmul.mubr.bf16.gmra.mrb[72].mxu0 %v9727_v3  ;;  %v18998_v53 = vpop.f32.mrb[11].mxu1 }
 0x49a   :  { %v7618_v62 = vsel %vm3932_vm6, %v7465_v7, %v7617_v57  ;;  %v7468_v61 = vsel %vm3938_vm8, %v7467_v33, %v7466_v2  ;;  %v20977_v63 = vrot.slane %v20963_v30, 1  ;;  %v20978_v8 = vrot.slane %v20940_v26, 4 }
 0x49b   :  { %v7619_v52 = vsel %vm3935_vm7, %v7467_v33, %v7618_v62  ;;  %v7820_v23 = vsel %vm3929_vm5, %v20975_v9, %v7818_v24  ;;  %v7830_v39 = vsel %vm3923_vm3, %v20976_v58, %v18792_v56  ;;  %v20979_v40 = vrot.slane %v20951_v44, 6 }
 0x49c   :  { %v7620_v7 = vsel %vm3938_vm8, %v20977_v63, %v7619_v52  ;;  %v7822_v33 = vsel %vm3932_vm6, %v20978_v8, %v7820_v23  ;;  %v7835_v27 = vrot.slane %v20954_v0, 4  ;;  %v20980_v56 = vrot.slane %v17547_v17, 3  ;;  %v20983_v63 = vld [vmem:[#allocation52_spill] sm:$0xff] }
 0x49d   :  { %v7832_v6 = vsel %vm3926_vm4, %v20979_v40, %v7830_v39  ;;  %v20981_v42 = vrot.slane %v20953_v48, 5  ;;  %v7837_v26 = vrot.slane %v20955_v34, 3  ;;  %v7839_v47 = vrot.slane %v20963_v30, 2 }
 0x49e   :  { %v7824_v37 = vsel %vm3935_vm7, %v20980_v56, %v7822_v33  ;;  %v20982_v24 = vrot.slane %v20942_v12, 2  ;;  %v14231_v2 = vpack.c.b16 %v7454_v55, %v18876_v45  ;;  %v14234_v17 = vpack.c.b16 %v18826_v18, %v18826_v18 }
 0x49f   :  { %v7834_v57 = vsel %vm3929_vm5, %v20981_v42, %v7832_v6  ;;  %v8756_v9 = vcombine.high %v18762_v28, %v18765_v20  ;;  %v8759_v34 = vcombine.high %v18844_v41, %v18844_v41  ;;  %v8818_v55 = vcombine.high %v18795_v22, %v18860_v46 }
 0x4a0   :  { %v7826_v3 = vsel %vm3938_vm8, %v20982_v24, %v7824_v37  ;;  %v7836_v0 = vsel %vm3932_vm6, %v7835_v27, %v7834_v57  ;;  %v8726_v23 = vrot.slane %v14231_v2, %v15286_v59  ;;  %v8754_v58 = vrot.slane %v14234_v17, %v15286_v59  ;;  %v20985_v24 = vld [vmem:[#allocation56_spill] sm:$0xff] }
 0x4a1   :  { %v7838_v62 = vsel %vm3935_vm7, %v7837_v26, %v7836_v0  ;;  %v14233_v52 = vpack.c.b16 %v7826_v3, %v7613_v5  ;;  %v8781_v45 = vrot.slane %v8756_v9, %v15286_v59  ;;  %v8809_v5 = vrot.slane %v8759_v34, %v15286_v59  ;;  %v20986_v0 = vld [vmem:[#allocation50_spill] sm:$0xff] }
 0x4a2   :  { %v7840_v12 = vsel %vm3938_vm8, %v7839_v47, %v7838_v62  ;;  %v14235_v28 = vpack.c.b16 %v7468_v61, %v18902_v29  ;;  %v8760_v20 = vcombine.high %v8754_v58, %v8754_v58  ;;  %v8802_v41 = vrot.slane %v8754_v58, %v15286_v59  ;;  %v20984_v29 = vld [vmem:[#allocation55_spill] sm:$0xff] }
 0x4a3   :  { %v8740_v18 = vrot.slane %v14233_v52, %v15286_v59  ;;  %v14237_v39 = vpack.c.b16 %v7840_v12, %v7620_v7  ;;  %v8822_v6 = vcombine.high %v8781_v45, %v8809_v5  ;;  %v14289_v42 = vcombine.low %v8781_v45, %v8818_v55  ;;  %v20987_v52 = vld [vmem:[#allocation93_spill] sm:$0xff]  ;;  %v20989_v12 = vld [vmem:[#allocation44_spill] sm:$0xff] }
 0x4a4   :  { %v19032_v56 = vrot.slane %v14235_v28, %v15286_v59  ;;  %v19035_v22 = vrot.slane %v8760_v20, %v15286_v59  ;;  %v7847_v61 = vrot.slane %v20984_v29, 5  ;;  %v7886_v2 = vrot.slane %v20986_v0, %v15286_v59 }
 0x4a5   :  { %v8757_v33 = vcombine.low %v8726_v23, %v8740_v18  ;;  %v8758_v40 = vcombine.high %v8726_v23, %v8740_v18  ;;  %v19038_v37 = vrot.slane %v14237_v39, %v15286_v59  ;;  %v9744_v62 = vrot.slane %v14289_v42, %v15286_v59  ;;  %v20990_v23 = vld [vmem:[#allocation42_spill] sm:$0xff] }
 0x4a6   :  { %v20988_v9 = vrot.slane %v20951_v44, 6  ;;  %v20991_v58 = vrot.slane %v20990_v23, 7  ;;  %v7888_v39 = vunpack.c.l.b16 %v7886_v2  ;;  %v20993_v44 = vld [vmem:[#allocation45_spill] sm:$0xff] }
 0x4a7   :  { %v8774_v57 = vrot.slane %v8757_v33, %v15286_v59  ;;  %v8788_v7 = vrot.slane %v8758_v40, %v15286_v59  ;;  %v8872_v17 = vcombine.low %v19032_v56, %v19038_v37  ;;  %v20992_v40 = vrot.slane %v20953_v48, 5 }
 0x4a8   :  { %v7987_v34 = vsel %vm3923_vm3, %v20988_v9, %v20987_v52  ;;  %v7993_v55 = vsel %vm3920_vm2, %v20991_v58, %v20989_v12  ;;  %v20994_v0 = vrot.slane %v20993_v44, 6 }
 0x4a9   :  { %v8820_v18 = vcombine.high %v8774_v57, %v8802_v41  ;;  %v8824_v28 = vcombine.high %v8788_v7, %v19035_v22  ;;  %v14291_v20 = vcombine.low %v8822_v6, %v8774_v57  ;;  %v19059_v33 = vrot.slane %v8872_v17, %v15286_v59 }
 0x4aa   :  { %v7988_v42 = vsel %vm3926_vm4, %v20992_v40, %v7987_v34  ;;  %v7994_v52 = vsel %vm3923_vm3, %v20994_v0, %v7993_v55  ;;  %v8819_v9 = vcombine.low %v8774_v57, %v8802_v41  ;;  %v20995_v17 = vrot.slane %v20985_v24, 4 }
 0x4ab   :  { %v14293_v8 = vcombine.low %v8788_v7, %v8820_v18  ;;  %v9758_v58 = vrot.slane %v14291_v20, %v15286_v59  ;;  %v7989_v3 = vsel %vm3929_vm5, %v7835_v27, %v7988_v42  ;;  %v7995_v6 = vsel %vm3926_vm4, %v7847_v61, %v7994_v52 }
 0x4ac   :  { %v14295_v2 = vcombine.low %v8824_v28, %v19059_v33  ;;  %v7990_v48 = vsel %vm3932_vm6, %v7837_v26, %v7989_v3  ;;  %v7996_v34 = vsel %vm3929_vm5, %v20995_v17, %v7995_v6  ;;  %v7997_v40 = vrot.slane %v7888_v39, 3 }
 0x4ad   :  { %v9772_v57 = vrot.slane %v14293_v8, %v15286_v59  ;;  %v9795_v55 = vcombine.high %v9744_v62, %v9758_v58  ;;  %v9794_v18 = vcombine.low %v9744_v62, %v9758_v58  ;;  %v7991_v20 = vsel %vm3935_vm7, %v7839_v47, %v7990_v48 }
 0x4ae   :  { %v9786_v27 = vrot.slane %v14295_v2, %v15286_v59  ;;  %v20996_v42 = vrot.slane %v20983_v63, 1  ;;  %v7998_v28 = vsel %vm3932_vm6, %v7997_v40, %v7996_v34  ;;  %v8821_v26 = vcombine.low %v8781_v45, %v8809_v5 }
 0x4af   :  { %v19085_v3 = vrot.slane %v9795_v55, %v15286_v59  ;;  %v19088_v39 = vrot.slane %v9794_v18, %v15286_v59  ;;  %v8823_v62 = vcombine.low %v8788_v7, %v19035_v22  ;;  %v14292_v6 = vcombine.high %v8809_v5, %v8819_v9 }
 0x4b0   :  { %v7992_v0 = vsel %vm3938_vm8, %v20996_v42, %v7991_v20  ;;  %v9798_v52 = vcombine.high %v9772_v57, %v9786_v27  ;;  %v9797_v47 = vcombine.low %v9772_v57, %v9786_v27  ;;  %v14290_v58 = vcombine.high %v8821_v26, %v18860_v46 }
 0x4b1   :  { %v8006_v8 = vpack.c.b16 %v7998_v28, %v7992_v0  ;;  %v14294_v48 = vcombine.high %v8823_v62, %v8802_v41  ;;  %v7245_v17 = vrot.slane %v20983_v63, 7  ;;  %v7247_v45 = vrot.slane %v20989_v12, 6 }
 0x4b2   :  { %v19096_v34 = vrot.slane %v9798_v52, %v15286_v59  ;;  %v19099_v40 = vrot.slane %v9797_v47, %v15286_v59  ;;  %v9751_v7 = vrot.slane %v14290_v58, %v15286_v59  ;;  %v9765_v57 = vrot.slane %v14292_v6, %v15286_v59 }
 0x4b3   :  { %v8864_v2 = vrot.slane %v8006_v8, %v15286_v59  ;;  %v9779_v5 = vrot.slane %v14294_v48, %v15286_v59  ;;  %v7246_v41 = vsel %vm3920_vm2, %v7245_v17, %v20963_v30  ;;  %v7249_v9 = vrot.slane %v20990_v23, 5 }
 0x4b4   :  { %v9845_v55 = vcombine.low %v19085_v3, %v19096_v34  ;;  %v9842_v18 = vcombine.low %v19088_v39, %v19099_v40  ;;  %v9796_v20 = vcombine.low %v9751_v7, %v9765_v57  ;;  %v7248_v27 = vsel %vm3923_vm3, %v7247_v45, %v7246_v41 }
 0x4b5   :  { %v8912_v46 = vrot.slane %v8864_v2, %v15286_v59  ;;  %v7250_v0 = vsel %vm3926_vm4, %v7249_v9, %v7248_v27  ;;  %v7251_v26 = vrot.slane %v20993_v44, 4  ;;  %v7253_v8 = vrot.slane %v20984_v29, 3 }
 0x4b6   :  { %10306 = vmatprep.mubr.bf16.mxu1 %v9845_v55  ;;  %v9813_v62 = vrot.slane %v9796_v20, %v15286_v59  ;;  %v20997_v52 = vrot.slane %v20963_v30, 1  ;;  %v7471_v58 = vrot.slane %v20989_v12, 7  ;;  %v7473_v6 = vrot.slane %v20990_v23, 6 }
 0x4b7   :  { %v8934_v42 = vcombine.low %v19059_v33, %v8912_v46  ;;  %10307 = vmatmul.mubr.bf16.gmra.mrb[24].mxu1 %v9842_v18  ;;  %v7252_v17 = vsel %vm3929_vm5, %v7251_v26, %v7250_v0  ;;  %v7475_v45 = vrot.slane %v20993_v44, 5  ;;  %v7477_v7 = vrot.slane %v20984_v29, 4 }
 0x4b8   :  { %v7470_v47 = vsel %vm3920_vm2, %v20983_v63, %v20997_v52  ;;  %v7254_v57 = vsel %vm3932_vm6, %v7253_v8, %v7252_v17  ;;  %v7621_v41 = vsel %vm3920_vm2, %v7471_v58, %v20983_v63  ;;  %v7625_v9 = vrot.slane %v20985_v24, 3 }
 0x4b9   :  { %v14296_v48 = vcombine.high %v19035_v22, %v8934_v42  ;;  %v7472_v30 = vsel %vm3923_vm3, %v7471_v58, %v7470_v47  ;;  %v7622_v22 = vsel %vm3923_vm3, %v7473_v6, %v7621_v41  ;;  %v20998_v20 = vrot.slane %v20983_v63, 1 }
 0x4ba   :  { %v7474_v18 = vsel %vm3926_vm4, %v7473_v6, %v7472_v30  ;;  %v7623_v0 = vsel %vm3926_vm4, %v7475_v45, %v7622_v22  ;;  %v20999_v26 = vrot.slane %v20990_v23, 7  ;;  %v14239_v52 = vpack.c.b16 %v7998_v28, %v7998_v28 }
 0x4bb   :  { %v9793_v55 = vrot.slane %v14296_v48, %v15286_v59  ;;  %v7842_v27 = vsel %vm3920_vm2, %v20989_v12, %v20998_v20  ;;  %v7476_v42 = vsel %vm3929_vm5, %v7475_v45, %v7474_v18  ;;  %v7624_v48 = vsel %vm3929_vm5, %v7477_v7, %v7623_v0 }
 0x4bc   :  { %v7844_v8 = vsel %vm3923_vm3, %v20999_v26, %v7842_v27  ;;  %v7478_v58 = vsel %vm3932_vm6, %v7477_v7, %v7476_v42  ;;  %v21000_v6 = vrot.slane %v20993_v44, 6  ;;  %v7626_v12 = vsel %vm3932_vm6, %v7625_v9, %v7624_v48 }
 0x4bd   :  { %v9799_v47 = vcombine.low %v9779_v5, %v9793_v55  ;;  %v14236_v45 = vpack.c.b16 %v7478_v58, %v7254_v57  ;;  %v8871_v23 = vrot.slane %v14239_v52, %v15286_v59  ;;  %v21001_v5 = vrot.slane %v20985_v24, 4 }
 0x4be   :  { %v7846_v63 = vsel %vm3926_vm4, %v21000_v6, %v7844_v8  ;;  %v8873_v44 = vcombine.high %v19032_v56, %v19038_v37  ;;  %v8876_v7 = vcombine.high %v8864_v2, %v8864_v2  ;;  %v8935_v29 = vcombine.high %v19059_v33, %v8912_v46 }
 0x4bf   :  { %v7848_v17 = vsel %vm3929_vm5, %v7847_v61, %v7846_v63  ;;  %v9834_v28 = vrot.slane %v9799_v47, %v15286_v59  ;;  %v8843_v9 = vrot.slane %v14236_v45, %v15286_v59  ;;  %v8877_v18 = vcombine.high %v8871_v23, %v8871_v23 }
 0x4c0   :  { %v7850_v30 = vsel %vm3932_vm6, %v21001_v5, %v7848_v17  ;;  %v8898_v61 = vrot.slane %v8873_v44, %v15286_v59  ;;  %v8926_v57 = vrot.slane %v8876_v7, %v15286_v59  ;;  %v8919_v37 = vrot.slane %v8871_v23, %v15286_v59 }
 0x4c1   :  { %v14238_v41 = vpack.c.b16 %v7850_v30, %v7626_v12  ;;  %v9844_v55 = vcombine.low %v9813_v62, %v9834_v28  ;;  %v8933_v2 = vrot.slane %v8877_v18, %v15286_v59  ;;  %v9729_v52 = vcombine.high %v18820_v49, %v18838_v19  ;;  %v21006_v18 = vld [vmem:[#allocation18_spill] sm:$0xff] }
 0x4c2   :  { %v8939_v24 = vcombine.high %v8898_v61, %v8926_v57  ;;  %v14297_v20 = vcombine.low %v8898_v61, %v8935_v29  ;;  %v8938_v27 = vcombine.low %v8898_v61, %v8926_v57  ;;  %v9726_v47 = vcombine.high %v18823_v14, %v18841_v60  ;;  %v21005_v61 = vld [vmem:[#allocation25_spill] sm:$0xff] }
 0x4c3   :  { %v8857_v22 = vrot.slane %v14238_v41, %v15286_v59  ;;  %14813 = vmatprep.mubr.bf16.mxu0 %v9844_v55  ;;  %v9846_v58 = vcombine.high %v19085_v3, %v19096_v34  ;;  %v9843_v12 = vcombine.high %v19088_v39, %v19099_v40  ;;  %v19182_v17 = vadd.f32 %v18897_v50, %v18887_v13  ;;  %v21004_v55 = vld [vmem:[#allocation27_spill] sm:$0xff] }
 0x4c4   :  { %v14298_v0 = vcombine.high %v8938_v27, %v8912_v46  ;;  %v9859_v26 = vrot.slane %v14297_v20, %v15286_v59  ;;  %v19186_v49 = vadd.f32 %v18917_v35, %v18909_v10  ;;  %v19190_v14 = vadd.f32 %v18938_v31, %v18929_v32  ;;  %v21009_v20 = vld [vmem:[#allocation22_spill] sm:$0xff]  ;;  %v21010_v27 = vld [vmem:[#allocation21_spill] sm:$0xff] }
 0x4c5   :  { %v8874_v42 = vcombine.low %v8843_v9, %v8857_v22  ;;  %v8875_v56 = vcombine.high %v8843_v9, %v8857_v22  ;;  %v19195_v39 = vadd.f32 %v18962_v21, %v18952_v38  ;;  %v19202_v31 = vadd.f32 %v18975_v36, %v18970_v1  ;;  %v21003_v9 = vld [vmem:[#allocation17_spill] sm:$0xff]  ;;  %v21007_v22 = vld [vmem:[#allocation74_spill] sm:$0xff] }
 0x4c6   :  { %v9866_v8 = vrot.slane %v14298_v0, %v15286_v59  ;;  %v19206_v32 = vadd.f32 %v18998_v53, %v18986_v54  ;;  %v21002_v53 = vld [vmem:[#allocation73_spill] sm:$0xff]  ;;  %v21013_v0 = vld [vmem:[#allocation34_spill] sm:$0xff] }
 0x4c7   :  { %v8891_v33 = vrot.slane %v8874_v42, %v15286_v59  ;;  %v8905_v62 = vrot.slane %v8875_v56, %v15286_v59  ;;  %v9144_v29 = vcombine.high %v21003_v9, %v21002_v53  ;;  %v9258_v42 = vcombine.high %v21010_v27, %v21009_v20  ;;  %v21011_v56 = vld [vmem:[#allocation35_spill] sm:$0xff] }
 0x4c9   :  { %v8937_v48 = vcombine.high %v8891_v33, %v8919_v37  ;;  %v14299_v6 = vcombine.low %v8939_v24, %v8891_v33  ;;  %v8936_v46 = vcombine.low %v8891_v33, %v8919_v37  ;;  %v8940_v63 = vcombine.low %v8905_v62, %v8933_v2  ;;  %v21014_v33 = vld [vmem:[#allocation40_spill] sm:$0xff] }
 0x4ca   :  { %v21008_v24 = vcombine.high %v21006_v18, %v21007_v22 }
 0x4cb   :  { %v14301_v19 = vcombine.low %v8905_v62, %v8937_v48  ;;  %v9873_v60 = vrot.slane %v14299_v6, %v15286_v59  ;;  %v14300_v3 = vcombine.high %v8926_v57, %v8936_v46  ;;  %v14302_v34 = vcombine.high %v8940_v63, %v8919_v37  ;;  %v21012_v37 = vld [vmem:[#allocation41_spill] sm:$0xff] }
 0x4cc   :  { %v9261_v57 = vcombine.high %v21005_v61, %v21004_v55  ;;  %v9378_v2 = vcombine.high %v21012_v37, %v21011_v56  ;;  %v9375_v62 = vcombine.high %v21014_v33, %v21013_v0  ;;  %v9612_v6 = vcombine.high %v18574_v43, %v18594_v11 }
 0x4cd   :  { %v9887_v13 = vrot.slane %v14301_v19, %v15286_v59  ;;  %v9896_v50 = vcombine.high %v9859_v26, %v9873_v60  ;;  %v9880_v40 = vrot.slane %v14300_v3, %v15286_v59  ;;  %v9894_v10 = vrot.slane %v14302_v34, %v15286_v59 }
 0x4ce   :  { %v9895_v35 = vcombine.low %v9859_v26, %v9873_v60  ;;  %v9495_v26 = vcombine.high %v18304_v25, %v18348_v4  ;;  %v9609_v46 = vcombine.high %v18577_v51, %v18597_v15 }
 0x4cf   :  { %v9898_v45 = vcombine.high %v9887_v13, %v9887_v13  ;;  %v9919_v38 = vrot.slane %v9896_v50, %v15286_v59  ;;  %v9897_v21 = vcombine.low %v9866_v8, %v9880_v40  ;;  %v9926_v28 = vrot.slane %v9887_v13, %v15286_v59  ;;  %v21015_v8 = vld [vmem:[#allocation53_spill] sm:$0xff] }
 0x4d0   :  { %v9905_v23 = vrot.slane %v9895_v35, %v15286_v59  ;;  %v9933_v44 = vrot.slane %v9894_v10, %v15286_v59  ;;  %v9492_v48 = vcombine.high %v21015_v8, %v18351_v16 }
 0x4d1   :  { %v9940_v5 = vrot.slane %v9898_v45, %v15286_v59  ;;  %v9912_v30 = vrot.slane %v9897_v21, %v15286_v59 }
 0x4d2   :  { %v9941_v1 = vcombine.low %v9905_v23, %v9926_v28  ;;  %v9942_v36 = vcombine.high %v9905_v23, %v9926_v28 }
 0x4d3   :  { %v9944_v7 = vcombine.low %v9919_v38, %v9940_v5  ;;  %v9943_v41 = vcombine.low %v9912_v30, %v9933_v44  ;;  %v9945_v54 = vcombine.high %v9919_v38, %v9940_v5 }
 0x4d5   :  { %10314 = vmatprep.mubr.bf16.mxu1 %v9944_v7  ;;  %14814 = vmatmul.mubr.bf16.gmra.mrb[76].mxu0 %v9943_v41 }
 0x4d6   :  { %10315 = vmatmul.mubr.bf16.gmra.mrb[28].mxu1 %v9941_v1 }
 0x4d7   :  { %10355 = vmatprep.mubr.bf16.mxu1 %v9144_v29 }
 0x4de   :  { %10356 = vmatmul.mubr.bf16.vlgmr.msra.gmra.mrb[32].mxu1 %v21008_v24  ;;  %v19264_v24 = vld [vmem:[%s20311_s4] ss:$0 sm:$0xff] }
 0x4df   :  { %10363 = vmatprep.mubr.bf16.mxu1 %v9261_v57  ;;  %v10264_v0 = vadd.f32 %v19186_v49, %v19264_v24 }
 0x4e6   :  { %10364 = vmatmul.mubr.bf16.gmra.mrb[36].mxu1 %v9258_v42  ;;  %v10261_v42 = vadd.f32 %v19182_v17, %v19264_v24  ;;  %v19279_v17 = vadd.f32 %v19202_v31, %v19264_v24 }
 0x4e7   :  { %10371 = vmatprep.mubr.bf16.mxu1 %v9378_v2 }
 0x4ee   :  { %10372 = vmatmul.mubr.bf16.gmra.mrb[40].mxu1 %v9375_v62 }
 0x4ef   :  { %10379 = vmatprep.mubr.bf16.mxu1 %v9495_v26  ;;  %v21016_v26 = vld [vmem:[#allocation57_spill] sm:$0xff] }
 0x4f6   :  { %10380 = vmatmul.mubr.bf16.gmra.mrb[44].mxu1 %v9492_v48 }
 0x4f7   :  { %10387 = vmatprep.mubr.bf16.mxu1 %v9612_v6  ;;  %v10269_v6 = vadd.f32 %v19190_v14, %v19264_v24 }
 0x4fe   :  { %10388 = vmatmul.mubr.bf16.gmra.mrb[48].mxu1 %v9609_v46  ;;  %v19275_v46 = vadd.f32 %v19195_v39, %v19264_v24 }
 0x4ff   :  { %10395 = vmatprep.mubr.bf16.mxu1 %v9729_v52 }
 0x505   :  { %v14545_v25 = vpop.f32.mrb[12].mxu1 }
 0x506   :  { %10396 = vmatmul.mubr.bf16.gmra.mrb[52].mxu1 %v9726_v47  ;;  %v14546_v4 = vpop.f32.mrb[13].mxu1 }
 0x507   :  { %10403 = vmatprep.mubr.bf16.mxu1 %v9846_v58  ;;  %v14547_v63 = vadd.f32 %v14546_v4, %v14545_v25  ;;  %v14548_v19 = vpop.f32.mrb[14].mxu1  ;;  %v19283_v25 = vadd.f32 %v19206_v32, %v19264_v24  ;;  %v21017_v4 = vld [vmem:[#allocation62_spill] sm:$0xff]  ;;  %v21018_v32 = vld [vmem:[#allocation5_spill] sm:$0xff] }
 0x508   :  { %v14549_v16 = vpop.f32.mrb[15].mxu1 }
 0x509   :  { %v14550_v60 = vadd.f32 %v14549_v16, %v14548_v19 }
 0x50b   :  { %v19290_v14 = vadd.f32 %v14550_v60, %v19264_v24 }
 0x50e   :  { %10404 = vmatmul.mubr.bf16.gmra.mrb[56].mxu1 %v9843_v12 }
 0x50f   :  { %10411 = vmatprep.mubr.bf16.mxu1 %v9945_v54 }
 0x514   :  { %v19235_v3 = vpop.f32.mrb[68].mxu0 }
 0x515   :  { %v19237_v43 = vpop.f32.mrb[69].mxu0 }
 0x516   :  { %10412 = vmatmul.mubr.bf16.gmra.mrb[60].mxu1 %v9942_v36  ;;  %v19239_v11 = vpop.f32.mrb[70].mxu0 }
 0x517   :  { %v19241_v51 = vpop.f32.mrb[71].mxu0 }
 0x531   :  { %v14551_v15 = vpop.f32.mrb[16].mxu1 }
 0x532   :  { %v14552_v52 = vpop.f32.mrb[17].mxu1 }
 0x533   :  { %v14553_v47 = vadd.f32 %v14552_v52, %v14551_v15  ;;  %v14554_v58 = vpop.f32.mrb[18].mxu1  ;;  %v19287_v15 = vadd.f32 %v14547_v63, %v19264_v24 }
 0x534   :  { %v14555_v12 = vpop.f32.mrb[19].mxu1 }
 0x535   :  { %v14556_v34 = vadd.f32 %v14555_v12, %v14554_v58  ;;  %v19293_v39 = vadd.f32 %v14553_v47, %v19264_v24 }
 0x537   :  { %v19296_v31 = vadd.f32 %v14556_v34, %v19264_v24 }
 0x55e   :  { %v14557_v13 = vpop.f32.mrb[20].mxu1 }
 0x55f   :  { %v14558_v50 = vpop.f32.mrb[21].mxu1 }
 0x560   :  { %v14559_v40 = vadd.f32 %v14558_v50, %v14557_v13  ;;  %v14560_v10 = vpop.f32.mrb[22].mxu1 }
 0x561   :  { %v14561_v35 = vpop.f32.mrb[23].mxu1 }
 0x562   :  { %v14562_v45 = vadd.f32 %v14561_v35, %v14560_v10  ;;  %v19300_v35 = vadd.f32 %v14559_v40, %v19264_v24 }
 0x564   :  { %v19303_v63 = vadd.f32 %v14562_v45, %v19264_v24 }
 0x56c   :  { %v19243_v38 = vpop.f32.mrb[72].mxu0 }
 0x56d   :  { %v19245_v21 = vpop.f32.mrb[73].mxu0 }
 0x56e   :  { %v19247_v23 = vpop.f32.mrb[74].mxu0 }
 0x56f   :  { %v19249_v28 = vpop.f32.mrb[75].mxu0 }
 0x58a   :  { %v14563_v5 = vpop.f32.mrb[24].mxu1 }
 0x58b   :  { %v14564_v30 = vpop.f32.mrb[25].mxu1 }
 0x58c   :  { %v14565_v44 = vadd.f32 %v14564_v30, %v14563_v5  ;;  %v14566_v1 = vpop.f32.mrb[26].mxu1 }
 0x58d   :  { %v14567_v36 = vpop.f32.mrb[27].mxu1 }
 0x58e   :  { %v14568_v7 = vadd.f32 %v14567_v36, %v14566_v1  ;;  %v19306_v60 = vadd.f32 %v14565_v44, %v19264_v24 }
 0x590   :  { %v19309_v47 = vadd.f32 %v14568_v7, %v19264_v24 }
 0x5a8   :  { %v19251_v41 = vpop.f32.mrb[76].mxu0 }
 0x5a9   :  { %v14569_v54 = vpop.f32.mrb[28].mxu1  ;;  %v19253_v53 = vpop.f32.mrb[77].mxu0 }
 0x5aa   :  { %v14570_v9 = vpop.f32.mrb[29].mxu1  ;;  %v19255_v29 = vpop.f32.mrb[78].mxu0 }
 0x5ab   :  { %v14571_v55 = vadd.f32 %v14570_v9, %v14569_v54  ;;  %v14572_v61 = vpop.f32.mrb[30].mxu1  ;;  %v19257_v57 = vpop.f32.mrb[79].mxu0 }
 0x5ac   :  { %v14573_v18 = vpop.f32.mrb[31].mxu1 }
 0x5ad   :  { %v19259_v22 = vadd.f32 %v14573_v18, %v14572_v61  ;;  %v19313_v54 = vadd.f32 %v14571_v55, %v19264_v24 }
 0x5b1   :  { %v14591_v20 = vpop.f32.mrb[32].mxu1 }
 0x5b2   :  { %v14592_v27 = vpop.f32.mrb[33].mxu1 }
 0x5b3   :  { %v14593_v56 = vadd.f32 %v14592_v27, %v14591_v20  ;;  %v14594_v37 = vpop.f32.mrb[34].mxu1 }
 0x5b4   :  { %v14595_v2 = vpop.f32.mrb[35].mxu1 }
 0x5b5   :  { %v10358_v33 = vadd.f32 %v14593_v56, %v10261_v42  ;;  %v14596_v62 = vadd.f32 %v14595_v2, %v14594_v37  ;;  %v21019_v56 = vld [vmem:[#allocation58_spill] sm:$0xff] }
 0x5b7   :  { %v10455_v8 = vadd.f32 %v21016_v26, %v10358_v33  ;;  %v10361_v48 = vadd.f32 %v14596_v62, %v10264_v0 }
 0x5b9   :  { %v10517_v49 = vmax.f32 %v10455_v8, 0.0  ;;  %v10458_v19 = vadd.f32 %v21017_v4, %v10361_v48  ;;  %v14597_v16 = vpop.f32.mrb[36].mxu1 }
 0x5ba   :  { %v14598_v52 = vpop.f32.mrb[37].mxu1 }
 0x5bb   :  { %v10549_v58 = vcombine.high %v10517_v49, %v10517_v49  ;;  %v10556_v12 = vrot.slane %v10517_v49, %v21018_v32  ;;  %v10518_v13 = vmax.f32 %v10458_v19, 0.0  ;;  %v14599_v50 = vadd.f32 %v14598_v52, %v14597_v16  ;;  %v14600_v10 = vpop.f32.mrb[38].mxu1 }
 0x5bc   :  { %v14601_v34 = vpop.f32.mrb[39].mxu1 }
 0x5bd   :  { %v10563_v5 = vrot.slane %v10549_v58, %v21018_v32  ;;  %v10564_v30 = vcombine.high %v10556_v12, %v10556_v12  ;;  %v14343_v1 = vrot.slane %v10556_v12, 9  ;;  %v10566_v36 = vcombine.high %v10518_v13, %v10518_v13 }
 0x5be   :  { %v10573_v40 = vrot.slane %v10518_v13, %v21018_v32  ;;  %v10366_v9 = vadd.f32 %v14599_v50, %v10269_v6  ;;  %v19316_v45 = vadd.f32 %v14601_v34, %v14600_v10 }
 0x5bf   :  { %v10565_v61 = vcombine.high %v10563_v5, %v10563_v5  ;;  %v14344_v44 = vrot.slane %v10564_v30, 9  ;;  %v14345_v18 = vrot.slane %v10563_v5, 9  ;;  %v11060_v20 = vmax.f32 %v10556_v12, %v14343_v1 }
 0x5c0   :  { %v10580_v7 = vrot.slane %v10566_v36, %v21018_v32  ;;  %v10581_v27 = vcombine.high %v10573_v40, %v10573_v40  ;;  %v14347_v42 = vrot.slane %v10573_v40, 9  ;;  %v10463_v37 = vadd.f32 %v21019_v56, %v10366_v9 }
 0x5c1   :  { %v14346_v2 = vrot.slane %v10565_v61, 9  ;;  %v11061_v0 = vmax.f32 %v10564_v30, %v14344_v44  ;;  %v11062_v33 = vmax.f32 %v10563_v5, %v14345_v18  ;;  %v11122_v55 = vpack.c.bf16 %v11060_v20, %v11060_v20  ;;  %v14603_v62 = vpop.f32.mrb[40].mxu1 }
 0x5c2   :  { %v10582_v26 = vcombine.high %v10580_v7, %v10580_v7  ;;  %v14348_v8 = vrot.slane %v10581_v27, 9  ;;  %v14349_v48 = vrot.slane %v10580_v7, 9  ;;  %v11064_v6 = vmax.f32 %v10573_v40, %v14347_v42  ;;  %v14604_v49 = vpop.f32.mrb[41].mxu1 }
 0x5c3   :  { %v11063_v4 = vmax.f32 %v10565_v61, %v14346_v2  ;;  %v11123_v19 = vpack.c.bf16 %v11061_v0, %v11061_v0  ;;  %v11124_v16 = vpack.c.bf16 %v11062_v33, %v11062_v33  ;;  %v11246_v52 = vunpack.c.l.b16 %v11122_v55  ;;  %v14606_v58 = vpop.f32.mrb[42].mxu1 }
 0x5c4   :  { %v14350_v12 = vrot.slane %v10582_v26, 9  ;;  %v11065_v13 = vmax.f32 %v10581_v27, %v14348_v8  ;;  %v11066_v50 = vmax.f32 %v10580_v7, %v14349_v48  ;;  %v11126_v10 = vpack.c.bf16 %v11064_v6, %v11064_v6  ;;  %v14607_v34 = vpop.f32.mrb[43].mxu1 }
 0x5c5   :  { %v11125_v1 = vpack.c.bf16 %v11063_v4, %v11063_v4  ;;  %v11247_v30 = vunpack.c.l.b16 %v11123_v19  ;;  %v11248_v5 = vunpack.c.l.b16 %v11124_v16  ;;  %v10519_v36 = vmax.f32 %v10463_v37, 0.0 }
 0x5c6   :  { %v11067_v9 = vmax.f32 %v10582_v26, %v14350_v12  ;;  %v11127_v44 = vpack.c.bf16 %v11065_v13, %v11065_v13  ;;  %v11128_v18 = vpack.c.bf16 %v11066_v50, %v11066_v50  ;;  %v11250_v20 = vunpack.c.l.b16 %v11126_v10 }
 0x5c7   :  { %v11249_v40 = vunpack.c.l.b16 %v11125_v1  ;;  %v11308_v42 = vrot.slane %v11247_v30, 7  ;;  %v11310_v61 = vrot.slane %v11248_v5, 6  ;;  %v10583_v56 = vcombine.high %v10519_v36, %v10519_v36 }
 0x5c8   :  { %v11129_v2 = vpack.c.bf16 %v11067_v9, %v11067_v9  ;;  %v11251_v0 = vunpack.c.l.b16 %v11127_v44  ;;  %v11252_v33 = vunpack.c.l.b16 %v11128_v18  ;;  %v11314_v55 = vrot.slane %v11250_v20, 4 }
 0x5c9   :  { %v11309_v7 = vsel %vm3920_vm2, %v11308_v42, %v11246_v52  ;;  %v11312_v27 = vrot.slane %v11249_v40, 5  ;;  %v10590_v8 = vrot.slane %v10519_v36, %v21018_v32  ;;  %v10597_v48 = vrot.slane %v10583_v56, %v21018_v32  ;;  %v14609_v37 = vpop.f32.mrb[44].mxu1  ;;  %v21020_v56 = vld [vmem:[#allocation64_spill] sm:$0xff] }
 0x5ca   :  { %v11311_v26 = vsel %vm3923_vm3, %v11310_v61, %v11309_v7  ;;  %v11253_v6 = vunpack.c.l.b16 %v11129_v2  ;;  %v11316_v4 = vrot.slane %v11251_v0, 3  ;;  %v11318_v19 = vrot.slane %v11252_v33, 2  ;;  %v14610_v16 = vpop.f32.mrb[45].mxu1 }
 0x5cb   :  { %v11313_v12 = vsel %vm3926_vm4, %v11312_v27, %v11311_v26  ;;  %v10598_v13 = vcombine.high %v10590_v8, %v10590_v8  ;;  %v10599_v50 = vcombine.high %v10597_v48, %v10597_v48  ;;  %v14351_v10 = vrot.slane %v10590_v8, 9  ;;  %v19325_v1 = vpop.f32.mrb[46].mxu1 }
 0x5cc   :  { %v11315_v52 = vsel %vm3929_vm5, %v11314_v55, %v11313_v12  ;;  %v11320_v30 = vrot.slane %v11253_v6, 1  ;;  %v14353_v5 = vrot.slane %v10597_v48, 9  ;;  %v10369_v36 = vadd.f32 %v19316_v45, %v19275_v46  ;;  %v19330_v9 = vpop.f32.mrb[47].mxu1 }
 0x5cd   :  { %v11317_v44 = vsel %vm3932_vm6, %v11316_v4, %v11315_v52  ;;  %v14352_v18 = vrot.slane %v10598_v13, 9  ;;  %v14354_v20 = vrot.slane %v10599_v50, 9  ;;  %v11068_v40 = vmax.f32 %v10590_v8, %v14351_v10 }
 0x5ce   :  { %v11319_v42 = vsel %vm3935_vm7, %v11318_v19, %v11317_v44  ;;  %v11070_v61 = vmax.f32 %v10597_v48, %v14353_v5  ;;  %v10466_v2 = vadd.f32 %v21020_v56, %v10369_v36  ;;  %v14605_v0 = vadd.f32 %v14604_v49, %v14603_v62 }
 0x5cf   :  { %v19336_v33 = vsel %vm3938_vm8, %v11320_v30, %v11319_v42  ;;  %v11069_v55 = vmax.f32 %v10598_v13, %v14352_v18  ;;  %v11071_v7 = vmax.f32 %v10599_v50, %v14354_v20  ;;  %v11130_v27 = vpack.c.bf16 %v11068_v40, %v11068_v40 }
 0x5d0   :  { %v11132_v46 = vpack.c.bf16 %v11070_v61, %v11070_v61  ;;  %v10520_v45 = vmax.f32 %v10466_v2, 0.0  ;;  %v10374_v26 = vadd.f32 %v14605_v0, %v19279_v17  ;;  %v14608_v6 = vadd.f32 %v14607_v34, %v14606_v58 }
 0x5d1   :  { %v11131_v4 = vpack.c.bf16 %v11069_v55, %v11069_v55  ;;  %v11133_v12 = vpack.c.bf16 %v11071_v7, %v11071_v7  ;;  %v11254_v8 = vunpack.c.l.b16 %v11130_v27  ;;  %v14611_v10 = vadd.f32 %v14610_v16, %v14609_v37  ;;  %v19339_v19 = vpop.f32.mrb[48].mxu1 }
 0x5d2   :  { %v11256_v48 = vunpack.c.l.b16 %v11132_v46  ;;  %v10600_v52 = vcombine.high %v10520_v45, %v10520_v45  ;;  %v10607_v62 = vrot.slane %v10520_v45, %v21018_v32  ;;  %v10471_v49 = vadd.f32 %v19237_v43, %v10374_v26  ;;  %v19343_v13 = vpop.f32.mrb[49].mxu1 }
 0x5d3   :  { %v11255_v50 = vunpack.c.l.b16 %v11131_v4  ;;  %v11257_v30 = vunpack.c.l.b16 %v11133_v12  ;;  %v10377_v5 = vadd.f32 %v14608_v6, %v19283_v25  ;;  %v19347_v17 = vadd.f32 %v14611_v10, %v19287_v15  ;;  %v19349_v58 = vpop.f32.mrb[50].mxu1 }
 0x5d4   :  { %v11324_v34 = vrot.slane %v11256_v48, 6  ;;  %v10614_v37 = vrot.slane %v10600_v52, %v21018_v32  ;;  %v10615_v16 = vcombine.high %v10607_v62, %v10607_v62  ;;  %v14355_v36 = vrot.slane %v10607_v62, 9  ;;  %v19352_v44 = vpop.f32.mrb[51].mxu1 }
 0x5d5   :  { %v11322_v18 = vrot.slane %v11255_v50, 7  ;;  %v11326_v43 = vrot.slane %v11257_v30, 5  ;;  %v10521_v20 = vmax.f32 %v10471_v49, 0.0  ;;  %v10474_v40 = vadd.f32 %v19241_v51, %v10377_v5 }
 0x5d6   :  { %v10616_v42 = vcombine.high %v10614_v37, %v10614_v37  ;;  %v14356_v61 = vrot.slane %v10615_v16, 9  ;;  %v14357_v25 = vrot.slane %v10614_v37, 9  ;;  %v11072_v56 = vmax.f32 %v10607_v62, %v14355_v36 }
 0x5d7   :  { %v11323_v15 = vsel %vm3920_vm2, %v11322_v18, %v11254_v8  ;;  %v10617_v2 = vcombine.high %v10521_v20, %v10521_v20  ;;  %v10624_v0 = vrot.slane %v10521_v20, %v21018_v32  ;;  %v10522_v55 = vmax.f32 %v10474_v40, 0.0 }
 0x5d8   :  { %v11325_v7 = vsel %vm3923_vm3, %v11324_v34, %v11323_v15  ;;  %v14358_v27 = vrot.slane %v10616_v42, 9  ;;  %v11073_v46 = vmax.f32 %v10615_v16, %v14356_v61  ;;  %v11074_v45 = vmax.f32 %v10614_v37, %v14357_v25 }
 0x5d9   :  { %v11134_v26 = vpack.c.bf16 %v11072_v56, %v11072_v56  ;;  %v11327_v6 = vsel %vm3926_vm4, %v11326_v43, %v11325_v7  ;;  %v10631_v51 = vrot.slane %v10617_v2, %v21018_v32  ;;  %v10632_v4 = vcombine.high %v10624_v0, %v10624_v0  ;;  %v19360_v12 = vpop.f32.mrb[52].mxu1 }
 0x5da   :  { %v11075_v10 = vmax.f32 %v10616_v42, %v14358_v27  ;;  %v11135_v48 = vpack.c.bf16 %v11073_v46, %v11073_v46  ;;  %v11136_v8 = vpack.c.bf16 %v11074_v45, %v11074_v45  ;;  %v14359_v52 = vrot.slane %v10624_v0, 9  ;;  %v19362_v62 = vpop.f32.mrb[53].mxu1 }
 0x5db   :  { %v11258_v49 = vunpack.c.l.b16 %v11134_v26  ;;  %v10633_v50 = vcombine.high %v10631_v51, %v10631_v51  ;;  %v14360_v30 = vrot.slane %v10632_v4, 9  ;;  %v14361_v5 = vrot.slane %v10631_v51, 9  ;;  %v19364_v34 = vpop.f32.mrb[54].mxu1 }
 0x5dc   :  { %v11137_v37 = vpack.c.bf16 %v11075_v10, %v11075_v10  ;;  %v11259_v16 = vunpack.c.l.b16 %v11135_v48  ;;  %v11260_v36 = vunpack.c.l.b16 %v11136_v8  ;;  %v11076_v18 = vmax.f32 %v10624_v0, %v14359_v52  ;;  %v19366_v43 = vpop.f32.mrb[55].mxu1 }
 0x5dd   :  { %v11328_v20 = vrot.slane %v11258_v49, 4  ;;  %v14362_v40 = vrot.slane %v10633_v50, 9  ;;  %v11077_v42 = vmax.f32 %v10632_v4, %v14360_v30  ;;  %v11078_v61 = vmax.f32 %v10631_v51, %v14361_v5 }
 0x5de   :  { %v11261_v25 = vunpack.c.l.b16 %v11137_v37  ;;  %v11330_v56 = vrot.slane %v11259_v16, 3  ;;  %v11332_v15 = vrot.slane %v11260_v36, 2  ;;  %v11138_v2 = vpack.c.bf16 %v11076_v18, %v11076_v18 }
 0x5df   :  { %v11329_v7 = vsel %vm3929_vm5, %v11328_v20, %v11327_v6  ;;  %v11079_v27 = vmax.f32 %v10633_v50, %v14362_v40  ;;  %v11139_v46 = vpack.c.bf16 %v11077_v42, %v11077_v42  ;;  %v11140_v45 = vpack.c.bf16 %v11078_v61, %v11078_v61 }
 0x5e0   :  { %v11331_v26 = vsel %vm3932_vm6, %v11330_v56, %v11329_v7  ;;  %v11334_v10 = vrot.slane %v11261_v25, 1  ;;  %v11262_v48 = vunpack.c.l.b16 %v11138_v2  ;;  %v10634_v0 = vcombine.high %v10522_v55, %v10522_v55 }
 0x5e1   :  { %v11333_v8 = vsel %vm3935_vm7, %v11332_v15, %v11331_v26  ;;  %v11141_v52 = vpack.c.bf16 %v11079_v27, %v11079_v27  ;;  %v11263_v49 = vunpack.c.l.b16 %v11139_v46  ;;  %v11264_v4 = vunpack.c.l.b16 %v11140_v45  ;;  %v19371_v51 = vpop.f32.mrb[56].mxu1 }
 0x5e2   :  { %v11335_v30 = vsel %vm3938_vm8, %v11334_v10, %v11333_v8  ;;  %v10641_v5 = vrot.slane %v10522_v55, %v21018_v32  ;;  %v10648_v6 = vrot.slane %v10634_v0, %v21018_v32  ;;  %v19378_v50 = vadd.f32 %v19235_v3, %v19347_v17  ;;  %v19380_v37 = vpop.f32.mrb[57].mxu1 }
 0x5e3   :  { %v11416_v16 = vpack.c.b16 %v11335_v30, %v19336_v33  ;;  %v14405_v36 = vpack.c.b16 %v11335_v30, %v11335_v30  ;;  %v19383_v18 = vunpack.c.l.b16 %v11141_v52  ;;  %v11336_v20 = vrot.slane %v11263_v49, 7  ;;  %v19385_v40 = vpop.f32.mrb[58].mxu1 }
 0x5e4   :  { %v11338_v42 = vrot.slane %v11264_v4, 6  ;;  %v10649_v61 = vcombine.high %v10641_v5, %v10641_v5  ;;  %v10650_v25 = vcombine.high %v10648_v6, %v10648_v6  ;;  %v14363_v55 = vrot.slane %v10641_v5, 9  ;;  %v19387_v56 = vpop.f32.mrb[59].mxu1 }
 0x5e5   :  { %v19391_v3 = vadd.f32 %v19259_v22, %v19264_v24  ;;  %v11433_v17 = vrot.slane %v11416_v16, %v15286_v59  ;;  %v11440_v33 = vrot.slane %v14405_v36, %v15286_v59  ;;  %v11337_v15 = vsel %vm3920_vm2, %v11336_v20, %v11262_v48 }
 0x5e6   :  { %v11340_v2 = vrot.slane %v19383_v18, 5  ;;  %v14364_v7 = vrot.slane %v10649_v61, 9  ;;  %v14365_v27 = vrot.slane %v10648_v6, 9  ;;  %v14366_v46 = vrot.slane %v10650_v25, 9 }
 0x5e7   :  { %v11441_v45 = vcombine.high %v11433_v17, %v11433_v17  ;;  %v11442_v26 = vcombine.high %v11440_v33, %v11440_v33  ;;  %v11449_v10 = vrot.slane %v11433_v17, %v15286_v59  ;;  %v11456_v0 = vrot.slane %v11440_v33, %v15286_v59 }
 0x5e8   :  { %v11339_v22 = vsel %vm3923_vm3, %v11338_v42, %v11337_v15  ;;  %v11080_v24 = vmax.f32 %v10641_v5, %v14363_v55  ;;  %v11081_v8 = vmax.f32 %v10649_v61, %v14364_v7  ;;  %v11082_v52 = vmax.f32 %v10648_v6, %v14365_v27 }
 0x5e9   :  { %v11463_v49 = vrot.slane %v11441_v45, %v15286_v59  ;;  %v19402_v48 = vrot.slane %v11442_v26, %v15286_v59  ;;  %v11471_v4 = vcombine.high %v11449_v10, %v11449_v10  ;;  %v11083_v30 = vmax.f32 %v10650_v25, %v14366_v46  ;;  %v19404_v16 = vpop.f32.mrb[60].mxu1 }
 0x5ea   :  { %v11472_v36 = vcombine.high %v11456_v0, %v11456_v0  ;;  %v11628_v18 = vrot.slane %v11449_v10, %v15286_v59  ;;  %v11684_v20 = vrot.slane %v11456_v0, %v15286_v59  ;;  %v11142_v17 = vpack.c.bf16 %v11080_v24, %v11080_v24  ;;  %v19408_v33 = vpop.f32.mrb[61].mxu1 }
 0x5eb   :  { %v11473_v5 = vcombine.high %v11463_v49, %v11463_v49  ;;  %v11642_v6 = vrot.slane %v11463_v49, %v15286_v59  ;;  %v11656_v42 = vrot.slane %v11471_v4, %v15286_v59  ;;  %v11143_v61 = vpack.c.bf16 %v11081_v8, %v11081_v8  ;;  %v19412_v55 = vpop.f32.mrb[62].mxu1 }
 0x5ec   :  { %v19417_v15 = vrot.slane %v11628_v18, %v15286_v59  ;;  %v19420_v7 = vrot.slane %v11684_v20, %v15286_v59  ;;  %v19424_v46 = vpop.f32.mrb[63].mxu1  ;;  %v11144_v0 = vpack.c.bf16 %v11082_v52, %v11082_v52  ;;  %v19430_v24 = vrot.slane %v11472_v36, %v15286_v59 }
 0x5ed   :  { %v11649_v45 = vrot.slane %v11642_v6, %v15286_v59  ;;  %v11663_v26 = vrot.slane %v11656_v42, %v15286_v59  ;;  %v11670_v10 = vrot.slane %v11473_v5, %v15286_v59  ;;  %v11145_v49 = vpack.c.bf16 %v11083_v30, %v11083_v30  ;;  %v14977_v6 = vld [vmem:[%s20312_s5 + $0x40] sm:$0xff]  }
 0x5ee   :  { %21021 = vst [vmem:[#allocation59_spill] sm:$0xff] %v19430_v24  ;;  %v12042_v8 = vunpack.c.l.b16 %v19417_v15  ;;  %v11266_v4 = vunpack.c.l.b16 %v11142_v17  ;;  %v11267_v27 = vunpack.c.l.b16 %v11143_v61  ;;  %v11268_v52 = vunpack.c.l.b16 %v11144_v0  ;;  %v14978_v0 = vld [vmem:[%s20312_s5] sm:$0xff]   ;;  %14655 = vmatprep.subr.bf16.mxu1 %v14977_v6 }
 0x5ef   :  { %v11677_v18 = vrot.slane %v11670_v10, %v15286_v59  ;;  %v19434_v20 = vunpack.c.l.b16 %v11649_v45  ;;  %v19436_v25 = vunpack.c.l.b16 %v11663_v26  ;;  %v11269_v36 = vunpack.c.l.b16 %v11145_v49  ;;  %14656 = vmatpush3.bf16.msra.mxu1 %v14978_v0 }
 0x5f0   :  { %v19441_v5 = vrot.slane %v12042_v8, 1  ;;  %v11341_v45 = vsel %vm3926_vm4, %v11340_v2, %v11339_v22  ;;  %v11342_v10 = vrot.slane %v11266_v4, 4  ;;  %v11344_v26 = vrot.slane %v11267_v27, 3  ;;  %v14979_v27 = vld [vmem:[%s20312_s5 + $0x48] sm:$0xff]  }
 0x5f1   :  { %v19443_v42 = vunpack.c.l.b16 %v11677_v18  ;;  %v11346_v24 = vrot.slane %v11268_v52, 2  ;;  %v11348_v61 = vrot.slane %v11269_v36, 1  ;;  %v10523_v49 = vmax.f32 %v19378_v50, 0.0  ;;  %14657 = vmatprep.subr.bf16.mxu1 %v14979_v27 }
 0x5f2   :  { %v14614_v18 = vadd.f32 %v19330_v9, %v19325_v1  ;;  %v14617_v2 = vadd.f32 %v19343_v13, %v19339_v19  ;;  %v14620_v22 = vadd.f32 %v19352_v44, %v19349_v58  ;;  %v11343_v4 = vsel %vm3929_vm5, %v11342_v10, %v11341_v45  ;;  %v14980_v44 = vld [vmem:[%s20312_s5 + $0x8] sm:$0xff]  }
 0x5f3   :  { %v14623_v52 = vadd.f32 %v19362_v62, %v19360_v12  ;;  %v19469_v50 = vadd.f32 %v19366_v43, %v19364_v34  ;;  %v19473_v1 = vadd.f32 %v19380_v37, %v19371_v51  ;;  %v11345_v9 = vsel %vm3932_vm6, %v11344_v26, %v11343_v4  ;;  %v14987_v12 = vld [vmem:[%s20312_s5 + $0x80] sm:$0xff]   ;;  %v14989_v37 = vld [vmem:[%s20312_s5 + $0x88] sm:$0xff]   ;;  %14658 = vmatpush3.bf16.msra.mxu1 %v14980_v44 }
 0x5f4   :  { %v10651_v19 = vcombine.high %v10523_v49, %v10523_v49  ;;  %v10658_v13 = vrot.slane %v10523_v49, %v21018_v32  ;;  %v10385_v58 = vadd.f32 %v14614_v18, %v19290_v14  ;;  %v11347_v62 = vsel %vm3935_vm7, %v11346_v24, %v11345_v9  ;;  %v14981_v14 = vld [vmem:[%s20312_s5 + $0x50] sm:$0xff]   ;;  %14817 = vmatprep.subr.bf16.mxu0 %v14987_v12 }
 0x5f5   :  { %v10390_v34 = vadd.f32 %v14617_v2, %v19293_v39  ;;  %v10393_v43 = vadd.f32 %v14620_v22, %v19296_v31  ;;  %v10398_v51 = vadd.f32 %v14623_v52, %v19300_v35  ;;  %v19497_v39 = vsel %vm3938_vm8, %v11348_v61, %v11347_v62  ;;  %14818 = vmatpush3.bf16.msra.mxu0 %v14987_v12  ;;  %v14983_v22 = vld [vmem:[%s20312_s5 + $0x58] sm:$0xff]  }
 0x5f6   :  { %v10665_v6 = vrot.slane %v10651_v19, %v21018_v32  ;;  %v10666_v36 = vcombine.high %v10658_v13, %v10658_v13  ;;  %v14367_v45 = vrot.slane %v10658_v13, 9  ;;  %v10482_v24 = vadd.f32 %v19239_v11, %v10385_v58  ;;  %v14982_v11 = vld [vmem:[%s20312_s5 + $0x10] sm:$0xff]   ;;  %14819 = vmatprep.subr.bf16.mxu0 %v14989_v37  ;;  %14659 = vmatprep.subr.bf16.mxu1 %v14981_v14  ;;  %v14993_v14 = vld [vmem:[%s20312_s5 + $0x98] sm:$0xff]  }
 0x5f7   :  { %v10487_v31 = vadd.f32 %v19245_v21, %v10390_v34  ;;  %v10490_v35 = vadd.f32 %v19249_v28, %v10393_v43  ;;  %v19502_v10 = vadd.f32 %v19243_v38, %v10398_v51  ;;  %v14991_v21 = vld [vmem:[%s20312_s5 + $0x90] sm:$0xff]   ;;  %14660 = vmatpush3.bf16.msra.mxu1 %v14982_v11  ;;  %v14984_v51 = vld [vmem:[%s20312_s5 + $0x18] sm:$0xff]  }
 0x5f8   :  { %v10667_v26 = vcombine.high %v10665_v6, %v10665_v6  ;;  %v14368_v0 = vrot.slane %v10666_v36, 9  ;;  %v14369_v49 = vrot.slane %v10665_v6, 9  ;;  %v11084_v18 = vmax.f32 %v10658_v13, %v14367_v45  ;;  %14661 = vmatprep.subr.bf16.mxu1 %v14983_v22  ;;  %v14986_v22 = vld [vmem:[%s20312_s5 + $0x20] sm:$0xff]  }
 0x5f9   :  { %v10524_v61 = vmax.f32 %v10482_v24, 0.0  ;;  %v10525_v38 = vmax.f32 %v10487_v31, 0.0  ;;  %v19511_v2 = vmax.f32 %v10490_v35, 0.0  ;;  %14820 = vmatpush3.bf16.msra.mxu0 %v14989_v37  ;;  %v14985_v24 = vld [vmem:[%s20312_s5 + $0x60] sm:$0xff]  }
 0x5fa   :  { %v14370_v27 = vrot.slane %v10667_v26, 9  ;;  %v11085_v4 = vmax.f32 %v10666_v36, %v14368_v0  ;;  %v11086_v52 = vmax.f32 %v10665_v6, %v14369_v49  ;;  %v11146_v9 = vpack.c.bf16 %v11084_v18, %v11084_v18  ;;  %14821 = vmatprep.subr.bf16.mxu0 %v14991_v21 }
 0x5fb   :  { %v10668_v19 = vcombine.high %v10524_v61, %v10524_v61  ;;  %v10675_v13 = vrot.slane %v10524_v61, %v21018_v32  ;;  %v10685_v58 = vcombine.high %v10525_v38, %v10525_v38  ;;  %v10692_v44 = vrot.slane %v10525_v38, %v21018_v32  ;;  %14662 = vmatpush3.bf16.msra.mxu1 %v14984_v51 }
 0x5fc   :  { %v11087_v12 = vmax.f32 %v10667_v26, %v14370_v27  ;;  %v11147_v62 = vpack.c.bf16 %v11085_v4, %v11085_v4  ;;  %v11148_v34 = vpack.c.bf16 %v11086_v52, %v11086_v52  ;;  %v11270_v43 = vunpack.c.l.b16 %v11146_v9  ;;  %v14995_v9 = vld [vmem:[%s20312_s5 + $0xa0] sm:$0xff]   ;;  %14663 = vmatprep.subr.bf16.mxu1 %v14985_v24 }
 0x5fd   :  { %v10682_v6 = vrot.slane %v10668_v19, %v21018_v32  ;;  %v10683_v36 = vcombine.high %v10675_v13, %v10675_v13  ;;  %v14371_v45 = vrot.slane %v10675_v13, 9  ;;  %v10699_v37 = vrot.slane %v10685_v58, %v21018_v32  ;;  %14822 = vmatpush3.bf16.msra.mxu0 %v14991_v21  ;;  %v14988_v21 = vld [vmem:[%s20312_s5 + $0x68] sm:$0xff]  }
 0x5fe   :  { %v11149_v31 = vpack.c.bf16 %v11087_v12, %v11087_v12  ;;  %v11271_v35 = vunpack.c.l.b16 %v11147_v62  ;;  %v11272_v26 = vunpack.c.l.b16 %v11148_v34  ;;  %v10700_v0 = vcombine.high %v10692_v44, %v10692_v44  ;;  %14823 = vmatprep.subr.bf16.mxu0 %v14993_v14 }
 0x5ff   :  { %v10684_v49 = vcombine.high %v10682_v6, %v10682_v6  ;;  %v14372_v18 = vrot.slane %v10683_v36, 9  ;;  %v14373_v11 = vrot.slane %v10682_v6, 9  ;;  %v11088_v61 = vmax.f32 %v10675_v13, %v14371_v45  ;;  %14664 = vmatpush3.bf16.msra.mxu1 %v14986_v22 }
 0x600   :  { %v11273_v38 = vunpack.c.l.b16 %v11149_v31  ;;  %v11350_v27 = vrot.slane %v11271_v35, 7  ;;  %v11352_v4 = vrot.slane %v11272_v26, 6  ;;  %v10701_v52 = vcombine.high %v10699_v37, %v10699_v37  ;;  %14665 = vmatprep.subr.bf16.mxu1 %v14988_v21 }
 0x601   :  { %v14374_v19 = vrot.slane %v10684_v49, 9  ;;  %v11089_v58 = vmax.f32 %v10683_v36, %v14372_v18  ;;  %v11090_v12 = vmax.f32 %v10682_v6, %v14373_v11  ;;  %v11150_v62 = vpack.c.bf16 %v11088_v61, %v11088_v61  ;;  %14824 = vmatpush3.bf16.msra.mxu0 %v14993_v14  ;;  %v14990_v18 = vld [vmem:[%s20312_s5 + $0x28] sm:$0xff]   ;;  %v14992_v14 = vld [vmem:[%s20312_s5 + $0x70] sm:$0xff]  }
 0x602   :  { %v11351_v13 = vsel %vm3920_vm2, %v11350_v27, %v11270_v43  ;;  %v11354_v34 = vrot.slane %v11273_v38, 5  ;;  %v14375_v51 = vrot.slane %v10692_v44, 9  ;;  %v14376_v45 = vrot.slane %v10700_v0, 9  ;;  %14825 = vmatprep.subr.bf16.mxu0 %v14995_v9 }
 0x603   :  { %v11353_v31 = vsel %vm3923_vm3, %v11352_v4, %v11351_v13  ;;  %v11091_v35 = vmax.f32 %v10684_v49, %v14374_v19  ;;  %v11151_v26 = vpack.c.bf16 %v11089_v58, %v11089_v58  ;;  %v11152_v28 = vpack.c.bf16 %v11090_v12, %v11090_v12  ;;  %v14997_v49 = vld [vmem:[%s20312_s5 + $0xa8] sm:$0xff]   ;;  %14666 = vmatpush3.bf16.msra.mxu1 %v14990_v18 }
 0x604   :  { %v11274_v17 = vunpack.c.l.b16 %v11150_v62  ;;  %v11355_v6 = vsel %vm3926_vm4, %v11354_v34, %v11353_v31  ;;  %v14377_v36 = vrot.slane %v10699_v37, 9  ;;  %v14378_v24 = vrot.slane %v10701_v52, 9  ;;  %14667 = vmatprep.subr.bf16.mxu1 %v14992_v14  ;;  %v14998_v14 = vld [vmem:[%s20312_s5 + $0x38] sm:$0xff]  }
 0x605   :  { %v11153_v43 = vpack.c.bf16 %v11091_v35, %v11091_v35  ;;  %v11275_v11 = vunpack.c.l.b16 %v11151_v26  ;;  %v11276_v61 = vunpack.c.l.b16 %v11152_v28  ;;  %v11092_v38 = vmax.f32 %v10692_v44, %v14375_v51  ;;  %14826 = vmatpush3.bf16.msra.mxu0 %v14995_v9  ;;  %v14994_v51 = vld [vmem:[%s20312_s5 + $0x30] sm:$0xff]  }
 0x606   :  { %v11356_v27 = vrot.slane %v11274_v17, 4  ;;  %v11093_v4 = vmax.f32 %v10700_v0, %v14376_v45  ;;  %v11094_v22 = vmax.f32 %v10699_v37, %v14377_v36  ;;  %v11095_v19 = vmax.f32 %v10701_v52, %v14378_v24  ;;  %v14999_v17 = vld [vmem:[%s20312_s5 + $0xb0] sm:$0xff]   ;;  %v14996_v45 = vld [vmem:[%s20312_s5 + $0x78] sm:$0xff]   ;;  %14827 = vmatprep.subr.bf16.mxu0 %v14997_v49 }
 0x607   :  { %v11277_v58 = vunpack.c.l.b16 %v11153_v43  ;;  %v11358_v12 = vrot.slane %v11275_v11, 3  ;;  %v11360_v62 = vrot.slane %v11276_v61, 2  ;;  %v11154_v13 = vpack.c.bf16 %v11092_v38, %v11092_v38  ;;  %14668 = vmatpush3.bf16.msra.mxu1 %v14994_v51 }
 0x608   :  { %v11357_v28 = vsel %vm3929_vm5, %v11356_v27, %v11355_v6  ;;  %v11155_v44 = vpack.c.bf16 %v11093_v4, %v11093_v4  ;;  %v11156_v21 = vpack.c.bf16 %v11094_v22, %v11094_v22  ;;  %v11157_v34 = vpack.c.bf16 %v11095_v19, %v11095_v19  ;;  %14669 = vmatprep.subr.bf16.mxu1 %v14996_v45 }
 0x609   :  { %v11359_v37 = vsel %vm3932_vm6, %v11358_v12, %v11357_v28  ;;  %v11278_v0 = vunpack.c.l.b16 %v11154_v13  ;;  %v10702_v52 = vcombine.high %v19511_v2, %v19511_v2  ;;  %v10709_v9 = vrot.slane %v19511_v2, %v21018_v32  ;;  %14828 = vmatpush3.bf16.msra.mxu0 %v14997_v49 }
 0x60a   :  { %v11361_v31 = vsel %vm3935_vm7, %v11360_v62, %v11359_v37  ;;  %v11279_v35 = vunpack.c.l.b16 %v11155_v44  ;;  %v11280_v26 = vunpack.c.l.b16 %v11156_v21  ;;  %v11281_v6 = vunpack.c.l.b16 %v11157_v34  ;;  %14829 = vmatprep.subr.bf16.mxu0 %v14999_v17 }
 0x60b   :  { %v11417_v36 = vpack.c.b16 %v11361_v31, %v19497_v39  ;;  %v11362_v24 = vrot.slane %v11278_v0, 7  ;;  %v10716_v18 = vrot.slane %v10702_v52, %v21018_v32  ;;  %v10717_v43 = vcombine.high %v10709_v9, %v10709_v9  ;;  %14670 = vmatpush3.bf16.msra.mxu1 %v14998_v14 }
 0x60c   :  { %v11364_v11 = vrot.slane %v11279_v35, 6  ;;  %v11366_v2 = vrot.slane %v11280_v26, 5  ;;  %v11368_v61 = vrot.slane %v11281_v6, 4  ;;  %v14379_v38 = vrot.slane %v10709_v9, 9  ;;  %v15000_v26 = vld [vmem:[%s20312_s5 + $0xb8] sm:$0xff]  }
 0x60d   :  { %v11422_v4 = vsel %vm16073_vm11, %v11417_v36, 0  ;;  %v11363_v39 = vsel %vm3920_vm2, %v11362_v24, %v11277_v58  ;;  %v10718_v22 = vcombine.high %v10716_v18, %v10716_v18  ;;  %v14380_v19 = vrot.slane %v10717_v43, 9  ;;  %14830 = vmatpush3.bf16.msra.mxu0 %v14999_v17 }
 0x60e   :  { %v11475_v12 = vcombine.high %v11422_v4, %v11422_v4  ;;  %v11482_v49 = vrot.slane %v11422_v4, %v15286_v59  ;;  %v11365_v62 = vsel %vm3923_vm3, %v11364_v11, %v11363_v39  ;;  %v14381_v13 = vrot.slane %v10716_v18, 9  ;;  %14831 = vmatprep.subr.bf16.mxu0 %v15000_v26 }
 0x60f   :  { %v11367_v28 = vsel %vm3926_vm4, %v11366_v2, %v11365_v62  ;;  %v14382_v44 = vrot.slane %v10718_v22, 9  ;;  %v11096_v21 = vmax.f32 %v10709_v9, %v14379_v38  ;;  %v11097_v34 = vmax.f32 %v10717_v43, %v14380_v19 }
 0x610   :  { %v11489_v51 = vrot.slane %v11475_v12, %v15286_v59  ;;  %v11490_v37 = vcombine.high %v11482_v49, %v11482_v49  ;;  %v19579_v58 = vrot.slane %v11482_v49, %v15286_v59  ;;  %v11098_v0 = vmax.f32 %v10716_v18, %v14381_v13 }
 0x611   :  { %v11099_v52 = vmax.f32 %v10718_v22, %v14382_v44  ;;  %v11158_v45 = vpack.c.bf16 %v11096_v21, %v11096_v21  ;;  %v11159_v31 = vpack.c.bf16 %v11097_v34, %v11097_v34  ;;  %v11369_v35 = vsel %vm3929_vm5, %v11368_v61, %v11367_v28  ;;  %14832 = vmatpush3.bf16.msra.mxu0 %v15000_v26 }
 0x612   :  { %v11491_v9 = vcombine.high %v11489_v51, %v11489_v51  ;;  %v19586_v17 = vrot.slane %v11489_v51, %v15286_v59  ;;  %v11512_v6 = vrot.slane %v11490_v37, %v15286_v59  ;;  %v11520_v36 = vcombine.high %v19579_v58, %v19579_v58 }
 0x613   :  { %v11160_v24 = vpack.c.bf16 %v11098_v0, %v11098_v0  ;;  %v11161_v18 = vpack.c.bf16 %v11099_v52, %v11099_v52  ;;  %v11282_v43 = vunpack.c.l.b16 %v11158_v45  ;;  %v10527_v11 = vmax.f32 %v19502_v10, 0.0 }
 0x614   :  { %v19593_v2 = vrot.slane %v11491_v9, %v15286_v59  ;;  %v11522_v61 = vcombine.high %v11512_v6, %v11512_v6  ;;  %v11740_v38 = vrot.slane %v19579_v58, %v15286_v59  ;;  %v11754_v14 = vrot.slane %v11512_v6, %v15286_v59 }
 0x615   :  { %v11768_v4 = vrot.slane %v11520_v36, %v15286_v59  ;;  %v11796_v39 = vrot.slane %v19586_v17, %v15286_v59  ;;  %v11283_v22 = vunpack.c.l.b16 %v11159_v31  ;;  %v11284_v19 = vunpack.c.l.b16 %v11160_v24 }
 0x616   :  { %v11521_v10 = vcombine.high %v19586_v17, %v19586_v17  ;;  %v11761_v12 = vrot.slane %v11754_v14, %v15286_v59  ;;  %v11782_v49 = vrot.slane %v11522_v61, %v15286_v59  ;;  %v11810_v62 = vrot.slane %v19593_v2, %v15286_v59 }
 0x617   :  { %v11775_v13 = vrot.slane %v11768_v4, %v15286_v59  ;;  %v19609_v28 = vrot.slane %v11796_v39, %v15286_v59  ;;  %v11285_v44 = vunpack.c.l.b16 %v11161_v18  ;;  %v11370_v21 = vrot.slane %v11282_v43, 3 }
 0x618   :  { %v11789_v34 = vrot.slane %v11782_v49, %v15286_v59  ;;  %v11372_v51 = vrot.slane %v11283_v22, 2  ;;  %v11374_v37 = vrot.slane %v11284_v19, 1  ;;  %v10719_v0 = vcombine.high %v10527_v11, %v10527_v11 }
 0x619   :  { %v19612_v52 = vunpack.c.l.b16 %v11775_v13  ;;  %v11371_v45 = vsel %vm3932_vm6, %v11370_v21, %v11369_v35  ;;  %v10726_v31 = vrot.slane %v10527_v11, %v21018_v32  ;;  %v10401_v26 = vadd.f32 %v19469_v50, %v19303_v63 }
 0x61a   :  { %v19618_v9 = vunpack.c.l.b16 %v11761_v12  ;;  %v11373_v6 = vsel %vm3935_vm7, %v11372_v51, %v11371_v45  ;;  %v10733_v36 = vrot.slane %v10719_v0, %v21018_v32  ;;  %v10406_v24 = vadd.f32 %v19473_v1, %v19306_v60 }
 0x61b   :  { %v19624_v18 = vunpack.c.l.b16 %v11789_v34  ;;  %v19628_v35 = vsel %vm3938_vm8, %v11374_v37, %v11373_v6  ;;  %v10734_v11 = vcombine.high %v10726_v31, %v10726_v31  ;;  %v14383_v14 = vrot.slane %v10726_v31, 9 }
 0x61c   :  { %v10735_v61 = vcombine.high %v10733_v36, %v10733_v36  ;;  %v14385_v63 = vrot.slane %v10733_v36, 9  ;;  %v10498_v50 = vadd.f32 %v19247_v23, %v10401_v26  ;;  %v10503_v39 = vadd.f32 %v19253_v53, %v10406_v24 }
 0x61d   :  { %v14384_v4 = vrot.slane %v10734_v11, 9  ;;  %v14632_v22 = vadd.f32 %v19387_v56, %v19385_v40  ;;  %v14635_v60 = vadd.f32 %v19408_v33, %v19404_v16  ;;  %v11100_v19 = vmax.f32 %v10726_v31, %v14383_v14 }
 0x61e   :  { %v14386_v1 = vrot.slane %v10735_v61, 9  ;;  %v11102_v12 = vmax.f32 %v10733_v36, %v14385_v63  ;;  %v10528_v49 = vmax.f32 %v10498_v50, 0.0  ;;  %v10529_v21 = vmax.f32 %v10503_v39, 0.0 }
 0x61f   :  { %v11101_v13 = vmax.f32 %v10734_v11, %v14384_v4  ;;  %v10409_v34 = vadd.f32 %v14632_v22, %v19309_v47  ;;  %v19638_v51 = vadd.f32 %v14635_v60, %v19313_v54  ;;  %v11162_v37 = vpack.c.bf16 %v11100_v19, %v11100_v19 }
 0x620   :  { %v11103_v23 = vmax.f32 %v10735_v61, %v14386_v1  ;;  %v11164_v53 = vpack.c.bf16 %v11102_v12, %v11102_v12  ;;  %v10736_v0 = vcombine.high %v10528_v49, %v10528_v49  ;;  %v10743_v40 = vrot.slane %v10528_v49, %v21018_v32 }
 0x621   :  { %v11163_v45 = vpack.c.bf16 %v11101_v13, %v11101_v13  ;;  %v10753_v56 = vcombine.high %v10529_v21, %v10529_v21  ;;  %v10760_v16 = vrot.slane %v10529_v21, %v21018_v32  ;;  %v11286_v31 = vunpack.c.l.b16 %v11162_v37 }
 0x622   :  { %v11165_v33 = vpack.c.bf16 %v11103_v23, %v11103_v23  ;;  %v11288_v26 = vunpack.c.l.b16 %v11164_v53  ;;  %v10750_v6 = vrot.slane %v10736_v0, %v21018_v32  ;;  %v10751_v47 = vcombine.high %v10743_v40, %v10743_v40 }
 0x623   :  { %v11287_v36 = vunpack.c.l.b16 %v11163_v45  ;;  %v14387_v24 = vrot.slane %v10743_v40, 9  ;;  %v10767_v54 = vrot.slane %v10753_v56, %v21018_v32  ;;  %v11376_v61 = vrot.slane %v11286_v31, 7 }
 0x624   :  { %v11289_v11 = vunpack.c.l.b16 %v11165_v33  ;;  %v11380_v14 = vrot.slane %v11288_v26, 5  ;;  %v10752_v63 = vcombine.high %v10750_v6, %v10750_v6  ;;  %v14388_v4 = vrot.slane %v10751_v47, 9 }
 0x625   :  { %v11378_v50 = vrot.slane %v11287_v36, 6  ;;  %v14389_v39 = vrot.slane %v10750_v6, 9  ;;  %v11104_v22 = vmax.f32 %v10743_v40, %v14387_v24  ;;  %v11377_v60 = vsel %vm3920_vm2, %v11376_v61, %v11285_v44 }
 0x626   :  { %v11382_v1 = vrot.slane %v11289_v11, 4  ;;  %v14390_v19 = vrot.slane %v10752_v63, 9  ;;  %v10768_v12 = vcombine.high %v10760_v16, %v10760_v16  ;;  %v11105_v13 = vmax.f32 %v10751_v47, %v14388_v4 }
 0x627   :  { %v11379_v49 = vsel %vm3923_vm3, %v11378_v50, %v11377_v60  ;;  %v11106_v21 = vmax.f32 %v10750_v6, %v14389_v39  ;;  %v11166_v23 = vpack.c.bf16 %v11104_v22, %v11104_v22  ;;  %v10769_v0 = vcombine.high %v10767_v54, %v10767_v54 }
 0x628   :  { %v11381_v37 = vsel %vm3926_vm4, %v11380_v14, %v11379_v49  ;;  %v11107_v53 = vmax.f32 %v10752_v63, %v14390_v19  ;;  %v14391_v45 = vrot.slane %v10760_v16, 9  ;;  %v11167_v56 = vpack.c.bf16 %v11105_v13, %v11105_v13 }
 0x629   :  { %v11168_v33 = vpack.c.bf16 %v11106_v21, %v11106_v21  ;;  %v11290_v31 = vunpack.c.l.b16 %v11166_v23  ;;  %v11383_v40 = vsel %vm3929_vm5, %v11382_v1, %v11381_v37  ;;  %v14392_v44 = vrot.slane %v10768_v12, 9 }
 0x62a   :  { %v11169_v26 = vpack.c.bf16 %v11107_v53, %v11107_v53  ;;  %v14393_v36 = vrot.slane %v10767_v54, 9  ;;  %v14394_v24 = vrot.slane %v10769_v0, 9  ;;  %v11291_v11 = vunpack.c.l.b16 %v11167_v56 }
 0x62b   :  { %v11292_v61 = vunpack.c.l.b16 %v11168_v33  ;;  %v11384_v50 = vrot.slane %v11290_v31, 3  ;;  %v11108_v47 = vmax.f32 %v10760_v16, %v14391_v45  ;;  %v11109_v4 = vmax.f32 %v10768_v12, %v14392_v44 }
 0x62c   :  { %v11293_v6 = vunpack.c.l.b16 %v11169_v26  ;;  %v11110_v39 = vmax.f32 %v10767_v54, %v14393_v36  ;;  %v11111_v14 = vmax.f32 %v10769_v0, %v14394_v24  ;;  %v11386_v22 = vrot.slane %v11291_v11, 2 }
 0x62d   :  { %v11385_v63 = vsel %vm3932_vm6, %v11384_v50, %v11383_v40  ;;  %v11388_v60 = vrot.slane %v11292_v61, 1  ;;  %v11170_v19 = vpack.c.bf16 %v11108_v47, %v11108_v47  ;;  %v11171_v49 = vpack.c.bf16 %v11109_v4, %v11109_v4 }
 0x62e   :  { %v11172_v13 = vpack.c.bf16 %v11110_v39, %v11110_v39  ;;  %v11173_v1 = vpack.c.bf16 %v11111_v14, %v11111_v14  ;;  %v10506_v21 = vadd.f32 %v19257_v57, %v10409_v34  ;;  %v11387_v23 = vsel %vm3935_vm7, %v11386_v22, %v11385_v63 }
 0x62f   :  { %v11294_v37 = vunpack.c.l.b16 %v11170_v19  ;;  %v10511_v16 = vadd.f32 %v19251_v41, %v19638_v51  ;;  %v19655_v54 = vadd.f32 %v19424_v46, %v19412_v55  ;;  %v11389_v12 = vsel %vm3938_vm8, %v11388_v60, %v11387_v23 }
 0x630   :  { %v11295_v53 = vunpack.c.l.b16 %v11171_v49  ;;  %v11296_v0 = vunpack.c.l.b16 %v11172_v13  ;;  %v19658_v45 = vunpack.c.l.b16 %v11173_v1  ;;  %v11418_v56 = vpack.c.b16 %v11389_v12, %v19628_v35 }
 0x631   :  { %v14406_v33 = vpack.c.b16 %v11389_v12, %v11389_v12  ;;  %v11390_v57 = vrot.slane %v11294_v37, 7  ;;  %v10530_v34 = vmax.f32 %v10506_v21, 0.0  ;;  %v19662_v41 = vmax.f32 %v10511_v16, 0.0 }
 0x632   :  { %v11392_v40 = vrot.slane %v11295_v53, 6  ;;  %v11394_v26 = vrot.slane %v11296_v0, 5  ;;  %v11531_v55 = vrot.slane %v11418_v56, %v15286_v59  ;;  %v11396_v35 = vrot.slane %v19658_v45, 4 }
 0x633   :  { %v11538_v46 = vrot.slane %v14406_v33, %v15286_v59  ;;  %v11391_v51 = vsel %vm3920_vm2, %v11390_v57, %v11293_v6  ;;  %v10770_v44 = vcombine.high %v10530_v34, %v10530_v34  ;;  %v10777_v24 = vrot.slane %v10530_v34, %v21018_v32 }
 0x634   :  { %v11393_v36 = vsel %vm3923_vm3, %v11392_v40, %v11391_v51  ;;  %v10787_v11 = vcombine.high %v19662_v41, %v19662_v41  ;;  %v11539_v61 = vcombine.high %v11531_v55, %v11531_v55  ;;  %v11547_v47 = vrot.slane %v11531_v55, %v15286_v59 }
 0x635   :  { %v11540_v50 = vcombine.high %v11538_v46, %v11538_v46  ;;  %v11554_v4 = vrot.slane %v11538_v46, %v15286_v59  ;;  %v11395_v39 = vsel %vm3926_vm4, %v11394_v26, %v11393_v36  ;;  %v10784_v6 = vrot.slane %v10770_v44, %v21018_v32 }
 0x636   :  { %v10785_v14 = vcombine.high %v10777_v24, %v10777_v24  ;;  %v19678_v63 = vrot.slane %v19662_v41, %v21018_v32  ;;  %v11561_v22 = vrot.slane %v11539_v61, %v15286_v59  ;;  %v11569_v19 = vcombine.high %v11547_v47, %v11547_v47 }
 0x637   :  { %v11568_v60 = vrot.slane %v11540_v50, %v15286_v59  ;;  %v11570_v49 = vcombine.high %v11554_v4, %v11554_v4  ;;  %v11838_v13 = vrot.slane %v11547_v47, %v15286_v59  ;;  %v11894_v1 = vrot.slane %v11554_v4, %v15286_v59 }
 0x638   :  { %v10786_v21 = vcombine.high %v10784_v6, %v10784_v6  ;;  %v14395_v23 = vrot.slane %v10777_v24, 9  ;;  %v11571_v37 = vcombine.high %v11561_v22, %v11561_v22  ;;  %v11852_v12 = vrot.slane %v11561_v22, %v15286_v59 }
 0x639   :  { %v11572_v16 = vcombine.high %v11568_v60, %v11568_v60  ;;  %v11866_v53 = vrot.slane %v11569_v19, %v15286_v59  ;;  %v11845_v0 = vrot.slane %v11838_v13, %v15286_v59  ;;  %v11901_v45 = vrot.slane %v11894_v1, %v15286_v59 }
 0x63a   :  { %v11908_v56 = vrot.slane %v11568_v60, %v15286_v59  ;;  %v11922_v33 = vrot.slane %v11570_v49, %v15286_v59  ;;  %v11859_v57 = vrot.slane %v11852_v12, %v15286_v59  ;;  %v11880_v40 = vrot.slane %v11571_v37, %v15286_v59 }
 0x63b   :  { %v11873_v34 = vrot.slane %v11866_v53, %v15286_v59  ;;  %v14396_v26 = vrot.slane %v10785_v14, 9  ;;  %v12057_v46 = vunpack.c.l.b16 %v11845_v0  ;;  %v12061_v51 = vunpack.c.l.b16 %v11901_v45 }
 0x63c   :  { %v11915_v41 = vrot.slane %v11908_v56, %v15286_v59  ;;  %v11929_v55 = vrot.slane %v11922_v33, %v15286_v59  ;;  %v11887_v44 = vrot.slane %v11880_v40, %v15286_v59  ;;  %v19697_v36 = vrot.slane %v11572_v16, %v15286_v59 }
 0x63d   :  { %v12058_v61 = vunpack.c.l.b16 %v11859_v57  ;;  %v19699_v50 = vunpack.c.l.b16 %v11873_v34  ;;  %v12152_v22 = vrot.slane %v12057_v46, 1  ;;  %v14397_v60 = vrot.slane %v10784_v6, 9 }
 0x63e   :  { %v12062_v47 = vunpack.c.l.b16 %v11915_v41  ;;  %v19701_v4 = vunpack.c.l.b16 %v11929_v55  ;;  %v19703_v19 = vunpack.c.l.b16 %v11887_v44  ;;  %v19705_v13 = vrot.slane %v12061_v51, 4 }
 0x63f   :  { %v12098_v49 = vrot.slane %v12058_v61, 7  ;;  %v20514_v1 = vrot.slane %v19699_v50, 7  ;;  %v12100_v37 = vrot.slane %v19699_v50, 6  ;;  %v19712_v16 = vsel %vm3920_vm2, %v12058_v61, %v12152_v22 }
 0x640   :  { %v19709_v12 = vrot.slane %v12062_v47, 3  ;;  %v19714_v53 = vrot.slane %v12061_v51, 5  ;;  %v19719_v33 = vrot.slane %v12062_v47, 4  ;;  %v14398_v34 = vrot.slane %v10786_v21, 9 }
 0x641   :  { %v12099_v0 = vsel %vm3920_vm2, %v12098_v49, %v12057_v46  ;;  %v19724_v57 = vsel %vm3920_vm2, %v20514_v1, %v12058_v61  ;;  %v11112_v40 = vmax.f32 %v10777_v24, %v14395_v23  ;;  %v11113_v41 = vmax.f32 %v10785_v14, %v14396_v26 }
 0x642   :  { %v11114_v55 = vmax.f32 %v10784_v6, %v14397_v60  ;;  %v11397_v51 = vsel %vm3929_vm5, %v11396_v35, %v11395_v39  ;;  %v10801_v44 = vrot.slane %v10787_v11, %v21018_v32  ;;  %v10802_v46 = vcombine.high %v19678_v63, %v19678_v63 }
 0x643   :  { %v11115_v22 = vmax.f32 %v10786_v21, %v14398_v34  ;;  %v11174_v49 = vpack.c.bf16 %v11112_v40, %v11112_v40  ;;  %v11175_v47 = vpack.c.bf16 %v11113_v41, %v11113_v41  ;;  %v14399_v56 = vrot.slane %v19678_v63, 9 }
 0x644   :  { %v11176_v31 = vpack.c.bf16 %v11114_v55, %v11114_v55  ;;  %v10803_v43 = vcombine.high %v10801_v44, %v10801_v44  ;;  %v14400_v61 = vrot.slane %v10802_v46, 9  ;;  %v14401_v1 = vrot.slane %v10801_v44, 9 }
 0x645   :  { %v11177_v45 = vpack.c.bf16 %v11115_v22, %v11115_v22  ;;  %v11298_v24 = vunpack.c.l.b16 %v11174_v49  ;;  %v11299_v14 = vunpack.c.l.b16 %v11175_v47  ;;  %v11116_v6 = vmax.f32 %v19678_v63, %v14399_v56 }
 0x646   :  { %v11300_v35 = vunpack.c.l.b16 %v11176_v31  ;;  %v14402_v39 = vrot.slane %v10803_v43, 9  ;;  %v11117_v11 = vmax.f32 %v10802_v46, %v14400_v61  ;;  %v11118_v23 = vmax.f32 %v10801_v44, %v14401_v1 }
 0x647   :  { %v19733_v26 = vsel %vm3923_vm3, %v12100_v37, %v12099_v0  ;;  %v11301_v21 = vunpack.c.l.b16 %v11177_v45  ;;  %v11398_v60 = vrot.slane %v11298_v24, 3  ;;  %v11178_v34 = vpack.c.bf16 %v11116_v6, %v11116_v6 }
 0x648   :  { %v11400_v40 = vrot.slane %v11299_v14, 2  ;;  %v11119_v41 = vmax.f32 %v10803_v43, %v14402_v39  ;;  %v11179_v55 = vpack.c.bf16 %v11117_v11, %v11117_v11  ;;  %v11180_v30 = vpack.c.bf16 %v11118_v23, %v11118_v23 }
 0x649   :  { %v11399_v22 = vsel %vm3932_vm6, %v11398_v60, %v11397_v51  ;;  %v11402_v49 = vrot.slane %v11300_v35, 1  ;;  %v11302_v47 = vunpack.c.l.b16 %v11178_v34  ;;  %v10417_v31 = vadd.f32 %v19655_v54, %v19391_v3  ;;  %v21024_v54 = vld [vmem:[#allocation59_spill] sm:$0xff] }
 0x64a   :  { %v11401_v63 = vsel %vm3935_vm7, %v11400_v40, %v11399_v22  ;;  %v11181_v1 = vpack.c.bf16 %v11119_v41, %v11119_v41  ;;  %v11303_v56 = vunpack.c.l.b16 %v11179_v55  ;;  %v11304_v37 = vunpack.c.l.b16 %v11180_v30 }
 0x64b   :  { %v19740_v0 = vsel %vm3938_vm8, %v11402_v49, %v11401_v63  ;;  %v11404_v45 = vrot.slane %v11302_v47, 7  ;;  %v10514_v43 = vadd.f32 %v19255_v29, %v10417_v31  ;;  %v21023_v51 = vrot.slane %v19402_v48, %v15286_v59 }
 0x64c   :  { %v11305_v46 = vunpack.c.l.b16 %v11181_v1  ;;  %v11406_v61 = vrot.slane %v11303_v56, 6  ;;  %v11408_v3 = vrot.slane %v11304_v37, 5  ;;  %v11719_v24 = vrot.slane %v21024_v54, %v15286_v59 }
 0x64d   :  { %v19747_v44 = vrot.slane %v21023_v51, %v15286_v59  ;;  %v11405_v30 = vsel %vm3920_vm2, %v11404_v45, %v11301_v21  ;;  %v10532_v14 = vmax.f32 %v10514_v43, 0.0  ;;  %v21025_v6 = vcombine.high %v19402_v48, %v19402_v48 }
 0x64e   :  { %v19760_v35 = vrot.slane %v11740_v38, %v15286_v59  ;;  %v11407_v39 = vsel %vm3923_vm3, %v11406_v61, %v11405_v30  ;;  %v11410_v11 = vrot.slane %v11305_v46, 4  ;;  %v19767_v23 = vrot.slane %v11810_v62, %v15286_v59 }
 0x64f   :  { %v11726_v29 = vrot.slane %v21025_v6, %v15286_v59  ;;  %v11824_v48 = vrot.slane %v11521_v10, %v15286_v59  ;;  %v11409_v21 = vsel %vm3926_vm4, %v11408_v3, %v11407_v39  ;;  %v10810_v58 = vrot.slane %v10532_v14, %v21018_v32 }
 0x650   :  { %v11943_v60 = vrot.slane %v19697_v36, %v15286_v59  ;;  %v11411_v34 = vsel %vm3929_vm5, %v11410_v11, %v11409_v21  ;;  %v12047_v62 = vunpack.c.l.b16 %v19747_v44  ;;  %v19781_v41 = vunpack.c.l.b16 %v11719_v24 }
 0x651   :  { %v11733_v38 = vrot.slane %v11726_v29, %v15286_v59  ;;  %v11831_v40 = vrot.slane %v11824_v48, %v15286_v59  ;;  %v10811_v55 = vcombine.high %v10810_v58, %v10810_v58  ;;  %v14403_v17 = vrot.slane %v10810_v58, 9 }
 0x652   :  { %v12050_v22 = vunpack.c.l.b16 %v19760_v35  ;;  %v12054_v32 = vunpack.c.l.b16 %v19609_v28  ;;  %v12055_v49 = vunpack.c.l.b16 %v19767_v23  ;;  %v19790_v36 = vunpack.c.l.b16 %v11943_v60 }
 0x653   :  { %v19783_v10 = vunpack.c.l.b16 %v11733_v38  ;;  %v19788_v47 = vunpack.c.l.b16 %v11831_v40  ;;  %v14404_v31 = vrot.slane %v10811_v55, 9  ;;  %v11120_v63 = vmax.f32 %v10810_v58, %v14403_v17 }
 0x654   :  { %v21026_v1 = vrot.slane %v19434_v20, 7  ;;  %v12076_v37 = vrot.slane %v19443_v42, 5  ;;  %v21027_v45 = vrot.slane %v19436_v25, 6  ;;  %v21028_v43 = vunpack.c.l.b16 %v19420_v7 }
 0x655   :  { %v12080_v44 = vrot.slane %v12047_v62, 3  ;;  %v12082_v46 = vrot.slane %v19781_v41, 2  ;;  %v11121_v61 = vmax.f32 %v10811_v55, %v14404_v31  ;;  %v11182_v3 = vpack.c.bf16 %v11120_v63, %v11120_v63 }
 0x656   :  { %v12073_v56 = vsel %vm3920_vm2, %v21026_v1, %v12042_v8  ;;  %v12078_v51 = vrot.slane %v21028_v43, 4  ;;  %v12084_v54 = vrot.slane %v19783_v10, 1  ;;  %v12086_v24 = vrot.slane %v19618_v9, 7 }
 0x657   :  { %v12075_v28 = vsel %vm3923_vm3, %v21027_v45, %v12073_v56  ;;  %v12090_v30 = vrot.slane %v19624_v18, 5  ;;  %v12092_v14 = vrot.slane %v12054_v32, 4  ;;  %v11183_v6 = vpack.c.bf16 %v11121_v61, %v11121_v61 }
 0x658   :  { %v12077_v15 = vsel %vm3926_vm4, %v12076_v37, %v12075_v28  ;;  %v11306_v29 = vunpack.c.l.b16 %v11182_v3  ;;  %v12094_v39 = vrot.slane %v12055_v49, 3  ;;  %v12087_v48 = vsel %vm3920_vm2, %v12086_v24, %v12050_v22 }
 0x659   :  { %v12079_v8 = vsel %vm3929_vm5, %v12078_v51, %v12077_v15  ;;  %v12096_v21 = vrot.slane %v19788_v47, 2  ;;  %v21029_v58 = vrot.slane %v19703_v19, 5  ;;  %v11307_v60 = vunpack.c.l.b16 %v11183_v6 }
 0x65a   :  { %v12081_v35 = vsel %vm3932_vm6, %v12080_v44, %v12079_v8  ;;  %v11412_v40 = vrot.slane %v11306_v29, 3  ;;  %v21030_v17 = vrot.slane %v19612_v52, 6  ;;  %v12108_v56 = vrot.slane %v19701_v4, 2 }
 0x65b   :  { %v12083_v11 = vsel %vm3935_vm7, %v12082_v46, %v12081_v35  ;;  %v12103_v38 = vsel %vm3926_vm4, %v21029_v58, %v19733_v26  ;;  %v12110_v37 = vrot.slane %v19790_v36, 1  ;;  %v11414_v45 = vrot.slane %v11307_v60, 2 }
 0x65c   :  { %v19820_v55 = vsel %vm3938_vm8, %v12084_v54, %v12083_v11  ;;  %v12089_v31 = vsel %vm3923_vm3, %v21030_v17, %v12087_v48  ;;  %v12105_v1 = vsel %vm3929_vm5, %v19705_v13, %v12103_v38  ;;  %v11413_v26 = vsel %vm3932_vm6, %v11412_v40, %v11411_v34 }
 0x65d   :  { %v12091_v63 = vsel %vm3926_vm4, %v12090_v30, %v12089_v31  ;;  %v12107_v43 = vsel %vm3932_vm6, %v19709_v12, %v12105_v1  ;;  %v12127_v13 = vsel %vm3920_vm2, %v19434_v20, %v19441_v5  ;;  %v12130_v46 = vrot.slane %v19443_v42, 6 }
 0x65e   :  { %v12093_v28 = vsel %vm3929_vm5, %v12092_v14, %v12091_v63  ;;  %v12109_v44 = vsel %vm3935_vm7, %v12108_v56, %v12107_v43  ;;  %v11415_v61 = vsel %vm3935_vm7, %v11414_v45, %v11413_v26  ;;  %v11523_v34 = vcombine.high %v19593_v2, %v19593_v2 }
 0x65f   :  { %v12095_v51 = vsel %vm3932_vm6, %v12094_v39, %v12093_v28  ;;  %v19844_v3 = vsel %vm3938_vm8, %v12110_v37, %v12109_v44  ;;  %v21031_v12 = vrot.slane %v19436_v25, 7  ;;  %v11419_v54 = vpack.c.b16 %v11415_v61, %v19740_v0 }
 0x660   :  { %v19851_v8 = vsel %vm3935_vm7, %v12096_v21, %v12095_v51  ;;  %v21032_v24 = vunpack.c.l.b16 %v19420_v7  ;;  %v19860_v2 = vrot.slane %v12047_v62, 4  ;;  %v12136_v14 = vrot.slane %v19781_v41, 3 }
 0x661   :  { %v12129_v15 = vsel %vm3923_vm3, %v21031_v12, %v12127_v13  ;;  %v12138_v6 = vrot.slane %v19783_v10, 2  ;;  %v19864_v29 = vrot.slane %v12050_v22, 1  ;;  %v11423_v0 = vsel %vm16073_vm11, %v11419_v54, 0 }
 0x662   :  { %v12131_v5 = vsel %vm3926_vm4, %v12130_v46, %v12129_v15  ;;  %v19858_v30 = vrot.slane %v21032_v24, 5  ;;  %v12144_v39 = vrot.slane %v19624_v18, 6  ;;  %v19871_v11 = vrot.slane %v12054_v32, 5 }
 0x663   :  { %v11573_v7 = vcombine.high %v11423_v0, %v11423_v0  ;;  %v11580_v62 = vrot.slane %v11423_v0, %v15286_v59  ;;  %v12141_v22 = vsel %vm3920_vm2, %v19618_v9, %v19864_v29  ;;  %v21033_v21 = vrot.slane %v19612_v52, 7 }
 0x664   :  { %v12133_v35 = vsel %vm3929_vm5, %v19858_v30, %v12131_v5  ;;  %v19887_v32 = vrot.slane %v12055_v49, 4  ;;  %v21034_v38 = vrot.slane %v19699_v50, 7  ;;  %v12150_v49 = vrot.slane %v19788_v47, 3 }
 0x665   :  { %v12135_v48 = vsel %vm3932_vm6, %v19860_v2, %v12133_v35  ;;  %v12143_v58 = vsel %vm3923_vm3, %v21033_v21, %v12141_v22  ;;  %v11587_v40 = vrot.slane %v11573_v7, %v15286_v59  ;;  %v11588_v17 = vcombine.high %v11580_v62, %v11580_v62 }
 0x666   :  { %v12137_v27 = vsel %vm3935_vm7, %v12136_v14, %v12135_v48  ;;  %v12155_v60 = vsel %vm3923_vm3, %v21034_v38, %v19712_v16  ;;  %v11596_v31 = vrot.slane %v11580_v62, %v15286_v59  ;;  %v12145_v23 = vsel %vm3926_vm4, %v12144_v39, %v12143_v58 }
 0x667   :  { %v19898_v63 = vsel %vm3938_vm8, %v12138_v6, %v12137_v27  ;;  %v21035_v50 = vrot.slane %v19703_v19, 6  ;;  %v12162_v1 = vrot.slane %v19701_v4, 3  ;;  %v11589_v56 = vcombine.high %v11587_v40, %v11587_v40 }
 0x668   :  { %v11603_v37 = vrot.slane %v11587_v40, %v15286_v59  ;;  %v11610_v26 = vrot.slane %v11588_v17, %v15286_v59  ;;  %v11618_v45 = vcombine.high %v11596_v31, %v11596_v31  ;;  %v11950_v28 = vrot.slane %v11596_v31, %v15286_v59 }
 0x669   :  { %v12157_v16 = vsel %vm3926_vm4, %v21035_v50, %v12155_v60  ;;  %v12147_v43 = vsel %vm3929_vm5, %v19871_v11, %v12145_v23  ;;  %v12164_v44 = vrot.slane %v19790_v36, 2  ;;  %v11617_v13 = vrot.slane %v11589_v56, %v15286_v59 }
 0x66a   :  { %v12159_v51 = vsel %vm3929_vm5, %v19714_v53, %v12157_v16  ;;  %v11619_v61 = vcombine.high %v11603_v37, %v11603_v37  ;;  %v11620_v12 = vcombine.high %v11610_v26, %v11610_v26  ;;  %v11964_v15 = vrot.slane %v11610_v26, %v15286_v59 }
 0x66b   :  { %v11957_v54 = vrot.slane %v11950_v28, %v15286_v59  ;;  %v11978_v5 = vrot.slane %v11618_v45, %v15286_v59  ;;  %v12006_v24 = vrot.slane %v11603_v37, %v15286_v59  ;;  %v12186_v0 = vrot.slane %v11523_v34, %v15286_v59 }
 0x66c   :  { %v11971_v35 = vrot.slane %v11964_v15, %v15286_v59  ;;  %v11992_v7 = vrot.slane %v11620_v12, %v15286_v59  ;;  %v12020_v62 = vrot.slane %v11617_v13, %v15286_v59  ;;  %v12149_v48 = vsel %vm3932_vm6, %v19887_v32, %v12147_v43 }
 0x66d   :  { %v11621_v22 = vcombine.high %v11617_v13, %v11617_v13  ;;  %v11985_v27 = vrot.slane %v11978_v5, %v15286_v59  ;;  %v19929_v21 = vrot.slane %v12006_v24, %v15286_v59  ;;  %v12034_v58 = vrot.slane %v11619_v61, %v15286_v59 }
 0x66e   :  { %v11999_v38 = vrot.slane %v11992_v7, %v15286_v59  ;;  %v19934_v34 = vrot.slane %v12020_v62, %v15286_v59  ;;  %v12065_v60 = vunpack.c.l.b16 %v11957_v54  ;;  %v12066_v40 = vunpack.c.l.b16 %v11971_v35 }
 0x66f   :  { %v12041_v17 = vrot.slane %v12034_v58, %v15286_v59  ;;  %v19937_v31 = vunpack.c.l.b16 %v11985_v27  ;;  %v12069_v23 = vunpack.c.l.b16 %v19929_v21  ;;  %v12161_v50 = vsel %vm3932_vm6, %v19719_v33, %v12159_v51 }
 0x670   :  { %v19942_v16 = vunpack.c.l.b16 %v11999_v38  ;;  %v12070_v56 = vunpack.c.l.b16 %v19934_v34  ;;  %v12112_v37 = vrot.slane %v12066_v40, 7  ;;  %v12163_v26 = vsel %vm3935_vm7, %v12162_v1, %v12161_v50 }
 0x671   :  { %v19948_v45 = vunpack.c.l.b16 %v12041_v17  ;;  %v12114_v28 = vrot.slane %v19937_v31, 6  ;;  %v12168_v43 = vrot.slane %v19937_v31, 7  ;;  %v12151_v13 = vsel %vm3935_vm7, %v12150_v49, %v12149_v48 }
 0x672   :  { %v12113_v51 = vsel %vm3920_vm2, %v12112_v37, %v12065_v60  ;;  %v12116_v61 = vrot.slane %v19942_v16, 5  ;;  %v12170_v12 = vrot.slane %v19942_v16, 6  ;;  %v19958_v15 = vrot.slane %v12069_v23, 5 }
 0x673   :  { %v12231_v54 = vsel %vm3920_vm2, %v12168_v43, %v12066_v40  ;;  %v12165_v5 = vsel %vm3938_vm8, %v12164_v44, %v12163_v26  ;;  %v12166_v24 = vrot.slane %v12065_v60, 1  ;;  %v19968_v35 = vrot.slane %v12070_v56, 4 }
 0x674   :  { %v12176_v7 = vrot.slane %v19948_v45, 3  ;;  %v12193_v62 = vrot.slane %v12186_v0, %v15286_v59  ;;  %v12200_v48 = vrot.slane %v11621_v22, %v15286_v59  ;;  %v21036_v27 = vrot.slane %v19436_v25, 7 }
 0x675   :  { %v12167_v58 = vsel %vm3920_vm2, %v12066_v40, %v12166_v24  ;;  %v21037_v60 = vrot.slane %v19612_v52, 7  ;;  %v21038_v0 = vrot.slane %v19703_v19, 6  ;;  %v14407_v4 = vpack.c.b16 %v19898_v63, %v19820_v55 }
 0x676   :  { %v12210_v21 = vsel %vm3920_vm2, %v21036_v27, %v19434_v20  ;;  %v12207_v25 = vrot.slane %v12200_v48, %v15286_v59  ;;  %v12208_v50 = vunpack.c.l.b16 %v12193_v62  ;;  %v12120_v63 = vrot.slane %v12070_v56, 3 }
 0x677   :  { %v12211_v38 = vsel %vm3923_vm3, %v12130_v46, %v12210_v21  ;;  %v12217_v17 = vsel %vm3920_vm2, %v21037_v60, %v19618_v9  ;;  %v12225_v22 = vsel %vm3923_vm3, %v21038_v0, %v19724_v57  ;;  %v12232_v57 = vsel %vm3923_vm3, %v12170_v12, %v12231_v54 }
 0x678   :  { %v12212_v20 = vsel %vm3926_vm4, %v19858_v30, %v12211_v38  ;;  %v12218_v42 = vsel %vm3923_vm3, %v12144_v39, %v12217_v17  ;;  %v12226_v19 = vsel %vm3926_vm4, %v19714_v53, %v12225_v22  ;;  %v12209_v46 = vunpack.c.l.b16 %v12207_v25 }
 0x679   :  { %v12213_v52 = vsel %vm3929_vm5, %v19860_v2, %v12212_v20  ;;  %v12219_v9 = vsel %vm3926_vm4, %v19871_v11, %v12218_v42  ;;  %v12222_v39 = vrot.slane %v12208_v50, 2  ;;  %v12227_v11 = vsel %vm3929_vm5, %v19719_v33, %v12226_v19 }
 0x67a   :  { %v12214_v18 = vsel %vm3932_vm6, %v12136_v14, %v12213_v52  ;;  %v12220_v30 = vsel %vm3929_vm5, %v19887_v32, %v12219_v9  ;;  %v12233_v41 = vsel %vm3926_vm4, %v19958_v15, %v12232_v57  ;;  %v12228_v10 = vsel %vm3932_vm6, %v12162_v1, %v12227_v11 }
 0x67b   :  { %v12215_v2 = vsel %vm3935_vm7, %v12138_v6, %v12214_v18  ;;  %v12221_v53 = vsel %vm3932_vm6, %v12150_v49, %v12220_v30  ;;  %v12234_v47 = vsel %vm3929_vm5, %v19968_v35, %v12233_v41  ;;  %v12229_v6 = vsel %vm3935_vm7, %v12164_v44, %v12228_v10 }
 0x67c   :  { %v12216_v14 = vsel %vm3938_vm8, %v19864_v29, %v12215_v2  ;;  %v12223_v32 = vsel %vm3935_vm7, %v12222_v39, %v12221_v53  ;;  %v12235_v33 = vsel %vm3932_vm6, %v12176_v7, %v12234_v47  ;;  %v12236_v49 = vrot.slane %v12209_v46, 2 }
 0x67d   :  { %v12238_v40 = vpack.c.b16 %v12223_v32, %v12216_v14  ;;  %v12230_v29 = vsel %vm3938_vm8, %v12166_v24, %v12229_v6  ;;  %v14408_v1 = vpack.c.b16 %v12151_v13, %v19851_v8  ;;  %v14409_v37 = vpack.c.b16 %v12223_v32, %v12223_v32 }
 0x67e   :  { %v12237_v26 = vsel %vm3935_vm7, %v12236_v49, %v12235_v33  ;;  %v14410_v44 = vpack.c.b16 %v12165_v5, %v19844_v3  ;;  %v12115_v54 = vsel %vm3923_vm3, %v12114_v28, %v12113_v51  ;;  %v12249_v48 = vrot.slane %v14407_v4, %v15286_v59 }
 0x67f   :  { %v12263_v36 = vrot.slane %v12238_v40, %v15286_v59  ;;  %v12239_v62 = vpack.c.b16 %v12237_v26, %v12230_v29  ;;  %v12256_v27 = vrot.slane %v14408_v1, %v15286_v59  ;;  %v12270_v24 = vrot.slane %v14409_v37, %v15286_v59 }
 0x680   :  { %v12118_v21 = vrot.slane %v12069_v23, 4  ;;  %v12316_v55 = vrot.slane %v14410_v44, %v15286_v59  ;;  %v12117_v8 = vsel %vm3926_vm4, %v12116_v61, %v12115_v54  ;;  %v12169_v60 = vsel %vm3923_vm3, %v12168_v43, %v12167_v58 }
 0x681   :  { %v12271_v13 = vcombine.low %v12249_v48, %v12263_v36  ;;  %v12272_v38 = vcombine.high %v12249_v48, %v12263_v36  ;;  %v12273_v3 = vcombine.low %v12256_v27, %v12270_v24  ;;  %v12274_v5 = vcombine.high %v12256_v27, %v12270_v24 }
 0x682   :  { %v12330_v28 = vrot.slane %v12239_v62, %v15286_v59  ;;  %v12119_v51 = vsel %vm3929_vm5, %v12118_v21, %v12117_v8  ;;  %v14412_v23 = vpack.c.b16 %v12237_v26, %v12237_v26  ;;  %v12122_v25 = vrot.slane %v19948_v45, 2 }
 0x683   :  { %v12281_v17 = vrot.slane %v12271_v13, %v15286_v59  ;;  %v12288_v61 = vrot.slane %v12273_v3, %v15286_v59  ;;  %v12295_v34 = vrot.slane %v12272_v38, %v15286_v59  ;;  %v12302_v56 = vrot.slane %v12274_v5, %v15286_v59 }
 0x684   :  { %v12338_v0 = vcombine.low %v12316_v55, %v12330_v28  ;;  %v12121_v22 = vsel %vm3932_vm6, %v12120_v63, %v12119_v51  ;;  %v12171_v31 = vsel %vm3926_vm4, %v12170_v12, %v12169_v60  ;;  %v12337_v20 = vrot.slane %v14412_v23, %v15286_v59 }
 0x685   :  { %v12304_v50 = vcombine.high %v12288_v61, %v12288_v61  ;;  %v12474_v43 = vcombine.low %v12281_v17, %v12295_v34  ;;  %v14422_v58 = vcombine.high %v12281_v17, %v12295_v34  ;;  %v12306_v42 = vcombine.high %v12302_v56, %v12302_v56 }
 0x686   :  { %v12348_v52 = vrot.slane %v12338_v0, %v15286_v59  ;;  %v12123_v9 = vsel %vm3935_vm7, %v12122_v25, %v12121_v22  ;;  %v12173_v19 = vsel %vm3929_vm5, %v19958_v15, %v12171_v31  ;;  %v12339_v12 = vcombine.high %v12316_v55, %v12330_v28 }
 0x687   :  { %v12484_v57 = vrot.slane %v12474_v43, %v15286_v59  ;;  %v12491_v46 = vrot.slane %v14422_v58, %v15286_v59  ;;  %v12175_v16 = vsel %vm3932_vm6, %v19968_v35, %v12173_v19  ;;  %v12476_v30 = vcombine.low %v12288_v61, %v12302_v56 }
 0x688   :  { %v14414_v18 = vpack.i.b16 %v12348_v52, %v12306_v42  ;;  %v12177_v39 = vsel %vm3935_vm7, %v12176_v7, %v12175_v16  ;;  %v12370_v2 = vcombine.high %v12348_v52, %v12348_v52  ;;  %v12362_v15 = vrot.slane %v12339_v12, %v15286_v59  ;;  %v15002_v12 = vld [vmem:[%s20314_s7 + $0x8] sm:$0xff]  }
 0x689   :  { %v12507_v53 = vcombine.high %v12484_v57, %v12491_v46  ;;  %v12506_v11 = vcombine.low %v12484_v57, %v12491_v46  ;;  %v14411_v41 = vpack.c.b16 %v12177_v39, %v12123_v9  ;;  %v12390_v32 = vunpack.i.h.s16 %v12348_v52  ;;  %v15001_v46 = vld [vmem:[%s20314_s7] sm:$0xff]  }
 0x68a   :  { %v12477_v14 = vcombine.low %v12304_v50, %v14414_v18  ;;  %v12394_v10 = vunpack.i.h.s16 %v12370_v2  ;;  %v12372_v6 = vcombine.high %v12362_v15, %v12362_v15  ;;  %v12498_v35 = vrot.slane %v12476_v30, %v15286_v59  ;;  %v15003_v18 = vld [vmem:[%s20314_s7 + $0x10] sm:$0xff]  }
 0x68b   :  { %v12323_v47 = vrot.slane %v14411_v41, %v15286_v59  ;;  %v12392_v49 = vunpack.i.h.s16 %v12362_v15  ;;  %v14415_v45 = vpack.i.b16 %v12362_v15, %v12390_v32  ;;  %v12523_v36 = vrot.slane %v12507_v53, %v15286_v59  ;;  %v14413_v15 = vld [vmem:[%s20313_s6] ss:$0 sm:$0xff] }
 0x68c   :  { %v12505_v33 = vrot.slane %v12477_v14, %v15286_v59  ;;  %v14417_v29 = vpack.i.b16 %v12372_v6, %v12394_v10  ;;  %v12396_v37 = vunpack.i.h.s16 %v12372_v6  ;;  %v12516_v48 = vrot.slane %v12506_v11, %v15286_v59 }
 0x68d   :  { %v12340_v40 = vcombine.low %v12323_v47, %v12337_v20  ;;  %v12341_v7 = vcombine.high %v12323_v47, %v12337_v20  ;;  %v14416_v26 = vpack.i.b16 %v12370_v2, %v12392_v49  ;;  %v15058_v16 = vmov 0.0  }
 0x68e   :  { %v12509_v4 = vcombine.high %v12498_v35, %v12505_v33  ;;  %v12508_v1 = vcombine.low %v12498_v35, %v12505_v33  ;;  %14837 = vmatprep.subr.bf16.mxu1 %v15058_v16  ;;  %14857 = vmatprep.subr.bf16.mxu0 %v15058_v16 }
 0x68f   :  { %v12355_v44 = vrot.slane %v12340_v40, %v15286_v59  ;;  %v12369_v54 = vrot.slane %v12341_v7, %v15286_v59  ;;  %v12541_v24 = vcombine.low %v14415_v45, %v14416_v26 }
 0x690   :  { %v12537_v62 = vrot.slane %v12509_v4, %v15286_v59  ;;  %v12530_v27 = vrot.slane %v12508_v1, %v15286_v59 }
 0x691   :  { %v12371_v21 = vcombine.high %v12355_v44, %v12355_v44  ;;  %v12398_v55 = vunpack.i.h.s16 %v12355_v44  ;;  %v12400_v8 = vunpack.i.h.s16 %v12369_v54  ;;  %v14418_v3 = vpack.i.b16 %v12355_v44, %v12396_v37 }
 0x692   :  { %v12540_v63 = vcombine.low %v12523_v36, %v12537_v62  ;;  %v12538_v13 = vcombine.low %v12516_v48, %v12530_v27  ;;  %v12539_v38 = vcombine.high %v12516_v48, %v12530_v27  ;;  %v12373_v5 = vcombine.high %v12369_v54, %v12369_v54 }
 0x693   :  { %v12402_v28 = vunpack.i.h.s16 %v12371_v21  ;;  %v14419_v51 = vpack.i.b16 %v12369_v54, %v12398_v55  ;;  %v14420_v60 = vpack.i.b16 %v12371_v21, %v12400_v8  ;;  %v12542_v23 = vcombine.low %v14417_v29, %v14418_v3 }
 0x694   :  { %12789 = vmatprep.mubr.bf16.mxu1 %v12540_v63  ;;  %14833 = vmatprep.mubr.bf16.mxu0 %v12539_v38  ;;  %v12550_v34 = vrot.slane %v12541_v24, %v15286_v59 }
 0x695   :  { %12790 = vmatmul.mubr.bf16.vlgmr.msra.gmra.mrb[64].mxu1 %v12538_v13  ;;  %v14421_v17 = vpack.i.b16 %v12373_v5, %v12402_v28  ;;  %v12543_v61 = vcombine.low %v14419_v51, %v14420_v60  ;;  %v12557_v56 = vrot.slane %v12542_v23, %v15286_v59 }
 0x696   :  { %14838 = vmatpush3.bf16.msra.mxu1 %v15001_v46 }
 0x697   :  { %v12564_v0 = vrot.slane %v12543_v61, %v15286_v59  ;;  %v12571_v22 = vrot.slane %v14421_v17, %v15286_v59  ;;  %v12572_v25 = vcombine.low %v12550_v34, %v12557_v56  ;;  %v12573_v31 = vcombine.high %v12550_v34, %v12557_v56  ;;  %14839 = vmatprep.subr.bf16.mxu1 %v15058_v16 }
 0x699   :  { %v12574_v50 = vcombine.low %v12564_v0, %v12571_v22  ;;  %v12575_v43 = vcombine.high %v12564_v0, %v12571_v22  ;;  %v12589_v58 = vrot.slane %v12573_v31, %v15286_v59  ;;  %v12582_v20 = vrot.slane %v12572_v25, %v15286_v59 }
 0x69a   :  { %14840 = vmatpush3.bf16.msra.mxu1 %v15002_v12 }
 0x69b   :  { %v12603_v42 = vrot.slane %v12575_v43, %v15286_v59  ;;  %v12596_v52 = vrot.slane %v12574_v50, %v15286_v59  ;;  %14841 = vmatprep.subr.bf16.mxu1 %v15058_v16 }
 0x69d   :  { %v12606_v9 = vcombine.low %v12589_v58, %v12603_v42  ;;  %v12605_v19 = vcombine.high %v12582_v20, %v12596_v52  ;;  %v12604_v57 = vcombine.low %v12582_v20, %v12596_v52 }
 0x69e   :  { %14842 = vmatpush3.bf16.msra.mxu1 %v15003_v18 }
 0x69f   :  { %12797 = vmatprep.mubr.bf16.mxu1 %v12606_v9  ;;  %14834 = vmatmul.mubr.bf16.vlgmr.msra.gmra.mrb[80].mxu0 %v12605_v19 }
 0x6a0   :  { %12798 = vmatmul.mubr.bf16.gmra.mrb[68].mxu1 %v12604_v57  ;;  %14843 = vmatprep.subr.bf16.mxu1 %v15058_v16 }
 0x6a1   :  { %14853 = vmatprep.mubr.msk.bf16.mxu1 %vm15060_vm15, %v15058_v16  ;;  %14861 = vmatprep.mubr.msk.bf16.mxu0 %vm15060_vm15, %v15058_v16 }
 0x768   :  { %v14671_v30 = vpop.f32.mrb[64].mxu1 }
 0x769   :  { %v14672_v39 = vpop.f32.mrb[65].mxu1 }
 0x76a   :  { %v14673_v2 = vadd.f32 %v14672_v39, %v14671_v30  ;;  %v14674_v53 = vpop.f32.mrb[66].mxu1 }
 0x76b   :  { %v14675_v11 = vpop.f32.mrb[67].mxu1 }
 0x76c   :  { %v14676_v41 = vadd.f32 %v14675_v11, %v14674_v53  ;;  %v12792_v14 = vadd.f32 %v14673_v2, %v14413_v15 }
 0x76e   :  { %v12795_v10 = vadd.f32 %v14676_v41, %v14413_v15 }
 0x772   :  { %v14835_v32 = vpop.f32.mrb[80].mxu0 }
 0x773   :  { %v12840_v47 = vpop.f32.mrb[81].mxu0  ;;  %v14677_v6 = vpop.f32.mrb[68].mxu1 }
 0x774   :  { %v12841_v35 = vadd.f32 %v12840_v47, %v12792_v14  ;;  %v14836_v33 = vpop.f32.mrb[82].mxu0  ;;  %v14678_v49 = vpop.f32.mrb[69].mxu1 }
 0x775   :  { %v12843_v45 = vpop.f32.mrb[83].mxu0  ;;  %v14679_v40 = vadd.f32 %v14678_v49, %v14677_v6  ;;  %v14680_v7 = vpop.f32.mrb[70].mxu1 }
 0x776   :  { %v12855_v29 = vmax.f32 %v12841_v35, 0.0  ;;  %v12844_v4 = vadd.f32 %v12843_v45, %v12795_v10  ;;  %v14681_v1 = vpop.f32.mrb[71].mxu1 }
 0x777   :  { %v12800_v37 = vadd.f32 %v14679_v40, %v14413_v15  ;;  %v14682_v26 = vadd.f32 %v14681_v1, %v14680_v7 }
 0x778   :  { %v12863_v36 = vcombine.high %v12855_v29, %v12855_v29  ;;  %v12870_v44 = vrot.slane %v12855_v29, %v15286_v59  ;;  %v12856_v54 = vmax.f32 %v12844_v4, 0.0 }
 0x779   :  { %v12849_v62 = vadd.f32 %v14835_v32, %v12800_v37  ;;  %v12803_v48 = vadd.f32 %v14682_v26, %v14413_v15 }
 0x77a   :  { %v12877_v27 = vrot.slane %v12863_v36, %v15286_v59  ;;  %v12878_v24 = vcombine.high %v12870_v44, %v12870_v44  ;;  %v12886_v21 = vrot.slane %v12870_v44, %v15286_v59  ;;  %v12912_v55 = vcombine.high %v12856_v54, %v12856_v54 }
 0x77b   :  { %v12919_v8 = vrot.slane %v12856_v54, %v15286_v59  ;;  %v12857_v63 = vmax.f32 %v12849_v62, 0.0  ;;  %v20113_v13 = vadd.f32 %v14836_v33, %v12803_v48 }
 0x77c   :  { %v12879_v38 = vcombine.high %v12877_v27, %v12877_v27  ;;  %v12893_v3 = vrot.slane %v12877_v27, %v15286_v59  ;;  %v12900_v5 = vrot.slane %v12878_v24, %v15286_v59  ;;  %v12908_v28 = vcombine.high %v12886_v21, %v12886_v21 }
 0x77d   :  { %v12926_v51 = vrot.slane %v12912_v55, %v15286_v59  ;;  %v12927_v60 = vcombine.high %v12919_v8, %v12919_v8  ;;  %v12935_v23 = vrot.slane %v12919_v8, %v15286_v59  ;;  %v12960_v17 = vcombine.high %v12857_v63, %v12857_v63 }
 0x77e   :  { %v12907_v61 = vrot.slane %v12879_v38, %v15286_v59  ;;  %v12909_v34 = vcombine.high %v12893_v3, %v12893_v3  ;;  %v12910_v56 = vcombine.high %v12900_v5, %v12900_v5  ;;  %v13076_v0 = vmax.f32 %v12886_v21, %v12900_v5 }
 0x77f   :  { %v12928_v22 = vcombine.high %v12926_v51, %v12926_v51  ;;  %v12942_v25 = vrot.slane %v12926_v51, %v15286_v59  ;;  %v12949_v31 = vrot.slane %v12927_v60, %v15286_v59  ;;  %v12957_v50 = vcombine.high %v12935_v23, %v12935_v23 }
 0x780   :  { %v12911_v43 = vcombine.high %v12907_v61, %v12907_v61  ;;  %v13077_v58 = vmax.f32 %v12908_v28, %v12910_v56  ;;  %v13078_v20 = vmax.f32 %v12893_v3, %v12907_v61  ;;  %v13090_v42 = vpack.c.bf16 %v13076_v0, %v13076_v0 }
 0x781   :  { %v12956_v52 = vrot.slane %v12928_v22, %v15286_v59  ;;  %v12958_v9 = vcombine.high %v12949_v31, %v12949_v31  ;;  %v13080_v19 = vmax.f32 %v12935_v23, %v12949_v31  ;;  %v12967_v57 = vrot.slane %v12857_v63, %v15286_v59 }
 0x782   :  { %v13079_v46 = vmax.f32 %v12909_v34, %v12911_v43  ;;  %v13091_v12 = vpack.c.bf16 %v13077_v58, %v13077_v58  ;;  %v13092_v18 = vpack.c.bf16 %v13078_v20, %v13078_v20  ;;  %v13118_v30 = vunpack.c.l.b16 %v13090_v42 }
 0x783   :  { %v12959_v39 = vcombine.high %v12956_v52, %v12956_v52  ;;  %v13081_v2 = vmax.f32 %v12957_v50, %v12958_v9  ;;  %v13082_v53 = vmax.f32 %v12942_v25, %v12956_v52  ;;  %v13094_v11 = vpack.c.bf16 %v13080_v19, %v13080_v19 }
 0x784   :  { %v13093_v41 = vpack.c.bf16 %v13079_v46, %v13079_v46  ;;  %v13119_v15 = vunpack.c.l.b16 %v13091_v12  ;;  %v13120_v14 = vunpack.c.l.b16 %v13092_v18  ;;  %v12974_v32 = vrot.slane %v12960_v17, %v15286_v59 }
 0x785   :  { %v13095_v10 = vpack.c.bf16 %v13081_v2, %v13081_v2  ;;  %v13096_v47 = vpack.c.bf16 %v13082_v53, %v13082_v53  ;;  %v13122_v6 = vunpack.c.l.b16 %v13094_v11  ;;  %v12975_v35 = vcombine.high %v12967_v57, %v12967_v57 }
 0x786   :  { %v13121_v33 = vunpack.c.l.b16 %v13093_v41  ;;  %v13132_v49 = vrot.slane %v13119_v15, 7  ;;  %v13134_v45 = vrot.slane %v13120_v14, 6  ;;  %v12976_v40 = vcombine.high %v12974_v32, %v12974_v32 }
 0x787   :  { %v13123_v7 = vunpack.c.l.b16 %v13095_v10  ;;  %v13124_v29 = vunpack.c.l.b16 %v13096_v47  ;;  %v13138_v4 = vrot.slane %v13122_v6, 4  ;;  %v12983_v1 = vrot.slane %v12967_v57, %v15286_v59 }
 0x788   :  { %v13133_v37 = vsel %vm3920_vm2, %v13132_v49, %v13118_v30  ;;  %v13136_v26 = vrot.slane %v13121_v33, 5  ;;  %v12990_v36 = vrot.slane %v12974_v32, %v15286_v59  ;;  %v12997_v44 = vrot.slane %v12975_v35, %v15286_v59 }
 0x789   :  { %v13135_v54 = vsel %vm3923_vm3, %v13134_v45, %v13133_v37  ;;  %v13140_v62 = vrot.slane %v13123_v7, 3  ;;  %v13142_v48 = vrot.slane %v13124_v29, 2  ;;  %v13004_v27 = vrot.slane %v12976_v40, %v15286_v59 }
 0x78a   :  { %v13137_v24 = vsel %vm3926_vm4, %v13136_v26, %v13135_v54  ;;  %v13005_v21 = vcombine.high %v12983_v1, %v12983_v1  ;;  %v13006_v55 = vcombine.high %v12990_v36, %v12990_v36  ;;  %v13007_v8 = vcombine.high %v12997_v44, %v12997_v44 }
 0x78b   :  { %v13139_v63 = vsel %vm3929_vm5, %v13138_v4, %v13137_v24  ;;  %v13083_v38 = vmax.f32 %v12959_v39, %v12983_v1  ;;  %v12858_v3 = vmax.f32 %v20113_v13, 0.0  ;;  %v13008_v5 = vcombine.high %v13004_v27, %v13004_v27 }
 0x78c   :  { %v13141_v28 = vsel %vm3932_vm6, %v13140_v62, %v13139_v63  ;;  %v13084_v51 = vmax.f32 %v12997_v44, %v13005_v21  ;;  %v13085_v60 = vmax.f32 %v13007_v8, %v12990_v36  ;;  %v13086_v23 = vmax.f32 %v13004_v27, %v13006_v55  ;;  %v15004_v8 = vld [vmem:[%s20314_s7 + $0x18] sm:$0xff]  }
 0x78d   :  { %v13143_v17 = vsel %vm3935_vm7, %v13142_v48, %v13141_v28  ;;  %v13097_v34 = vpack.c.bf16 %v13083_v38, %v13083_v38  ;;  %v13009_v56 = vcombine.high %v12858_v3, %v12858_v3  ;;  %v13016_v0 = vrot.slane %v12858_v3, %v15286_v59  ;;  %14844 = vmatpush3.bf16.msra.mxu1 %v15004_v8 }
 0x78e   :  { %v13156_v22 = vpack.c.b16 %v13143_v17, %v13143_v17  ;;  %v13098_v13 = vpack.c.bf16 %v13084_v51, %v13084_v51  ;;  %v13099_v25 = vpack.c.bf16 %v13085_v60, %v13085_v60  ;;  %v13100_v31 = vpack.c.bf16 %v13086_v23, %v13086_v23  ;;  %14845 = vmatprep.subr.bf16.mxu1 %v15058_v16 }
 0x78f   :  { %v13023_v50 = vrot.slane %v13009_v56, %v15286_v59  ;;  %v13024_v43 = vcombine.high %v13016_v0, %v13016_v0  ;;  %v13031_v58 = vrot.slane %v13016_v0, %v15286_v59  ;;  %v13125_v19 = vunpack.c.l.b16 %v13097_v34 }
 0x790   :  { %v13163_v20 = vsel %vm20138_vm14, %v13156_v22, 0  ;;  %v13126_v42 = vunpack.c.l.b16 %v13098_v13  ;;  %v13127_v52 = vunpack.c.l.b16 %v13099_v25  ;;  %v13128_v9 = vunpack.c.l.b16 %v13100_v31 }
 0x791   :  { %v13045_v57 = vrot.slane %v13024_v43, %v15286_v59  ;;  %v13046_v46 = vcombine.high %v13031_v58, %v13031_v58  ;;  %v13087_v12 = vmax.f32 %v13008_v5, %v13031_v58  ;;  %v13173_v2 = vrot.slane %v13163_v20, %v15286_v59 }
 0x792   :  { %v13144_v18 = vrot.slane %v13126_v42, 7  ;;  %v13146_v30 = vrot.slane %v13127_v52, 6  ;;  %v13148_v39 = vrot.slane %v13128_v9, 5  ;;  %v13038_v53 = vrot.slane %v13023_v50, %v15286_v59 }
 0x793   :  { %v13047_v11 = vcombine.high %v13045_v57, %v13045_v57  ;;  %v13088_v41 = vmax.f32 %v13045_v57, %v13046_v46  ;;  %v13101_v15 = vpack.c.bf16 %v13087_v12, %v13087_v12  ;;  %v13174_v32 = vcombine.high %v13173_v2, %v13173_v2 }
 0x794   :  { %v13145_v14 = vsel %vm3920_vm2, %v13144_v18, %v13125_v19  ;;  %v13181_v10 = vrot.slane %v13173_v2, %v15286_v59 }
 0x795   :  { %v13147_v47 = vsel %vm3923_vm3, %v13146_v30, %v13145_v14  ;;  %v13089_v6 = vmax.f32 %v13047_v11, %v13038_v53  ;;  %v13102_v35 = vpack.c.bf16 %v13088_v41, %v13088_v41  ;;  %v13129_v33 = vunpack.c.l.b16 %v13101_v15 }
 0x796   :  { %v13149_v49 = vsel %vm3926_vm4, %v13148_v39, %v13147_v47  ;;  %v13188_v45 = vrot.slane %v13174_v32, %v15286_v59  ;;  %v13189_v40 = vcombine.high %v13181_v10, %v13181_v10  ;;  %v13219_v7 = vrot.slane %v13181_v10, %v15286_v59  ;;  %v15005_v32 = vld [vmem:[%s20314_s7 + $0x20] sm:$0xff]   ;;  %v15006_v10 = vld [vmem:[%s20314_s7 + $0x28] sm:$0xff]   ;;  %v15007_v47 = vld [vmem:[%s20314_s7 + $0x30] sm:$0xff]  }
 0x797   :  { %v13103_v29 = vpack.c.bf16 %v13089_v6, %v13089_v6  ;;  %v13130_v4 = vunpack.c.l.b16 %v13102_v35  ;;  %v13150_v1 = vrot.slane %v13129_v33, 4  ;;  %14846 = vmatpush3.bf16.msra.mxu1 %v15005_v32  ;;  %v15008_v6 = vld [vmem:[%s20314_s7 + $0x38] sm:$0xff]  }
 0x798   :  { %v13226_v37 = vrot.slane %v13219_v7, %v15286_v59  ;;  %v13233_v26 = vrot.slane %v13188_v45, %v15286_v59  ;;  %v13247_v36 = vrot.slane %v13189_v40, %v15286_v59  ;;  %14847 = vmatprep.subr.bf16.mxu1 %v15058_v16 }
 0x799   :  { %v13131_v44 = vunpack.c.l.b16 %v13103_v29  ;;  %v13151_v54 = vsel %vm3929_vm5, %v13150_v1, %v13149_v49  ;;  %v13152_v62 = vrot.slane %v13130_v4, 3 }
 0x79a   :  { %v13240_v48 = vrot.slane %v13233_v26, %v15286_v59  ;;  %v13254_v27 = vrot.slane %v13247_v36, %v15286_v59  ;;  %v13297_v24 = vunpack.c.l.b16 %v13226_v37 }
 0x79b   :  { %v13153_v21 = vsel %vm3932_vm6, %v13152_v62, %v13151_v54  ;;  %v13154_v55 = vrot.slane %v13131_v44, 2  ;;  %14848 = vmatpush3.bf16.msra.mxu1 %v15006_v10 }
 0x79c   :  { %v13298_v63 = vunpack.c.l.b16 %v13240_v48  ;;  %v13299_v38 = vunpack.c.l.b16 %v13254_v27  ;;  %v13313_v3 = vrot.slane %v13297_v24, 1  ;;  %14849 = vmatprep.subr.bf16.mxu1 %v15058_v16 }
 0x79d   :  { %v13155_v5 = vsel %vm3935_vm7, %v13154_v55, %v13153_v21 }
 0x79e   :  { %v13157_v28 = vpack.c.b16 %v13155_v5, %v13155_v5  ;;  %v13305_v51 = vrot.slane %v13299_v38, 6  ;;  %v13314_v60 = vsel %vm3920_vm2, %v13298_v63, %v13313_v3  ;;  %v13315_v23 = vrot.slane %v13299_v38, 7  ;;  %v15009_v38 = vld [vmem:[%s20316_s9] sm:$0xff]   ;;  %v15010_v3 = vld [vmem:[%s20316_s9 + $0x8] sm:$0xff]  }
 0x79f   :  { %v13303_v17 = vrot.slane %v13298_v63, 7  ;;  %14850 = vmatpush3.bf16.msra.mxu1 %v15007_v47  ;;  %14858 = vmatpush3.bf16.msra.mxu0 %v15009_v38  ;;  %v14447_v5 = vld [vmem:[%s20315_s8] ss:$0 sm:$0xff] }
 0x7a0   :  { %v13316_v34 = vsel %vm3923_vm3, %v13315_v23, %v13314_v60  ;;  %v13164_v56 = vsel %vm20138_vm14, %v13157_v28, 0  ;;  %14851 = vmatprep.subr.bf16.mxu1 %v15058_v16  ;;  %14859 = vmatprep.subr.bf16.mxu0 %v15058_v16 }
 0x7a1   :  { %v13321_v0 = vpack.c.b16 %v13316_v34, %v13316_v34  ;;  %v13196_v22 = vrot.slane %v13164_v56, %v15286_v59  ;;  %v13304_v13 = vsel %vm3920_vm2, %v13303_v17, %v13297_v24 }
 0x7a2   :  { %v13306_v25 = vsel %vm3923_vm3, %v13305_v51, %v13304_v13 }
 0x7a3   :  { %13323 = vrot.lane.b32.xlu0 %v13321_v0, %s15059_s22  ;;  %v13197_v31 = vcombine.high %v13196_v22, %v13196_v22  ;;  %v13204_v50 = vrot.slane %v13196_v22, %v15286_v59  ;;  %14852 = vmatpush3.bf16.msra.mxu1 %v15008_v6  ;;  %v13311_v33 = vpack.c.b16 %v13306_v25, %v13306_v25 }
 0x7a4   :  { %14885 = vmatprep.subr.bf16.mxu1 %v15058_v16  ;;  %14860 = vmatpush3.bf16.msra.mxu0 %v15010_v3 }
 0x7a5   :  { %v13211_v43 = vrot.slane %v13197_v31, %v15286_v59  ;;  %v13212_v58 = vcombine.high %v13204_v50, %v13204_v50  ;;  %v13261_v20 = vrot.slane %v13204_v50, %v15286_v59  ;;  %14865 = vmatprep.subr.bf16.mxu0 %v15058_v16 }
 0x7a7   :  { %v13268_v61 = vrot.slane %v13261_v20, %v15286_v59  ;;  %v13275_v42 = vrot.slane %v13211_v43, %v15286_v59  ;;  %v13289_v52 = vrot.slane %v13212_v58, %v15286_v59 }
 0x7a9   :  { %v13282_v9 = vrot.slane %v13275_v42, %v15286_v59  ;;  %v13296_v19 = vrot.slane %v13289_v52, %v15286_v59  ;;  %v13300_v57 = vunpack.c.l.b16 %v13268_v61 }
 0x7ab   :  { %v13301_v46 = vunpack.c.l.b16 %v13282_v9  ;;  %v13302_v12 = vunpack.c.l.b16 %v13296_v19  ;;  %v13317_v18 = vrot.slane %v13300_v57, 1 }
 0x7ad   :  { %v13307_v30 = vrot.slane %v13301_v46, 7  ;;  %v13318_v39 = vsel %vm3920_vm2, %v13301_v46, %v13317_v18  ;;  %v13319_v2 = vrot.slane %v13302_v12, 7  ;;  %v13309_v53 = vrot.slane %v13302_v12, 6  ;;  %v15011_v46 = vld [vmem:[%s20318_s11] sm:$0xff]   ;;  %v15013_v18 = vld [vmem:[%s20318_s11 + $0x10] sm:$0xff]  }
 0x7af   :  { %v13320_v11 = vsel %vm3923_vm3, %v13319_v2, %v13318_v39  ;;  %v13308_v41 = vsel %vm3920_vm2, %v13307_v30, %v13300_v57  ;;  %v15014_v30 = vld [vmem:[%s20318_s11 + $0x18] sm:$0xff]   ;;  %v15015_v39 = vld [vmem:[%s20318_s11 + $0x20] sm:$0xff]   ;;  %v15016_v2 = vld [vmem:[%s20318_s11 + $0x28] sm:$0xff]  }
 0x7b0   :  { %v13322_v15 = vpack.c.b16 %v13320_v11, %v13320_v11  ;;  %v13310_v14 = vsel %vm3923_vm3, %v13309_v53, %v13308_v41  ;;  %v15017_v53 = vld [vmem:[%s20318_s11 + $0x30] sm:$0xff]   ;;  %v15018_v11 = vld [vmem:[%s20318_s11 + $0x38] sm:$0xff]   ;;  %v15019_v41 = vld [vmem:[%s20320_s13] sm:$0xff]  }
 0x7b1   :  { %v13312_v40 = vpack.c.b16 %v13310_v14, %v13310_v14  ;;  %v14458_v14 = vld [vmem:[%s20317_s10] ss:$0 sm:$0xff] }
 0x7b2   :  { %13325 = vrot.lane.b32.xlu0 %v13322_v15, %s15059_s22  ;;  %v15020_v15 = vld [vmem:[%s20320_s13 + $0x8] sm:$0xff]  }
 0x815   :  { %v13324_v35 = vpop.permute.xlu0 %13323 }
 0x816   :  { %v13330_v49 = vsel %vm13327_vm0, %v13311_v33, %v13324_v35 }
 0x817   :  { %v13342_v45 = vrot.slane %v13330_v49, %v15286_v59 }
 0x819   :  { %v13343_v7 = vcombine.high %v13342_v45, %v13342_v45  ;;  %v13350_v44 = vrot.slane %v13342_v45, %v15286_v59  ;;  %v15021_v45 = vld [vmem:[%s20320_s13 + $0x10] sm:$0xff]  }
 0x81b   :  { %v13357_v37 = vrot.slane %v13343_v7, %v15286_v59  ;;  %v14462_v7 = vld [vmem:[%s20319_s12] ss:$0 sm:$0xff]  ;;  %s15061_s12 = smov [#allocation2]  }
 0x824   :  { %v13326_v29 = vpop.permute.xlu0 %13325 }
 0x825   :  { %v13333_v4 = vsel %vm13327_vm0, %v13312_v40, %v13326_v29  ;;  %v15022_v40 = vld [vmem:[%s20320_s13 + $0x18] sm:$0xff]   ;;  %s13858_s13 = sshll.u32 %s15061_s12, 4  ;;  %s13859_s13 = int_to_ptr.vmem [resolvable:$true] %s13858_s13 }
 0x826   :  { %v13364_v1 = vrot.slane %v13333_v4, %v15286_v59  ;;  %s15032_s2 = scalar_lea.vmem %s13859_s13, 32  ;;  %p15037_p1 = scmp.lt.s32.totalorder %s13859_s13, %s13859_s13 }
 0x827   :  { %p15033_p0 = scmp.ne.s32.totalorder %s13859_s13, %s15032_s2  ;;  %p15038_p2 = scmp.lt.s32.totalorder %s15032_s2, %s15032_s2 }
 0x828   :  { %v13365_v26 = vcombine.high %v13364_v1, %v13364_v1  ;;  %v13372_v36 = vrot.slane %v13364_v1, %v15286_v59 }
 0x829   :  { %p15039_p3 = por %p15038_p2, %p15037_p1 }
 0x82a   :  { %v13379_v54 = vrot.slane %v13365_v26, %v15286_v59  ;;  %v13384_v62 = vunpack.i.h.s16 %v13372_v36  ;;  %v14448_v48 = vpack.i.b16 %v13372_v36, %v13357_v37 }
 0x82b   :  { %p15040_p4 = pnand %p15039_p3, %p15033_p0 }
 0x82c   :  { %v14449_v27 = vpack.i.b16 %v13379_v54, %v13384_v62  ;;  %v13412_v24 = vcombine.low %v13350_v44, %v14448_v48  ;;  %v14471_v54 = vld [vmem:[%s20321_s14] ss:$0 sm:$0xff] }
 0x82e   :  { %v13419_v21 = vrot.slane %v13412_v24, %v15286_v59  ;;  %v13426_v55 = vrot.slane %v14449_v27, %v15286_v59 }
 0x830   :  { %v13427_v8 = vcombine.low %v13419_v21, %v13426_v55 }
 0x832   :  { %v13434_v63 = vrot.slane %v13427_v8, %v15286_v59 }
 0x834   :  { %14854 = vmatmul.mubr.bf16.vlgmr.msra.gmra.mrb[72].mxu1 %v13434_v63 }
 0x835   :  { %14893 = vmatprep.mubr.msk.bf16.mxu1 %vm15060_vm15, %v15058_v16  ;;  %14886 = vmatpush3.bf16.msra.mxu1 %v15019_v41 }
 0x836   :  { %14887 = vmatprep.subr.bf16.mxu1 %v15058_v16 }
 0x839   :  { %14888 = vmatpush3.bf16.msra.mxu1 %v15020_v15 }
 0x83a   :  { %14889 = vmatprep.subr.bf16.mxu1 %v15058_v16 }
 0x83d   :  { %14890 = vmatpush3.bf16.msra.mxu1 %v15021_v45 }
 0x83e   :  { %14891 = vmatprep.subr.bf16.mxu1 %v15058_v16 }
 0x841   :  { %14892 = vmatpush3.bf16.msra.mxu1 %v15022_v40 }
 0x907   :  { %v13518_v28 = vpop.f32.mrb[72].mxu1 }
 0x908   :  { %v13519_v51 = vadd.f32 %v14447_v5, %v13518_v28  ;;  %v14855_v60 = vpop.f32.mrb[73].mxu1 }
 0x909   :  { %v13521_v23 = vpop.f32.mrb[74].mxu1 }
 0x90a   :  { %v13524_v17 = vmax.f32 %v13519_v51, 0.0  ;;  %v14856_v34 = vpop.f32.mrb[75].mxu1 }
 0x90c   :  { %v13526_v56 = vcombine.high %v13524_v17, %v13524_v17  ;;  %v13533_v0 = vrot.slane %v13524_v17, %v15286_v59 }
 0x90e   :  { %v13540_v22 = vrot.slane %v13526_v56, %v15286_v59  ;;  %v13541_v13 = vcombine.high %v13533_v0, %v13533_v0  ;;  %v13548_v25 = vrot.slane %v13533_v0, %v15286_v59 }
 0x910   :  { %v13562_v31 = vrot.slane %v13541_v13, %v15286_v59  ;;  %v13555_v50 = vrot.slane %v13540_v22, %v15286_v59  ;;  %v15012_v59 = vld [vmem:[%s20318_s11 + $0x8] sm:$0xff]  }
 0x912   :  { %v13563_v43 = vcombine.high %v13562_v31, %v13562_v31  ;;  %v13568_v58 = vmax.f32 %v13548_v25, %v13562_v31 }
 0x914   :  { %v13569_v20 = vmax.f32 %v13563_v43, %v13555_v50  ;;  %v13572_v61 = vpack.c.bf16 %v13568_v58, %v13568_v58 }
 0x916   :  { %v13573_v42 = vpack.c.bf16 %v13569_v20, %v13569_v20  ;;  %v13587_v9 = vunpack.c.l.b16 %v13572_v61 }
 0x918   :  { %v13588_v52 = vunpack.c.l.b16 %v13573_v42 }
 0x91a   :  { %v13589_v19 = vrot.slane %v13588_v52, 7 }
 0x91c   :  { %v13590_v57 = vsel %vm3920_vm2, %v13589_v19, %v13587_v9 }
 0x91d   :  { %v13591_v12 = vpack.c.b16 %v13590_v57, %v13590_v57 }
 0x91f   :  { %14862 = vmatmul.mubr.msk.bf16.vlgmr.msra.gmra.mrb[84].mxu0 %vm13604_vm1, %v13591_v12 }
 0x920   :  { %14866 = vmatpush3.bf16.msra.mxu0 %v15011_v46  ;;  %14881 = vmatprep.mubr.msk.bf16.mxu0 %vm15060_vm15, %v15058_v16 }
 0x921   :  { %14867 = vmatprep.subr.bf16.mxu0 %v15058_v16 }
 0x924   :  { %14868 = vmatpush3.bf16.msra.mxu0 %v15012_v59 }
 0x925   :  { %14869 = vmatprep.subr.bf16.mxu0 %v15058_v16 }
 0x928   :  { %14870 = vmatpush3.bf16.msra.mxu0 %v15013_v18 }
 0x929   :  { %14871 = vmatprep.subr.bf16.mxu0 %v15058_v16 }
 0x92c   :  { %14872 = vmatpush3.bf16.msra.mxu0 %v15014_v30 }
 0x92d   :  { %14873 = vmatprep.subr.bf16.mxu0 %v15058_v16 }
 0x930   :  { %14874 = vmatpush3.bf16.msra.mxu0 %v15015_v39 }
 0x931   :  { %14875 = vmatprep.subr.bf16.mxu0 %v15058_v16 }
 0x934   :  { %14876 = vmatpush3.bf16.msra.mxu0 %v15016_v2 }
 0x935   :  { %14877 = vmatprep.subr.bf16.mxu0 %v15058_v16 }
 0x938   :  { %14878 = vmatpush3.bf16.msra.mxu0 %v15017_v53 }
 0x939   :  { %14879 = vmatprep.subr.bf16.mxu0 %v15058_v16 }
 0x93c   :  { %14880 = vmatpush3.bf16.msra.mxu0 %v15018_v11 }
 0x9f2   :  { %v13642_v32 = vpop.f32.mrb[84].mxu0 }
 0x9f3   :  { %v13643_v10 = vadd.f32 %v14458_v14, %v13642_v32  ;;  %v14863_v47 = vpop.f32.mrb[85].mxu0 }
 0x9f4   :  { %v13645_v6 = vpop.f32.mrb[86].mxu0 }
 0x9f5   :  { %v13648_v35 = vmax.f32 %v13643_v10, 0.0  ;;  %v14864_v33 = vpop.f32.mrb[87].mxu0 }
 0x9f7   :  { %v13649_v49 = vpack.c.bf16 %v13648_v35, %v13648_v35 }
 0x9f9   :  { %14882 = vmatmul.mubr.bf16.vlgmr.msra.gmra.mrb[88].mxu0 %v13649_v49 }
 0xacc   :  { %v13755_v29 = vpop.f32.mrb[88].mxu0 }
 0xacd   :  { %v13756_v4 = vadd.f32 %v14462_v7, %v13755_v29  ;;  %v14883_v1 = vpop.f32.mrb[89].mxu0 }
 0xace   :  { %v13758_v37 = vpop.f32.mrb[90].mxu0 }
 0xacf   :  { %v13761_v26 = vmax.f32 %v13756_v4, 0.0  ;;  %v14884_v36 = vpop.f32.mrb[91].mxu0 }
 0xad1   :  { %v13762_v44 = vpack.c.bf16 %v13761_v26, %v13761_v26 }
 0xad3   :  { %14894 = vmatmul.mubr.msk.bf16.vlgmr.msra.gmra.mrb[76].mxu1 %vm13327_vm0, %v13762_v44 }
 0xba6   :  { %v13839_v62 = vpop.f32.mrb[76].mxu1 }
 0xba7   :  { %v13840_v16 = vadd.f32 %v14471_v54, %v13839_v62  ;;  %v14895_v48 = vpop.f32.mrb[77].mxu1 }
 0xba8   :  { %v13842_v27 = vpop.f32.mrb[78].mxu1 }
 0xba9   :  { %v14477_v24 = vmul.f32 -1.442695, %v13840_v16  ;;  %v14896_v21 = vpop.f32.mrb[79].mxu1 }
 0xbab   :  { %15023 = vpow2.f32 %v14477_v24 }
 0xbb5   :  { %v15024_v55 = vpop.eup %15023 }
 0xbb6   :  { %v13848_v8 = vadd.f32 1.0, %v15024_v55 }
 0xbb8   :  { %15025 = vrcp.f32 %v13848_v8 }
 0xbc2   :  { %v15026_v63 = vpop.eup %15025 }
 0xbc3   :  { %13851 = vst [vmem:[#allocation2] sm:$0x3] %v15026_v63 }
 0xbc4   :  { %15043 = shalt.err (!%p15040_p4)
}
 0xbc5   :  { %s15044_s19 = scalar_lea.hbm %s20322_s15, 32 }
 0xbc6   :  { %p15045_p5 = scmp.ne.s32.totalorder %s20322_s15, %s15044_s19  ;;  %p15048_p6 = scmp.lt.u32.totalorder %s15044_s19, %s20322_s15 }
 0xbc8   :  { %p15050_p7 = pnand %p15048_p6, %p15045_p5 }
 0xbca   :  { %15053 = shalt.err (!%p15050_p7)
}
 0xbcb   :  { %13861 = dma.vmem_to_hbm [thread:$0]  %s13859_s13, 32, %s20322_s15, [#allocation3]  }
 0xbcc   :  { %15054 = dma.done.wait [#allocation3], 32  }
 0xbcd   :  { %15055 = vsyncadd [#allocation3], 4294967264 }
 0xbce   :  { %13865 = vsyncpa [#allocation3], 1 }

</bundles_post_ra>
